<compile_context>
chip_gen: v7x
topology: tpu7x:2x2x1
jax: 0.10.0
libtpu: 0.0.40
codegen_flags: <defaults>
</compile_context>

<pallas_src>
import numpy as np
import jax
import jax.numpy as jnp
from jax.experimental import pallas as pl
from jax.experimental.pallas import tpu as pltpu

EPS = 1e-5  # PyTorch BatchNorm2d default eps


# ------------------------------ kernel helpers ------------------------------

def _bn_relu(y, gamma, beta):
    """Batch-statistics BatchNorm (training mode) + ReLU on y: [M, C].

    One pass of stats (sum, sum of squares), biased variance, affine folded into
    a single scale/shift, fused ReLU."""
    inv_m = 1.0 / y.shape[0]
    s = jnp.sum(y, axis=0, keepdims=True)
    ss = jnp.sum(y * y, axis=0, keepdims=True)
    mean = s * inv_m
    var = jnp.maximum(ss * inv_m - mean * mean, 0.0)   # biased var (training BN)
    scale = gamma * jax.lax.rsqrt(var + EPS)
    shift = beta - mean * scale
    return jnp.maximum(y * scale + shift, 0.0)


def _conv_taps(z, w_ref, idx_ref):
    """Strided conv as per-tap (row-gather @ weights) accumulation, fully in VMEM.

    z:       [M_in, C]    input activation rows (flat n*H*W order, channels-last)
    w_ref:   [T, C, Cout] per-tap weight slabs (tap order t = i*k + j)
    idx_ref: [T, M_out, 1] int32: source row of z for each output row, per tap

    The row gather is a one-hot matmul on the MXU (indices are compile-time
    constants passed as a tiny i32 table), so the kernel only needs plain 2-D
    dots, a 2-D iota and integer compares. Conv bias is intentionally omitted
    (exactly cancelled by the following batch-statistics BatchNorm)."""
    taps, _, cout = w_ref.shape
    m_out = idx_ref.shape[1]
    m_in = z.shape[0]
    col = jax.lax.broadcasted_iota(jnp.int32, (m_out, m_in), 1)
    acc = jnp.zeros((m_out, cout), jnp.float32)
    for t in range(taps):                                   # static unroll, T <= 9
        sel = jnp.where(col == idx_ref[t], 1.0, 0.0)        # [M_out, M_in] one-hot
        rows = jnp.dot(sel, z, preferred_element_type=jnp.float32)        # gather
        acc = acc + jnp.dot(rows, w_ref[t], preferred_element_type=jnp.float32)
    return acc


def fused_forward_kernel(p1_ref, w1_ref, g1_ref, b1_ref,
                         w2_ref, idx2_ref, g2_ref, b2_ref,
                         w3_ref, idx3_ref, g3_ref, b3_ref,
                         w4_ref, idx4_ref, g4_ref, b4_ref,
                         fcw_ref, fcb_ref, out_ref):
    # Layer 1: wrapper-built im2col patches [N*13*13, 9] @ [9, 64]
    z = jnp.dot(p1_ref[...], w1_ref[...], preferred_element_type=jnp.float32)
    z = _bn_relu(z, g1_ref[...], b1_ref[...])                       # [N*169, 64]
    # Layers 2-4: strided convs via per-tap gather+matmul, VMEM-resident
    z = _bn_relu(_conv_taps(z, w2_ref, idx2_ref), g2_ref[...], b2_ref[...])  # [N*36, 64]
    z = _bn_relu(_conv_taps(z, w3_ref, idx3_ref), g3_ref[...], b3_ref[...])  # [N*4, 64]
    z = _bn_relu(_conv_taps(z, w4_ref, idx4_ref), g4_ref[...], b4_ref[...])  # [N, 64]
    # fc + log_softmax
    logits = jnp.dot(z, fcw_ref[...], preferred_element_type=jnp.float32) + fcb_ref[...]
    m = jnp.max(logits, axis=-1, keepdims=True)
    e = jnp.exp(logits - m)
    out_ref[...] = logits - m - jnp.log(jnp.sum(e, axis=-1, keepdims=True))


# ------------------------------- JAX wrapper --------------------------------

def _conv_out(size, k, s):
    return (size - k) // s + 1


def _gather_indices_np(n, h, w, k, stride):
    """int32 [k*k, n*Ho*Wo, 1]: flat source row (n*h*w + hh*w + ww) per tap/out-row."""
    ho, wo = _conv_out(h, k, stride), _conv_out(w, k, stride)
    idx = np.empty((k * k, n * ho * wo, 1), np.int32)
    for i in range(k):
        for j in range(k):
            t = i * k + j
            r = 0
            for nn in range(n):
                for a in range(ho):
                    for b in range(wo):
                        idx[t, r, 0] = nn * h * w + (stride * a + i) * w + (stride * b + j)
                        r += 1
    return idx


def precompute_kernel_params(params, batch_n):
    """One-time conversion of PyTorch-layout params to the fused-kernel layout.

    Conv weights -> per-tap [Cin, Cout] slabs, BN affines -> [1, 64] rows, fc weight
    transposed, plus constant gather-index tables (depend only on static shapes and
    the batch size). Conv biases are dropped: batch-stat BN cancels them exactly."""
    f32 = jnp.float32

    def taps(wc):
        cout, cin, kh, kw = wc.shape
        return jnp.transpose(wc, (2, 3, 1, 0)).reshape(kh * kw, cin, cout).astype(f32)

    kp = {
        "w1": jnp.transpose(params["conv1_w"], (2, 3, 1, 0)).reshape(9, 64).astype(f32),
        "w2": taps(params["conv2_w"]),
        "w3": taps(params["conv3_w"]),
        "w4": taps(params["conv4_w"]),
        "fcw": jnp.transpose(params["fc_w"]).astype(f32),     # [64, N_way]
        "fcb": params["fc_b"].reshape(1, -1).astype(f32),
    }
    for l in (1, 2, 3, 4):
        kp[f"g{l}"] = params[f"bn{l}_g"].reshape(1, 64).astype(f32)
        kp[f"b{l}"] = params[f"bn{l}_b"].reshape(1, 64).astype(f32)
    # spatial chain: 28 ->(3,s2) 13 ->(3,s2) 6 ->(3,s2) 2 ->(2,s1) 1
    kp["idx2"] = jnp.asarray(_gather_indices_np(batch_n, 13, 13, 3, 2))   # [9, N*36, 1]
    kp["idx3"] = jnp.asarray(_gather_indices_np(batch_n, 6, 6, 3, 2))     # [9, N*4, 1]
    kp["idx4"] = jnp.asarray(_gather_indices_np(batch_n, 2, 2, 2, 1))     # [4, N, 1]
    return kp


def _layer1_patches(x):
    """x: [N, 1, 28, 28] -> im2col patches [N*13*13, 9] (taps ordered i*3+j)."""
    n = x.shape[0]
    xs = x[:, 0]                                               # [N, 28, 28]
    cols = [xs[:, i:i + 25:2, j:j + 25:2] for i in range(3) for j in range(3)]
    return jnp.stack(cols, axis=-1).reshape(n * 13 * 13, 9)


def learner_conv_forward(x, kp):
    """x: [N, 1, 28, 28] float32 (NCHW, like PyTorch). Returns [N, N_way] log-probs."""
    n = x.shape[0]
    assert x.shape[1:] == (1, 28, 28), x.shape
    assert kp["idx2"].shape[1] == n * 36, "kernel params built for a different batch size"
    n_way = kp["fcw"].shape[1]

    p1 = _layer1_patches(x.astype(jnp.float32))
    args = (p1, kp["w1"], kp["g1"], kp["b1"],
            kp["w2"], kp["idx2"], kp["g2"], kp["b2"],
            kp["w3"], kp["idx3"], kp["g3"], kp["b3"],
            kp["w4"], kp["idx4"], kp["g4"], kp["b4"],
            kp["fcw"], kp["fcb"])
    vmem = pl.BlockSpec(memory_space=pltpu.MemorySpace.VMEM)
    return pl.pallas_call(
        fused_forward_kernel,
        out_shape=jax.ShapeDtypeStruct((n, n_way), jnp.float32),
        in_specs=[vmem] * len(args),
        out_specs=vmem,
    )(*args)


# ------------------------------ param creation ------------------------------

def init_params(key, n_way):
    ks = jax.random.split(key, 10)
    scale = 0.1
    return {
        # conv biases are kept for module fidelity but are mathematically cancelled
        # by the batch-statistics BatchNorm that follows each conv (not fed to kernel).
        "conv1_w": scale * jax.random.normal(ks[0], (64, 1, 3, 3), jnp.float32),
        "conv1_b": scale * jax.random.normal(ks[1], (64,), jnp.float32),
        "bn1_g": jnp.ones((64,), jnp.float32), "bn1_b": jnp.zeros((64,), jnp.float32),
        "conv2_w": scale * jax.random.normal(ks[2], (64, 64, 3, 3), jnp.float32),
        "conv2_b": scale * jax.random.normal(ks[3], (64,), jnp.float32),
        "bn2_g": jnp.ones((64,), jnp.float32), "bn2_b": jnp.zeros((64,), jnp.float32),
        "conv3_w": scale * jax.random.normal(ks[4], (64, 64, 3, 3), jnp.float32),
        "conv3_b": scale * jax.random.normal(ks[5], (64,), jnp.float32),
        "bn3_g": jnp.ones((64,), jnp.float32), "bn3_b": jnp.zeros((64,), jnp.float32),
        "conv4_w": scale * jax.random.normal(ks[6], (64, 64, 2, 2), jnp.float32),
        "conv4_b": scale * jax.random.normal(ks[7], (64,), jnp.float32),
        "bn4_g": jnp.ones((64,), jnp.float32), "bn4_b": jnp.zeros((64,), jnp.float32),
        "fc_w": scale * jax.random.normal(ks[8], (n_way, 64), jnp.float32),
        "fc_b": scale * jax.random.normal(ks[9], (n_way,), jnp.float32),
    }


if __name__ == "__main__":
    N_WAY = 5
    key = jax.random.PRNGKey(0)
    k_params, k_x = jax.random.split(key)
    params = init_params(k_params, N_WAY)
    # Omniglot-style single-channel 28x28 input, batch of 2 (NCHW like PyTorch).
    x = jax.random.normal(k_x, (2, 1, 28, 28), jnp.float32)

    kparams = precompute_kernel_params(params, batch_n=x.shape[0])
    out = jax.jit(learner_conv_forward)(x, kparams)
    out = jax.block_until_ready(out)

    assert out.shape == (2, N_WAY), out.shape
    assert bool(jnp.all(jnp.isfinite(out)))
    # log_softmax rows should sum (in prob space) to ~1
    assert bool(jnp.all(jnp.abs(jnp.sum(jnp.exp(out), axis=-1) - 1.0) < 1e-4))
    print("KERNEL_OK")
</pallas_src>

<mosaic_0001>
module attributes {stable_mosaic.version = 11 : i64} {
  func.func @fused_forward_kernel(%arg0: memref<338x9xf32, #tpu.memory_space<vmem>>, %arg1: memref<9x64xf32, #tpu.memory_space<vmem>>, %arg2: memref<1x64xf32, #tpu.memory_space<vmem>>, %arg3: memref<1x64xf32, #tpu.memory_space<vmem>>, %arg4: memref<9x64x64xf32, #tpu.memory_space<vmem>>, %arg5: memref<9x72x1xi32, #tpu.memory_space<vmem>>, %arg6: memref<1x64xf32, #tpu.memory_space<vmem>>, %arg7: memref<1x64xf32, #tpu.memory_space<vmem>>, %arg8: memref<9x64x64xf32, #tpu.memory_space<vmem>>, %arg9: memref<9x8x1xi32, #tpu.memory_space<vmem>>, %arg10: memref<1x64xf32, #tpu.memory_space<vmem>>, %arg11: memref<1x64xf32, #tpu.memory_space<vmem>>, %arg12: memref<4x64x64xf32, #tpu.memory_space<vmem>>, %arg13: memref<4x2x1xi32, #tpu.memory_space<vmem>>, %arg14: memref<1x64xf32, #tpu.memory_space<vmem>>, %arg15: memref<1x64xf32, #tpu.memory_space<vmem>>, %arg16: memref<64x5xf32, #tpu.memory_space<vmem>>, %arg17: memref<1x5xf32, #tpu.memory_space<vmem>>, %arg18: memref<2x5xf32, #tpu.memory_space<vmem>>) attributes {dimension_semantics = [], scalar_prefetch = 0 : i64, scratch_operands = 0 : i64, tpu.core_type = #tpu.core_type<tc>} {
    %c0 = arith.constant 0 : index
    %c0_0 = arith.constant 0 : index
    %0 = vector.load %arg0[%c0, %c0_0] : memref<338x9xf32, #tpu.memory_space<vmem>>, vector<338x9xf32>
    %c0_1 = arith.constant 0 : index
    %c0_2 = arith.constant 0 : index
    %1 = vector.load %arg1[%c0_1, %c0_2] : memref<9x64xf32, #tpu.memory_space<vmem>>, vector<9x64xf32>
    %cst = arith.constant dense<0.000000e+00> : vector<338x64xf32>
    %2 = tpu.matmul %0, %1, %cst {dimension_numbers = #tpu.dot_dimension_numbers<[1], [0], [0], [1], [0, 0, 1, 1], [], []>} : vector<338x9xf32>, vector<9x64xf32>, vector<338x64xf32> -> vector<338x64xf32>
    %c0_3 = arith.constant 0 : index
    %c0_4 = arith.constant 0 : index
    %3 = vector.load %arg2[%c0_3, %c0_4] : memref<1x64xf32, #tpu.memory_space<vmem>>, vector<1x64xf32>
    %c0_5 = arith.constant 0 : index
    %c0_6 = arith.constant 0 : index
    %4 = vector.load %arg3[%c0_5, %c0_6] : memref<1x64xf32, #tpu.memory_space<vmem>>, vector<1x64xf32>
    %cst_7 = arith.constant dense<0.000000e+00> : vector<64xf32>
    %5 = vector.multi_reduction <add>, %2, %cst_7 [0] : vector<338x64xf32> to vector<64xf32>
    %6 = vector.shape_cast %5 : vector<64xf32> to vector<1x64xf32>
    %7 = arith.mulf %2, %2 : vector<338x64xf32>
    %cst_8 = arith.constant dense<0.000000e+00> : vector<64xf32>
    %8 = vector.multi_reduction <add>, %7, %cst_8 [0] : vector<338x64xf32> to vector<64xf32>
    %9 = vector.shape_cast %8 : vector<64xf32> to vector<1x64xf32>
    %cst_9 = arith.constant 2.958580e-03 : f32
    %10 = vector.broadcast %cst_9 : f32 to vector<1x64xf32>
    %11 = arith.mulf %6, %10 : vector<1x64xf32>
    %cst_10 = arith.constant 2.958580e-03 : f32
    %12 = vector.broadcast %cst_10 : f32 to vector<1x64xf32>
    %13 = arith.mulf %9, %12 : vector<1x64xf32>
    %14 = arith.mulf %11, %11 : vector<1x64xf32>
    %15 = arith.subf %13, %14 : vector<1x64xf32>
    %cst_11 = arith.constant 0.000000e+00 : f32
    %16 = vector.broadcast %cst_11 : f32 to vector<1x64xf32>
    %17 = arith.maximumf %15, %16 : vector<1x64xf32>
    %cst_12 = arith.constant 9.99999974E-6 : f32
    %18 = vector.broadcast %cst_12 : f32 to vector<1x64xf32>
    %19 = arith.addf %17, %18 : vector<1x64xf32>
    %20 = math.rsqrt %19 : vector<1x64xf32>
    %21 = arith.mulf %3, %20 : vector<1x64xf32>
    %22 = arith.mulf %11, %21 : vector<1x64xf32>
    %23 = arith.subf %4, %22 : vector<1x64xf32>
    %24 = vector.broadcast %21 : vector<1x64xf32> to vector<338x64xf32>
    %25 = arith.mulf %2, %24 : vector<338x64xf32>
    %26 = vector.broadcast %23 : vector<1x64xf32> to vector<338x64xf32>
    %27 = arith.addf %25, %26 : vector<338x64xf32>
    %cst_13 = arith.constant 0.000000e+00 : f32
    %28 = vector.broadcast %cst_13 : f32 to vector<338x64xf32>
    %29 = arith.maximumf %27, %28 : vector<338x64xf32>
    %30 = tpu.iota {dimensions = array<i32: 1>} : vector<72x338xi32>
    %cst_14 = arith.constant 0.000000e+00 : f32
    %31 = vector.broadcast %cst_14 : f32 to vector<72x64xf32>
    %c0_15 = arith.constant 0 : index
    %c0_16 = arith.constant 0 : index
    %c0_17 = arith.constant 0 : index
    %32 = vector.load %arg5[%c0_15, %c0_16, %c0_17] : memref<9x72x1xi32, #tpu.memory_space<vmem>>, vector<1x72x1xi32>
    %33 = vector.shape_cast %32 : vector<1x72x1xi32> to vector<72x1xi32>
    %34 = vector.broadcast %33 : vector<72x1xi32> to vector<72x338xi32>
    %35 = arith.cmpi eq, %30, %34 : vector<72x338xi32>
    %cst_18 = arith.constant 1.000000e+00 : f32
    %cst_19 = arith.constant 0.000000e+00 : f32
    %36 = vector.broadcast %cst_18 : f32 to vector<72x338xf32>
    %37 = vector.broadcast %cst_19 : f32 to vector<72x338xf32>
    %38 = arith.select %35, %36, %37 : vector<72x338xi1>, vector<72x338xf32>
    %cst_20 = arith.constant dense<0.000000e+00> : vector<72x64xf32>
    %39 = tpu.matmul %38, %29, %cst_20 {dimension_numbers = #tpu.dot_dimension_numbers<[1], [0], [0], [1], [0, 0, 1, 1], [], []>} : vector<72x338xf32>, vector<338x64xf32>, vector<72x64xf32> -> vector<72x64xf32>
    %c0_21 = arith.constant 0 : index
    %c0_22 = arith.constant 0 : index
    %c0_23 = arith.constant 0 : index
    %40 = vector.load %arg4[%c0_21, %c0_22, %c0_23] : memref<9x64x64xf32, #tpu.memory_space<vmem>>, vector<1x64x64xf32>
    %41 = vector.shape_cast %40 : vector<1x64x64xf32> to vector<64x64xf32>
    %cst_24 = arith.constant dense<0.000000e+00> : vector<72x64xf32>
    %42 = tpu.matmul %39, %41, %cst_24 {dimension_numbers = #tpu.dot_dimension_numbers<[1], [0], [0], [1], [0, 0, 1, 1], [], []>} : vector<72x64xf32>, vector<64x64xf32>, vector<72x64xf32> -> vector<72x64xf32>
    %43 = arith.addf %31, %42 : vector<72x64xf32>
    %c1 = arith.constant 1 : index
    %c0_25 = arith.constant 0 : index
    %c0_26 = arith.constant 0 : index
    %44 = vector.load %arg5[%c1, %c0_25, %c0_26] : memref<9x72x1xi32, #tpu.memory_space<vmem>>, vector<1x72x1xi32>
    %45 = vector.shape_cast %44 : vector<1x72x1xi32> to vector<72x1xi32>
    %46 = vector.broadcast %45 : vector<72x1xi32> to vector<72x338xi32>
    %47 = arith.cmpi eq, %30, %46 : vector<72x338xi32>
    %cst_27 = arith.constant 1.000000e+00 : f32
    %cst_28 = arith.constant 0.000000e+00 : f32
    %48 = vector.broadcast %cst_27 : f32 to vector<72x338xf32>
    %49 = vector.broadcast %cst_28 : f32 to vector<72x338xf32>
    %50 = arith.select %47, %48, %49 : vector<72x338xi1>, vector<72x338xf32>
    %cst_29 = arith.constant dense<0.000000e+00> : vector<72x64xf32>
    %51 = tpu.matmul %50, %29, %cst_29 {dimension_numbers = #tpu.dot_dimension_numbers<[1], [0], [0], [1], [0, 0, 1, 1], [], []>} : vector<72x338xf32>, vector<338x64xf32>, vector<72x64xf32> -> vector<72x64xf32>
    %c1_30 = arith.constant 1 : index
    %c0_31 = arith.constant 0 : index
    %c0_32 = arith.constant 0 : index
    %52 = vector.load %arg4[%c1_30, %c0_31, %c0_32] : memref<9x64x64xf32, #tpu.memory_space<vmem>>, vector<1x64x64xf32>
    %53 = vector.shape_cast %52 : vector<1x64x64xf32> to vector<64x64xf32>
    %cst_33 = arith.constant dense<0.000000e+00> : vector<72x64xf32>
    %54 = tpu.matmul %51, %53, %cst_33 {dimension_numbers = #tpu.dot_dimension_numbers<[1], [0], [0], [1], [0, 0, 1, 1], [], []>} : vector<72x64xf32>, vector<64x64xf32>, vector<72x64xf32> -> vector<72x64xf32>
    %55 = arith.addf %43, %54 : vector<72x64xf32>
    %c2 = arith.constant 2 : index
    %c0_34 = arith.constant 0 : index
    %c0_35 = arith.constant 0 : index
    %56 = vector.load %arg5[%c2, %c0_34, %c0_35] : memref<9x72x1xi32, #tpu.memory_space<vmem>>, vector<1x72x1xi32>
    %57 = vector.shape_cast %56 : vector<1x72x1xi32> to vector<72x1xi32>
    %58 = vector.broadcast %57 : vector<72x1xi32> to vector<72x338xi32>
    %59 = arith.cmpi eq, %30, %58 : vector<72x338xi32>
    %cst_36 = arith.constant 1.000000e+00 : f32
    %cst_37 = arith.constant 0.000000e+00 : f32
    %60 = vector.broadcast %cst_36 : f32 to vector<72x338xf32>
    %61 = vector.broadcast %cst_37 : f32 to vector<72x338xf32>
    %62 = arith.select %59, %60, %61 : vector<72x338xi1>, vector<72x338xf32>
    %cst_38 = arith.constant dense<0.000000e+00> : vector<72x64xf32>
    %63 = tpu.matmul %62, %29, %cst_38 {dimension_numbers = #tpu.dot_dimension_numbers<[1], [0], [0], [1], [0, 0, 1, 1], [], []>} : vector<72x338xf32>, vector<338x64xf32>, vector<72x64xf32> -> vector<72x64xf32>
    %c2_39 = arith.constant 2 : index
    %c0_40 = arith.constant 0 : index
    %c0_41 = arith.constant 0 : index
    %64 = vector.load %arg4[%c2_39, %c0_40, %c0_41] : memref<9x64x64xf32, #tpu.memory_space<vmem>>, vector<1x64x64xf32>
    %65 = vector.shape_cast %64 : vector<1x64x64xf32> to vector<64x64xf32>
    %cst_42 = arith.constant dense<0.000000e+00> : vector<72x64xf32>
    %66 = tpu.matmul %63, %65, %cst_42 {dimension_numbers = #tpu.dot_dimension_numbers<[1], [0], [0], [1], [0, 0, 1, 1], [], []>} : vector<72x64xf32>, vector<64x64xf32>, vector<72x64xf32> -> vector<72x64xf32>
    %67 = arith.addf %55, %66 : vector<72x64xf32>
    %c3 = arith.constant 3 : index
    %c0_43 = arith.constant 0 : index
    %c0_44 = arith.constant 0 : index
    %68 = vector.load %arg5[%c3, %c0_43, %c0_44] : memref<9x72x1xi32, #tpu.memory_space<vmem>>, vector<1x72x1xi32>
    %69 = vector.shape_cast %68 : vector<1x72x1xi32> to vector<72x1xi32>
    %70 = vector.broadcast %69 : vector<72x1xi32> to vector<72x338xi32>
    %71 = arith.cmpi eq, %30, %70 : vector<72x338xi32>
    %cst_45 = arith.constant 1.000000e+00 : f32
    %cst_46 = arith.constant 0.000000e+00 : f32
    %72 = vector.broadcast %cst_45 : f32 to vector<72x338xf32>
    %73 = vector.broadcast %cst_46 : f32 to vector<72x338xf32>
    %74 = arith.select %71, %72, %73 : vector<72x338xi1>, vector<72x338xf32>
    %cst_47 = arith.constant dense<0.000000e+00> : vector<72x64xf32>
    %75 = tpu.matmul %74, %29, %cst_47 {dimension_numbers = #tpu.dot_dimension_numbers<[1], [0], [0], [1], [0, 0, 1, 1], [], []>} : vector<72x338xf32>, vector<338x64xf32>, vector<72x64xf32> -> vector<72x64xf32>
    %c3_48 = arith.constant 3 : index
    %c0_49 = arith.constant 0 : index
    %c0_50 = arith.constant 0 : index
    %76 = vector.load %arg4[%c3_48, %c0_49, %c0_50] : memref<9x64x64xf32, #tpu.memory_space<vmem>>, vector<1x64x64xf32>
    %77 = vector.shape_cast %76 : vector<1x64x64xf32> to vector<64x64xf32>
    %cst_51 = arith.constant dense<0.000000e+00> : vector<72x64xf32>
    %78 = tpu.matmul %75, %77, %cst_51 {dimension_numbers = #tpu.dot_dimension_numbers<[1], [0], [0], [1], [0, 0, 1, 1], [], []>} : vector<72x64xf32>, vector<64x64xf32>, vector<72x64xf32> -> vector<72x64xf32>
    %79 = arith.addf %67, %78 : vector<72x64xf32>
    %c4 = arith.constant 4 : index
    %c0_52 = arith.constant 0 : index
    %c0_53 = arith.constant 0 : index
    %80 = vector.load %arg5[%c4, %c0_52, %c0_53] : memref<9x72x1xi32, #tpu.memory_space<vmem>>, vector<1x72x1xi32>
    %81 = vector.shape_cast %80 : vector<1x72x1xi32> to vector<72x1xi32>
    %82 = vector.broadcast %81 : vector<72x1xi32> to vector<72x338xi32>
    %83 = arith.cmpi eq, %30, %82 : vector<72x338xi32>
    %cst_54 = arith.constant 1.000000e+00 : f32
    %cst_55 = arith.constant 0.000000e+00 : f32
    %84 = vector.broadcast %cst_54 : f32 to vector<72x338xf32>
    %85 = vector.broadcast %cst_55 : f32 to vector<72x338xf32>
    %86 = arith.select %83, %84, %85 : vector<72x338xi1>, vector<72x338xf32>
    %cst_56 = arith.constant dense<0.000000e+00> : vector<72x64xf32>
    %87 = tpu.matmul %86, %29, %cst_56 {dimension_numbers = #tpu.dot_dimension_numbers<[1], [0], [0], [1], [0, 0, 1, 1], [], []>} : vector<72x338xf32>, vector<338x64xf32>, vector<72x64xf32> -> vector<72x64xf32>
    %c4_57 = arith.constant 4 : index
    %c0_58 = arith.constant 0 : index
    %c0_59 = arith.constant 0 : index
    %88 = vector.load %arg4[%c4_57, %c0_58, %c0_59] : memref<9x64x64xf32, #tpu.memory_space<vmem>>, vector<1x64x64xf32>
    %89 = vector.shape_cast %88 : vector<1x64x64xf32> to vector<64x64xf32>
    %cst_60 = arith.constant dense<0.000000e+00> : vector<72x64xf32>
    %90 = tpu.matmul %87, %89, %cst_60 {dimension_numbers = #tpu.dot_dimension_numbers<[1], [0], [0], [1], [0, 0, 1, 1], [], []>} : vector<72x64xf32>, vector<64x64xf32>, vector<72x64xf32> -> vector<72x64xf32>
    %91 = arith.addf %79, %90 : vector<72x64xf32>
    %c5 = arith.constant 5 : index
    %c0_61 = arith.constant 0 : index
    %c0_62 = arith.constant 0 : index
    %92 = vector.load %arg5[%c5, %c0_61, %c0_62] : memref<9x72x1xi32, #tpu.memory_space<vmem>>, vector<1x72x1xi32>
    %93 = vector.shape_cast %92 : vector<1x72x1xi32> to vector<72x1xi32>
    %94 = vector.broadcast %93 : vector<72x1xi32> to vector<72x338xi32>
    %95 = arith.cmpi eq, %30, %94 : vector<72x338xi32>
    %cst_63 = arith.constant 1.000000e+00 : f32
    %cst_64 = arith.constant 0.000000e+00 : f32
    %96 = vector.broadcast %cst_63 : f32 to vector<72x338xf32>
    %97 = vector.broadcast %cst_64 : f32 to vector<72x338xf32>
    %98 = arith.select %95, %96, %97 : vector<72x338xi1>, vector<72x338xf32>
    %cst_65 = arith.constant dense<0.000000e+00> : vector<72x64xf32>
    %99 = tpu.matmul %98, %29, %cst_65 {dimension_numbers = #tpu.dot_dimension_numbers<[1], [0], [0], [1], [0, 0, 1, 1], [], []>} : vector<72x338xf32>, vector<338x64xf32>, vector<72x64xf32> -> vector<72x64xf32>
    %c5_66 = arith.constant 5 : index
    %c0_67 = arith.constant 0 : index
    %c0_68 = arith.constant 0 : index
    %100 = vector.load %arg4[%c5_66, %c0_67, %c0_68] : memref<9x64x64xf32, #tpu.memory_space<vmem>>, vector<1x64x64xf32>
    %101 = vector.shape_cast %100 : vector<1x64x64xf32> to vector<64x64xf32>
    %cst_69 = arith.constant dense<0.000000e+00> : vector<72x64xf32>
    %102 = tpu.matmul %99, %101, %cst_69 {dimension_numbers = #tpu.dot_dimension_numbers<[1], [0], [0], [1], [0, 0, 1, 1], [], []>} : vector<72x64xf32>, vector<64x64xf32>, vector<72x64xf32> -> vector<72x64xf32>
    %103 = arith.addf %91, %102 : vector<72x64xf32>
    %c6 = arith.constant 6 : index
    %c0_70 = arith.constant 0 : index
    %c0_71 = arith.constant 0 : index
    %104 = vector.load %arg5[%c6, %c0_70, %c0_71] : memref<9x72x1xi32, #tpu.memory_space<vmem>>, vector<1x72x1xi32>
    %105 = vector.shape_cast %104 : vector<1x72x1xi32> to vector<72x1xi32>
    %106 = vector.broadcast %105 : vector<72x1xi32> to vector<72x338xi32>
    %107 = arith.cmpi eq, %30, %106 : vector<72x338xi32>
    %cst_72 = arith.constant 1.000000e+00 : f32
    %cst_73 = arith.constant 0.000000e+00 : f32
    %108 = vector.broadcast %cst_72 : f32 to vector<72x338xf32>
    %109 = vector.broadcast %cst_73 : f32 to vector<72x338xf32>
    %110 = arith.select %107, %108, %109 : vector<72x338xi1>, vector<72x338xf32>
    %cst_74 = arith.constant dense<0.000000e+00> : vector<72x64xf32>
    %111 = tpu.matmul %110, %29, %cst_74 {dimension_numbers = #tpu.dot_dimension_numbers<[1], [0], [0], [1], [0, 0, 1, 1], [], []>} : vector<72x338xf32>, vector<338x64xf32>, vector<72x64xf32> -> vector<72x64xf32>
    %c6_75 = arith.constant 6 : index
    %c0_76 = arith.constant 0 : index
    %c0_77 = arith.constant 0 : index
    %112 = vector.load %arg4[%c6_75, %c0_76, %c0_77] : memref<9x64x64xf32, #tpu.memory_space<vmem>>, vector<1x64x64xf32>
    %113 = vector.shape_cast %112 : vector<1x64x64xf32> to vector<64x64xf32>
    %cst_78 = arith.constant dense<0.000000e+00> : vector<72x64xf32>
    %114 = tpu.matmul %111, %113, %cst_78 {dimension_numbers = #tpu.dot_dimension_numbers<[1], [0], [0], [1], [0, 0, 1, 1], [], []>} : vector<72x64xf32>, vector<64x64xf32>, vector<72x64xf32> -> vector<72x64xf32>
    %115 = arith.addf %103, %114 : vector<72x64xf32>
    %c7 = arith.constant 7 : index
    %c0_79 = arith.constant 0 : index
    %c0_80 = arith.constant 0 : index
    %116 = vector.load %arg5[%c7, %c0_79, %c0_80] : memref<9x72x1xi32, #tpu.memory_space<vmem>>, vector<1x72x1xi32>
    %117 = vector.shape_cast %116 : vector<1x72x1xi32> to vector<72x1xi32>
    %118 = vector.broadcast %117 : vector<72x1xi32> to vector<72x338xi32>
    %119 = arith.cmpi eq, %30, %118 : vector<72x338xi32>
    %cst_81 = arith.constant 1.000000e+00 : f32
    %cst_82 = arith.constant 0.000000e+00 : f32
    %120 = vector.broadcast %cst_81 : f32 to vector<72x338xf32>
    %121 = vector.broadcast %cst_82 : f32 to vector<72x338xf32>
    %122 = arith.select %119, %120, %121 : vector<72x338xi1>, vector<72x338xf32>
    %cst_83 = arith.constant dense<0.000000e+00> : vector<72x64xf32>
    %123 = tpu.matmul %122, %29, %cst_83 {dimension_numbers = #tpu.dot_dimension_numbers<[1], [0], [0], [1], [0, 0, 1, 1], [], []>} : vector<72x338xf32>, vector<338x64xf32>, vector<72x64xf32> -> vector<72x64xf32>
    %c7_84 = arith.constant 7 : index
    %c0_85 = arith.constant 0 : index
    %c0_86 = arith.constant 0 : index
    %124 = vector.load %arg4[%c7_84, %c0_85, %c0_86] : memref<9x64x64xf32, #tpu.memory_space<vmem>>, vector<1x64x64xf32>
    %125 = vector.shape_cast %124 : vector<1x64x64xf32> to vector<64x64xf32>
    %cst_87 = arith.constant dense<0.000000e+00> : vector<72x64xf32>
    %126 = tpu.matmul %123, %125, %cst_87 {dimension_numbers = #tpu.dot_dimension_numbers<[1], [0], [0], [1], [0, 0, 1, 1], [], []>} : vector<72x64xf32>, vector<64x64xf32>, vector<72x64xf32> -> vector<72x64xf32>
    %127 = arith.addf %115, %126 : vector<72x64xf32>
    %c8 = arith.constant 8 : index
    %c0_88 = arith.constant 0 : index
    %c0_89 = arith.constant 0 : index
    %128 = vector.load %arg5[%c8, %c0_88, %c0_89] : memref<9x72x1xi32, #tpu.memory_space<vmem>>, vector<1x72x1xi32>
    %129 = vector.shape_cast %128 : vector<1x72x1xi32> to vector<72x1xi32>
    %130 = vector.broadcast %129 : vector<72x1xi32> to vector<72x338xi32>
    %131 = arith.cmpi eq, %30, %130 : vector<72x338xi32>
    %cst_90 = arith.constant 1.000000e+00 : f32
    %cst_91 = arith.constant 0.000000e+00 : f32
    %132 = vector.broadcast %cst_90 : f32 to vector<72x338xf32>
    %133 = vector.broadcast %cst_91 : f32 to vector<72x338xf32>
    %134 = arith.select %131, %132, %133 : vector<72x338xi1>, vector<72x338xf32>
    %cst_92 = arith.constant dense<0.000000e+00> : vector<72x64xf32>
    %135 = tpu.matmul %134, %29, %cst_92 {dimension_numbers = #tpu.dot_dimension_numbers<[1], [0], [0], [1], [0, 0, 1, 1], [], []>} : vector<72x338xf32>, vector<338x64xf32>, vector<72x64xf32> -> vector<72x64xf32>
    %c8_93 = arith.constant 8 : index
    %c0_94 = arith.constant 0 : index
    %c0_95 = arith.constant 0 : index
    %136 = vector.load %arg4[%c8_93, %c0_94, %c0_95] : memref<9x64x64xf32, #tpu.memory_space<vmem>>, vector<1x64x64xf32>
    %137 = vector.shape_cast %136 : vector<1x64x64xf32> to vector<64x64xf32>
    %cst_96 = arith.constant dense<0.000000e+00> : vector<72x64xf32>
    %138 = tpu.matmul %135, %137, %cst_96 {dimension_numbers = #tpu.dot_dimension_numbers<[1], [0], [0], [1], [0, 0, 1, 1], [], []>} : vector<72x64xf32>, vector<64x64xf32>, vector<72x64xf32> -> vector<72x64xf32>
    %139 = arith.addf %127, %138 : vector<72x64xf32>
    %c0_97 = arith.constant 0 : index
    %c0_98 = arith.constant 0 : index
    %140 = vector.load %arg6[%c0_97, %c0_98] : memref<1x64xf32, #tpu.memory_space<vmem>>, vector<1x64xf32>
    %c0_99 = arith.constant 0 : index
    %c0_100 = arith.constant 0 : index
    %141 = vector.load %arg7[%c0_99, %c0_100] : memref<1x64xf32, #tpu.memory_space<vmem>>, vector<1x64xf32>
    %cst_101 = arith.constant dense<0.000000e+00> : vector<64xf32>
    %142 = vector.multi_reduction <add>, %139, %cst_101 [0] : vector<72x64xf32> to vector<64xf32>
    %143 = vector.shape_cast %142 : vector<64xf32> to vector<1x64xf32>
    %144 = arith.mulf %139, %139 : vector<72x64xf32>
    %cst_102 = arith.constant dense<0.000000e+00> : vector<64xf32>
    %145 = vector.multi_reduction <add>, %144, %cst_102 [0] : vector<72x64xf32> to vector<64xf32>
    %146 = vector.shape_cast %145 : vector<64xf32> to vector<1x64xf32>
    %cst_103 = arith.constant 0.013888889 : f32
    %147 = vector.broadcast %cst_103 : f32 to vector<1x64xf32>
    %148 = arith.mulf %143, %147 : vector<1x64xf32>
    %cst_104 = arith.constant 0.013888889 : f32
    %149 = vector.broadcast %cst_104 : f32 to vector<1x64xf32>
    %150 = arith.mulf %146, %149 : vector<1x64xf32>
    %151 = arith.mulf %148, %148 : vector<1x64xf32>
    %152 = arith.subf %150, %151 : vector<1x64xf32>
    %cst_105 = arith.constant 0.000000e+00 : f32
    %153 = vector.broadcast %cst_105 : f32 to vector<1x64xf32>
    %154 = arith.maximumf %152, %153 : vector<1x64xf32>
    %cst_106 = arith.constant 9.99999974E-6 : f32
    %155 = vector.broadcast %cst_106 : f32 to vector<1x64xf32>
    %156 = arith.addf %154, %155 : vector<1x64xf32>
    %157 = math.rsqrt %156 : vector<1x64xf32>
    %158 = arith.mulf %140, %157 : vector<1x64xf32>
    %159 = arith.mulf %148, %158 : vector<1x64xf32>
    %160 = arith.subf %141, %159 : vector<1x64xf32>
    %161 = vector.broadcast %158 : vector<1x64xf32> to vector<72x64xf32>
    %162 = arith.mulf %139, %161 : vector<72x64xf32>
    %163 = vector.broadcast %160 : vector<1x64xf32> to vector<72x64xf32>
    %164 = arith.addf %162, %163 : vector<72x64xf32>
    %cst_107 = arith.constant 0.000000e+00 : f32
    %165 = vector.broadcast %cst_107 : f32 to vector<72x64xf32>
    %166 = arith.maximumf %164, %165 : vector<72x64xf32>
    %167 = tpu.iota {dimensions = array<i32: 1>} : vector<8x72xi32>
    %cst_108 = arith.constant 0.000000e+00 : f32
    %168 = vector.broadcast %cst_108 : f32 to vector<8x64xf32>
    %c0_109 = arith.constant 0 : index
    %c0_110 = arith.constant 0 : index
    %c0_111 = arith.constant 0 : index
    %169 = vector.load %arg9[%c0_109, %c0_110, %c0_111] : memref<9x8x1xi32, #tpu.memory_space<vmem>>, vector<1x8x1xi32>
    %170 = vector.shape_cast %169 : vector<1x8x1xi32> to vector<8x1xi32>
    %171 = vector.broadcast %170 : vector<8x1xi32> to vector<8x72xi32>
    %172 = arith.cmpi eq, %167, %171 : vector<8x72xi32>
    %cst_112 = arith.constant 1.000000e+00 : f32
    %cst_113 = arith.constant 0.000000e+00 : f32
    %173 = vector.broadcast %cst_112 : f32 to vector<8x72xf32>
    %174 = vector.broadcast %cst_113 : f32 to vector<8x72xf32>
    %175 = arith.select %172, %173, %174 : vector<8x72xi1>, vector<8x72xf32>
    %cst_114 = arith.constant dense<0.000000e+00> : vector<8x64xf32>
    %176 = tpu.matmul %175, %166, %cst_114 {dimension_numbers = #tpu.dot_dimension_numbers<[1], [0], [0], [1], [0, 0, 1, 1], [], []>} : vector<8x72xf32>, vector<72x64xf32>, vector<8x64xf32> -> vector<8x64xf32>
    %c0_115 = arith.constant 0 : index
    %c0_116 = arith.constant 0 : index
    %c0_117 = arith.constant 0 : index
    %177 = vector.load %arg8[%c0_115, %c0_116, %c0_117] : memref<9x64x64xf32, #tpu.memory_space<vmem>>, vector<1x64x64xf32>
    %178 = vector.shape_cast %177 : vector<1x64x64xf32> to vector<64x64xf32>
    %cst_118 = arith.constant dense<0.000000e+00> : vector<8x64xf32>
    %179 = tpu.matmul %176, %178, %cst_118 {dimension_numbers = #tpu.dot_dimension_numbers<[1], [0], [0], [1], [0, 0, 1, 1], [], []>} : vector<8x64xf32>, vector<64x64xf32>, vector<8x64xf32> -> vector<8x64xf32>
    %180 = arith.addf %168, %179 : vector<8x64xf32>
    %c1_119 = arith.constant 1 : index
    %c0_120 = arith.constant 0 : index
    %c0_121 = arith.constant 0 : index
    %181 = vector.load %arg9[%c1_119, %c0_120, %c0_121] : memref<9x8x1xi32, #tpu.memory_space<vmem>>, vector<1x8x1xi32>
    %182 = vector.shape_cast %181 : vector<1x8x1xi32> to vector<8x1xi32>
    %183 = vector.broadcast %182 : vector<8x1xi32> to vector<8x72xi32>
    %184 = arith.cmpi eq, %167, %183 : vector<8x72xi32>
    %cst_122 = arith.constant 1.000000e+00 : f32
    %cst_123 = arith.constant 0.000000e+00 : f32
    %185 = vector.broadcast %cst_122 : f32 to vector<8x72xf32>
    %186 = vector.broadcast %cst_123 : f32 to vector<8x72xf32>
    %187 = arith.select %184, %185, %186 : vector<8x72xi1>, vector<8x72xf32>
    %cst_124 = arith.constant dense<0.000000e+00> : vector<8x64xf32>
    %188 = tpu.matmul %187, %166, %cst_124 {dimension_numbers = #tpu.dot_dimension_numbers<[1], [0], [0], [1], [0, 0, 1, 1], [], []>} : vector<8x72xf32>, vector<72x64xf32>, vector<8x64xf32> -> vector<8x64xf32>
    %c1_125 = arith.constant 1 : index
    %c0_126 = arith.constant 0 : index
    %c0_127 = arith.constant 0 : index
    %189 = vector.load %arg8[%c1_125, %c0_126, %c0_127] : memref<9x64x64xf32, #tpu.memory_space<vmem>>, vector<1x64x64xf32>
    %190 = vector.shape_cast %189 : vector<1x64x64xf32> to vector<64x64xf32>
    %cst_128 = arith.constant dense<0.000000e+00> : vector<8x64xf32>
    %191 = tpu.matmul %188, %190, %cst_128 {dimension_numbers = #tpu.dot_dimension_numbers<[1], [0], [0], [1], [0, 0, 1, 1], [], []>} : vector<8x64xf32>, vector<64x64xf32>, vector<8x64xf32> -> vector<8x64xf32>
    %192 = arith.addf %180, %191 : vector<8x64xf32>
    %c2_129 = arith.constant 2 : index
    %c0_130 = arith.constant 0 : index
    %c0_131 = arith.constant 0 : index
    %193 = vector.load %arg9[%c2_129, %c0_130, %c0_131] : memref<9x8x1xi32, #tpu.memory_space<vmem>>, vector<1x8x1xi32>
    %194 = vector.shape_cast %193 : vector<1x8x1xi32> to vector<8x1xi32>
    %195 = vector.broadcast %194 : vector<8x1xi32> to vector<8x72xi32>
    %196 = arith.cmpi eq, %167, %195 : vector<8x72xi32>
    %cst_132 = arith.constant 1.000000e+00 : f32
    %cst_133 = arith.constant 0.000000e+00 : f32
    %197 = vector.broadcast %cst_132 : f32 to vector<8x72xf32>
    %198 = vector.broadcast %cst_133 : f32 to vector<8x72xf32>
    %199 = arith.select %196, %197, %198 : vector<8x72xi1>, vector<8x72xf32>
    %cst_134 = arith.constant dense<0.000000e+00> : vector<8x64xf32>
    %200 = tpu.matmul %199, %166, %cst_134 {dimension_numbers = #tpu.dot_dimension_numbers<[1], [0], [0], [1], [0, 0, 1, 1], [], []>} : vector<8x72xf32>, vector<72x64xf32>, vector<8x64xf32> -> vector<8x64xf32>
    %c2_135 = arith.constant 2 : index
    %c0_136 = arith.constant 0 : index
    %c0_137 = arith.constant 0 : index
    %201 = vector.load %arg8[%c2_135, %c0_136, %c0_137] : memref<9x64x64xf32, #tpu.memory_space<vmem>>, vector<1x64x64xf32>
    %202 = vector.shape_cast %201 : vector<1x64x64xf32> to vector<64x64xf32>
    %cst_138 = arith.constant dense<0.000000e+00> : vector<8x64xf32>
    %203 = tpu.matmul %200, %202, %cst_138 {dimension_numbers = #tpu.dot_dimension_numbers<[1], [0], [0], [1], [0, 0, 1, 1], [], []>} : vector<8x64xf32>, vector<64x64xf32>, vector<8x64xf32> -> vector<8x64xf32>
    %204 = arith.addf %192, %203 : vector<8x64xf32>
    %c3_139 = arith.constant 3 : index
    %c0_140 = arith.constant 0 : index
    %c0_141 = arith.constant 0 : index
    %205 = vector.load %arg9[%c3_139, %c0_140, %c0_141] : memref<9x8x1xi32, #tpu.memory_space<vmem>>, vector<1x8x1xi32>
    %206 = vector.shape_cast %205 : vector<1x8x1xi32> to vector<8x1xi32>
    %207 = vector.broadcast %206 : vector<8x1xi32> to vector<8x72xi32>
    %208 = arith.cmpi eq, %167, %207 : vector<8x72xi32>
    %cst_142 = arith.constant 1.000000e+00 : f32
    %cst_143 = arith.constant 0.000000e+00 : f32
    %209 = vector.broadcast %cst_142 : f32 to vector<8x72xf32>
    %210 = vector.broadcast %cst_143 : f32 to vector<8x72xf32>
    %211 = arith.select %208, %209, %210 : vector<8x72xi1>, vector<8x72xf32>
    %cst_144 = arith.constant dense<0.000000e+00> : vector<8x64xf32>
    %212 = tpu.matmul %211, %166, %cst_144 {dimension_numbers = #tpu.dot_dimension_numbers<[1], [0], [0], [1], [0, 0, 1, 1], [], []>} : vector<8x72xf32>, vector<72x64xf32>, vector<8x64xf32> -> vector<8x64xf32>
    %c3_145 = arith.constant 3 : index
    %c0_146 = arith.constant 0 : index
    %c0_147 = arith.constant 0 : index
    %213 = vector.load %arg8[%c3_145, %c0_146, %c0_147] : memref<9x64x64xf32, #tpu.memory_space<vmem>>, vector<1x64x64xf32>
    %214 = vector.shape_cast %213 : vector<1x64x64xf32> to vector<64x64xf32>
    %cst_148 = arith.constant dense<0.000000e+00> : vector<8x64xf32>
    %215 = tpu.matmul %212, %214, %cst_148 {dimension_numbers = #tpu.dot_dimension_numbers<[1], [0], [0], [1], [0, 0, 1, 1], [], []>} : vector<8x64xf32>, vector<64x64xf32>, vector<8x64xf32> -> vector<8x64xf32>
    %216 = arith.addf %204, %215 : vector<8x64xf32>
    %c4_149 = arith.constant 4 : index
    %c0_150 = arith.constant 0 : index
    %c0_151 = arith.constant 0 : index
    %217 = vector.load %arg9[%c4_149, %c0_150, %c0_151] : memref<9x8x1xi32, #tpu.memory_space<vmem>>, vector<1x8x1xi32>
    %218 = vector.shape_cast %217 : vector<1x8x1xi32> to vector<8x1xi32>
    %219 = vector.broadcast %218 : vector<8x1xi32> to vector<8x72xi32>
    %220 = arith.cmpi eq, %167, %219 : vector<8x72xi32>
    %cst_152 = arith.constant 1.000000e+00 : f32
    %cst_153 = arith.constant 0.000000e+00 : f32
    %221 = vector.broadcast %cst_152 : f32 to vector<8x72xf32>
    %222 = vector.broadcast %cst_153 : f32 to vector<8x72xf32>
    %223 = arith.select %220, %221, %222 : vector<8x72xi1>, vector<8x72xf32>
    %cst_154 = arith.constant dense<0.000000e+00> : vector<8x64xf32>
    %224 = tpu.matmul %223, %166, %cst_154 {dimension_numbers = #tpu.dot_dimension_numbers<[1], [0], [0], [1], [0, 0, 1, 1], [], []>} : vector<8x72xf32>, vector<72x64xf32>, vector<8x64xf32> -> vector<8x64xf32>
    %c4_155 = arith.constant 4 : index
    %c0_156 = arith.constant 0 : index
    %c0_157 = arith.constant 0 : index
    %225 = vector.load %arg8[%c4_155, %c0_156, %c0_157] : memref<9x64x64xf32, #tpu.memory_space<vmem>>, vector<1x64x64xf32>
    %226 = vector.shape_cast %225 : vector<1x64x64xf32> to vector<64x64xf32>
    %cst_158 = arith.constant dense<0.000000e+00> : vector<8x64xf32>
    %227 = tpu.matmul %224, %226, %cst_158 {dimension_numbers = #tpu.dot_dimension_numbers<[1], [0], [0], [1], [0, 0, 1, 1], [], []>} : vector<8x64xf32>, vector<64x64xf32>, vector<8x64xf32> -> vector<8x64xf32>
    %228 = arith.addf %216, %227 : vector<8x64xf32>
    %c5_159 = arith.constant 5 : index
    %c0_160 = arith.constant 0 : index
    %c0_161 = arith.constant 0 : index
    %229 = vector.load %arg9[%c5_159, %c0_160, %c0_161] : memref<9x8x1xi32, #tpu.memory_space<vmem>>, vector<1x8x1xi32>
    %230 = vector.shape_cast %229 : vector<1x8x1xi32> to vector<8x1xi32>
    %231 = vector.broadcast %230 : vector<8x1xi32> to vector<8x72xi32>
    %232 = arith.cmpi eq, %167, %231 : vector<8x72xi32>
    %cst_162 = arith.constant 1.000000e+00 : f32
    %cst_163 = arith.constant 0.000000e+00 : f32
    %233 = vector.broadcast %cst_162 : f32 to vector<8x72xf32>
    %234 = vector.broadcast %cst_163 : f32 to vector<8x72xf32>
    %235 = arith.select %232, %233, %234 : vector<8x72xi1>, vector<8x72xf32>
    %cst_164 = arith.constant dense<0.000000e+00> : vector<8x64xf32>
    %236 = tpu.matmul %235, %166, %cst_164 {dimension_numbers = #tpu.dot_dimension_numbers<[1], [0], [0], [1], [0, 0, 1, 1], [], []>} : vector<8x72xf32>, vector<72x64xf32>, vector<8x64xf32> -> vector<8x64xf32>
    %c5_165 = arith.constant 5 : index
    %c0_166 = arith.constant 0 : index
    %c0_167 = arith.constant 0 : index
    %237 = vector.load %arg8[%c5_165, %c0_166, %c0_167] : memref<9x64x64xf32, #tpu.memory_space<vmem>>, vector<1x64x64xf32>
    %238 = vector.shape_cast %237 : vector<1x64x64xf32> to vector<64x64xf32>
    %cst_168 = arith.constant dense<0.000000e+00> : vector<8x64xf32>
    %239 = tpu.matmul %236, %238, %cst_168 {dimension_numbers = #tpu.dot_dimension_numbers<[1], [0], [0], [1], [0, 0, 1, 1], [], []>} : vector<8x64xf32>, vector<64x64xf32>, vector<8x64xf32> -> vector<8x64xf32>
    %240 = arith.addf %228, %239 : vector<8x64xf32>
    %c6_169 = arith.constant 6 : index
    %c0_170 = arith.constant 0 : index
    %c0_171 = arith.constant 0 : index
    %241 = vector.load %arg9[%c6_169, %c0_170, %c0_171] : memref<9x8x1xi32, #tpu.memory_space<vmem>>, vector<1x8x1xi32>
    %242 = vector.shape_cast %241 : vector<1x8x1xi32> to vector<8x1xi32>
    %243 = vector.broadcast %242 : vector<8x1xi32> to vector<8x72xi32>
    %244 = arith.cmpi eq, %167, %243 : vector<8x72xi32>
    %cst_172 = arith.constant 1.000000e+00 : f32
    %cst_173 = arith.constant 0.000000e+00 : f32
    %245 = vector.broadcast %cst_172 : f32 to vector<8x72xf32>
    %246 = vector.broadcast %cst_173 : f32 to vector<8x72xf32>
    %247 = arith.select %244, %245, %246 : vector<8x72xi1>, vector<8x72xf32>
    %cst_174 = arith.constant dense<0.000000e+00> : vector<8x64xf32>
    %248 = tpu.matmul %247, %166, %cst_174 {dimension_numbers = #tpu.dot_dimension_numbers<[1], [0], [0], [1], [0, 0, 1, 1], [], []>} : vector<8x72xf32>, vector<72x64xf32>, vector<8x64xf32> -> vector<8x64xf32>
    %c6_175 = arith.constant 6 : index
    %c0_176 = arith.constant 0 : index
    %c0_177 = arith.constant 0 : index
    %249 = vector.load %arg8[%c6_175, %c0_176, %c0_177] : memref<9x64x64xf32, #tpu.memory_space<vmem>>, vector<1x64x64xf32>
    %250 = vector.shape_cast %249 : vector<1x64x64xf32> to vector<64x64xf32>
    %cst_178 = arith.constant dense<0.000000e+00> : vector<8x64xf32>
    %251 = tpu.matmul %248, %250, %cst_178 {dimension_numbers = #tpu.dot_dimension_numbers<[1], [0], [0], [1], [0, 0, 1, 1], [], []>} : vector<8x64xf32>, vector<64x64xf32>, vector<8x64xf32> -> vector<8x64xf32>
    %252 = arith.addf %240, %251 : vector<8x64xf32>
    %c7_179 = arith.constant 7 : index
    %c0_180 = arith.constant 0 : index
    %c0_181 = arith.constant 0 : index
    %253 = vector.load %arg9[%c7_179, %c0_180, %c0_181] : memref<9x8x1xi32, #tpu.memory_space<vmem>>, vector<1x8x1xi32>
    %254 = vector.shape_cast %253 : vector<1x8x1xi32> to vector<8x1xi32>
    %255 = vector.broadcast %254 : vector<8x1xi32> to vector<8x72xi32>
    %256 = arith.cmpi eq, %167, %255 : vector<8x72xi32>
    %cst_182 = arith.constant 1.000000e+00 : f32
    %cst_183 = arith.constant 0.000000e+00 : f32
    %257 = vector.broadcast %cst_182 : f32 to vector<8x72xf32>
    %258 = vector.broadcast %cst_183 : f32 to vector<8x72xf32>
    %259 = arith.select %256, %257, %258 : vector<8x72xi1>, vector<8x72xf32>
    %cst_184 = arith.constant dense<0.000000e+00> : vector<8x64xf32>
    %260 = tpu.matmul %259, %166, %cst_184 {dimension_numbers = #tpu.dot_dimension_numbers<[1], [0], [0], [1], [0, 0, 1, 1], [], []>} : vector<8x72xf32>, vector<72x64xf32>, vector<8x64xf32> -> vector<8x64xf32>
    %c7_185 = arith.constant 7 : index
    %c0_186 = arith.constant 0 : index
    %c0_187 = arith.constant 0 : index
    %261 = vector.load %arg8[%c7_185, %c0_186, %c0_187] : memref<9x64x64xf32, #tpu.memory_space<vmem>>, vector<1x64x64xf32>
    %262 = vector.shape_cast %261 : vector<1x64x64xf32> to vector<64x64xf32>
    %cst_188 = arith.constant dense<0.000000e+00> : vector<8x64xf32>
    %263 = tpu.matmul %260, %262, %cst_188 {dimension_numbers = #tpu.dot_dimension_numbers<[1], [0], [0], [1], [0, 0, 1, 1], [], []>} : vector<8x64xf32>, vector<64x64xf32>, vector<8x64xf32> -> vector<8x64xf32>
    %264 = arith.addf %252, %263 : vector<8x64xf32>
    %c8_189 = arith.constant 8 : index
    %c0_190 = arith.constant 0 : index
    %c0_191 = arith.constant 0 : index
    %265 = vector.load %arg9[%c8_189, %c0_190, %c0_191] : memref<9x8x1xi32, #tpu.memory_space<vmem>>, vector<1x8x1xi32>
    %266 = vector.shape_cast %265 : vector<1x8x1xi32> to vector<8x1xi32>
    %267 = vector.broadcast %266 : vector<8x1xi32> to vector<8x72xi32>
    %268 = arith.cmpi eq, %167, %267 : vector<8x72xi32>
    %cst_192 = arith.constant 1.000000e+00 : f32
    %cst_193 = arith.constant 0.000000e+00 : f32
    %269 = vector.broadcast %cst_192 : f32 to vector<8x72xf32>
    %270 = vector.broadcast %cst_193 : f32 to vector<8x72xf32>
    %271 = arith.select %268, %269, %270 : vector<8x72xi1>, vector<8x72xf32>
    %cst_194 = arith.constant dense<0.000000e+00> : vector<8x64xf32>
    %272 = tpu.matmul %271, %166, %cst_194 {dimension_numbers = #tpu.dot_dimension_numbers<[1], [0], [0], [1], [0, 0, 1, 1], [], []>} : vector<8x72xf32>, vector<72x64xf32>, vector<8x64xf32> -> vector<8x64xf32>
    %c8_195 = arith.constant 8 : index
    %c0_196 = arith.constant 0 : index
    %c0_197 = arith.constant 0 : index
    %273 = vector.load %arg8[%c8_195, %c0_196, %c0_197] : memref<9x64x64xf32, #tpu.memory_space<vmem>>, vector<1x64x64xf32>
    %274 = vector.shape_cast %273 : vector<1x64x64xf32> to vector<64x64xf32>
    %cst_198 = arith.constant dense<0.000000e+00> : vector<8x64xf32>
    %275 = tpu.matmul %272, %274, %cst_198 {dimension_numbers = #tpu.dot_dimension_numbers<[1], [0], [0], [1], [0, 0, 1, 1], [], []>} : vector<8x64xf32>, vector<64x64xf32>, vector<8x64xf32> -> vector<8x64xf32>
    %276 = arith.addf %264, %275 : vector<8x64xf32>
    %c0_199 = arith.constant 0 : index
    %c0_200 = arith.constant 0 : index
    %277 = vector.load %arg10[%c0_199, %c0_200] : memref<1x64xf32, #tpu.memory_space<vmem>>, vector<1x64xf32>
    %c0_201 = arith.constant 0 : index
    %c0_202 = arith.constant 0 : index
    %278 = vector.load %arg11[%c0_201, %c0_202] : memref<1x64xf32, #tpu.memory_space<vmem>>, vector<1x64xf32>
    %cst_203 = arith.constant dense<0.000000e+00> : vector<64xf32>
    %279 = vector.multi_reduction <add>, %276, %cst_203 [0] : vector<8x64xf32> to vector<64xf32>
    %280 = vector.shape_cast %279 : vector<64xf32> to vector<1x64xf32>
    %281 = arith.mulf %276, %276 : vector<8x64xf32>
    %cst_204 = arith.constant dense<0.000000e+00> : vector<64xf32>
    %282 = vector.multi_reduction <add>, %281, %cst_204 [0] : vector<8x64xf32> to vector<64xf32>
    %283 = vector.shape_cast %282 : vector<64xf32> to vector<1x64xf32>
    %cst_205 = arith.constant 1.250000e-01 : f32
    %284 = vector.broadcast %cst_205 : f32 to vector<1x64xf32>
    %285 = arith.mulf %280, %284 : vector<1x64xf32>
    %cst_206 = arith.constant 1.250000e-01 : f32
    %286 = vector.broadcast %cst_206 : f32 to vector<1x64xf32>
    %287 = arith.mulf %283, %286 : vector<1x64xf32>
    %288 = arith.mulf %285, %285 : vector<1x64xf32>
    %289 = arith.subf %287, %288 : vector<1x64xf32>
    %cst_207 = arith.constant 0.000000e+00 : f32
    %290 = vector.broadcast %cst_207 : f32 to vector<1x64xf32>
    %291 = arith.maximumf %289, %290 : vector<1x64xf32>
    %cst_208 = arith.constant 9.99999974E-6 : f32
    %292 = vector.broadcast %cst_208 : f32 to vector<1x64xf32>
    %293 = arith.addf %291, %292 : vector<1x64xf32>
    %294 = math.rsqrt %293 : vector<1x64xf32>
    %295 = arith.mulf %277, %294 : vector<1x64xf32>
    %296 = arith.mulf %285, %295 : vector<1x64xf32>
    %297 = arith.subf %278, %296 : vector<1x64xf32>
    %298 = vector.broadcast %295 : vector<1x64xf32> to vector<8x64xf32>
    %299 = arith.mulf %276, %298 : vector<8x64xf32>
    %300 = vector.broadcast %297 : vector<1x64xf32> to vector<8x64xf32>
    %301 = arith.addf %299, %300 : vector<8x64xf32>
    %cst_209 = arith.constant 0.000000e+00 : f32
    %302 = vector.broadcast %cst_209 : f32 to vector<8x64xf32>
    %303 = arith.maximumf %301, %302 : vector<8x64xf32>
    %304 = tpu.iota {dimensions = array<i32: 1>} : vector<2x8xi32>
    %cst_210 = arith.constant 0.000000e+00 : f32
    %305 = vector.broadcast %cst_210 : f32 to vector<2x64xf32>
    %c0_211 = arith.constant 0 : index
    %c0_212 = arith.constant 0 : index
    %c0_213 = arith.constant 0 : index
    %306 = vector.load %arg13[%c0_211, %c0_212, %c0_213] : memref<4x2x1xi32, #tpu.memory_space<vmem>>, vector<1x2x1xi32>
    %307 = vector.shape_cast %306 : vector<1x2x1xi32> to vector<2x1xi32>
    %308 = vector.broadcast %307 : vector<2x1xi32> to vector<2x8xi32>
    %309 = arith.cmpi eq, %304, %308 : vector<2x8xi32>
    %cst_214 = arith.constant 1.000000e+00 : f32
    %cst_215 = arith.constant 0.000000e+00 : f32
    %310 = vector.broadcast %cst_214 : f32 to vector<2x8xf32>
    %311 = vector.broadcast %cst_215 : f32 to vector<2x8xf32>
    %312 = arith.select %309, %310, %311 : vector<2x8xi1>, vector<2x8xf32>
    %cst_216 = arith.constant dense<0.000000e+00> : vector<2x64xf32>
    %313 = tpu.matmul %312, %303, %cst_216 {dimension_numbers = #tpu.dot_dimension_numbers<[1], [0], [0], [1], [0, 0, 1, 1], [], []>} : vector<2x8xf32>, vector<8x64xf32>, vector<2x64xf32> -> vector<2x64xf32>
    %c0_217 = arith.constant 0 : index
    %c0_218 = arith.constant 0 : index
    %c0_219 = arith.constant 0 : index
    %314 = vector.load %arg12[%c0_217, %c0_218, %c0_219] : memref<4x64x64xf32, #tpu.memory_space<vmem>>, vector<1x64x64xf32>
    %315 = vector.shape_cast %314 : vector<1x64x64xf32> to vector<64x64xf32>
    %cst_220 = arith.constant dense<0.000000e+00> : vector<2x64xf32>
    %316 = tpu.matmul %313, %315, %cst_220 {dimension_numbers = #tpu.dot_dimension_numbers<[1], [0], [0], [1], [0, 0, 1, 1], [], []>} : vector<2x64xf32>, vector<64x64xf32>, vector<2x64xf32> -> vector<2x64xf32>
    %317 = arith.addf %305, %316 : vector<2x64xf32>
    %c1_221 = arith.constant 1 : index
    %c0_222 = arith.constant 0 : index
    %c0_223 = arith.constant 0 : index
    %318 = vector.load %arg13[%c1_221, %c0_222, %c0_223] : memref<4x2x1xi32, #tpu.memory_space<vmem>>, vector<1x2x1xi32>
    %319 = vector.shape_cast %318 : vector<1x2x1xi32> to vector<2x1xi32>
    %320 = vector.broadcast %319 : vector<2x1xi32> to vector<2x8xi32>
    %321 = arith.cmpi eq, %304, %320 : vector<2x8xi32>
    %cst_224 = arith.constant 1.000000e+00 : f32
    %cst_225 = arith.constant 0.000000e+00 : f32
    %322 = vector.broadcast %cst_224 : f32 to vector<2x8xf32>
    %323 = vector.broadcast %cst_225 : f32 to vector<2x8xf32>
    %324 = arith.select %321, %322, %323 : vector<2x8xi1>, vector<2x8xf32>
    %cst_226 = arith.constant dense<0.000000e+00> : vector<2x64xf32>
    %325 = tpu.matmul %324, %303, %cst_226 {dimension_numbers = #tpu.dot_dimension_numbers<[1], [0], [0], [1], [0, 0, 1, 1], [], []>} : vector<2x8xf32>, vector<8x64xf32>, vector<2x64xf32> -> vector<2x64xf32>
    %c1_227 = arith.constant 1 : index
    %c0_228 = arith.constant 0 : index
    %c0_229 = arith.constant 0 : index
    %326 = vector.load %arg12[%c1_227, %c0_228, %c0_229] : memref<4x64x64xf32, #tpu.memory_space<vmem>>, vector<1x64x64xf32>
    %327 = vector.shape_cast %326 : vector<1x64x64xf32> to vector<64x64xf32>
    %cst_230 = arith.constant dense<0.000000e+00> : vector<2x64xf32>
    %328 = tpu.matmul %325, %327, %cst_230 {dimension_numbers = #tpu.dot_dimension_numbers<[1], [0], [0], [1], [0, 0, 1, 1], [], []>} : vector<2x64xf32>, vector<64x64xf32>, vector<2x64xf32> -> vector<2x64xf32>
    %329 = arith.addf %317, %328 : vector<2x64xf32>
    %c2_231 = arith.constant 2 : index
    %c0_232 = arith.constant 0 : index
    %c0_233 = arith.constant 0 : index
    %330 = vector.load %arg13[%c2_231, %c0_232, %c0_233] : memref<4x2x1xi32, #tpu.memory_space<vmem>>, vector<1x2x1xi32>
    %331 = vector.shape_cast %330 : vector<1x2x1xi32> to vector<2x1xi32>
    %332 = vector.broadcast %331 : vector<2x1xi32> to vector<2x8xi32>
    %333 = arith.cmpi eq, %304, %332 : vector<2x8xi32>
    %cst_234 = arith.constant 1.000000e+00 : f32
    %cst_235 = arith.constant 0.000000e+00 : f32
    %334 = vector.broadcast %cst_234 : f32 to vector<2x8xf32>
    %335 = vector.broadcast %cst_235 : f32 to vector<2x8xf32>
    %336 = arith.select %333, %334, %335 : vector<2x8xi1>, vector<2x8xf32>
    %cst_236 = arith.constant dense<0.000000e+00> : vector<2x64xf32>
    %337 = tpu.matmul %336, %303, %cst_236 {dimension_numbers = #tpu.dot_dimension_numbers<[1], [0], [0], [1], [0, 0, 1, 1], [], []>} : vector<2x8xf32>, vector<8x64xf32>, vector<2x64xf32> -> vector<2x64xf32>
    %c2_237 = arith.constant 2 : index
    %c0_238 = arith.constant 0 : index
    %c0_239 = arith.constant 0 : index
    %338 = vector.load %arg12[%c2_237, %c0_238, %c0_239] : memref<4x64x64xf32, #tpu.memory_space<vmem>>, vector<1x64x64xf32>
    %339 = vector.shape_cast %338 : vector<1x64x64xf32> to vector<64x64xf32>
    %cst_240 = arith.constant dense<0.000000e+00> : vector<2x64xf32>
    %340 = tpu.matmul %337, %339, %cst_240 {dimension_numbers = #tpu.dot_dimension_numbers<[1], [0], [0], [1], [0, 0, 1, 1], [], []>} : vector<2x64xf32>, vector<64x64xf32>, vector<2x64xf32> -> vector<2x64xf32>
    %341 = arith.addf %329, %340 : vector<2x64xf32>
    %c3_241 = arith.constant 3 : index
    %c0_242 = arith.constant 0 : index
    %c0_243 = arith.constant 0 : index
    %342 = vector.load %arg13[%c3_241, %c0_242, %c0_243] : memref<4x2x1xi32, #tpu.memory_space<vmem>>, vector<1x2x1xi32>
    %343 = vector.shape_cast %342 : vector<1x2x1xi32> to vector<2x1xi32>
    %344 = vector.broadcast %343 : vector<2x1xi32> to vector<2x8xi32>
    %345 = arith.cmpi eq, %304, %344 : vector<2x8xi32>
    %cst_244 = arith.constant 1.000000e+00 : f32
    %cst_245 = arith.constant 0.000000e+00 : f32
    %346 = vector.broadcast %cst_244 : f32 to vector<2x8xf32>
    %347 = vector.broadcast %cst_245 : f32 to vector<2x8xf32>
    %348 = arith.select %345, %346, %347 : vector<2x8xi1>, vector<2x8xf32>
    %cst_246 = arith.constant dense<0.000000e+00> : vector<2x64xf32>
    %349 = tpu.matmul %348, %303, %cst_246 {dimension_numbers = #tpu.dot_dimension_numbers<[1], [0], [0], [1], [0, 0, 1, 1], [], []>} : vector<2x8xf32>, vector<8x64xf32>, vector<2x64xf32> -> vector<2x64xf32>
    %c3_247 = arith.constant 3 : index
    %c0_248 = arith.constant 0 : index
    %c0_249 = arith.constant 0 : index
    %350 = vector.load %arg12[%c3_247, %c0_248, %c0_249] : memref<4x64x64xf32, #tpu.memory_space<vmem>>, vector<1x64x64xf32>
    %351 = vector.shape_cast %350 : vector<1x64x64xf32> to vector<64x64xf32>
    %cst_250 = arith.constant dense<0.000000e+00> : vector<2x64xf32>
    %352 = tpu.matmul %349, %351, %cst_250 {dimension_numbers = #tpu.dot_dimension_numbers<[1], [0], [0], [1], [0, 0, 1, 1], [], []>} : vector<2x64xf32>, vector<64x64xf32>, vector<2x64xf32> -> vector<2x64xf32>
    %353 = arith.addf %341, %352 : vector<2x64xf32>
    %c0_251 = arith.constant 0 : index
    %c0_252 = arith.constant 0 : index
    %354 = vector.load %arg14[%c0_251, %c0_252] : memref<1x64xf32, #tpu.memory_space<vmem>>, vector<1x64xf32>
    %c0_253 = arith.constant 0 : index
    %c0_254 = arith.constant 0 : index
    %355 = vector.load %arg15[%c0_253, %c0_254] : memref<1x64xf32, #tpu.memory_space<vmem>>, vector<1x64xf32>
    %cst_255 = arith.constant dense<0.000000e+00> : vector<64xf32>
    %356 = vector.multi_reduction <add>, %353, %cst_255 [0] : vector<2x64xf32> to vector<64xf32>
    %357 = vector.shape_cast %356 : vector<64xf32> to vector<1x64xf32>
    %358 = arith.mulf %353, %353 : vector<2x64xf32>
    %cst_256 = arith.constant dense<0.000000e+00> : vector<64xf32>
    %359 = vector.multi_reduction <add>, %358, %cst_256 [0] : vector<2x64xf32> to vector<64xf32>
    %360 = vector.shape_cast %359 : vector<64xf32> to vector<1x64xf32>
    %cst_257 = arith.constant 5.000000e-01 : f32
    %361 = vector.broadcast %cst_257 : f32 to vector<1x64xf32>
    %362 = arith.mulf %357, %361 : vector<1x64xf32>
    %cst_258 = arith.constant 5.000000e-01 : f32
    %363 = vector.broadcast %cst_258 : f32 to vector<1x64xf32>
    %364 = arith.mulf %360, %363 : vector<1x64xf32>
    %365 = arith.mulf %362, %362 : vector<1x64xf32>
    %366 = arith.subf %364, %365 : vector<1x64xf32>
    %cst_259 = arith.constant 0.000000e+00 : f32
    %367 = vector.broadcast %cst_259 : f32 to vector<1x64xf32>
    %368 = arith.maximumf %366, %367 : vector<1x64xf32>
    %cst_260 = arith.constant 9.99999974E-6 : f32
    %369 = vector.broadcast %cst_260 : f32 to vector<1x64xf32>
    %370 = arith.addf %368, %369 : vector<1x64xf32>
    %371 = math.rsqrt %370 : vector<1x64xf32>
    %372 = arith.mulf %354, %371 : vector<1x64xf32>
    %373 = arith.mulf %362, %372 : vector<1x64xf32>
    %374 = arith.subf %355, %373 : vector<1x64xf32>
    %375 = vector.broadcast %372 : vector<1x64xf32> to vector<2x64xf32>
    %376 = arith.mulf %353, %375 : vector<2x64xf32>
    %377 = vector.broadcast %374 : vector<1x64xf32> to vector<2x64xf32>
    %378 = arith.addf %376, %377 : vector<2x64xf32>
    %cst_261 = arith.constant 0.000000e+00 : f32
    %379 = vector.broadcast %cst_261 : f32 to vector<2x64xf32>
    %380 = arith.maximumf %378, %379 : vector<2x64xf32>
    %c0_262 = arith.constant 0 : index
    %c0_263 = arith.constant 0 : index
    %381 = vector.load %arg16[%c0_262, %c0_263] : memref<64x5xf32, #tpu.memory_space<vmem>>, vector<64x5xf32>
    %cst_264 = arith.constant dense<0.000000e+00> : vector<2x5xf32>
    %382 = tpu.matmul %380, %381, %cst_264 {dimension_numbers = #tpu.dot_dimension_numbers<[1], [0], [0], [1], [0, 0, 1, 1], [], []>} : vector<2x64xf32>, vector<64x5xf32>, vector<2x5xf32> -> vector<2x5xf32>
    %c0_265 = arith.constant 0 : index
    %c0_266 = arith.constant 0 : index
    %383 = vector.load %arg17[%c0_265, %c0_266] : memref<1x5xf32, #tpu.memory_space<vmem>>, vector<1x5xf32>
    %384 = vector.broadcast %383 : vector<1x5xf32> to vector<2x5xf32>
    %385 = arith.addf %382, %384 : vector<2x5xf32>
    %cst_267 = arith.constant dense<0xFF800000> : vector<2xf32>
    %386 = vector.multi_reduction <maximumf>, %385, %cst_267 [1] : vector<2x5xf32> to vector<2xf32>
    %387 = vector.shape_cast %386 : vector<2xf32> to vector<2x1xf32>
    %388 = vector.broadcast %387 : vector<2x1xf32> to vector<2x5xf32>
    %389 = arith.subf %385, %388 : vector<2x5xf32>
    %390 = math.exp %389 : vector<2x5xf32>
    %391 = vector.broadcast %387 : vector<2x1xf32> to vector<2x5xf32>
    %392 = arith.subf %385, %391 : vector<2x5xf32>
    %cst_268 = arith.constant dense<0.000000e+00> : vector<2xf32>
    %393 = vector.multi_reduction <add>, %390, %cst_268 [1] : vector<2x5xf32> to vector<2xf32>
    %394 = vector.shape_cast %393 : vector<2xf32> to vector<2x1xf32>
    %395 = math.log %394 : vector<2x1xf32>
    %396 = vector.broadcast %395 : vector<2x1xf32> to vector<2x5xf32>
    %397 = arith.subf %392, %396 : vector<2x5xf32>
    %c0_269 = arith.constant 0 : index
    %c0_270 = arith.constant 0 : index
    %398 = vector.load %arg18[%c0_269, %c0_270] : memref<2x5xf32, #tpu.memory_space<vmem>>, vector<2x5xf32>
    tpu.vector_store %arg18[%c0_269, %c0_270], %397 {strides = array<i32>} : memref<2x5xf32, #tpu.memory_space<vmem>>, vector<2x5xf32>,
    return
  }
}

</mosaic_0001>

<bundles_post_ra>
// kernel: learner_conv_forward.1
= control target key start
LH: loop header
LB: loop body
LE: loop exit
PB: predicated region body
PF: predicated region fallthrough
CT: control target
= control target key end

     0   :  { %s16110_s0 = inlined_call_operand.vmem [shape: f32[338,9], index: 0, kind: input, shape index: {}]   ;;  %s16111_s1 = inlined_call_operand.vmem [shape: f32[9,64], index: 1, kind: input, shape index: {}]   ;;  %s16112_s2 = inlined_call_operand.vmem [shape: f32[1,64], index: 2, kind: input, shape index: {}]   ;;  %s16113_s3 = inlined_call_operand.vmem [shape: f32[1,64], index: 3, kind: input, shape index: {}]   ;;  %s16114_s4 = inlined_call_operand.vmem [shape: f32[9,64,64], index: 4, kind: input, shape index: {}]   ;;  %s16115_s5 = inlined_call_operand.vmem [shape: s32[9,72,1], index: 5, kind: input, shape index: {}]   ;;  %s16116_s6 = inlined_call_operand.vmem [shape: f32[1,64], index: 6, kind: input, shape index: {}]   ;;  %s16117_s7 = inlined_call_operand.vmem [shape: f32[1,64], index: 7, kind: input, shape index: {}]   ;;  %s16118_s8 = inlined_call_operand.vmem [shape: f32[9,64,64], index: 8, kind: input, shape index: {}]   ;;  %s16119_s9 = inlined_call_operand.vmem [shape: s32[9,8,1], index: 9, kind: input, shape index: {}]   ;;  %s16120_s10 = inlined_call_operand.vmem [shape: f32[1,64], index: 10, kind: input, shape index: {}]   ;;  %s16121_s11 = inlined_call_operand.vmem [shape: f32[1,64], index: 11, kind: input, shape index: {}]   ;;  %s16122_s12 = inlined_call_operand.vmem [shape: f32[4,64,64], index: 12, kind: input, shape index: {}]   ;;  %s16123_s13 = inlined_call_operand.vmem [shape: s32[4,2,1], index: 13, kind: input, shape index: {}]   ;;  %s16124_s14 = inlined_call_operand.vmem [shape: f32[1,64], index: 14, kind: input, shape index: {}]   ;;  %s16125_s15 = inlined_call_operand.vmem [shape: f32[1,64], index: 15, kind: input, shape index: {}]   ;;  %s16126_s16 = inlined_call_operand.vmem [shape: f32[64,5], index: 16, kind: input, shape index: {}]   ;;  %s16127_s17 = inlined_call_operand.vmem [shape: f32[1,5], index: 17, kind: input, shape index: {}]   ;;  %s16128_s18 = inlined_call_operand.hbm [shape: f32[2,5], index: 18, kind: output, shape index: {}]  }
   0x1   :  { %16164 = sst [smem:[#allocation22_spill]] %s16110_s0 }
   0x2   :  { %16165 = sst [smem:[#allocation23_spill]] %s16111_s1 }
   0x3   :  { %16166 = sst [smem:[#allocation24_spill]] %s16112_s2 }
   0x4   :  { %s16167_s29 = sld [smem:[#allocation23_spill]]  ;;  %vm235_vm0 = vcmask 1040384   ;;  %v16135_v2 = vmov 0.0|0.0   ;;  %vm11975_vm1 = vmmov 1   ;;  %vm11976_vm3 = vmmov 0   ;;  %s16168_s20 = sld [smem:[#allocation22_spill]] }
   0x5   :  { %10953 = vmatprep.subr.bf16.mxu0 %v16135_v2  ;;  %vm10955_vm2 = vmpackc.low %vm235_vm0, %vm11975_vm1  ;;  %v16131_v4 = vmov 0.0   ;;  %vm105_vm4 = vcmask 72704  }
   0x6   :  { %9521 = vmatprep.mubr.msk.f32.mxu0 %vm11976_vm3, %v16131_v4 }
   0xa   :  { %v103_v0 = vld [vmem:[%s16167_s29] sm:$0xff]  ;;  %v104_v1 = vld [vmem:[%s16167_s29 + $0x8] sm:$0x1]  ;;  %v62_v7 = vld [vmem:[%s16168_s20 + $0x10] sm:$0xff] }
   0xb   :  { %v10954_v3 = vpack.c.bf16 %v104_v1, %v103_v0  ;;  %v60_v5 = vld [vmem:[%s16168_s20] sm:$0xff]  ;;  %v61_v6 = vld [vmem:[%s16168_s20 + $0x8] sm:$0xff] }
   0xd   :  { %10956 = vmatpush3.bf16.msk.msra.mxu0 %vm10955_vm2, %v10954_v3 }
   0xe   :  { %11051 = vmatprep.subr.bf16.mxu0 %v16135_v2 }
  0x10   :  { %9522 = vmatmul.mubr.msk.f32.vlgmr.msra.gmra.mrb[0].mxu0 %vm105_vm4, %v60_v5 }
  0x11   :  { %9524 = vmatprep.mubr.msk.f32.mxu0 %vm11976_vm3, %v16131_v4 }
  0x14   :  { %9525 = vmatmul.mubr.msk.f32.gmra.mrb[2].mxu0 %vm105_vm4, %v61_v6 }
  0x15   :  { %9527 = vmatprep.mubr.msk.f32.mxu0 %vm11976_vm3, %v16131_v4 }
  0x16   :  { %23 = vsyncpa [#allocation3], 0  ;;  %v63_v8 = vld [vmem:[%s16168_s20 + $0x18] sm:$0xff]  ;;  %v64_v9 = vld [vmem:[%s16168_s20 + $0x20] sm:$0xff]  ;;  %v11978_v11 = vmov 0   ;;  %vm521_vm5 = vcmask 523264  }
  0x17   :  { %v65_v10 = vld [vmem:[%s16168_s20 + $0x28] sm:$0xff]  ;;  %11936 = vset.pattern.permute.xlu0 %v11978_v11  ;;  %v903_v12 = vld [vmem:[%s16115_s5] sm:$0xff]  ;;  %11937 = vset.pattern.permute.xlu1 %v11978_v11  ;;  %v66_v13 = vld [vmem:[%s16168_s20 + $0x30] sm:$0xff]  ;;  %vm605_vm7 = vcmask 517120   ;;  %s16175_s22 = sld [smem:[#allocation24_spill]]  ;;  %vm1021_vm2 = vcmask 1041408  }
  0x18   :  { %9528 = vmatmul.mubr.msk.f32.gmra.mrb[4].mxu0 %vm105_vm4, %v62_v7  ;;  %913 = vperm.xlu0 %11936, %v903_v12   ;;  %v904_v14 = vld [vmem:[%s16115_s5 + $0x8] sm:$0xff]  ;;  %v67_v15 = vld [vmem:[%s16168_s20 + $0x38] sm:$0xff]  ;;  %v905_v16 = vld [vmem:[%s16115_s5 + $0x10] sm:$0xff] }
  0x19   :  { %9530 = vmatprep.mubr.msk.f32.mxu0 %vm11976_vm3, %v16131_v4  ;;  %v907_v17 = vld [vmem:[%s16115_s5 + $0x20] sm:$0xff]  ;;  %919 = vperm.xlu1 %11937, %v905_v16   ;;  %v906_v19 = vld [vmem:[%s16115_s5 + $0x18] sm:$0xff]  ;;  %v909_v20 = vld [vmem:[%s16115_s5 + $0x30] sm:$0xff] }
  0x1a   :  { %v68_v18 = vld [vmem:[%s16168_s20 + $0x40] sm:$0xff]  ;;  %v69_v21 = vld [vmem:[%s16168_s20 + $0x48] sm:$0xff]  ;;  %v70_v24 = vld [vmem:[%s16168_s20 + $0x50] sm:$0xff] }
  0x1b   :  { %v908_v22 = vld [vmem:[%s16115_s5 + $0x28] sm:$0xff]  ;;  %v911_v23 = vld [vmem:[%s16115_s5 + $0x40] sm:$0xff]  ;;  %v910_v25 = vld [vmem:[%s16115_s5 + $0x38] sm:$0xff] }
  0x1c   :  { %9531 = vmatmul.mubr.msk.f32.gmra.mrb[6].mxu0 %vm105_vm4, %v63_v8  ;;  %916 = vperm.xlu0 %11936, %v904_v14   ;;  %v7817_v26 = vld [vmem:[%s16115_s5 + $0x50] sm:$0xff]  ;;  %v7816_v27 = vld [vmem:[%s16115_s5 + $0x48] sm:$0xff]  ;;  %v7819_v28 = vld [vmem:[%s16115_s5 + $0x60] sm:$0xff] }
  0x1d   :  { %9533 = vmatprep.mubr.msk.f32.mxu0 %vm11976_vm3, %v16131_v4  ;;  %922 = vperm.xlu1 %11937, %v906_v19   ;;  %v71_v29 = vld [vmem:[%s16168_s20 + $0x58] sm:$0xff]  ;;  %v7821_v31 = vld [vmem:[%s16115_s5 + $0x70] sm:$0xff]  ;;  %v72_v32 = vld [vmem:[%s16168_s20 + $0x60] sm:$0xff] }
  0x1e   :  { %v7818_v30 = vld [vmem:[%s16115_s5 + $0x58] sm:$0xff]  ;;  %v7820_v33 = vld [vmem:[%s16115_s5 + $0x68] sm:$0xff]  ;;  %v7823_v34 = vld [vmem:[%s16115_s5 + $0x80] sm:$0xff] }
  0x1f   :  { %v73_v35 = vld [vmem:[%s16168_s20 + $0x68] sm:$0xff]  ;;  %v7822_v36 = vld [vmem:[%s16115_s5 + $0x78] sm:$0xff]  ;;  %v7879_v37 = vld [vmem:[%s16115_s5 + $0x90] sm:$0xff] }
  0x20   :  { %9534 = vmatmul.mubr.msk.f32.gmra.mrb[8].mxu0 %vm105_vm4, %v64_v9  ;;  %925 = vperm.xlu0 %11936, %v907_v17   ;;  %v74_v38 = vld [vmem:[%s16168_s20 + $0x70] sm:$0xff]  ;;  %v7824_v39 = vld [vmem:[%s16115_s5 + $0x88] sm:$0xff]  ;;  %v7881_v40 = vld [vmem:[%s16115_s5 + $0xa0] sm:$0xff] }
  0x21   :  { %9536 = vmatprep.mubr.msk.f32.mxu0 %vm11976_vm3, %v16131_v4  ;;  %928 = vperm.xlu1 %11937, %v908_v22   ;;  %v75_v41 = vld [vmem:[%s16168_s20 + $0x78] sm:$0xff]  ;;  %v7883_v43 = vld [vmem:[%s16115_s5 + $0xb0] sm:$0xff]  ;;  %v76_v44 = vld [vmem:[%s16168_s20 + $0x80] sm:$0xff] }
  0x22   :  { %v7880_v42 = vld [vmem:[%s16115_s5 + $0x98] sm:$0xff]  ;;  %v7882_v45 = vld [vmem:[%s16115_s5 + $0xa8] sm:$0xff]  ;;  %v7885_v46 = vld [vmem:[%s16115_s5 + $0xc0] sm:$0xff] }
  0x23   :  { %v77_v47 = vld [vmem:[%s16168_s20 + $0x88] sm:$0xff]  ;;  %v7884_v48 = vld [vmem:[%s16115_s5 + $0xb8] sm:$0xff]  ;;  %v7887_v49 = vld [vmem:[%s16115_s5 + $0xd0] sm:$0xff] }
  0x24   :  { %9537 = vmatmul.mubr.msk.f32.gmra.mrb[10].mxu0 %vm105_vm4, %v65_v10  ;;  %931 = vperm.xlu0 %11936, %v909_v20   ;;  %v78_v50 = vld [vmem:[%s16168_s20 + $0x90] sm:$0xff]  ;;  %v7886_v51 = vld [vmem:[%s16115_s5 + $0xc8] sm:$0xff]  ;;  %v7934_v52 = vld [vmem:[%s16115_s5 + $0xe0] sm:$0xff] }
  0x25   :  { %9539 = vmatprep.mubr.msk.f32.mxu0 %vm11976_vm3, %v16131_v4  ;;  %934 = vperm.xlu1 %11937, %v910_v25   ;;  %v79_v53 = vld [vmem:[%s16168_s20 + $0x98] sm:$0xff]  ;;  %v7936_v55 = vld [vmem:[%s16115_s5 + $0xf0] sm:$0xff]  ;;  %v80_v56 = vld [vmem:[%s16168_s20 + $0xa0] sm:$0xff] }
  0x26   :  { %v7933_v54 = vld [vmem:[%s16115_s5 + $0xd8] sm:$0xff]  ;;  %v81_v57 = vld [vmem:[%s16168_s20 + $0xa8] sm:$0xff]  ;;  %v7938_v59 = vld [vmem:[%s16115_s5 + $0x100] sm:$0xff] }
  0x27   :  { %v7935_v58 = vld [vmem:[%s16115_s5 + $0xe8] sm:$0xff]  ;;  %v82_v60 = vld [vmem:[%s16168_s20 + $0xb0] sm:$0xff]  ;;  %v7937_v61 = vld [vmem:[%s16115_s5 + $0xf8] sm:$0xff] }
  0x28   :  { %9540 = vmatmul.mubr.msk.f32.gmra.mrb[12].mxu0 %vm105_vm4, %v66_v13  ;;  %937 = vperm.xlu0 %11936, %v911_v23   ;;  %v7940_v62 = vld [vmem:[%s16115_s5 + $0x110] sm:$0xff]  ;;  %v83_v63 = vld [vmem:[%s16168_s20 + $0xb8] sm:$0xff]  ;;  %v7939_v0 = vld [vmem:[%s16115_s5 + $0x108] sm:$0xff] }
  0x29   :  { %9542 = vmatprep.mubr.msk.f32.mxu0 %vm11976_vm3, %v16131_v4  ;;  %1264 = vperm.xlu1 %11937, %v7816_v27   ;;  %v7987_v1 = vld [vmem:[%s16115_s5 + $0x120] sm:$0xff]  ;;  %v7941_v5 = vld [vmem:[%s16115_s5 + $0x118] sm:$0xff]  ;;  %v7989_v6 = vld [vmem:[%s16115_s5 + $0x130] sm:$0xff] }
  0x2a   :  { %v84_v3 = vld [vmem:[%s16168_s20 + $0xc0] sm:$0xff]  ;;  %v85_v7 = vld [vmem:[%s16168_s20 + $0xc8] sm:$0xff]  ;;  %v86_v10 = vld [vmem:[%s16168_s20 + $0xd0] sm:$0xff] }
  0x2b   :  { %v7988_v8 = vld [vmem:[%s16115_s5 + $0x128] sm:$0xff]  ;;  %v7991_v9 = vld [vmem:[%s16115_s5 + $0x140] sm:$0xff]  ;;  %v7990_v11 = vld [vmem:[%s16115_s5 + $0x138] sm:$0xff] }
  0x2c   :  { %9543 = vmatmul.mubr.msk.f32.gmra.mrb[14].mxu0 %vm105_vm4, %v67_v15  ;;  %1267 = vperm.xlu0 %11936, %v7817_v26   ;;  %v7993_v12 = vld [vmem:[%s16115_s5 + $0x150] sm:$0xff]  ;;  %v87_v13 = vld [vmem:[%s16168_s20 + $0xd8] sm:$0xff]  ;;  %v7992_v14 = vld [vmem:[%s16115_s5 + $0x148] sm:$0xff] }
  0x2d   :  { %9545 = vmatprep.mubr.msk.f32.mxu0 %vm11976_vm3, %v16131_v4  ;;  %1270 = vperm.xlu1 %11937, %v7818_v30   ;;  %v7995_v15 = vld [vmem:[%s16115_s5 + $0x160] sm:$0xff]  ;;  %v7994_v17 = vld [vmem:[%s16115_s5 + $0x158] sm:$0xff]  ;;  %v89_v19 = vld [vmem:[%s16168_s20 + $0xe8] sm:$0xff] }
  0x2e   :  { %v88_v16 = vld [vmem:[%s16168_s20 + $0xe0] sm:$0xff]  ;;  %v8041_v20 = vld [vmem:[%s16115_s5 + $0x168] sm:$0xff]  ;;  %v90_v22 = vld [vmem:[%s16168_s20 + $0xf0] sm:$0xff] }
  0x2f   :  { %v8043_v23 = vld [vmem:[%s16115_s5 + $0x178] sm:$0xff]  ;;  %v8045_v26 = vld [vmem:[%s16115_s5 + $0x188] sm:$0xff]  ;;  %v8048_v27 = vld [vmem:[%s16115_s5 + $0x1a0] sm:$0xff] }
  0x30   :  { %9546 = vmatmul.mubr.msk.f32.gmra.mrb[16].mxu0 %vm105_vm4, %v68_v18  ;;  %1273 = vperm.xlu0 %11936, %v7819_v28   ;;  %v8042_v18 = vld [vmem:[%s16115_s5 + $0x170] sm:$0xff]  ;;  %v91_v25 = vld [vmem:[%s16168_s20 + $0xf8] sm:$0xff]  ;;  %v92_v28 = vld [vmem:[%s16168_s20 + $0x100] sm:$0xff] }
  0x31   :  { %9548 = vmatprep.mubr.msk.f32.mxu0 %vm11976_vm3, %v16131_v4  ;;  %1276 = vperm.xlu1 %11937, %v7820_v33   ;;  %v8095_v30 = vld [vmem:[%s16115_s5 + $0x1b0] sm:$0xff]  ;;  %v8097_v33 = vld [vmem:[%s16115_s5 + $0x1c0] sm:$0xff] }
  0x34   :  { %9549 = vmatmul.mubr.msk.f32.gmra.mrb[18].mxu0 %vm105_vm4, %v69_v21  ;;  %1279 = vperm.xlu0 %11936, %v7821_v31   ;;  %v8044_v21 = vld [vmem:[%s16115_s5 + $0x180] sm:$0xff]  ;;  %v93_v31 = vld [vmem:[%s16168_s20 + $0x108] sm:$0xff] }
  0x35   :  { %9551 = vmatprep.mubr.msk.f32.mxu0 %vm11976_vm3, %v16131_v4  ;;  %1282 = vperm.xlu1 %11937, %v7822_v36   ;;  %v8099_v36 = vld [vmem:[%s16115_s5 + $0x1d0] sm:$0xff] }
  0x38   :  { %9552 = vmatmul.mubr.msk.f32.gmra.mrb[20].mxu0 %vm105_vm4, %v70_v24  ;;  %1285 = vperm.xlu0 %11936, %v7823_v34   ;;  %v8046_v24 = vld [vmem:[%s16115_s5 + $0x190] sm:$0xff] }
  0x39   :  { %9554 = vmatprep.mubr.msk.f32.mxu0 %vm11976_vm3, %v16131_v4  ;;  %1288 = vperm.xlu1 %11937, %v7824_v39   ;;  %v94_v34 = vld [vmem:[%s16168_s20 + $0x110] sm:$0xff]  ;;  %v8101_v39 = vld [vmem:[%s16115_s5 + $0x1e0] sm:$0xff] }
  0x3c   :  { %9555 = vmatmul.mubr.msk.f32.gmra.mrb[22].mxu0 %vm105_vm4, %v71_v29  ;;  %1885 = vperm.xlu0 %11936, %v7879_v37   ;;  %v8047_v29 = vld [vmem:[%s16115_s5 + $0x198] sm:$0xff] }
  0x3d   :  { %9557 = vmatprep.mubr.msk.f32.mxu0 %vm11976_vm3, %v16131_v4  ;;  %1888 = vperm.xlu1 %11937, %v7880_v42   ;;  %v95_v37 = vld [vmem:[%s16168_s20 + $0x118] sm:$0xff]  ;;  %v8103_v42 = vld [vmem:[%s16115_s5 + $0x1f0] sm:$0xff] }
  0x40   :  { %9558 = vmatmul.mubr.msk.f32.gmra.mrb[24].mxu0 %vm105_vm4, %v72_v32  ;;  %1891 = vperm.xlu0 %11936, %v7881_v40   ;;  %v8049_v32 = vld [vmem:[%s16115_s5 + $0x1a8] sm:$0xff]  ;;  %v96_v40 = vld [vmem:[%s16168_s20 + $0x120] sm:$0xff] }
  0x41   :  { %9560 = vmatprep.mubr.msk.f32.mxu0 %vm11976_vm3, %v16131_v4  ;;  %1894 = vperm.xlu1 %11937, %v7882_v45   ;;  %v8150_v45 = vld [vmem:[%s16115_s5 + $0x200] sm:$0xff] }
  0x44   :  { %9561 = vmatmul.mubr.msk.f32.gmra.mrb[26].mxu0 %vm105_vm4, %v73_v35  ;;  %1897 = vperm.xlu0 %11936, %v7883_v43   ;;  %v8096_v35 = vld [vmem:[%s16115_s5 + $0x1b8] sm:$0xff]  ;;  %v97_v43 = vld [vmem:[%s16168_s20 + $0x128] sm:$0xff] }
  0x45   :  { %9563 = vmatprep.mubr.msk.f32.mxu0 %vm11976_vm3, %v16131_v4  ;;  %1900 = vperm.xlu1 %11937, %v7884_v48   ;;  %v8152_v48 = vld [vmem:[%s16115_s5 + $0x210] sm:$0xff] }
  0x48   :  { %9564 = vmatmul.mubr.msk.f32.gmra.mrb[28].mxu0 %vm105_vm4, %v74_v38  ;;  %1903 = vperm.xlu0 %11936, %v7885_v46   ;;  %v8098_v38 = vld [vmem:[%s16115_s5 + $0x1c8] sm:$0xff]  ;;  %v98_v46 = vld [vmem:[%s16168_s20 + $0x130] sm:$0xff] }
  0x49   :  { %9566 = vmatprep.mubr.msk.f32.mxu0 %vm11976_vm3, %v16131_v4  ;;  %1906 = vperm.xlu1 %11937, %v7886_v51   ;;  %v8154_v51 = vld [vmem:[%s16115_s5 + $0x220] sm:$0xff] }
  0x4c   :  { %9567 = vmatmul.mubr.msk.f32.gmra.mrb[30].mxu0 %vm105_vm4, %v75_v41  ;;  %1909 = vperm.xlu0 %11936, %v7887_v49   ;;  %v8100_v41 = vld [vmem:[%s16115_s5 + $0x1d8] sm:$0xff] }
  0x4d   :  { %9569 = vmatprep.mubr.msk.f32.mxu0 %vm11976_vm3, %v16131_v4  ;;  %2378 = vperm.xlu1 %11937, %v7933_v54   ;;  %v99_v49 = vld [vmem:[%s16168_s20 + $0x138] sm:$0xff]  ;;  %v8156_v54 = vld [vmem:[%s16115_s5 + $0x230] sm:$0xff] }
  0x50   :  { %9570 = vmatmul.mubr.msk.f32.gmra.mrb[32].mxu0 %vm105_vm4, %v76_v44  ;;  %2381 = vperm.xlu0 %11936, %v7934_v52   ;;  %v8102_v44 = vld [vmem:[%s16115_s5 + $0x1e8] sm:$0xff]  ;;  %v100_v52 = vld [vmem:[%s16168_s20 + $0x140] sm:$0xff] }
  0x51   :  { %9572 = vmatprep.mubr.msk.f32.mxu0 %vm11976_vm3, %v16131_v4  ;;  %2384 = vperm.xlu1 %11937, %v7935_v58   ;;  %v102_v58 = vld [vmem:[%s16168_s20 + $0x150] sm:$0x3] }
  0x54   :  { %9573 = vmatmul.mubr.msk.f32.gmra.mrb[34].mxu0 %vm105_vm4, %v77_v47  ;;  %2387 = vperm.xlu0 %11936, %v7936_v55   ;;  %v8149_v47 = vld [vmem:[%s16115_s5 + $0x1f8] sm:$0xff]  ;;  %v101_v55 = vld [vmem:[%s16168_s20 + $0x148] sm:$0xff] }
  0x55   :  { %9575 = vmatprep.mubr.msk.f32.mxu0 %vm11976_vm3, %v16131_v4  ;;  %2390 = vperm.xlu1 %11937, %v7937_v61   ;;  %v8204_v61 = vld [vmem:[%s16115_s5 + $0x248] sm:$0xff] }
  0x58   :  { %9576 = vmatmul.mubr.msk.f32.gmra.mrb[36].mxu0 %vm105_vm4, %v78_v50  ;;  %2393 = vperm.xlu0 %11936, %v7938_v59   ;;  %v8151_v50 = vld [vmem:[%s16115_s5 + $0x208] sm:$0xff]  ;;  %v8157_v59 = vld [vmem:[%s16115_s5 + $0x238] sm:$0xff] }
  0x59   :  { %9578 = vmatprep.mubr.msk.f32.mxu0 %vm11976_vm3, %v16131_v4  ;;  %2396 = vperm.xlu1 %11937, %v7939_v0   ;;  %v8209_v0 = vld [vmem:[%s16115_s5 + $0x270] sm:$0xff] }
  0x5c   :  { %9579 = vmatmul.mubr.msk.f32.gmra.mrb[38].mxu0 %vm105_vm4, %v79_v53  ;;  %2399 = vperm.xlu0 %11936, %v7940_v62   ;;  %v8153_v53 = vld [vmem:[%s16115_s5 + $0x218] sm:$0xff]  ;;  %v8207_v62 = vld [vmem:[%s16115_s5 + $0x260] sm:$0xff] }
  0x5d   :  { %9581 = vmatprep.mubr.msk.f32.mxu0 %vm11976_vm3, %v16131_v4  ;;  %2402 = vperm.xlu1 %11937, %v7941_v5   ;;  %v8210_v5 = vld [vmem:[%s16115_s5 + $0x278] sm:$0xff] }
  0x60   :  { %9582 = vmatmul.mubr.msk.f32.gmra.mrb[40].mxu0 %vm105_vm4, %v80_v56  ;;  %2871 = vperm.xlu0 %11936, %v7987_v1   ;;  %v8155_v56 = vld [vmem:[%s16115_s5 + $0x228] sm:$0xff] }
  0x61   :  { %9584 = vmatprep.mubr.msk.f32.mxu0 %vm11976_vm3, %v16131_v4  ;;  %2874 = vperm.xlu1 %11937, %v7988_v8   ;;  %v8208_v1 = vld [vmem:[%s16115_s5 + $0x268] sm:$0xff]  ;;  %v8281_v8 = vld [vmem:[%s16119_s9 + $0x18] sm:$0xff] }
  0x64   :  { %9585 = vmatmul.mubr.msk.f32.gmra.mrb[42].mxu0 %vm105_vm4, %v81_v57  ;;  %2877 = vperm.xlu0 %11936, %v7989_v6   ;;  %v8203_v57 = vld [vmem:[%s16115_s5 + $0x240] sm:$0xff]  ;;  %v8258_v6 = vld [vmem:[%s16119_s9 + $0x8] sm:$0xff] }
  0x65   :  { %9587 = vmatprep.mubr.msk.f32.mxu0 %vm11976_vm3, %v16131_v4  ;;  %2880 = vperm.xlu1 %11937, %v7990_v11   ;;  %v8292_v11 = vld [vmem:[%s16119_s9 + $0x20] sm:$0xff] }
  0x68   :  { %9588 = vmatmul.mubr.msk.f32.gmra.mrb[44].mxu0 %vm105_vm4, %v82_v60  ;;  %2883 = vperm.xlu0 %11936, %v7991_v9   ;;  %v8205_v60 = vld [vmem:[%s16115_s5 + $0x250] sm:$0xff] }
  0x69   :  { %9590 = vmatprep.mubr.msk.f32.mxu0 %vm11976_vm3, %v16131_v4  ;;  %2886 = vperm.xlu1 %11937, %v7992_v14   ;;  %v8270_v9 = vld [vmem:[%s16119_s9 + $0x10] sm:$0xff]  ;;  %v6937_v14 = vld [vmem:[%s16123_s13] sm:$0x3] }
  0x6c   :  { %9591 = vmatmul.mubr.msk.f32.gmra.mrb[46].mxu0 %vm105_vm4, %v83_v63  ;;  %2889 = vperm.xlu0 %11936, %v7993_v12   ;;  %v8206_v63 = vld [vmem:[%s16115_s5 + $0x258] sm:$0xff] }
  0x6d   :  { %9593 = vmatprep.mubr.msk.f32.mxu0 %vm11976_vm3, %v16131_v4  ;;  %2892 = vperm.xlu1 %11937, %v7994_v17   ;;  %v8325_v12 = vld [vmem:[%s16119_s9 + $0x38] sm:$0xff]  ;;  %v8348_v17 = vld [vmem:[%s16123_s13 + $0x2] sm:$0x3] }
  0x70   :  { %9594 = vmatmul.mubr.msk.f32.gmra.mrb[48].mxu0 %vm105_vm4, %v84_v3  ;;  %2895 = vperm.xlu0 %11936, %v7995_v15   ;;  %v8211_v3 = vld [vmem:[%s16115_s5 + $0x280] sm:$0xff] }
  0x71   :  { %9596 = vmatprep.mubr.msk.f32.mxu0 %vm11976_vm3, %v16131_v4  ;;  %3364 = vperm.xlu1 %11937, %v8041_v20   ;;  %v8336_v15 = vld [vmem:[%s16119_s9 + $0x40] sm:$0xff] }
  0x74   :  { %9597 = vmatmul.mubr.msk.f32.gmra.mrb[50].mxu0 %vm105_vm4, %v85_v7  ;;  %3367 = vperm.xlu0 %11936, %v8042_v18   ;;  %v5431_v7 = vld [vmem:[%s16119_s9] sm:$0xff] }
  0x75   :  { %9599 = vmatprep.mubr.msk.f32.mxu0 %vm11976_vm3, %v16131_v4  ;;  %3370 = vperm.xlu1 %11937, %v8043_v23  }
  0x78   :  { %9600 = vmatmul.mubr.msk.f32.gmra.mrb[52].mxu0 %vm105_vm4, %v86_v10  ;;  %3373 = vperm.xlu0 %11936, %v8044_v21   ;;  %v8303_v10 = vld [vmem:[%s16119_s9 + $0x28] sm:$0xff] }
  0x79   :  { %9602 = vmatprep.mubr.msk.f32.mxu0 %vm11976_vm3, %v16131_v4  ;;  %3376 = vperm.xlu1 %11937, %v8045_v26  }
  0x7c   :  { %9603 = vmatmul.mubr.msk.f32.gmra.mrb[54].mxu0 %vm105_vm4, %v87_v13  ;;  %3379 = vperm.xlu0 %11936, %v8046_v24   ;;  %v8314_v13 = vld [vmem:[%s16119_s9 + $0x30] sm:$0xff] }
  0x7d   :  { %9605 = vmatprep.mubr.msk.f32.mxu0 %vm11976_vm3, %v16131_v4  ;;  %3382 = vperm.xlu1 %11937, %v8047_v29  }
  0x80   :  { %9606 = vmatmul.mubr.msk.f32.gmra.mrb[56].mxu0 %vm105_vm4, %v88_v16  ;;  %3385 = vperm.xlu0 %11936, %v8048_v27   ;;  %v8360_v16 = vld [vmem:[%s16123_s13 + $0x4] sm:$0x3] }
  0x81   :  { %9608 = vmatprep.mubr.msk.f32.mxu0 %vm11976_vm3, %v16131_v4  ;;  %3388 = vperm.xlu1 %11937, %v8049_v32  }
  0x84   :  { %9609 = vmatmul.mubr.msk.f32.gmra.mrb[58].mxu0 %vm105_vm4, %v89_v19  ;;  %3857 = vperm.xlu0 %11936, %v8095_v30   ;;  %v8371_v19 = vld [vmem:[%s16123_s13 + $0x6] sm:$0x3] }
  0x85   :  { %9611 = vmatprep.mubr.msk.f32.mxu0 %vm11976_vm3, %v16131_v4  ;;  %3860 = vperm.xlu1 %11937, %v8096_v35  }
  0x88   :  { %9612 = vmatmul.mubr.msk.f32.gmra.mrb[60].mxu0 %vm105_vm4, %v90_v22  ;;  %3863 = vperm.xlu0 %11936, %v8097_v33  }
  0x89   :  { %9614 = vmatprep.mubr.msk.f32.mxu0 %vm11976_vm3, %v16131_v4  ;;  %3866 = vperm.xlu1 %11937, %v8098_v38  }
  0x8c   :  { %9615 = vmatmul.mubr.msk.f32.gmra.mrb[62].mxu0 %vm105_vm4, %v91_v25  ;;  %3869 = vperm.xlu0 %11936, %v8099_v36  }
  0x8d   :  { %9617 = vmatprep.mubr.msk.f32.mxu0 %vm11976_vm3, %v16131_v4  ;;  %3872 = vperm.xlu1 %11937, %v8100_v41  }
  0x90   :  { %9618 = vmatmul.mubr.msk.f32.gmra.mrb[64].mxu0 %vm105_vm4, %v92_v28  ;;  %3875 = vperm.xlu0 %11936, %v8101_v39  }
  0x91   :  { %9620 = vmatprep.mubr.msk.f32.mxu0 %vm11976_vm3, %v16131_v4  ;;  %3878 = vperm.xlu1 %11937, %v8102_v44  }
  0x94   :  { %9621 = vmatmul.mubr.msk.f32.gmra.mrb[66].mxu0 %vm105_vm4, %v93_v31  ;;  %3881 = vperm.xlu0 %11936, %v8103_v42  }
  0x95   :  { %9623 = vmatprep.mubr.msk.f32.mxu0 %vm11976_vm3, %v16131_v4  ;;  %4350 = vperm.xlu1 %11937, %v8149_v47  }
  0x98   :  { %9624 = vmatmul.mubr.msk.f32.gmra.mrb[68].mxu0 %vm105_vm4, %v94_v34  ;;  %4353 = vperm.xlu0 %11936, %v8150_v45  }
  0x99   :  { %9626 = vmatprep.mubr.msk.f32.mxu0 %vm11976_vm3, %v16131_v4  ;;  %4356 = vperm.xlu1 %11937, %v8151_v50  }
  0x9c   :  { %9627 = vmatmul.mubr.msk.f32.gmra.mrb[70].mxu0 %vm105_vm4, %v95_v37  ;;  %4359 = vperm.xlu0 %11936, %v8152_v48  }
  0x9d   :  { %9629 = vmatprep.mubr.msk.f32.mxu0 %vm11976_vm3, %v16131_v4  ;;  %4362 = vperm.xlu1 %11937, %v8153_v53  }
  0xa0   :  { %9630 = vmatmul.mubr.msk.f32.gmra.mrb[72].mxu0 %vm105_vm4, %v96_v40  ;;  %4365 = vperm.xlu0 %11936, %v8154_v51  }
  0xa1   :  { %9632 = vmatprep.mubr.msk.f32.mxu0 %vm11976_vm3, %v16131_v4  ;;  %4368 = vperm.xlu1 %11937, %v8155_v56  }
  0xa4   :  { %9633 = vmatmul.mubr.msk.f32.gmra.mrb[74].mxu0 %vm105_vm4, %v97_v43  ;;  %4371 = vperm.xlu0 %11936, %v8156_v54  }
  0xa5   :  { %9635 = vmatprep.mubr.msk.f32.mxu0 %vm11976_vm3, %v16131_v4  ;;  %4374 = vperm.xlu1 %11937, %v8157_v59  }
  0xa8   :  { %9636 = vmatmul.mubr.msk.f32.gmra.mrb[76].mxu0 %vm105_vm4, %v98_v46  ;;  %4843 = vperm.xlu0 %11936, %v8203_v57  }
  0xa9   :  { %9638 = vmatprep.mubr.msk.f32.mxu0 %vm11976_vm3, %v16131_v4  ;;  %4846 = vperm.xlu1 %11937, %v8204_v61  }
  0xac   :  { %9639 = vmatmul.mubr.msk.f32.gmra.mrb[78].mxu0 %vm105_vm4, %v99_v49  ;;  %4849 = vperm.xlu0 %11936, %v8205_v60  }
  0xad   :  { %9641 = vmatprep.mubr.msk.f32.mxu0 %vm11976_vm3, %v16131_v4  ;;  %4852 = vperm.xlu1 %11937, %v8206_v63  }
  0xb0   :  { %9642 = vmatmul.mubr.msk.f32.gmra.mrb[80].mxu0 %vm105_vm4, %v100_v52  ;;  %4855 = vperm.xlu0 %11936, %v8207_v62  }
  0xb1   :  { %9644 = vmatprep.mubr.msk.f32.mxu0 %vm11976_vm3, %v16131_v4  ;;  %4858 = vperm.xlu1 %11937, %v8208_v1  }
  0xb4   :  { %9645 = vmatmul.mubr.msk.f32.gmra.mrb[82].mxu0 %vm105_vm4, %v101_v55  ;;  %4861 = vperm.xlu0 %11936, %v8209_v0  }
  0xb5   :  { %9647 = vmatprep.mubr.msk.f32.mxu0 %vm11976_vm3, %v16131_v4  ;;  %4864 = vperm.xlu1 %11937, %v8210_v5  }
  0xb8   :  { %9648 = vmatmul.mubr.msk.f32.gmra.mrb[84].mxu0 %vm105_vm4, %v102_v58  ;;  %4867 = vperm.xlu0 %11936, %v8211_v3  }
  0xb9   :  { %9764 = vmatprep.mubr.msk.f32.mxu0 %vm11976_vm3, %v16131_v4  ;;  %5433 = vperm.xlu1 %11937, %v5431_v7  }
  0xbc   :  { %5522 = vperm.xlu0 %11936, %v8258_v6  }
  0xbd   :  { %5757 = vperm.xlu1 %11937, %v8270_v9  }
  0xc0   :  { %5920 = vperm.xlu0 %11936, %v8281_v8  }
  0xc1   :  { %6083 = vperm.xlu1 %11937, %v8292_v11  }
  0xc4   :  { %6246 = vperm.xlu0 %11936, %v8303_v10  }
  0xc5   :  { %6409 = vperm.xlu1 %11937, %v8314_v13  }
  0xc8   :  { %6572 = vperm.xlu0 %11936, %v8325_v12  }
  0xc9   :  { %6735 = vperm.xlu1 %11937, %v8336_v15  }
  0xcc   :  { %6939 = vperm.xlu0 %11936, %v6937_v14  }
  0xcd   :  { %7028 = vperm.xlu1 %11937, %v8348_v17  }
  0xd0   :  { %7263 = vperm.xlu0 %11936, %v8360_v16  }
  0xd1   :  { %7426 = vperm.xlu1 %11937, %v8371_v19  }
  0xe3   :  { %v12623_v18 = vpop.f32.mrb[0].mxu0 }
  0xe4   :  { %v9523_v20 = vpop.f32.mrb[1].mxu0  ;;  %v614_v21 = vmul.f32 %v12623_v18, %v12623_v18  ;;  %v522_v23 = vsel %vm521_vm5, %v12623_v18, 0.0 }
  0xe6   :  { %v657_v28 = vsel %vm521_vm5, %v614_v21, 0.0 }
  0xe7   :  { %v12630_v22 = vpop.f32.mrb[2].mxu0 }
  0xe8   :  { %v523_v24 = vsel %vm521_vm5, %v12630_v22, 0.0  ;;  %v615_v25 = vmul.f32 %v12630_v22, %v12630_v22  ;;  %v9526_v26 = vpop.f32.mrb[3].mxu0 }
  0xe9   :  { %v524_v27 = vadd.f32 %v523_v24, %v522_v23 }
  0xea   :  { %v658_v29 = vsel %vm521_vm5, %v615_v25, 0.0 }
  0xeb   :  { %v659_v30 = vadd.f32 %v658_v29, %v657_v28  ;;  %v12640_v31 = vpop.f32.mrb[4].mxu0 }
  0xec   :  { %v525_v32 = vsel %vm521_vm5, %v12640_v31, 0.0  ;;  %v616_v33 = vmul.f32 %v12640_v31, %v12640_v31  ;;  %v9529_v34 = vpop.f32.mrb[5].mxu0 }
  0xed   :  { %v526_v35 = vadd.f32 %v525_v32, %v524_v27 }
  0xee   :  { %v660_v36 = vsel %vm521_vm5, %v616_v33, 0.0 }
  0xef   :  { %v661_v37 = vadd.f32 %v660_v36, %v659_v30  ;;  %v12647_v38 = vpop.f32.mrb[6].mxu0 }
  0xf0   :  { %v527_v39 = vsel %vm521_vm5, %v12647_v38, 0.0  ;;  %v617_v40 = vmul.f32 %v12647_v38, %v12647_v38  ;;  %v9532_v41 = vpop.f32.mrb[7].mxu0 }
  0xf1   :  { %v528_v42 = vadd.f32 %v527_v39, %v526_v35 }
  0xf2   :  { %v662_v43 = vsel %vm521_vm5, %v617_v40, 0.0 }
  0xf3   :  { %v663_v44 = vadd.f32 %v662_v43, %v661_v37  ;;  %v12654_v45 = vpop.f32.mrb[8].mxu0 }
  0xf4   :  { %v529_v46 = vsel %vm521_vm5, %v12654_v45, 0.0  ;;  %v618_v47 = vmul.f32 %v12654_v45, %v12654_v45  ;;  %v9535_v48 = vpop.f32.mrb[9].mxu0 }
  0xf5   :  { %v530_v49 = vadd.f32 %v529_v46, %v528_v42 }
  0xf6   :  { %v664_v50 = vsel %vm521_vm5, %v618_v47, 0.0 }
  0xf7   :  { %v665_v51 = vadd.f32 %v664_v50, %v663_v44  ;;  %v12661_v52 = vpop.f32.mrb[10].mxu0 }
  0xf8   :  { %v531_v53 = vsel %vm521_vm5, %v12661_v52, 0.0  ;;  %v619_v54 = vmul.f32 %v12661_v52, %v12661_v52  ;;  %v9538_v55 = vpop.f32.mrb[11].mxu0 }
  0xf9   :  { %v532_v56 = vadd.f32 %v531_v53, %v530_v49 }
  0xfa   :  { %v666_v57 = vsel %vm521_vm5, %v619_v54, 0.0 }
  0xfb   :  { %v667_v58 = vadd.f32 %v666_v57, %v665_v51  ;;  %v12668_v59 = vpop.f32.mrb[12].mxu0 }
  0xfc   :  { %v533_v60 = vsel %vm521_vm5, %v12668_v59, 0.0  ;;  %v620_v61 = vmul.f32 %v12668_v59, %v12668_v59  ;;  %v9541_v62 = vpop.f32.mrb[13].mxu0 }
  0xfd   :  { %v534_v63 = vadd.f32 %v533_v60, %v532_v56 }
  0xfe   :  { %v668_v0 = vsel %vm521_vm5, %v620_v61, 0.0 }
  0xff   :  { %v669_v1 = vadd.f32 %v668_v0, %v667_v58  ;;  %v12675_v3 = vpop.f32.mrb[14].mxu0 }
 0x100   :  { %v535_v5 = vsel %vm521_vm5, %v12675_v3, 0.0  ;;  %v621_v6 = vmul.f32 %v12675_v3, %v12675_v3  ;;  %v9544_v7 = vpop.f32.mrb[15].mxu0 }
 0x101   :  { %v536_v8 = vadd.f32 %v535_v5, %v534_v63 }
 0x102   :  { %v670_v9 = vsel %vm521_vm5, %v621_v6, 0.0 }
 0x103   :  { %v671_v10 = vadd.f32 %v670_v9, %v669_v1  ;;  %v12682_v11 = vpop.f32.mrb[16].mxu0 }
 0x104   :  { %v537_v12 = vsel %vm521_vm5, %v12682_v11, 0.0  ;;  %v622_v13 = vmul.f32 %v12682_v11, %v12682_v11  ;;  %v9547_v14 = vpop.f32.mrb[17].mxu0 }
 0x105   :  { %v538_v15 = vadd.f32 %v537_v12, %v536_v8 }
 0x106   :  { %v672_v16 = vsel %vm521_vm5, %v622_v13, 0.0 }
 0x107   :  { %v673_v17 = vadd.f32 %v672_v16, %v671_v10  ;;  %v12689_v19 = vpop.f32.mrb[18].mxu0 }
 0x108   :  { %v539_v20 = vsel %vm521_vm5, %v12689_v19, 0.0  ;;  %v623_v21 = vmul.f32 %v12689_v19, %v12689_v19  ;;  %v9550_v23 = vpop.f32.mrb[19].mxu0 }
 0x109   :  { %v540_v24 = vadd.f32 %v539_v20, %v538_v15 }
 0x10a   :  { %v674_v25 = vsel %vm521_vm5, %v623_v21, 0.0 }
 0x10b   :  { %v675_v26 = vadd.f32 %v674_v25, %v673_v17  ;;  %v12696_v27 = vpop.f32.mrb[20].mxu0 }
 0x10c   :  { %v541_v28 = vsel %vm521_vm5, %v12696_v27, 0.0  ;;  %v624_v29 = vmul.f32 %v12696_v27, %v12696_v27  ;;  %v9553_v30 = vpop.f32.mrb[21].mxu0 }
 0x10d   :  { %v542_v32 = vadd.f32 %v541_v28, %v540_v24 }
 0x10e   :  { %v676_v33 = vsel %vm521_vm5, %v624_v29, 0.0 }
 0x10f   :  { %v677_v34 = vadd.f32 %v676_v33, %v675_v26  ;;  %v12703_v35 = vpop.f32.mrb[22].mxu0 }
 0x110   :  { %v543_v36 = vsel %vm521_vm5, %v12703_v35, 0.0  ;;  %v625_v37 = vmul.f32 %v12703_v35, %v12703_v35  ;;  %v9556_v39 = vpop.f32.mrb[23].mxu0 }
 0x111   :  { %v544_v40 = vadd.f32 %v543_v36, %v542_v32 }
 0x112   :  { %v678_v41 = vsel %vm521_vm5, %v625_v37, 0.0 }
 0x113   :  { %v679_v42 = vadd.f32 %v678_v41, %v677_v34  ;;  %v12710_v43 = vpop.f32.mrb[24].mxu0 }
 0x114   :  { %v545_v44 = vsel %vm521_vm5, %v12710_v43, 0.0  ;;  %v626_v46 = vmul.f32 %v12710_v43, %v12710_v43  ;;  %v9559_v47 = vpop.f32.mrb[25].mxu0 }
 0x115   :  { %v546_v48 = vadd.f32 %v545_v44, %v544_v40 }
 0x116   :  { %v680_v49 = vsel %vm521_vm5, %v626_v46, 0.0 }
 0x117   :  { %v681_v50 = vadd.f32 %v680_v49, %v679_v42  ;;  %v12717_v51 = vpop.f32.mrb[26].mxu0 }
 0x118   :  { %v547_v53 = vsel %vm521_vm5, %v12717_v51, 0.0  ;;  %v627_v54 = vmul.f32 %v12717_v51, %v12717_v51  ;;  %v9562_v55 = vpop.f32.mrb[27].mxu0 }
 0x119   :  { %v548_v56 = vadd.f32 %v547_v53, %v546_v48 }
 0x11a   :  { %v682_v57 = vsel %vm521_vm5, %v627_v54, 0.0 }
 0x11b   :  { %v683_v58 = vadd.f32 %v682_v57, %v681_v50  ;;  %v12724_v60 = vpop.f32.mrb[28].mxu0 }
 0x11c   :  { %v549_v61 = vsel %vm521_vm5, %v12724_v60, 0.0  ;;  %v628_v62 = vmul.f32 %v12724_v60, %v12724_v60  ;;  %v9565_v63 = vpop.f32.mrb[29].mxu0 }
 0x11d   :  { %v550_v0 = vadd.f32 %v549_v61, %v548_v56 }
 0x11e   :  { %v684_v1 = vsel %vm521_vm5, %v628_v62, 0.0 }
 0x11f   :  { %v685_v5 = vadd.f32 %v684_v1, %v683_v58  ;;  %v12731_v6 = vpop.f32.mrb[30].mxu0 }
 0x120   :  { %v551_v7 = vsel %vm521_vm5, %v12731_v6, 0.0  ;;  %v629_v8 = vmul.f32 %v12731_v6, %v12731_v6  ;;  %v9568_v9 = vpop.f32.mrb[31].mxu0 }
 0x121   :  { %v552_v10 = vadd.f32 %v551_v7, %v550_v0 }
 0x122   :  { %v686_v12 = vsel %vm521_vm5, %v629_v8, 0.0 }
 0x123   :  { %v687_v13 = vadd.f32 %v686_v12, %v685_v5  ;;  %v12738_v14 = vpop.f32.mrb[32].mxu0 }
 0x124   :  { %v553_v15 = vsel %vm521_vm5, %v12738_v14, 0.0  ;;  %v630_v16 = vmul.f32 %v12738_v14, %v12738_v14  ;;  %v9571_v17 = vpop.f32.mrb[33].mxu0 }
 0x125   :  { %v554_v20 = vadd.f32 %v553_v15, %v552_v10 }
 0x126   :  { %v688_v21 = vsel %vm521_vm5, %v630_v16, 0.0 }
 0x127   :  { %v689_v23 = vadd.f32 %v688_v21, %v687_v13  ;;  %v12745_v24 = vpop.f32.mrb[34].mxu0 }
 0x128   :  { %v555_v25 = vsel %vm521_vm5, %v12745_v24, 0.0  ;;  %v631_v26 = vmul.f32 %v12745_v24, %v12745_v24  ;;  %v9574_v28 = vpop.f32.mrb[35].mxu0 }
 0x129   :  { %v556_v29 = vadd.f32 %v555_v25, %v554_v20 }
 0x12a   :  { %v690_v30 = vsel %vm521_vm5, %v631_v26, 0.0 }
 0x12b   :  { %v691_v32 = vadd.f32 %v690_v30, %v689_v23  ;;  %v12752_v33 = vpop.f32.mrb[36].mxu0 }
 0x12c   :  { %v557_v34 = vsel %vm521_vm5, %v12752_v33, 0.0  ;;  %v632_v36 = vmul.f32 %v12752_v33, %v12752_v33  ;;  %v9577_v37 = vpop.f32.mrb[37].mxu0 }
 0x12d   :  { %v558_v39 = vadd.f32 %v557_v34, %v556_v29 }
 0x12e   :  { %v692_v40 = vsel %vm521_vm5, %v632_v36, 0.0 }
 0x12f   :  { %v693_v41 = vadd.f32 %v692_v40, %v691_v32  ;;  %v12759_v42 = vpop.f32.mrb[38].mxu0 }
 0x130   :  { %v559_v44 = vsel %vm521_vm5, %v12759_v42, 0.0  ;;  %v633_v46 = vmul.f32 %v12759_v42, %v12759_v42  ;;  %v9580_v47 = vpop.f32.mrb[39].mxu0 }
 0x131   :  { %v560_v48 = vadd.f32 %v559_v44, %v558_v39 }
 0x132   :  { %v694_v49 = vsel %vm521_vm5, %v633_v46, 0.0 }
 0x133   :  { %v695_v50 = vadd.f32 %v694_v49, %v693_v41  ;;  %v12766_v53 = vpop.f32.mrb[40].mxu0 }
 0x134   :  { %v561_v54 = vsel %vm521_vm5, %v12766_v53, 0.0  ;;  %v634_v55 = vmul.f32 %v12766_v53, %v12766_v53  ;;  %v9583_v56 = vpop.f32.mrb[41].mxu0 }
 0x135   :  { %v562_v57 = vadd.f32 %v561_v54, %v560_v48 }
 0x136   :  { %v696_v58 = vsel %vm521_vm5, %v634_v55, 0.0 }
 0x137   :  { %v697_v61 = vadd.f32 %v696_v58, %v695_v50  ;;  %v12773_v62 = vpop.f32.mrb[42].mxu0 }
 0x138   :  { %v563_v63 = vsel %vm521_vm5, %v12773_v62, 0.0  ;;  %v635_v0 = vmul.f32 %v12773_v62, %v12773_v62  ;;  %v9586_v1 = vpop.f32.mrb[43].mxu0 }
 0x139   :  { %v564_v5 = vadd.f32 %v563_v63, %v562_v57 }
 0x13a   :  { %v698_v7 = vsel %vm521_vm5, %v635_v0, 0.0 }
 0x13b   :  { %v699_v8 = vadd.f32 %v698_v7, %v697_v61  ;;  %v12780_v9 = vpop.f32.mrb[44].mxu0 }
 0x13c   :  { %v565_v10 = vsel %vm521_vm5, %v12780_v9, 0.0  ;;  %v636_v12 = vmul.f32 %v12780_v9, %v12780_v9  ;;  %v9589_v13 = vpop.f32.mrb[45].mxu0 }
 0x13d   :  { %v566_v15 = vadd.f32 %v565_v10, %v564_v5 }
 0x13e   :  { %v700_v16 = vsel %vm521_vm5, %v636_v12, 0.0 }
 0x13f   :  { %v701_v17 = vadd.f32 %v700_v16, %v699_v8  ;;  %v12787_v20 = vpop.f32.mrb[46].mxu0 }
 0x140   :  { %v567_v21 = vsel %vm521_vm5, %v12787_v20, 0.0  ;;  %v637_v23 = vmul.f32 %v12787_v20, %v12787_v20  ;;  %v9592_v25 = vpop.f32.mrb[47].mxu0 }
 0x141   :  { %v568_v26 = vadd.f32 %v567_v21, %v566_v15 }
 0x142   :  { %v702_v28 = vsel %vm521_vm5, %v637_v23, 0.0 }
 0x143   :  { %v703_v29 = vadd.f32 %v702_v28, %v701_v17  ;;  %v12794_v30 = vpop.f32.mrb[48].mxu0 }
 0x144   :  { %v569_v32 = vsel %vm521_vm5, %v12794_v30, 0.0  ;;  %v638_v34 = vmul.f32 %v12794_v30, %v12794_v30  ;;  %v9595_v36 = vpop.f32.mrb[49].mxu0 }
 0x145   :  { %v570_v37 = vadd.f32 %v569_v32, %v568_v26 }
 0x146   :  { %v704_v39 = vsel %vm521_vm5, %v638_v34, 0.0 }
 0x147   :  { %v705_v40 = vadd.f32 %v704_v39, %v703_v29  ;;  %v12801_v41 = vpop.f32.mrb[50].mxu0 }
 0x148   :  { %v571_v44 = vsel %vm521_vm5, %v12801_v41, 0.0  ;;  %v639_v46 = vmul.f32 %v12801_v41, %v12801_v41  ;;  %v9598_v47 = vpop.f32.mrb[51].mxu0 }
 0x149   :  { %v572_v48 = vadd.f32 %v571_v44, %v570_v37 }
 0x14a   :  { %v706_v49 = vsel %vm521_vm5, %v639_v46, 0.0 }
 0x14b   :  { %v707_v50 = vadd.f32 %v706_v49, %v705_v40  ;;  %v12808_v54 = vpop.f32.mrb[52].mxu0 }
 0x14c   :  { %v573_v55 = vsel %vm521_vm5, %v12808_v54, 0.0  ;;  %v640_v56 = vmul.f32 %v12808_v54, %v12808_v54  ;;  %v9601_v57 = vpop.f32.mrb[53].mxu0 }
 0x14d   :  { %v574_v58 = vadd.f32 %v573_v55, %v572_v48 }
 0x14e   :  { %v708_v61 = vsel %vm521_vm5, %v640_v56, 0.0 }
 0x14f   :  { %v709_v63 = vadd.f32 %v708_v61, %v707_v50  ;;  %v12815_v0 = vpop.f32.mrb[54].mxu0 }
 0x150   :  { %v575_v1 = vsel %vm521_vm5, %v12815_v0, 0.0  ;;  %v641_v5 = vmul.f32 %v12815_v0, %v12815_v0  ;;  %v9604_v7 = vpop.f32.mrb[55].mxu0 }
 0x151   :  { %v576_v8 = vadd.f32 %v575_v1, %v574_v58 }
 0x152   :  { %v710_v10 = vsel %vm521_vm5, %v641_v5, 0.0 }
 0x153   :  { %v711_v12 = vadd.f32 %v710_v10, %v709_v63  ;;  %v12822_v13 = vpop.f32.mrb[56].mxu0 }
 0x154   :  { %v577_v15 = vsel %vm521_vm5, %v12822_v13, 0.0  ;;  %v642_v16 = vmul.f32 %v12822_v13, %v12822_v13  ;;  %v9607_v17 = vpop.f32.mrb[57].mxu0 }
 0x155   :  { %v578_v21 = vadd.f32 %v577_v15, %v576_v8 }
 0x156   :  { %v712_v23 = vsel %vm521_vm5, %v642_v16, 0.0 }
 0x157   :  { %v713_v25 = vadd.f32 %v712_v23, %v711_v12  ;;  %v12829_v26 = vpop.f32.mrb[58].mxu0 }
 0x158   :  { %v579_v28 = vsel %vm521_vm5, %v12829_v26, 0.0  ;;  %v643_v29 = vmul.f32 %v12829_v26, %v12829_v26  ;;  %v9610_v32 = vpop.f32.mrb[59].mxu0 }
 0x159   :  { %v580_v34 = vadd.f32 %v579_v28, %v578_v21 }
 0x15a   :  { %v714_v36 = vsel %vm521_vm5, %v643_v29, 0.0 }
 0x15b   :  { %v715_v37 = vadd.f32 %v714_v36, %v713_v25  ;;  %v12836_v39 = vpop.f32.mrb[60].mxu0 }
 0x15c   :  { %v581_v40 = vsel %vm521_vm5, %v12836_v39, 0.0  ;;  %v644_v44 = vmul.f32 %v12836_v39, %v12836_v39  ;;  %v9613_v46 = vpop.f32.mrb[61].mxu0 }
 0x15d   :  { %v582_v47 = vadd.f32 %v581_v40, %v580_v34  ;;  %v16137_v40 = vlaneseq }
 0x15e   :  { %v716_v48 = vsel %vm521_vm5, %v644_v44, 0.0 }
 0x15f   :  { %v717_v49 = vadd.f32 %v716_v48, %v715_v37  ;;  %v12843_v50 = vpop.f32.mrb[62].mxu0 }
 0x160   :  { %v583_v55 = vsel %vm521_vm5, %v12843_v50, 0.0  ;;  %v645_v56 = vmul.f32 %v12843_v50, %v12843_v50  ;;  %v9616_v57 = vpop.f32.mrb[63].mxu0 }
 0x161   :  { %v584_v58 = vadd.f32 %v583_v55, %v582_v47  ;;  %v12872_v47 = vand.u32 127, %v16137_v40 }
 0x162   :  { %v718_v61 = vsel %vm521_vm5, %v645_v56, 0.0 }
 0x163   :  { %v719_v63 = vadd.f32 %v718_v61, %v717_v49  ;;  %v12850_v1 = vpop.f32.mrb[64].mxu0  ;;  %16169 = vst [vmem:[#allocation5_spill] sm:$0xff] %v12872_v47 }
 0x164   :  { %v585_v5 = vsel %vm521_vm5, %v12850_v1, 0.0  ;;  %v646_v7 = vmul.f32 %v12850_v1, %v12850_v1  ;;  %v9619_v8 = vpop.f32.mrb[65].mxu0 }
 0x165   :  { %v586_v10 = vadd.f32 %v585_v5, %v584_v58  ;;  %v12886_v8 = vpop.permute.xlu0 %913 }
 0x166   :  { %v720_v12 = vsel %vm521_vm5, %v646_v7, 0.0  ;;  %v12884_v7 = vadd.s32 128, %v12872_v47  ;;  %16171 = vst [vmem:[#allocation7_spill] sm:$0xff] %v12886_v8 }
 0x167   :  { %v721_v15 = vadd.f32 %v720_v12, %v719_v63  ;;  %v12857_v16 = vpop.f32.mrb[66].mxu0 }
 0x168   :  { %v587_v17 = vsel %vm521_vm5, %v12857_v16, 0.0  ;;  %v647_v21 = vmul.f32 %v12857_v16, %v12857_v16  ;;  %v9622_v23 = vpop.f32.mrb[67].mxu0  ;;  %16170 = vst [vmem:[#allocation6_spill] sm:$0xff] %v12884_v7  ;;  %vm940_vm6 = vcmp.eq.s32.totalorder %v12884_v7, %v12886_v8 }
 0x169   :  { %v588_v25 = vadd.f32 %v587_v17, %v586_v10  ;;  %v16133_v23 = vmov 1.0  }
 0x16a   :  { %v722_v28 = vsel %vm521_vm5, %v647_v21, 0.0  ;;  %7788 = vmatprep.mubr.msk.f32.mxu1 %vm940_vm6, %v16133_v23 }
 0x16b   :  { %v723_v29 = vadd.f32 %v722_v28, %v721_v15  ;;  %v12864_v32 = vpop.f32.mrb[68].mxu0 }
 0x16c   :  { %v589_v34 = vsel %vm521_vm5, %v12864_v32, 0.0  ;;  %v648_v36 = vmul.f32 %v12864_v32, %v12864_v32  ;;  %v9625_v37 = vpop.f32.mrb[69].mxu0 }
 0x16d   :  { %v590_v44 = vadd.f32 %v589_v34, %v588_v25 }
 0x16e   :  { %v724_v46 = vsel %vm521_vm5, %v648_v36, 0.0 }
 0x16f   :  { %v725_v48 = vadd.f32 %v724_v46, %v723_v29  ;;  %v12874_v49 = vpop.f32.mrb[70].mxu0 }
 0x170   :  { %v591_v55 = vsel %vm521_vm5, %v12874_v49, 0.0  ;;  %v649_v56 = vmul.f32 %v12874_v49, %v12874_v49  ;;  %v9628_v57 = vpop.f32.mrb[71].mxu0 }
 0x171   :  { %v592_v58 = vadd.f32 %v591_v55, %v590_v44 }
 0x172   :  { %v726_v61 = vsel %vm521_vm5, %v649_v56, 0.0 }
 0x173   :  { %v727_v63 = vadd.f32 %v726_v61, %v725_v48  ;;  %v12881_v5 = vpop.f32.mrb[72].mxu0 }
 0x174   :  { %v593_v10 = vsel %vm521_vm5, %v12881_v5, 0.0  ;;  %v650_v12 = vmul.f32 %v12881_v5, %v12881_v5  ;;  %v9631_v15 = vpop.f32.mrb[73].mxu0 }
 0x175   :  { %v594_v17 = vadd.f32 %v593_v10, %v592_v58 }
 0x176   :  { %v728_v21 = vsel %vm521_vm5, %v650_v12, 0.0 }
 0x177   :  { %v729_v25 = vadd.f32 %v728_v21, %v727_v63  ;;  %v12896_v28 = vpop.f32.mrb[74].mxu0 }
 0x178   :  { %v595_v29 = vsel %vm521_vm5, %v12896_v28, 0.0  ;;  %v651_v34 = vmul.f32 %v12896_v28, %v12896_v28  ;;  %v9634_v36 = vpop.f32.mrb[75].mxu0 }
 0x179   :  { %v596_v37 = vadd.f32 %v595_v29, %v594_v17 }
 0x17a   :  { %v730_v44 = vsel %vm521_vm5, %v651_v34, 0.0 }
 0x17b   :  { %v731_v46 = vadd.f32 %v730_v44, %v729_v25  ;;  %v12903_v48 = vpop.f32.mrb[76].mxu0 }
 0x17c   :  { %v597_v55 = vsel %vm521_vm5, %v12903_v48, 0.0  ;;  %v652_v56 = vmul.f32 %v12903_v48, %v12903_v48  ;;  %v9637_v57 = vpop.f32.mrb[77].mxu0 }
 0x17d   :  { %v598_v58 = vadd.f32 %v597_v55, %v596_v37 }
 0x17e   :  { %v732_v61 = vsel %vm521_vm5, %v652_v56, 0.0 }
 0x17f   :  { %v733_v63 = vadd.f32 %v732_v61, %v731_v46  ;;  %v12910_v10 = vpop.f32.mrb[78].mxu0 }
 0x180   :  { %v599_v12 = vsel %vm521_vm5, %v12910_v10, 0.0  ;;  %v653_v15 = vmul.f32 %v12910_v10, %v12910_v10  ;;  %v9640_v17 = vpop.f32.mrb[79].mxu0 }
 0x181   :  { %v600_v21 = vadd.f32 %v599_v12, %v598_v58 }
 0x182   :  { %v734_v25 = vsel %vm521_vm5, %v653_v15, 0.0 }
 0x183   :  { %v735_v29 = vadd.f32 %v734_v25, %v733_v63  ;;  %v12917_v34 = vpop.f32.mrb[80].mxu0 }
 0x184   :  { %16172 = vst [vmem:[#allocation8_spill] sm:$0xff] %v12917_v34  ;;  %v601_v36 = vsel %vm521_vm5, %v12917_v34, 0.0  ;;  %v654_v37 = vmul.f32 %v12917_v34, %v12917_v34  ;;  %v9643_v44 = vpop.f32.mrb[81].mxu0 }
 0x185   :  { %v602_v46 = vadd.f32 %v601_v36, %v600_v21 }
 0x186   :  { %v736_v55 = vsel %vm521_vm5, %v654_v37, 0.0 }
 0x187   :  { %v737_v56 = vadd.f32 %v736_v55, %v735_v29  ;;  %v12924_v57 = vpop.f32.mrb[82].mxu0 }
 0x188   :  { %16173 = vst [vmem:[#allocation9_spill] sm:$0xff] %v12924_v57  ;;  %v603_v58 = vsel %vm521_vm5, %v12924_v57, 0.0  ;;  %v655_v61 = vmul.f32 %v12924_v57, %v12924_v57  ;;  %v9646_v63 = vpop.f32.mrb[83].mxu0 }
 0x189   :  { %v604_v12 = vadd.f32 %v603_v58, %v602_v46 }
 0x18a   :  { %v738_v15 = vsel %vm521_vm5, %v655_v61, 0.0 }
 0x18b   :  { %v739_v17 = vadd.f32 %v738_v15, %v737_v56  ;;  %v515_v25 = vpop.f32.mrb[84].mxu0 }
 0x18c   :  { %v606_v21 = vsel %vm605_vm7, %v515_v25, 0.0  ;;  %v656_v36 = vmul.f32 %v515_v25, %v515_v25  ;;  %v9649_v37 = vpop.f32.mrb[85].mxu0 }
 0x18d   :  { %v607_v29 = vadd.f32 %v606_v21, %v604_v12 }
 0x18e   :  { %v740_v44 = vsel %vm605_vm7, %v656_v36, 0.0  ;;  %v16174_v36 = vlaneseq }
 0x18f   :  { %v608_v55 = vrot.slane %v607_v29, 4  ;;  %v741_v4 = vadd.f32 %v740_v44, %v739_v17 }
 0x190   :  { %v760_v17 = vshrl.u32 %v16174_v36, 7  ;;  %v16178_v36 = vld [vmem:[#allocation9_spill] sm:$0xff] }
 0x191   :  { %v609_v23 = vadd.f32 %v608_v55, %v607_v29  ;;  %v742_v2 = vrot.slane %v741_v4, 4 }
 0x193   :  { %v610_v40 = vrot.slane %v609_v23, 2  ;;  %v743_v7 = vadd.f32 %v742_v2, %v741_v4  ;;  %v519_v2 = vld [vmem:[%s16175_s22] sm:$0x1]  ;;  %v12937_v4 = vsub.s32 0, %v760_v17 }
 0x195   :  { %v611_v63 = vadd.f32 %v610_v40, %v609_v23  ;;  %v744_v46 = vrot.slane %v743_v7, 2  ;;  %16176 = vst [vmem:[#allocation10_spill] sm:$0xff] %v12937_v4 }
 0x197   :  { %v612_v58 = vrot.slane %v611_v63, 1  ;;  %v745_v47 = vadd.f32 %v744_v46, %v743_v7 }
 0x199   :  { %v613_v61 = vadd.f32 %v612_v58, %v611_v63  ;;  %v746_v56 = vrot.slane %v745_v47, 1 }
 0x19b   :  { %v747_v15 = vadd.f32 %v746_v56, %v745_v47  ;;  %v748_v8 = vmul.f32 0.00295858, %v613_v61  ;;  %v520_v47 = vld [vmem:[%s16113_s3] sm:$0x1] }
 0x19d   :  { %v749_v57 = vmul.f32 0.00295858, %v747_v15  ;;  %v750_v34 = vmul.f32 %v748_v8, %v748_v8 }
 0x19f   :  { %v751_v37 = vsub.f32 %v749_v57, %v750_v34 }
 0x1a1   :  { %v752_v12 = vmax.f32 %v751_v37, 0.0 }
 0x1a3   :  { %v753_v21 = vadd.f32 1e-05, %v752_v12 }
 0x1a5   :  { %11938 = vrsqrt.f32 %v753_v21  ;;  %v16177_v21 = vld [vmem:[#allocation8_spill] sm:$0xff] }
 0x1af   :  { %v11939_v40 = vpop.eup %11938 }
 0x1b0   :  { %v755_v7 = vmul.f32 %v11939_v40, %v519_v2 }
 0x1b2   :  { %v756_v23 = vmul.f32 %v755_v7, %v748_v8  ;;  %v762_v34 = vrot.slane %v755_v7, %v12937_v4 }
 0x1b4   :  { %v757_v57 = vsub.f32 %v520_v47, %v756_v23  ;;  %v806_v29 = vmul.f32 %v762_v34, %v515_v25  ;;  %v764_v44 = vmul.f32 %v762_v34, %v12623_v18  ;;  %v765_v55 = vmul.f32 %v762_v34, %v12630_v22 }
 0x1b5   :  { %v766_v63 = vmul.f32 %v762_v34, %v12640_v31  ;;  %v767_v46 = vmul.f32 %v762_v34, %v12647_v38  ;;  %v768_v58 = vmul.f32 %v762_v34, %v12654_v45  ;;  %v769_v61 = vmul.f32 %v762_v34, %v12661_v52 }
 0x1b6   :  { %v12950_v56 = vrot.slane %v757_v57, %v12937_v4  ;;  %v770_v8 = vmul.f32 %v762_v34, %v12668_v59  ;;  %v771_v15 = vmul.f32 %v762_v34, %v12675_v3  ;;  %v772_v25 = vmul.f32 %v762_v34, %v12682_v11 }
 0x1b7   :  { %v773_v18 = vmul.f32 %v762_v34, %v12689_v19  ;;  %v774_v22 = vmul.f32 %v762_v34, %v12696_v27  ;;  %v775_v31 = vmul.f32 %v762_v34, %v12703_v35  ;;  %v776_v38 = vmul.f32 %v762_v34, %v12710_v43 }
 0x1b8   :  { %v12960_v45 = vadd.f32 %v12950_v56, %v806_v29  ;;  %v777_v52 = vmul.f32 %v762_v34, %v12717_v51  ;;  %v778_v37 = vmul.f32 %v762_v34, %v12724_v60  ;;  %v779_v59 = vmul.f32 %v762_v34, %v12731_v6 }
 0x1b9   :  { %v780_v3 = vmul.f32 %v762_v34, %v12738_v14  ;;  %v781_v11 = vmul.f32 %v762_v34, %v12745_v24  ;;  %v782_v19 = vmul.f32 %v762_v34, %v12752_v33  ;;  %v783_v27 = vmul.f32 %v762_v34, %v12759_v42 }
 0x1ba   :  { %v784_v35 = vmul.f32 %v762_v34, %v12766_v53  ;;  %v785_v43 = vmul.f32 %v762_v34, %v12773_v62  ;;  %v786_v12 = vmul.f32 %v762_v34, %v12780_v9  ;;  %v787_v51 = vmul.f32 %v762_v34, %v12787_v20 }
 0x1bb   :  { %v788_v60 = vmul.f32 %v762_v34, %v12794_v30  ;;  %v789_v6 = vmul.f32 %v762_v34, %v12801_v41  ;;  %v790_v14 = vmul.f32 %v762_v34, %v12808_v54  ;;  %v791_v24 = vmul.f32 %v762_v34, %v12815_v0 }
 0x1bc   :  { %v792_v33 = vmul.f32 %v762_v34, %v12822_v13  ;;  %v793_v42 = vmul.f32 %v762_v34, %v12829_v26  ;;  %v794_v53 = vmul.f32 %v762_v34, %v12836_v39  ;;  %v795_v62 = vmul.f32 %v762_v34, %v12843_v50 }
 0x1bd   :  { %v796_v9 = vmul.f32 %v762_v34, %v12850_v1  ;;  %v797_v20 = vmul.f32 %v762_v34, %v12857_v16  ;;  %v798_v30 = vmul.f32 %v762_v34, %v12864_v32  ;;  %v799_v41 = vmul.f32 %v762_v34, %v12874_v49 }
 0x1be   :  { %v800_v54 = vmul.f32 %v762_v34, %v12881_v5  ;;  %v801_v0 = vmul.f32 %v762_v34, %v12896_v28  ;;  %v802_v13 = vmul.f32 %v762_v34, %v12903_v48  ;;  %v803_v26 = vmul.f32 %v762_v34, %v12910_v10 }
 0x1bf   :  { %v804_v39 = vmul.f32 %v762_v34, %v16177_v21  ;;  %v805_v50 = vmul.f32 %v762_v34, %v16178_v36  ;;  %v12992_v1 = vadd.f32 %v12950_v56, %v764_v44  ;;  %v12995_v16 = vadd.f32 %v12950_v56, %v765_v55 }
 0x1c0   :  { %v12998_v32 = vadd.f32 %v12950_v56, %v766_v63  ;;  %v13001_v49 = vadd.f32 %v12950_v56, %v767_v46  ;;  %v13004_v5 = vadd.f32 %v12950_v56, %v768_v58  ;;  %v13007_v28 = vadd.f32 %v12950_v56, %v769_v61 }
 0x1c1   :  { %v13010_v48 = vadd.f32 %v12950_v56, %v770_v8  ;;  %v13013_v10 = vadd.f32 %v12950_v56, %v771_v15  ;;  %v13016_v17 = vadd.f32 %v12950_v56, %v772_v25  ;;  %v13019_v2 = vadd.f32 %v12950_v56, %v773_v18 }
 0x1c2   :  { %v13022_v40 = vadd.f32 %v12950_v56, %v774_v22  ;;  %v13025_v7 = vadd.f32 %v12950_v56, %v775_v31  ;;  %v13028_v47 = vadd.f32 %v12950_v56, %v776_v38  ;;  %v13031_v23 = vadd.f32 %v12950_v56, %v777_v52 }
 0x1c3   :  { %v13034_v34 = vadd.f32 %v12950_v56, %v778_v37  ;;  %v13037_v57 = vadd.f32 %v12950_v56, %v779_v59  ;;  %v13040_v29 = vadd.f32 %v12950_v56, %v780_v3  ;;  %v13043_v44 = vadd.f32 %v12950_v56, %v781_v11 }
 0x1c4   :  { %v13046_v55 = vadd.f32 %v12950_v56, %v782_v19  ;;  %v13049_v63 = vadd.f32 %v12950_v56, %v783_v27  ;;  %v13052_v46 = vadd.f32 %v12950_v56, %v784_v35  ;;  %v13055_v58 = vadd.f32 %v12950_v56, %v785_v43 }
 0x1c5   :  { %v13058_v61 = vadd.f32 %v12950_v56, %v786_v12  ;;  %v13061_v8 = vadd.f32 %v12950_v56, %v787_v51  ;;  %v13064_v15 = vadd.f32 %v12950_v56, %v788_v60  ;;  %v13067_v25 = vadd.f32 %v12950_v56, %v789_v6 }
 0x1c6   :  { %v13070_v18 = vadd.f32 %v12950_v56, %v790_v14  ;;  %v13073_v22 = vadd.f32 %v12950_v56, %v791_v24  ;;  %v13076_v31 = vadd.f32 %v12950_v56, %v792_v33  ;;  %v13079_v38 = vadd.f32 %v12950_v56, %v793_v42 }
 0x1c7   :  { %v13082_v52 = vadd.f32 %v12950_v56, %v794_v53  ;;  %v13085_v37 = vadd.f32 %v12950_v56, %v795_v62  ;;  %v13088_v59 = vadd.f32 %v12950_v56, %v796_v9  ;;  %v13091_v3 = vadd.f32 %v12950_v56, %v797_v20 }
 0x1c8   :  { %v13094_v11 = vadd.f32 %v12950_v56, %v798_v30  ;;  %v13097_v19 = vadd.f32 %v12950_v56, %v799_v41  ;;  %v13100_v27 = vadd.f32 %v12950_v56, %v800_v54  ;;  %v13103_v35 = vadd.f32 %v12950_v56, %v801_v0 }
 0x1c9   :  { %v13106_v43 = vadd.f32 %v12950_v56, %v802_v13  ;;  %v13109_v12 = vadd.f32 %v12950_v56, %v803_v26  ;;  %v13112_v51 = vadd.f32 %v12950_v56, %v804_v39  ;;  %v13115_v60 = vadd.f32 %v12950_v56, %v805_v50 }
 0x1ca   :  { %v856_v6 = vmax.f32 %v12992_v1, 0.0  ;;  %v857_v14 = vmax.f32 %v12995_v16, 0.0  ;;  %v858_v24 = vmax.f32 %v12998_v32, 0.0  ;;  %v859_v33 = vmax.f32 %v13001_v49, 0.0 }
 0x1cb   :  { %v860_v42 = vmax.f32 %v13004_v5, 0.0  ;;  %v861_v53 = vmax.f32 %v13007_v28, 0.0  ;;  %v862_v62 = vmax.f32 %v13010_v48, 0.0  ;;  %v863_v9 = vmax.f32 %v13013_v10, 0.0 }
 0x1cc   :  { %v864_v20 = vmax.f32 %v13016_v17, 0.0  ;;  %v865_v56 = vmax.f32 %v13019_v2, 0.0  ;;  %v866_v30 = vmax.f32 %v13022_v40, 0.0  ;;  %v867_v41 = vmax.f32 %v13025_v7, 0.0 }
 0x1cd   :  { %v868_v54 = vmax.f32 %v13028_v47, 0.0  ;;  %v869_v0 = vmax.f32 %v13031_v23, 0.0  ;;  %v870_v13 = vmax.f32 %v13034_v34, 0.0  ;;  %v871_v26 = vmax.f32 %v13037_v57, 0.0 }
 0x1ce   :  { %v872_v21 = vmax.f32 %v13040_v29, 0.0  ;;  %v873_v39 = vmax.f32 %v13043_v44, 0.0  ;;  %v874_v36 = vmax.f32 %v13046_v55, 0.0  ;;  %v875_v50 = vmax.f32 %v13049_v63, 0.0 }
 0x1cf   :  { %v876_v1 = vmax.f32 %v13052_v46, 0.0  ;;  %v877_v16 = vmax.f32 %v13055_v58, 0.0  ;;  %v878_v32 = vmax.f32 %v13058_v61, 0.0  ;;  %v879_v49 = vmax.f32 %v13061_v8, 0.0 }
 0x1d0   :  { %v880_v5 = vmax.f32 %v13064_v15, 0.0  ;;  %v881_v28 = vmax.f32 %v13067_v25, 0.0  ;;  %v882_v48 = vmax.f32 %v13070_v18, 0.0  ;;  %v883_v10 = vmax.f32 %v13073_v22, 0.0 }
 0x1d1   :  { %v884_v17 = vmax.f32 %v13076_v31, 0.0  ;;  %v885_v2 = vmax.f32 %v13079_v38, 0.0  ;;  %v886_v40 = vmax.f32 %v13082_v52, 0.0  ;;  %v887_v7 = vmax.f32 %v13085_v37, 0.0 }
 0x1d2   :  { %v888_v47 = vmax.f32 %v13088_v59, 0.0  ;;  %v889_v23 = vmax.f32 %v13091_v3, 0.0  ;;  %v890_v34 = vmax.f32 %v13094_v11, 0.0  ;;  %v891_v57 = vmax.f32 %v13097_v19, 0.0 }
 0x1d3   :  { %v892_v29 = vmax.f32 %v13100_v27, 0.0  ;;  %v893_v44 = vmax.f32 %v13103_v35, 0.0  ;;  %v894_v55 = vmax.f32 %v13106_v43, 0.0  ;;  %v895_v63 = vmax.f32 %v13109_v12, 0.0 }
 0x1d4   :  { %v896_v46 = vmax.f32 %v13112_v51, 0.0  ;;  %v897_v58 = vmax.f32 %v13115_v60, 0.0  ;;  %v13159_v61 = vpack.c.bf16 %v873_v39, %v872_v21  ;;  %v13161_v8 = vpack.c.bf16 %v857_v14, %v856_v6  ;;  %v16179_v14 = vld [vmem:[#allocation7_spill] sm:$0xff]  ;;  %v7853_v39 = vld [vmem:[%s16114_s4 + $0x40] sm:$0xff] }
 0x1d5   :  { %v13163_v15 = vpack.c.bf16 %v875_v50, %v874_v36  ;;  %v13165_v25 = vpack.c.bf16 %v859_v33, %v858_v24  ;;  %v13167_v18 = vpack.c.bf16 %v877_v16, %v876_v1  ;;  %v13169_v22 = vpack.c.bf16 %v861_v53, %v860_v42  ;;  %v16180_v24 = vld [vmem:[#allocation5_spill] sm:$0xff]  ;;  %v13220_v42 = vpop.permute.xlu0 %916 }
 0x1d6   :  { %v13171_v31 = vpack.c.bf16 %v879_v49, %v878_v32  ;;  %v13173_v38 = vpack.c.bf16 %v863_v9, %v862_v62  ;;  %v13175_v52 = vpack.c.bf16 %v881_v28, %v880_v5  ;;  %10958 = vmatprep.subr.bf16.mxu1 %v13159_v61  ;;  %v13178_v37 = vpack.c.bf16 %v865_v56, %v864_v20  ;;  %v16183_v62 = vld [vmem:[#allocation6_spill] sm:$0xff]  ;;  %v13225_v9 = vpop.permute.xlu1 %919 }
 0x1d7   :  { %v13180_v59 = vpack.c.bf16 %v883_v10, %v882_v48  ;;  %v13182_v3 = vpack.c.bf16 %v867_v41, %v866_v30  ;;  %v13184_v11 = vpack.c.bf16 %v885_v2, %v884_v17  ;;  %10960 = vmatpush3.bf16.msra.mxu1 %v13161_v8  ;;  %v13187_v19 = vpack.c.bf16 %v869_v0, %v868_v54  ;;  %v7854_v36 = vld [vmem:[%s16114_s4 + $0x48] sm:$0xff] }
 0x1d8   :  { %v13189_v27 = vpack.c.bf16 %v887_v7, %v886_v40  ;;  %v13191_v35 = vpack.c.bf16 %v871_v26, %v870_v13  ;;  %v13193_v43 = vpack.c.bf16 %v889_v23, %v888_v47  ;;  %10962 = vmatprep.subr.bf16.mxu1 %v13163_v15  ;;  %v13196_v12 = vpack.c.bf16 %v891_v57, %v890_v34  ;;  %v7855_v23 = vld [vmem:[%s16114_s4 + $0x50] sm:$0xff]  ;;  %v7856_v34 = vld [vmem:[%s16114_s4 + $0x58] sm:$0xff] }
 0x1d9   :  { %v13198_v51 = vpack.c.bf16 %v893_v44, %v892_v29  ;;  %v13200_v60 = vpack.c.bf16 %v895_v63, %v894_v55  ;;  %v13202_v6 = vpack.c.bf16 %v897_v58, %v896_v46  ;;  %vm939_vm8 = vcmp.eq.s32.totalorder %v16180_v24, %v16179_v14  ;;  %v13248_v56 = vpop.permute.xlu0 %925 }
 0x1da   :  { %v16181_v33 = vmov 0.0|0.0   ;;  %v16182_v53 = vmov 1.0   ;;  %vm943_vm9 = vcmp.eq.s32.totalorder %v16183_v62, %v13220_v42  ;;  %vm946_vm10 = vcmp.eq.s32.totalorder %v16183_v62, %v13225_v9  ;;  %v13240_v20 = vpop.permute.xlu1 %922 }
 0x1db   :  { %10964 = vmatpush3.bf16.msra.mxu1 %v13165_v25  ;;  %vm942_vm11 = vcmp.eq.s32.totalorder %v16180_v24, %v13220_v42  ;;  %vm945_vm12 = vcmp.eq.s32.totalorder %v16180_v24, %v13225_v9  ;;  %vm949_vm13 = vcmp.eq.s32.totalorder %v16183_v62, %v13240_v20  ;;  %vm948_vm14 = vcmp.eq.s32.totalorder %v16180_v24, %v13240_v20 }
 0x1dc   :  { %10966 = vmatprep.subr.bf16.mxu1 %v13167_v18  ;;  %vm952_vm15 = vcmp.eq.s32.totalorder %v16183_v62, %v13248_v56  ;;  %vm951_vm0 = vcmp.eq.s32.totalorder %v16180_v24, %v13248_v56  ;;  %v16184_v41 = vmov 0.0   ;;  %v13271_v0 = vmax.f32 %v12960_v45, 0.0 }
 0x1dd   :  { %v13268_v54 = vpop.permute.xlu0 %931  ;;  %v13295_v26 = vadd.s32 256, %v16180_v24  ;;  %v11052_v1 = vpack.c.bf16 %v7854_v36, %v7853_v39  ;;  %v11055_v57 = vpack.c.bf16 %v7856_v34, %v7855_v23 }
 0x1de   :  { %v13258_v30 = vpop.permute.xlu1 %928  ;;  %vm958_vm6 = vcmp.eq.s32.totalorder %v16183_v62, %v13268_v54 }
 0x1df   :  { %10968 = vmatpush3.bf16.msra.mxu1 %v13169_v22  ;;  %vm955_vm1 = vcmp.eq.s32.totalorder %v16183_v62, %v13258_v30  ;;  %vm954_vm4 = vcmp.eq.s32.totalorder %v16180_v24, %v13258_v30  ;;  %11053 = vmatpush3.bf16.msra.mxu0 %v11052_v1 }
 0x1e0   :  { %10970 = vmatprep.subr.bf16.mxu1 %v13171_v31  ;;  %11054 = vmatprep.subr.bf16.mxu0 %v16181_v33 }
 0x1e1   :  { %v13290_v45 = vpop.permute.xlu0 %937 }
 0x1e2   :  { %v13282_v13 = vpop.permute.xlu1 %934 }
 0x1e3   :  { %10972 = vmatpush3.bf16.msra.mxu1 %v13173_v38  ;;  %11056 = vmatpush3.bf16.msra.mxu0 %v11055_v57 }
 0x1e4   :  { %10974 = vmatprep.subr.bf16.mxu1 %v13175_v52  ;;  %11057 = vmatprep.subr.bf16.mxu0 %v16181_v33 }
 0x1e5   :  { %v13386_v2 = vpop.permute.xlu0 %1267 }
 0x1e6   :  { %v13379_v10 = vpop.permute.xlu1 %1264 }
 0x1e7   :  { %10976 = vmatpush3.bf16.msra.mxu1 %v13178_v37 }
 0x1e8   :  { %10978 = vmatprep.subr.bf16.mxu1 %v13180_v59 }
 0x1e9   :  { %v13406_v7 = vpop.permute.xlu0 %1273 }
 0x1ea   :  { %v13396_v40 = vpop.permute.xlu1 %1270 }
 0x1eb   :  { %10980 = vmatpush3.bf16.msra.mxu1 %v13182_v3 }
 0x1ec   :  { %10982 = vmatprep.subr.bf16.mxu1 %v13184_v11 }
 0x1ed   :  { %v13432_v29 = vpop.permute.xlu0 %1279 }
 0x1ee   :  { %v13416_v47 = vpop.permute.xlu1 %1276 }
 0x1ef   :  { %10984 = vmatpush3.bf16.msra.mxu1 %v13187_v19 }
 0x1f0   :  { %10986 = vmatprep.subr.bf16.mxu1 %v13189_v27 }
 0x1f1   :  { %v1286_v55 = vpop.permute.xlu0 %1285 }
 0x1f2   :  { %v13443_v44 = vpop.permute.xlu1 %1282 }
 0x1f3   :  { %10988 = vmatpush3.bf16.msra.mxu1 %v13191_v35 }
 0x1f4   :  { %10989 = vmatprep.subr.bf16.mxu1 %v16181_v33 }
 0x1f6   :  { %7789 = vmatmul.mubr.msk.f32.vlgmr.msra.gmra.mrb[0].mxu1 %vm939_vm8, %v16182_v53  ;;  %vm957_vm8 = vcmp.eq.s32.totalorder %v16180_v24, %v13268_v54  ;;  %v13459_v63 = vpop.permute.xlu1 %1288 }
 0x1f7   :  { %7790 = vmatprep.mubr.msk.f32.mxu1 %vm943_vm9, %v16182_v53  ;;  %10991 = vmatpush3.bf16.msra.mxu1 %v13193_v43  ;;  %vm961_vm9 = vcmp.eq.s32.totalorder %v16183_v62, %v13282_v13 }
 0x1f8   :  { %10992 = vmatprep.subr.bf16.mxu1 %v16181_v33 }
 0x1fa   :  { %7791 = vmatmul.mubr.msk.f32.gmra.mrb[2].mxu1 %vm942_vm11, %v16182_v53  ;;  %vm964_vm11 = vcmp.eq.s32.totalorder %v16183_v62, %v13290_v45  ;;  %v13552_v36 = vpop.permute.xlu1 %1888 }
 0x1fb   :  { %10994 = vmatpush3.bf16.msra.mxu1 %v13196_v12  ;;  %7792 = vmatprep.mubr.msk.f32.mxu1 %vm946_vm10, %v16182_v53  ;;  %vm960_vm10 = vcmp.eq.s32.totalorder %v16180_v24, %v13282_v13 }
 0x1fc   :  { %10995 = vmatprep.subr.bf16.mxu1 %v16181_v33 }
 0x1fe   :  { %7793 = vmatmul.mubr.msk.f32.gmra.mrb[4].mxu1 %vm945_vm12, %v16182_v53  ;;  %vm963_vm12 = vcmp.eq.s32.totalorder %v16180_v24, %v13290_v45  ;;  %v13570_v1 = vpop.permute.xlu1 %1894 }
 0x1ff   :  { %7794 = vmatprep.mubr.msk.f32.mxu1 %vm949_vm13, %v16182_v53  ;;  %10997 = vmatpush3.bf16.msra.mxu1 %v13198_v51  ;;  %vm941_vm13 = vcmp.eq.s32.totalorder %v13295_v26, %v16179_v14 }
 0x200   :  { %10998 = vmatprep.subr.bf16.mxu1 %v16181_v33  ;;  %v968_v21 = vsel %vm941_vm13, 1.0, %v16184_v41  ;;  %vm1294_vm13 = vcmp.eq.s32.totalorder %v16183_v62, %v13386_v2 }
 0x202   :  { %7795 = vmatmul.mubr.msk.f32.gmra.mrb[6].mxu1 %vm948_vm14, %v16182_v53  ;;  %vm993_vm14 = vcmask 670720  }
 0x203   :  { %7796 = vmatprep.mubr.msk.f32.mxu1 %vm952_vm15, %v16182_v53  ;;  %11000 = vmatpush3.bf16.msra.mxu1 %v13200_v60  ;;  %vm944_vm15 = vcmp.eq.s32.totalorder %v13295_v26, %v13220_v42 }
 0x204   :  { %11001 = vmatprep.subr.bf16.mxu1 %v16181_v33  ;;  %v971_v50 = vsel %vm944_vm15, 1.0, %v16184_v41  ;;  %vm1293_vm15 = vcmp.eq.s32.totalorder %v16180_v24, %v13386_v2 }
 0x206   :  { %7797 = vmatmul.mubr.msk.f32.gmra.mrb[8].mxu1 %vm951_vm0, %v16182_v53  ;;  %vm947_vm0 = vcmp.eq.s32.totalorder %v13295_v26, %v13225_v9 }
 0x207   :  { %7798 = vmatprep.mubr.msk.f32.mxu1 %vm955_vm1, %v16182_v53  ;;  %11003 = vmatpush3.bf16.msra.mxu1 %v13202_v6  ;;  %v974_v16 = vsel %vm947_vm0, 1.0, %v16184_v41  ;;  %vm950_vm1 = vcmp.eq.s32.totalorder %v13295_v26, %v13240_v20  ;;  %vm1297_vm0 = vcmp.eq.s32.totalorder %v16183_v62, %v13396_v40  ;;  %v7857_v20 = vld [vmem:[%s16114_s4 + $0x60] sm:$0xff] }
 0x208   :  { %9670 = vmatprep.subr.mxu1 %v16184_v41  ;;  %v977_v32 = vsel %vm950_vm1, 1.0, %v16184_v41  ;;  %vm1296_vm1 = vcmp.eq.s32.totalorder %v16180_v24, %v13396_v40 }
 0x20a   :  { %7799 = vmatmul.mubr.msk.f32.gmra.mrb[10].mxu1 %vm954_vm4, %v16182_v53  ;;  %vm953_vm4 = vcmp.eq.s32.totalorder %v13295_v26, %v13248_v56  ;;  %v7858_v56 = vld [vmem:[%s16114_s4 + $0x68] sm:$0xff] }
 0x20b   :  { %7800 = vmatprep.mubr.msk.f32.mxu1 %vm958_vm6, %v16182_v53  ;;  %9671 = vmatpush3.msk.msra.mxu1 %vm1021_vm2, %v13271_v0  ;;  %v980_v49 = vsel %vm953_vm4, 1.0, %v16184_v41  ;;  %vm956_vm6 = vcmp.eq.s32.totalorder %v13295_v26, %v13258_v30  ;;  %vm1300_vm4 = vcmp.eq.s32.totalorder %v16183_v62, %v13406_v7  ;;  %v11058_v30 = vpack.c.bf16 %v7858_v56, %v7857_v20 }
 0x20c   :  { %11005 = vmatprep.subr.bf16.mxu1 %v13159_v61  ;;  %v983_v5 = vsel %vm956_vm6, 1.0, %v16184_v41  ;;  %vm1299_vm6 = vcmp.eq.s32.totalorder %v16180_v24, %v13406_v7 }
 0x20d   :  { %11059 = vmatpush3.bf16.msra.mxu0 %v11058_v30 }
 0x20e   :  { %7801 = vmatmul.mubr.msk.f32.gmra.mrb[12].mxu1 %vm957_vm8, %v16182_v53  ;;  %vm959_vm8 = vcmp.eq.s32.totalorder %v13295_v26, %v13268_v54  ;;  %11060 = vmatprep.subr.bf16.mxu0 %v16181_v33 }
 0x20f   :  { %7802 = vmatprep.mubr.msk.f32.mxu1 %vm961_vm9, %v16182_v53  ;;  %v986_v28 = vsel %vm959_vm8, 1.0, %v16184_v41  ;;  %vm962_vm9 = vcmp.eq.s32.totalorder %v13295_v26, %v13282_v13  ;;  %vm1303_vm8 = vcmp.eq.s32.totalorder %v16183_v62, %v13416_v47 }
 0x210   :  { %v989_v48 = vsel %vm962_vm9, 1.0, %v16184_v41  ;;  %vm1302_vm9 = vcmp.eq.s32.totalorder %v16180_v24, %v13416_v47 }
 0x212   :  { %7803 = vmatmul.mubr.msk.f32.gmra.mrb[14].mxu1 %vm960_vm10, %v16182_v53  ;;  %vm965_vm10 = vcmp.eq.s32.totalorder %v13295_v26, %v13290_v45 }
 0x213   :  { %7804 = vmatprep.mubr.msk.f32.mxu1 %vm964_vm11, %v16182_v53  ;;  %v992_v17 = vsel %vm965_vm10, 1.0, %v16184_v41  ;;  %vm1291_vm11 = vcmp.eq.s32.totalorder %v16183_v62, %v13379_v10  ;;  %vm1306_vm10 = vcmp.eq.s32.totalorder %v16183_v62, %v13432_v29 }
 0x216   :  { %7805 = vmatmul.mubr.msk.f32.gmra.mrb[16].mxu1 %vm963_vm12, %v16182_v53  ;;  %vm1290_vm12 = vcmp.eq.s32.totalorder %v16180_v24, %v13379_v10 }
 0x217   :  { %9672 = vmatprep.mubr.msk.f32.mxu1 %vm11976_vm3, %v16184_v41 }
 0x21a   :  { %9673 = vmatmul.mubr.msk.f32.vlgmr.msra.gmra.mrb[18].mxu1 %vm993_vm14, %v968_v21  ;;  %v13543_v21 = vpop.permute.xlu0 %1885 }
 0x21b   :  { %11007 = vmatpush3.bf16.msra.mxu1 %v13161_v8  ;;  %9675 = vmatprep.mubr.msk.f32.mxu1 %vm11976_vm3, %v16184_v41 }
 0x21c   :  { %11009 = vmatprep.subr.bf16.mxu1 %v13163_v15 }
 0x21e   :  { %9676 = vmatmul.mubr.msk.f32.gmra.mrb[20].mxu1 %vm993_vm14, %v971_v50  ;;  %v13560_v50 = vpop.permute.xlu0 %1891 }
 0x21f   :  { %11011 = vmatpush3.bf16.msra.mxu1 %v13165_v25  ;;  %9678 = vmatprep.mubr.msk.f32.mxu1 %vm11976_vm3, %v16184_v41 }
 0x220   :  { %11013 = vmatprep.subr.bf16.mxu1 %v13167_v18 }
 0x222   :  { %9679 = vmatmul.mubr.msk.f32.gmra.mrb[22].mxu1 %vm993_vm14, %v974_v16  ;;  %v13580_v16 = vpop.permute.xlu0 %1897 }
 0x223   :  { %11015 = vmatpush3.bf16.msra.mxu1 %v13169_v22  ;;  %9681 = vmatprep.mubr.msk.f32.mxu1 %vm11976_vm3, %v16184_v41 }
 0x224   :  { %11017 = vmatprep.subr.bf16.mxu1 %v13171_v31 }
 0x226   :  { %9682 = vmatmul.mubr.msk.f32.gmra.mrb[24].mxu1 %vm993_vm14, %v977_v32  ;;  %v13590_v32 = vpop.permute.xlu1 %1900 }
 0x227   :  { %11019 = vmatpush3.bf16.msra.mxu1 %v13173_v38  ;;  %9684 = vmatprep.mubr.msk.f32.mxu1 %vm11976_vm3, %v16184_v41 }
 0x228   :  { %11021 = vmatprep.subr.bf16.mxu1 %v13175_v52 }
 0x22a   :  { %9685 = vmatmul.mubr.msk.f32.gmra.mrb[26].mxu1 %vm993_vm14, %v980_v49  ;;  %v13600_v49 = vpop.permute.xlu0 %1903 }
 0x22b   :  { %11023 = vmatpush3.bf16.msra.mxu1 %v13178_v37  ;;  %9687 = vmatprep.mubr.msk.f32.mxu1 %vm11976_vm3, %v16184_v41 }
 0x22c   :  { %11025 = vmatprep.subr.bf16.mxu1 %v13180_v59 }
 0x22e   :  { %9688 = vmatmul.mubr.msk.f32.gmra.mrb[28].mxu1 %vm993_vm14, %v983_v5  ;;  %v1907_v5 = vpop.permute.xlu1 %1906 }
 0x22f   :  { %11027 = vmatpush3.bf16.msra.mxu1 %v13182_v3  ;;  %9690 = vmatprep.mubr.msk.f32.mxu1 %vm11976_vm3, %v16184_v41 }
 0x230   :  { %11029 = vmatprep.subr.bf16.mxu1 %v13184_v11 }
 0x232   :  { %9691 = vmatmul.mubr.msk.f32.gmra.mrb[30].mxu1 %vm993_vm14, %v986_v28  ;;  %v7859_v28 = vld [vmem:[%s16114_s4 + $0x70] sm:$0xff] }
 0x233   :  { %11031 = vmatpush3.bf16.msra.mxu1 %v13187_v19  ;;  %9693 = vmatprep.mubr.msk.f32.mxu1 %vm11976_vm3, %v16184_v41 }
 0x234   :  { %11033 = vmatprep.subr.bf16.mxu1 %v13189_v27 }
 0x236   :  { %9694 = vmatmul.mubr.msk.f32.gmra.mrb[32].mxu1 %vm993_vm14, %v989_v48  ;;  %v7860_v48 = vld [vmem:[%s16114_s4 + $0x78] sm:$0xff] }
 0x237   :  { %11035 = vmatpush3.bf16.msra.mxu1 %v13191_v35  ;;  %9696 = vmatprep.mubr.msk.f32.mxu1 %vm11976_vm3, %v16184_v41 }
 0x238   :  { %11036 = vmatprep.subr.bf16.mxu1 %v16181_v33 }
 0x23a   :  { %9697 = vmatmul.mubr.msk.f32.gmra.mrb[34].mxu1 %vm993_vm14, %v992_v17  ;;  %v1910_v17 = vpop.permute.xlu0 %1909 }
 0x23b   :  { %7825 = vmatprep.mubr.msk.f32.mxu1 %vm1291_vm11, %v16182_v53  ;;  %vm1305_vm11 = vcmp.eq.s32.totalorder %v16180_v24, %v13432_v29 }
 0x23e   :  { %7826 = vmatmul.mubr.msk.f32.vlgmr.msra.gmra.mrb[36].mxu1 %vm1290_vm12, %v16182_v53  ;;  %vm1309_vm12 = vcmp.eq.s32.totalorder %v16183_v62, %v13443_v44 }
 0x23f   :  { %11038 = vmatpush3.bf16.msra.mxu1 %v13193_v43  ;;  %7827 = vmatprep.mubr.msk.f32.mxu1 %vm1294_vm13, %v16182_v53  ;;  %vm1308_vm13 = vcmp.eq.s32.totalorder %v16180_v24, %v13443_v44 }
 0x240   :  { %11039 = vmatprep.subr.bf16.mxu1 %v16181_v33 }
 0x242   :  { %7828 = vmatmul.mubr.msk.f32.gmra.mrb[38].mxu1 %vm1293_vm15, %v16182_v53  ;;  %vm1312_vm15 = vcmp.eq.s32.totalorder %v16183_v62, %v1286_v55 }
 0x243   :  { %11041 = vmatpush3.bf16.msra.mxu1 %v13196_v12  ;;  %7829 = vmatprep.mubr.msk.f32.mxu1 %vm1297_vm0, %v16182_v53  ;;  %vm1311_vm0 = vcmp.eq.s32.totalorder %v16180_v24, %v1286_v55 }
 0x244   :  { %11042 = vmatprep.subr.bf16.mxu1 %v16181_v33 }
 0x246   :  { %7830 = vmatmul.mubr.msk.f32.gmra.mrb[40].mxu1 %vm1296_vm1, %v16182_v53  ;;  %vm1315_vm1 = vcmp.eq.s32.totalorder %v16183_v62, %v13459_v63 }
 0x247   :  { %11044 = vmatpush3.bf16.msra.mxu1 %v13198_v51  ;;  %7831 = vmatprep.mubr.msk.f32.mxu1 %vm1300_vm4, %v16182_v53  ;;  %vm1314_vm4 = vcmp.eq.s32.totalorder %v16180_v24, %v13459_v63 }
 0x248   :  { %11045 = vmatprep.subr.bf16.mxu1 %v16181_v33 }
 0x24a   :  { %7832 = vmatmul.mubr.msk.f32.gmra.mrb[42].mxu1 %vm1299_vm6, %v16182_v53  ;;  %vm1292_vm6 = vcmp.eq.s32.totalorder %v13295_v26, %v13379_v10  ;;  %v11061_v10 = vpack.c.bf16 %v7860_v48, %v7859_v28 }
 0x24b   :  { %11047 = vmatpush3.bf16.msra.mxu1 %v13200_v60  ;;  %7833 = vmatprep.mubr.msk.f32.mxu1 %vm1303_vm8, %v16182_v53  ;;  %v1319_v46 = vsel %vm1292_vm6, 1.0, %v16184_v41  ;;  %vm1295_vm8 = vcmp.eq.s32.totalorder %v13295_v26, %v13386_v2  ;;  %vm1915_vm6 = vcmp.eq.s32.totalorder %v16183_v62, %v13552_v36 }
 0x24c   :  { %11048 = vmatprep.subr.bf16.mxu1 %v16181_v33  ;;  %v1322_v58 = vsel %vm1295_vm8, 1.0, %v16184_v41  ;;  %vm1914_vm8 = vcmp.eq.s32.totalorder %v16180_v24, %v13552_v36  ;;  %11062 = vmatpush3.bf16.msra.mxu0 %v11061_v10 }
 0x24d   :  { %11063 = vmatprep.subr.bf16.mxu0 %v16181_v33 }
 0x24e   :  { %7834 = vmatmul.mubr.msk.f32.gmra.mrb[44].mxu1 %vm1302_vm9, %v16182_v53  ;;  %vm1298_vm9 = vcmp.eq.s32.totalorder %v13295_v26, %v13396_v40 }
 0x24f   :  { %11050 = vmatpush3.bf16.msra.mxu1 %v13202_v6  ;;  %7835 = vmatprep.mubr.msk.f32.mxu1 %vm1306_vm10, %v16182_v53  ;;  %v1325_v14 = vsel %vm1298_vm9, 1.0, %v16184_v41  ;;  %vm1301_vm10 = vcmp.eq.s32.totalorder %v13295_v26, %v13406_v7  ;;  %vm1918_vm9 = vcmp.eq.s32.totalorder %v16183_v62, %v13560_v50 }
 0x250   :  { %9719 = vmatprep.subr.mxu1 %v16184_v41  ;;  %v1328_v42 = vsel %vm1301_vm10, 1.0, %v16184_v41  ;;  %vm1917_vm10 = vcmp.eq.s32.totalorder %v16180_v24, %v13560_v50 }
 0x252   :  { %7836 = vmatmul.mubr.msk.f32.gmra.mrb[46].mxu1 %vm1305_vm11, %v16182_v53  ;;  %vm1304_vm11 = vcmp.eq.s32.totalorder %v13295_v26, %v13416_v47 }
 0x253   :  { %9720 = vmatpush3.msk.msra.mxu1 %vm1021_vm2, %v13271_v0  ;;  %7837 = vmatprep.mubr.msk.f32.mxu1 %vm1309_vm12, %v16182_v53  ;;  %v1331_v9 = vsel %vm1304_vm11, 1.0, %v16184_v41  ;;  %vm1307_vm12 = vcmp.eq.s32.totalorder %v13295_v26, %v13432_v29  ;;  %vm1921_vm11 = vcmp.eq.s32.totalorder %v16183_v62, %v13570_v1 }
 0x254   :  { %11076 = vmatprep.subr.bf16.mxu1 %v13159_v61  ;;  %v1334_v54 = vsel %vm1307_vm12, 1.0, %v16184_v41  ;;  %vm1920_vm12 = vcmp.eq.s32.totalorder %v16180_v24, %v13570_v1 }
 0x256   :  { %7838 = vmatmul.mubr.msk.f32.gmra.mrb[48].mxu1 %vm1308_vm13, %v16182_v53  ;;  %vm1310_vm13 = vcmp.eq.s32.totalorder %v13295_v26, %v13443_v44  ;;  %v13695_v44 = vpop.permute.xlu1 %2378 }
 0x257   :  { %7839 = vmatprep.mubr.msk.f32.mxu1 %vm1312_vm15, %v16182_v53  ;;  %v1337_v13 = vsel %vm1310_vm13, 1.0, %v16184_v41  ;;  %vm1313_vm15 = vcmp.eq.s32.totalorder %v13295_v26, %v1286_v55  ;;  %vm1924_vm13 = vcmp.eq.s32.totalorder %v16183_v62, %v13580_v16 }
 0x258   :  { %v1340_v45 = vsel %vm1313_vm15, 1.0, %v16184_v41  ;;  %vm1923_vm15 = vcmp.eq.s32.totalorder %v16180_v24, %v13580_v16 }
 0x25a   :  { %7840 = vmatmul.mubr.msk.f32.gmra.mrb[50].mxu1 %vm1311_vm0, %v16182_v53  ;;  %vm1316_vm0 = vcmp.eq.s32.totalorder %v13295_v26, %v13459_v63  ;;  %v13716_v56 = vpop.permute.xlu1 %2384 }
 0x25b   :  { %7841 = vmatprep.mubr.msk.f32.mxu1 %vm1315_vm1, %v16182_v53  ;;  %v1343_v39 = vsel %vm1316_vm0, 1.0, %v16184_v41  ;;  %vm1912_vm1 = vcmp.eq.s32.totalorder %v16183_v62, %v13543_v21  ;;  %vm1927_vm0 = vcmp.eq.s32.totalorder %v16183_v62, %v13590_v32 }
 0x25e   :  { %7842 = vmatmul.mubr.msk.f32.gmra.mrb[52].mxu1 %vm1314_vm4, %v16182_v53  ;;  %vm1911_vm4 = vcmp.eq.s32.totalorder %v16180_v24, %v13543_v21 }
 0x25f   :  { %9721 = vmatprep.mubr.msk.f32.mxu1 %vm11976_vm3, %v16184_v41 }
 0x262   :  { %9722 = vmatmul.mubr.msk.f32.vlgmr.msra.gmra.mrb[54].mxu1 %vm993_vm14, %v1319_v46 }
 0x263   :  { %11078 = vmatpush3.bf16.msra.mxu1 %v13161_v8  ;;  %9724 = vmatprep.mubr.msk.f32.mxu1 %vm11976_vm3, %v16184_v41 }
 0x264   :  { %11080 = vmatprep.subr.bf16.mxu1 %v13163_v15 }
 0x266   :  { %9725 = vmatmul.mubr.msk.f32.gmra.mrb[56].mxu1 %vm993_vm14, %v1322_v58 }
 0x267   :  { %11082 = vmatpush3.bf16.msra.mxu1 %v13165_v25  ;;  %9727 = vmatprep.mubr.msk.f32.mxu1 %vm11976_vm3, %v16184_v41 }
 0x268   :  { %11084 = vmatprep.subr.bf16.mxu1 %v13167_v18 }
 0x26a   :  { %9728 = vmatmul.mubr.msk.f32.gmra.mrb[58].mxu1 %vm993_vm14, %v1325_v14  ;;  %v13704_v14 = vpop.permute.xlu0 %2381 }
 0x26b   :  { %11086 = vmatpush3.bf16.msra.mxu1 %v13169_v22  ;;  %9730 = vmatprep.mubr.msk.f32.mxu1 %vm11976_vm3, %v16184_v41 }
 0x26c   :  { %11088 = vmatprep.subr.bf16.mxu1 %v13171_v31 }
 0x26e   :  { %9731 = vmatmul.mubr.msk.f32.gmra.mrb[60].mxu1 %vm993_vm14, %v1328_v42 }
 0x26f   :  { %11090 = vmatpush3.bf16.msra.mxu1 %v13173_v38  ;;  %9733 = vmatprep.mubr.msk.f32.mxu1 %vm11976_vm3, %v16184_v41 }
 0x270   :  { %11092 = vmatprep.subr.bf16.mxu1 %v13175_v52 }
 0x272   :  { %9734 = vmatmul.mubr.msk.f32.gmra.mrb[62].mxu1 %vm993_vm14, %v1331_v9 }
 0x273   :  { %11094 = vmatpush3.bf16.msra.mxu1 %v13178_v37  ;;  %9736 = vmatprep.mubr.msk.f32.mxu1 %vm11976_vm3, %v16184_v41 }
 0x274   :  { %11096 = vmatprep.subr.bf16.mxu1 %v13180_v59 }
 0x276   :  { %9737 = vmatmul.mubr.msk.f32.gmra.mrb[64].mxu1 %vm993_vm14, %v1334_v54 }
 0x277   :  { %11098 = vmatpush3.bf16.msra.mxu1 %v13182_v3  ;;  %9739 = vmatprep.mubr.msk.f32.mxu1 %vm11976_vm3, %v16184_v41 }
 0x278   :  { %11100 = vmatprep.subr.bf16.mxu1 %v13184_v11 }
 0x27a   :  { %9740 = vmatmul.mubr.msk.f32.gmra.mrb[66].mxu1 %vm993_vm14, %v1337_v13 }
 0x27b   :  { %11102 = vmatpush3.bf16.msra.mxu1 %v13187_v19  ;;  %9742 = vmatprep.mubr.msk.f32.mxu1 %vm11976_vm3, %v16184_v41 }
 0x27c   :  { %11104 = vmatprep.subr.bf16.mxu1 %v13189_v27 }
 0x27e   :  { %9743 = vmatmul.mubr.msk.f32.gmra.mrb[68].mxu1 %vm993_vm14, %v1340_v45  ;;  %v13728_v45 = vpop.permute.xlu0 %2387 }
 0x27f   :  { %11106 = vmatpush3.bf16.msra.mxu1 %v13191_v35  ;;  %9745 = vmatprep.mubr.msk.f32.mxu1 %vm11976_vm3, %v16184_v41 }
 0x280   :  { %11107 = vmatprep.subr.bf16.mxu1 %v16181_v33 }
 0x282   :  { %9746 = vmatmul.mubr.msk.f32.gmra.mrb[70].mxu1 %vm993_vm14, %v1343_v39 }
 0x283   :  { %7888 = vmatprep.mubr.msk.f32.mxu1 %vm1912_vm1, %v16182_v53  ;;  %vm1926_vm1 = vcmp.eq.s32.totalorder %v16180_v24, %v13590_v32 }
 0x286   :  { %7889 = vmatmul.mubr.msk.f32.vlgmr.msra.gmra.mrb[72].mxu1 %vm1911_vm4, %v16182_v53  ;;  %vm1930_vm4 = vcmp.eq.s32.totalorder %v16183_v62, %v13600_v49 }
 0x287   :  { %11109 = vmatpush3.bf16.msra.mxu1 %v13193_v43  ;;  %7890 = vmatprep.mubr.msk.f32.mxu1 %vm1915_vm6, %v16182_v53  ;;  %vm1929_vm6 = vcmp.eq.s32.totalorder %v16180_v24, %v13600_v49 }
 0x288   :  { %11110 = vmatprep.subr.bf16.mxu1 %v16181_v33 }
 0x28a   :  { %7891 = vmatmul.mubr.msk.f32.gmra.mrb[74].mxu1 %vm1914_vm8, %v16182_v53  ;;  %vm1933_vm8 = vcmp.eq.s32.totalorder %v16183_v62, %v1907_v5 }
 0x28b   :  { %11112 = vmatpush3.bf16.msra.mxu1 %v13196_v12  ;;  %7892 = vmatprep.mubr.msk.f32.mxu1 %vm1918_vm9, %v16182_v53  ;;  %vm1932_vm9 = vcmp.eq.s32.totalorder %v16180_v24, %v1907_v5 }
 0x28c   :  { %11113 = vmatprep.subr.bf16.mxu1 %v16181_v33 }
 0x28e   :  { %7893 = vmatmul.mubr.msk.f32.gmra.mrb[76].mxu1 %vm1917_vm10, %v16182_v53  ;;  %vm1936_vm10 = vcmp.eq.s32.totalorder %v16183_v62, %v1910_v17 }
 0x28f   :  { %11115 = vmatpush3.bf16.msra.mxu1 %v13198_v51  ;;  %7894 = vmatprep.mubr.msk.f32.mxu1 %vm1921_vm11, %v16182_v53  ;;  %vm1935_vm11 = vcmp.eq.s32.totalorder %v16180_v24, %v1910_v17 }
 0x290   :  { %11116 = vmatprep.subr.bf16.mxu1 %v16181_v33 }
 0x292   :  { %7895 = vmatmul.mubr.msk.f32.gmra.mrb[78].mxu1 %vm1920_vm12, %v16182_v53  ;;  %vm1913_vm12 = vcmp.eq.s32.totalorder %v13295_v26, %v13543_v21 }
 0x293   :  { %11118 = vmatpush3.bf16.msra.mxu1 %v13200_v60  ;;  %7896 = vmatprep.mubr.msk.f32.mxu1 %vm1924_vm13, %v16182_v53  ;;  %v1940_v2 = vsel %vm1913_vm12, 1.0, %v16184_v41  ;;  %vm1916_vm13 = vcmp.eq.s32.totalorder %v13295_v26, %v13552_v36  ;;  %vm2408_vm12 = vcmp.eq.s32.totalorder %v16183_v62, %v13704_v14 }
 0x294   :  { %11119 = vmatprep.subr.bf16.mxu1 %v16181_v33  ;;  %v1943_v40 = vsel %vm1916_vm13, 1.0, %v16184_v41  ;;  %vm2407_vm13 = vcmp.eq.s32.totalorder %v16180_v24, %v13704_v14 }
 0x296   :  { %7897 = vmatmul.mubr.msk.f32.gmra.mrb[80].mxu1 %vm1923_vm15, %v16182_v53  ;;  %vm1919_vm15 = vcmp.eq.s32.totalorder %v13295_v26, %v13560_v50  ;;  %v13740_v50 = vpop.permute.xlu1 %2390 }
 0x297   :  { %11121 = vmatpush3.bf16.msra.mxu1 %v13202_v6  ;;  %7898 = vmatprep.mubr.msk.f32.mxu1 %vm1927_vm0, %v16182_v53  ;;  %v1946_v7 = vsel %vm1919_vm15, 1.0, %v16184_v41  ;;  %vm1922_vm0 = vcmp.eq.s32.totalorder %v13295_v26, %v13570_v1  ;;  %vm2411_vm15 = vcmp.eq.s32.totalorder %v16183_v62, %v13716_v56 }
 0x298   :  { %9854 = vmatprep.subr.mxu1 %v16184_v41  ;;  %v1949_v47 = vsel %vm1922_vm0, 1.0, %v16184_v41  ;;  %vm2410_vm0 = vcmp.eq.s32.totalorder %v16180_v24, %v13716_v56 }
 0x29a   :  { %7899 = vmatmul.mubr.msk.f32.gmra.mrb[82].mxu1 %vm1926_vm1, %v16182_v53  ;;  %vm1925_vm1 = vcmp.eq.s32.totalorder %v13295_v26, %v13580_v16  ;;  %v13764_v10 = vpop.permute.xlu1 %2396 }
 0x29b   :  { %9855 = vmatpush3.msk.msra.mxu1 %vm1021_vm2, %v13271_v0  ;;  %7900 = vmatprep.mubr.msk.f32.mxu1 %vm1930_vm4, %v16182_v53  ;;  %v1952_v23 = vsel %vm1925_vm1, 1.0, %v16184_v41  ;;  %vm1928_vm4 = vcmp.eq.s32.totalorder %v13295_v26, %v13590_v32  ;;  %vm2414_vm1 = vcmp.eq.s32.totalorder %v16183_v62, %v13728_v45 }
 0x29c   :  { %11135 = vmatprep.subr.bf16.mxu1 %v13159_v61  ;;  %v1955_v34 = vsel %vm1928_vm4, 1.0, %v16184_v41  ;;  %vm2413_vm4 = vcmp.eq.s32.totalorder %v16180_v24, %v13728_v45 }
 0x29e   :  { %7901 = vmatmul.mubr.msk.f32.gmra.mrb[84].mxu1 %vm1929_vm6, %v16182_v53  ;;  %vm1931_vm6 = vcmp.eq.s32.totalorder %v13295_v26, %v13600_v49  ;;  %v13752_v49 = vpop.permute.xlu0 %2393 }
 0x29f   :  { %7902 = vmatprep.mubr.msk.f32.mxu1 %vm1933_vm8, %v16182_v53  ;;  %v1958_v57 = vsel %vm1931_vm6, 1.0, %v16184_v41  ;;  %vm1934_vm8 = vcmp.eq.s32.totalorder %v13295_v26, %v1907_v5  ;;  %vm2417_vm6 = vcmp.eq.s32.totalorder %v16183_v62, %v13740_v50 }
 0x2a0   :  { %v1961_v29 = vsel %vm1934_vm8, 1.0, %v16184_v41  ;;  %vm2416_vm8 = vcmp.eq.s32.totalorder %v16180_v24, %v13740_v50 }
 0x2a2   :  { %7903 = vmatmul.mubr.msk.f32.gmra.mrb[86].mxu1 %vm1932_vm9, %v16182_v53  ;;  %vm1937_vm9 = vcmp.eq.s32.totalorder %v13295_v26, %v1910_v17 }
 0x2a3   :  { %7904 = vmatprep.mubr.msk.f32.mxu1 %vm1936_vm10, %v16182_v53  ;;  %v1964_v63 = vsel %vm1937_vm9, 1.0, %v16184_v41  ;;  %vm2405_vm10 = vcmp.eq.s32.totalorder %v16183_v62, %v13695_v44  ;;  %vm2420_vm9 = vcmp.eq.s32.totalorder %v16183_v62, %v13752_v49 }
 0x2a6   :  { %7905 = vmatmul.mubr.msk.f32.gmra.mrb[88].mxu1 %vm1935_vm11, %v16182_v53  ;;  %vm2404_vm11 = vcmp.eq.s32.totalorder %v16180_v24, %v13695_v44 }
 0x2a7   :  { %9856 = vmatprep.mubr.msk.f32.mxu1 %vm11976_vm3, %v16184_v41 }
 0x2aa   :  { %9857 = vmatmul.mubr.msk.f32.vlgmr.msra.gmra.mrb[90].mxu1 %vm993_vm14, %v1940_v2 }
 0x2ab   :  { %11137 = vmatpush3.bf16.msra.mxu1 %v13161_v8  ;;  %9859 = vmatprep.mubr.msk.f32.mxu1 %vm11976_vm3, %v16184_v41 }
 0x2ac   :  { %11139 = vmatprep.subr.bf16.mxu1 %v13163_v15 }
 0x2ae   :  { %9860 = vmatmul.mubr.msk.f32.gmra.mrb[92].mxu1 %vm993_vm14, %v1943_v40 }
 0x2af   :  { %11141 = vmatpush3.bf16.msra.mxu1 %v13165_v25  ;;  %9862 = vmatprep.mubr.msk.f32.mxu1 %vm11976_vm3, %v16184_v41 }
 0x2b0   :  { %11143 = vmatprep.subr.bf16.mxu1 %v13167_v18 }
 0x2b2   :  { %9863 = vmatmul.mubr.msk.f32.gmra.mrb[94].mxu1 %vm993_vm14, %v1946_v7  ;;  %v13776_v7 = vpop.permute.xlu0 %2399 }
 0x2b3   :  { %11145 = vmatpush3.bf16.msra.mxu1 %v13169_v22  ;;  %9865 = vmatprep.mubr.msk.f32.mxu1 %vm11976_vm3, %v16184_v41 }
 0x2b4   :  { %11147 = vmatprep.subr.bf16.mxu1 %v13171_v31 }
 0x2b6   :  { %9866 = vmatmul.mubr.msk.f32.gmra.mrb[96].mxu1 %vm993_vm14, %v1949_v47 }
 0x2b7   :  { %11149 = vmatpush3.bf16.msra.mxu1 %v13173_v38  ;;  %9868 = vmatprep.mubr.msk.f32.mxu1 %vm11976_vm3, %v16184_v41 }
 0x2b8   :  { %11151 = vmatprep.subr.bf16.mxu1 %v13175_v52 }
 0x2ba   :  { %9869 = vmatmul.mubr.msk.f32.gmra.mrb[98].mxu1 %vm993_vm14, %v1952_v23 }
 0x2bb   :  { %11153 = vmatpush3.bf16.msra.mxu1 %v13178_v37  ;;  %9871 = vmatprep.mubr.msk.f32.mxu1 %vm11976_vm3, %v16184_v41 }
 0x2bc   :  { %11155 = vmatprep.subr.bf16.mxu1 %v13180_v59 }
 0x2be   :  { %9872 = vmatmul.mubr.msk.f32.gmra.mrb[100].mxu1 %vm993_vm14, %v1955_v34 }
 0x2bf   :  { %11157 = vmatpush3.bf16.msra.mxu1 %v13182_v3  ;;  %9874 = vmatprep.mubr.msk.f32.mxu1 %vm11976_vm3, %v16184_v41 }
 0x2c0   :  { %11159 = vmatprep.subr.bf16.mxu1 %v13184_v11 }
 0x2c2   :  { %9875 = vmatmul.mubr.msk.f32.gmra.mrb[102].mxu1 %vm993_vm14, %v1958_v57  ;;  %v13788_v57 = vpop.permute.xlu1 %2402 }
 0x2c3   :  { %11161 = vmatpush3.bf16.msra.mxu1 %v13187_v19  ;;  %9877 = vmatprep.mubr.msk.f32.mxu1 %vm11976_vm3, %v16184_v41  ;;  %16185 = vst [vmem:[#allocation8_spill] sm:$0xff] %v13788_v57 }
 0x2c4   :  { %11163 = vmatprep.subr.bf16.mxu1 %v13189_v27 }
 0x2c6   :  { %9878 = vmatmul.mubr.msk.f32.gmra.mrb[104].mxu1 %vm993_vm14, %v1961_v29 }
 0x2c7   :  { %11165 = vmatpush3.bf16.msra.mxu1 %v13191_v35  ;;  %9880 = vmatprep.mubr.msk.f32.mxu1 %vm11976_vm3, %v16184_v41 }
 0x2c8   :  { %11194 = vmatprep.subr.bf16.mxu1 %v13159_v61 }
 0x2c9   :  { %v8461_v55 = vpop.f32.mrb[0].mxu1 }
 0x2ca   :  { %v8462_v46 = vpop.f32.mrb[1].mxu1  ;;  %9881 = vmatmul.mubr.msk.f32.gmra.mrb[106].mxu1 %vm993_vm14, %v1964_v63 }
 0x2cb   :  { %v13701_v58 = vadd.f32 %v8462_v46, %v8461_v55  ;;  %7942 = vmatprep.mubr.msk.f32.mxu1 %vm2405_vm10, %v16182_v53  ;;  %vm2419_vm10 = vcmp.eq.s32.totalorder %v16180_v24, %v13752_v49  ;;  %v13800_v46 = vpop.permute.xlu0 %2871 }
 0x2cd   :  { %v8464_v42 = vpop.f32.mrb[2].mxu1 }
 0x2ce   :  { %v8465_v9 = vpop.f32.mrb[3].mxu1  ;;  %7943 = vmatmul.mubr.msk.f32.vlgmr.msra.gmra.mrb[108].mxu1 %vm2404_vm11, %v16182_v53  ;;  %vm2423_vm11 = vcmp.eq.s32.totalorder %v16183_v62, %v13764_v10 }
 0x2cf   :  { %v13711_v20 = vadd.f32 %v8465_v9, %v8464_v42  ;;  %11196 = vmatpush3.bf16.msra.mxu1 %v13161_v8  ;;  %7944 = vmatprep.mubr.msk.f32.mxu1 %vm2408_vm12, %v16182_v53  ;;  %vm2422_vm12 = vcmp.eq.s32.totalorder %v16180_v24, %v13764_v10 }
 0x2d0   :  { %11198 = vmatprep.subr.bf16.mxu1 %v13163_v15 }
 0x2d1   :  { %v8467_v30 = vpop.f32.mrb[4].mxu1 }
 0x2d2   :  { %v8468_v54 = vpop.f32.mrb[5].mxu1  ;;  %7945 = vmatmul.mubr.msk.f32.gmra.mrb[110].mxu1 %vm2407_vm13, %v16182_v53  ;;  %vm2426_vm13 = vcmp.eq.s32.totalorder %v16183_v62, %v13776_v7 }
 0x2d3   :  { %v13723_v13 = vadd.f32 %v8468_v54, %v8467_v30  ;;  %11200 = vmatpush3.bf16.msra.mxu1 %v13165_v25  ;;  %7946 = vmatprep.mubr.msk.f32.mxu1 %vm2411_vm15, %v16182_v53  ;;  %vm2425_vm15 = vcmp.eq.s32.totalorder %v16180_v24, %v13776_v7  ;;  %v13813_v54 = vpop.permute.xlu1 %2874 }
 0x2d4   :  { %11202 = vmatprep.subr.bf16.mxu1 %v13167_v18 }
 0x2d5   :  { %v8470_v21 = vpop.f32.mrb[6].mxu1 }
 0x2d6   :  { %v8471_v39 = vpop.f32.mrb[7].mxu1  ;;  %7947 = vmatmul.mubr.msk.f32.gmra.mrb[112].mxu1 %vm2410_vm0, %v16182_v53  ;;  %vm2429_vm0 = vcmp.eq.s32.totalorder %v16183_v62, %v13788_v57 }
 0x2d7   :  { %v13735_v36 = vadd.f32 %v8471_v39, %v8470_v21  ;;  %11204 = vmatpush3.bf16.msra.mxu1 %v13169_v22  ;;  %7948 = vmatprep.mubr.msk.f32.mxu1 %vm2414_vm1, %v16182_v53  ;;  %vm2428_vm1 = vcmp.eq.s32.totalorder %v16180_v24, %v13788_v57 }
 0x2d8   :  { %11206 = vmatprep.subr.bf16.mxu1 %v13171_v31 }
 0x2d9   :  { %v8473_v1 = vpop.f32.mrb[8].mxu1 }
 0x2da   :  { %v8474_v16 = vpop.f32.mrb[9].mxu1  ;;  %7949 = vmatmul.mubr.msk.f32.gmra.mrb[114].mxu1 %vm2413_vm4, %v16182_v53  ;;  %vm2898_vm4 = vcmp.eq.s32.totalorder %v16183_v62, %v13800_v46 }
 0x2db   :  { %v13747_v32 = vadd.f32 %v8474_v16, %v8473_v1  ;;  %11208 = vmatpush3.bf16.msra.mxu1 %v13173_v38  ;;  %7950 = vmatprep.mubr.msk.f32.mxu1 %vm2417_vm6, %v16182_v53  ;;  %vm2897_vm6 = vcmp.eq.s32.totalorder %v16180_v24, %v13800_v46 }
 0x2dc   :  { %11210 = vmatprep.subr.bf16.mxu1 %v13175_v52 }
 0x2dd   :  { %v8476_v5 = vpop.f32.mrb[10].mxu1 }
 0x2de   :  { %v8477_v28 = vpop.f32.mrb[11].mxu1  ;;  %7951 = vmatmul.mubr.msk.f32.gmra.mrb[116].mxu1 %vm2416_vm8, %v16182_v53  ;;  %vm2901_vm8 = vcmp.eq.s32.totalorder %v16183_v62, %v13813_v54 }
 0x2df   :  { %11212 = vmatpush3.bf16.msra.mxu1 %v13178_v37  ;;  %7952 = vmatprep.mubr.msk.f32.mxu1 %vm2420_vm9, %v16182_v53  ;;  %v13761_v48 = vadd.f32 %v8477_v28, %v8476_v5  ;;  %vm2900_vm9 = vcmp.eq.s32.totalorder %v16180_v24, %v13813_v54  ;;  %v13837_v28 = vpop.permute.xlu1 %2880 }
 0x2e0   :  { %11214 = vmatprep.subr.bf16.mxu1 %v13180_v59 }
 0x2e1   :  { %v8479_v17 = vpop.f32.mrb[12].mxu1 }
 0x2e2   :  { %v8480_v2 = vpop.f32.mrb[13].mxu1  ;;  %7953 = vmatmul.mubr.msk.f32.gmra.mrb[118].mxu1 %vm2419_vm10, %v16182_v53 }
 0x2e3   :  { %11216 = vmatpush3.bf16.msra.mxu1 %v13182_v3  ;;  %7954 = vmatprep.mubr.msk.f32.mxu1 %vm2423_vm11, %v16182_v53  ;;  %v13773_v40 = vadd.f32 %v8480_v2, %v8479_v17 }
 0x2e4   :  { %11218 = vmatprep.subr.bf16.mxu1 %v13184_v11 }
 0x2e5   :  { %v8482_v47 = vpop.f32.mrb[14].mxu1 }
 0x2e6   :  { %v8483_v23 = vpop.f32.mrb[15].mxu1  ;;  %7955 = vmatmul.mubr.msk.f32.gmra.mrb[120].mxu1 %vm2422_vm12, %v16182_v53  ;;  %vm2907_vm12 = vcmp.eq.s32.totalorder %v16183_v62, %v13837_v28 }
 0x2e7   :  { %11220 = vmatpush3.bf16.msra.mxu1 %v13187_v19  ;;  %7956 = vmatprep.mubr.msk.f32.mxu1 %vm2426_vm13, %v16182_v53  ;;  %v13785_v34 = vadd.f32 %v8483_v23, %v8482_v47  ;;  %vm2906_vm13 = vcmp.eq.s32.totalorder %v16180_v24, %v13837_v28 }
 0x2e8   :  { %11222 = vmatprep.subr.bf16.mxu1 %v13189_v27 }
 0x2e9   :  { %v8485_v29 = vpop.f32.mrb[16].mxu1 }
 0x2ea   :  { %v8486_v55 = vpop.f32.mrb[17].mxu1  ;;  %7957 = vmatmul.mubr.msk.f32.gmra.mrb[122].mxu1 %vm2425_vm15, %v16182_v53 }
 0x2eb   :  { %11224 = vmatpush3.bf16.msra.mxu1 %v13191_v35  ;;  %7958 = vmatprep.mubr.msk.f32.mxu1 %vm2429_vm0, %v16182_v53  ;;  %v13797_v63 = vadd.f32 %v8486_v55, %v8485_v29  ;;  %v13863_v55 = vpop.permute.xlu1 %2886 }
 0x2ec   :  { %11225 = vmatprep.subr.bf16.mxu1 %v16181_v33 }
 0x2ed   :  { %v1201_v42 = vpop.f32.mrb[18].mxu1 }
 0x2ee   :  { %v9674_v9 = vpop.f32.mrb[19].mxu1  ;;  %7959 = vmatmul.mubr.msk.f32.gmra.mrb[124].mxu1 %vm2428_vm1, %v16182_v53  ;;  %v13808_v30 = vadd.f32 %v13701_v58, %v1201_v42  ;;  %v13824_v58 = vpop.permute.xlu0 %2877  ;;  %vm2913_vm1 = vcmp.eq.s32.totalorder %v16183_v62, %v13863_v55 }
 0x2ef   :  { %7996 = vmatprep.mubr.msk.f32.mxu1 %vm2898_vm4, %v16182_v53  ;;  %vm2904_vm10 = vcmp.eq.s32.totalorder %v16183_v62, %v13824_v58  ;;  %vm2903_vm11 = vcmp.eq.s32.totalorder %v16180_v24, %v13824_v58  ;;  %vm2912_vm4 = vcmp.eq.s32.totalorder %v16180_v24, %v13863_v55 }
 0x2f1   :  { %v1206_v21 = vpop.f32.mrb[20].mxu1 }
 0x2f2   :  { %v13816_v39 = vadd.f32 %v13711_v20, %v1206_v21  ;;  %v9677_v1 = vpop.f32.mrb[21].mxu1  ;;  %7997 = vmatmul.mubr.msk.f32.vlgmr.msra.gmra.mrb[126].mxu1 %vm2897_vm6, %v16182_v53  ;;  %v13850_v47 = vpop.permute.xlu0 %2883 }
 0x2f3   :  { %11227 = vmatpush3.bf16.msra.mxu1 %v13193_v43  ;;  %7998 = vmatprep.mubr.msk.f32.mxu1 %vm2901_vm8, %v16182_v53  ;;  %vm2910_vm15 = vcmp.eq.s32.totalorder %v16183_v62, %v13850_v47  ;;  %vm2909_vm0 = vcmp.eq.s32.totalorder %v16180_v24, %v13850_v47 }
 0x2f4   :  { %11228 = vmatprep.subr.bf16.mxu1 %v16181_v33 }
 0x2f5   :  { %v1211_v16 = vpop.f32.mrb[22].mxu1 }
 0x2f6   :  { %v13829_v20 = vadd.f32 %v13723_v13, %v1211_v16  ;;  %v9680_v5 = vpop.f32.mrb[23].mxu1  ;;  %7999 = vmatmul.mubr.msk.f32.gmra.mrb[128].mxu1 %vm2900_vm9, %v16182_v53  ;;  %v13876_v21 = vpop.permute.xlu0 %2889 }
 0x2f7   :  { %11230 = vmatpush3.bf16.msra.mxu1 %v13196_v12  ;;  %8000 = vmatprep.mubr.msk.f32.mxu1 %vm2904_vm10, %v16182_v53  ;;  %vm2916_vm6 = vcmp.eq.s32.totalorder %v16183_v62, %v13876_v21  ;;  %v13890_v5 = vpop.permute.xlu1 %2892  ;;  %vm2915_vm8 = vcmp.eq.s32.totalorder %v16180_v24, %v13876_v21 }
 0x2f8   :  { %11231 = vmatprep.subr.bf16.mxu1 %v16181_v33  ;;  %vm2919_vm9 = vcmp.eq.s32.totalorder %v16183_v62, %v13890_v5  ;;  %vm2918_vm10 = vcmp.eq.s32.totalorder %v16180_v24, %v13890_v5 }
 0x2f9   :  { %v1216_v17 = vpop.f32.mrb[24].mxu1 }
 0x2fa   :  { %v13842_v13 = vadd.f32 %v13735_v36, %v1216_v17  ;;  %v9683_v2 = vpop.f32.mrb[25].mxu1  ;;  %8001 = vmatmul.mubr.msk.f32.gmra.mrb[130].mxu1 %vm2903_vm11, %v16182_v53 }
 0x2fb   :  { %11233 = vmatpush3.bf16.msra.mxu1 %v13198_v51  ;;  %8002 = vmatprep.mubr.msk.f32.mxu1 %vm2907_vm12, %v16182_v53 }
 0x2fc   :  { %11234 = vmatprep.subr.bf16.mxu1 %v16181_v33 }
 0x2fd   :  { %v1221_v23 = vpop.f32.mrb[26].mxu1 }
 0x2fe   :  { %v13855_v36 = vadd.f32 %v13747_v32, %v1221_v23  ;;  %v9686_v29 = vpop.f32.mrb[27].mxu1  ;;  %8003 = vmatmul.mubr.msk.f32.gmra.mrb[132].mxu1 %vm2906_vm13, %v16182_v53  ;;  %v13901_v23 = vpop.permute.xlu0 %2895  ;;  %vm2899_vm13 = vcmp.eq.s32.totalorder %v13295_v26, %v13800_v46 }
 0x2ff   :  { %11236 = vmatpush3.bf16.msra.mxu1 %v13200_v60  ;;  %8004 = vmatprep.mubr.msk.f32.mxu1 %vm2910_vm15, %v16182_v53  ;;  %vm2922_vm11 = vcmp.eq.s32.totalorder %v16183_v62, %v13901_v23  ;;  %vm2921_vm12 = vcmp.eq.s32.totalorder %v16180_v24, %v13901_v23  ;;  %vm2902_vm15 = vcmp.eq.s32.totalorder %v13295_v26, %v13813_v54 }
 0x300   :  { %11237 = vmatprep.subr.bf16.mxu1 %v16181_v33 }
 0x301   :  { %v1226_v42 = vpop.f32.mrb[28].mxu1 }
 0x302   :  { %v13868_v32 = vadd.f32 %v13761_v48, %v1226_v42  ;;  %v9689_v9 = vpop.f32.mrb[29].mxu1  ;;  %8005 = vmatmul.mubr.msk.f32.gmra.mrb[134].mxu1 %vm2909_vm0, %v16182_v53  ;;  %vm2905_vm0 = vcmp.eq.s32.totalorder %v13295_v26, %v13824_v58 }
 0x303   :  { %11239 = vmatpush3.bf16.msra.mxu1 %v13202_v6  ;;  %8006 = vmatprep.mubr.msk.f32.mxu1 %vm2913_vm1, %v16182_v53  ;;  %vm2908_vm1 = vcmp.eq.s32.totalorder %v13295_v26, %v13837_v28 }
 0x304   :  { %10038 = vmatprep.subr.mxu1 %v16184_v41 }
 0x305   :  { %v1231_v1 = vpop.f32.mrb[30].mxu1 }
 0x306   :  { %v13881_v48 = vadd.f32 %v13773_v40, %v1231_v1  ;;  %v9692_v16 = vpop.f32.mrb[31].mxu1  ;;  %8007 = vmatmul.mubr.msk.f32.gmra.mrb[136].mxu1 %vm2912_vm4, %v16182_v53  ;;  %vm2911_vm4 = vcmp.eq.s32.totalorder %v13295_v26, %v13850_v47 }
 0x307   :  { %10039 = vmatpush3.msk.msra.mxu1 %vm1021_vm2, %v13271_v0  ;;  %8008 = vmatprep.mubr.msk.f32.mxu1 %vm2916_vm6, %v16182_v53  ;;  %v2926_v16 = vsel %vm2899_vm13, 1.0, %v16184_v41  ;;  %vm2914_vm6 = vcmp.eq.s32.totalorder %v13295_v26, %v13863_v55 }
 0x308   :  { %11253 = vmatprep.subr.bf16.mxu1 %v13159_v61 }
 0x309   :  { %v1236_v17 = vpop.f32.mrb[32].mxu1 }
 0x30a   :  { %v13895_v40 = vadd.f32 %v13785_v34, %v1236_v17  ;;  %v9695_v2 = vpop.f32.mrb[33].mxu1  ;;  %8009 = vmatmul.mubr.msk.f32.gmra.mrb[138].mxu1 %vm2915_vm8, %v16182_v53  ;;  %vm2917_vm8 = vcmp.eq.s32.totalorder %v13295_v26, %v13876_v21 }
 0x30b   :  { %8010 = vmatprep.mubr.msk.f32.mxu1 %vm2919_vm9, %v16182_v53  ;;  %vm2920_vm9 = vcmp.eq.s32.totalorder %v13295_v26, %v13890_v5  ;;  %v1245_v5 = vld [vmem:[%s16114_s4] sm:$0xff] }
 0x30d   :  { %v1241_v29 = vpop.f32.mrb[34].mxu1 }
 0x30e   :  { %v13906_v42 = vadd.f32 %v13797_v63, %v1241_v29  ;;  %v9698_v9 = vpop.f32.mrb[35].mxu1  ;;  %8011 = vmatmul.mubr.msk.f32.gmra.mrb[140].mxu1 %vm2918_vm10, %v16182_v53  ;;  %vm2923_vm10 = vcmp.eq.s32.totalorder %v13295_v26, %v13901_v23  ;;  %v14007_v23 = vpop.permute.xlu1 %3364 }
 0x30f   :  { %8012 = vmatprep.mubr.msk.f32.mxu1 %vm2922_vm11, %v16182_v53  ;;  %v2929_v9 = vsel %vm2902_vm15, 1.0, %v16184_v41  ;;  %vm3391_vm11 = vcmp.eq.s32.totalorder %v16183_v62, %v14007_v23 }
 0x311   :  { %v8540_v34 = vpop.f32.mrb[36].mxu1 }
 0x312   :  { %v8541_v1 = vpop.f32.mrb[37].mxu1  ;;  %8013 = vmatmul.mubr.msk.f32.gmra.mrb[142].mxu1 %vm2921_vm12, %v16182_v53  ;;  %vm3390_vm12 = vcmp.eq.s32.totalorder %v16180_v24, %v14007_v23 }
 0x313   :  { %v13917_v63 = vadd.f32 %v8541_v1, %v8540_v34  ;;  %10040 = vmatprep.mubr.msk.f32.mxu1 %vm11976_vm3, %v16184_v41 }
 0x315   :  { %v8543_v17 = vpop.f32.mrb[38].mxu1 }
 0x316   :  { %v8544_v2 = vpop.f32.mrb[39].mxu1  ;;  %10041 = vmatmul.mubr.msk.f32.vlgmr.msra.gmra.mrb[144].mxu1 %vm993_vm14, %v2926_v16  ;;  %v2932_v16 = vsel %vm2905_vm0, 1.0, %v16184_v41 }
 0x317   :  { %v13925_v29 = vadd.f32 %v8544_v2, %v8543_v17  ;;  %11255 = vmatpush3.bf16.msra.mxu1 %v13161_v8  ;;  %10043 = vmatprep.mubr.msk.f32.mxu1 %vm11976_vm3, %v16184_v41 }
 0x318   :  { %11257 = vmatprep.subr.bf16.mxu1 %v13163_v15 }
 0x319   :  { %v8546_v46 = vpop.f32.mrb[40].mxu1 }
 0x31a   :  { %v8547_v34 = vpop.f32.mrb[41].mxu1  ;;  %10044 = vmatmul.mubr.msk.f32.gmra.mrb[146].mxu1 %vm993_vm14, %v2929_v9 }
 0x31b   :  { %v13935_v54 = vadd.f32 %v8547_v34, %v8546_v46  ;;  %11259 = vmatpush3.bf16.msra.mxu1 %v13165_v25  ;;  %10046 = vmatprep.mubr.msk.f32.mxu1 %vm11976_vm3, %v16184_v41  ;;  %v2935_v46 = vsel %vm2908_vm1, 1.0, %v16184_v41 }
 0x31c   :  { %11261 = vmatprep.subr.bf16.mxu1 %v13167_v18 }
 0x31d   :  { %v8549_v1 = vpop.f32.mrb[42].mxu1 }
 0x31e   :  { %v8550_v17 = vpop.f32.mrb[43].mxu1  ;;  %10047 = vmatmul.mubr.msk.f32.gmra.mrb[148].mxu1 %vm993_vm14, %v2932_v16 }
 0x31f   :  { %v13945_v58 = vadd.f32 %v8550_v17, %v8549_v1  ;;  %11263 = vmatpush3.bf16.msra.mxu1 %v13169_v22  ;;  %10049 = vmatprep.mubr.msk.f32.mxu1 %vm11976_vm3, %v16184_v41  ;;  %v2938_v1 = vsel %vm2911_vm4, 1.0, %v16184_v41 }
 0x320   :  { %11265 = vmatprep.subr.bf16.mxu1 %v13171_v31 }
 0x321   :  { %v8552_v2 = vpop.f32.mrb[44].mxu1 }
 0x322   :  { %v8553_v9 = vpop.f32.mrb[45].mxu1  ;;  %10050 = vmatmul.mubr.msk.f32.gmra.mrb[150].mxu1 %vm993_vm14, %v2935_v46 }
 0x323   :  { %v13955_v28 = vadd.f32 %v8553_v9, %v8552_v2  ;;  %11267 = vmatpush3.bf16.msra.mxu1 %v13173_v38  ;;  %10052 = vmatprep.mubr.msk.f32.mxu1 %vm11976_vm3, %v16184_v41  ;;  %v2941_v2 = vsel %vm2914_vm6, 1.0, %v16184_v41 }
 0x324   :  { %11269 = vmatprep.subr.bf16.mxu1 %v13175_v52 }
 0x325   :  { %v8555_v34 = vpop.f32.mrb[46].mxu1 }
 0x326   :  { %v8556_v16 = vpop.f32.mrb[47].mxu1  ;;  %10053 = vmatmul.mubr.msk.f32.gmra.mrb[152].mxu1 %vm993_vm14, %v2938_v1 }
 0x327   :  { %v13965_v47 = vadd.f32 %v8556_v16, %v8555_v34  ;;  %11271 = vmatpush3.bf16.msra.mxu1 %v13178_v37  ;;  %10055 = vmatprep.mubr.msk.f32.mxu1 %vm11976_vm3, %v16184_v41  ;;  %v2944_v34 = vsel %vm2917_vm8, 1.0, %v16184_v41 }
 0x328   :  { %11273 = vmatprep.subr.bf16.mxu1 %v13180_v59 }
 0x329   :  { %v8558_v17 = vpop.f32.mrb[48].mxu1 }
 0x32a   :  { %v8559_v46 = vpop.f32.mrb[49].mxu1  ;;  %10056 = vmatmul.mubr.msk.f32.gmra.mrb[154].mxu1 %vm993_vm14, %v2941_v2 }
 0x32b   :  { %v13975_v55 = vadd.f32 %v8559_v46, %v8558_v17  ;;  %11275 = vmatpush3.bf16.msra.mxu1 %v13182_v3  ;;  %10058 = vmatprep.mubr.msk.f32.mxu1 %vm11976_vm3, %v16184_v41  ;;  %v2947_v17 = vsel %vm2920_vm9, 1.0, %v16184_v41  ;;  %v1246_v46 = vld [vmem:[%s16114_s4 + $0x8] sm:$0xff] }
 0x32c   :  { %11277 = vmatprep.subr.bf16.mxu1 %v13184_v11 }
 0x32d   :  { %v8561_v9 = vpop.f32.mrb[50].mxu1 }
 0x32e   :  { %v8562_v1 = vpop.f32.mrb[51].mxu1  ;;  %10059 = vmatmul.mubr.msk.f32.gmra.mrb[156].mxu1 %vm993_vm14, %v2944_v34 }
 0x32f   :  { %v13985_v21 = vadd.f32 %v8562_v1, %v8561_v9  ;;  %11279 = vmatpush3.bf16.msra.mxu1 %v13187_v19  ;;  %10061 = vmatprep.mubr.msk.f32.mxu1 %vm11976_vm3, %v16184_v41  ;;  %v2950_v1 = vsel %vm2923_vm10, 1.0, %v16184_v41 }
 0x330   :  { %11281 = vmatprep.subr.bf16.mxu1 %v13189_v27 }
 0x331   :  { %v8564_v16 = vpop.f32.mrb[52].mxu1 }
 0x332   :  { %v8565_v2 = vpop.f32.mrb[53].mxu1  ;;  %10062 = vmatmul.mubr.msk.f32.gmra.mrb[158].mxu1 %vm993_vm14, %v2947_v17  ;;  %v11064_v17 = vpack.c.bf16 %v1246_v46, %v1245_v5  ;;  %v14022_v5 = vpop.permute.xlu0 %3367 }
 0x333   :  { %v14001_v9 = vadd.f32 %v8565_v2, %v8564_v16  ;;  %11283 = vmatpush3.bf16.msra.mxu1 %v13191_v35  ;;  %10064 = vmatprep.mubr.msk.f32.mxu1 %vm11976_vm3, %v16184_v41  ;;  %v1247_v16 = vld [vmem:[%s16114_s4 + $0x10] sm:$0xff]  ;;  %v1248_v2 = vld [vmem:[%s16114_s4 + $0x18] sm:$0xff]  ;;  %vm3394_vm13 = vcmp.eq.s32.totalorder %v16183_v62, %v14022_v5  ;;  %vm3393_vm15 = vcmp.eq.s32.totalorder %v16180_v24, %v14022_v5 }
 0x334   :  { %11312 = vmatprep.subr.bf16.mxu1 %v13159_v61 }
 0x335   :  { %v1547_v34 = vpop.f32.mrb[54].mxu1 }
 0x336   :  { %v1548_v4 = vadd.f32 %v13917_v63, %v1547_v34  ;;  %v9723_v57 = vpop.f32.mrb[55].mxu1  ;;  %10065 = vmatmul.mubr.msk.f32.gmra.mrb[160].mxu1 %vm993_vm14, %v2950_v1  ;;  %v11067_v63 = vpack.c.bf16 %v1248_v2, %v1247_v16  ;;  %v1250_v1 = vld [vmem:[%s16114_s4 + $0x28] sm:$0xff] }
 0x337   :  { %8050 = vmatprep.mubr.msk.f32.mxu1 %vm3391_vm11, %v16182_v53 }
 0x338   :  { %9765 = vmatmul.mubr.msk.f32.vlgmr.msra.gmra.mrb[86].mxu0 %vm521_vm5, %v1548_v4  ;;  %v1249_v4 = vld [vmem:[%s16114_s4 + $0x20] sm:$0xff] }
 0x339   :  { %v1552_v57 = vpop.f32.mrb[56].mxu1  ;;  %9767 = vmatprep.mubr.msk.f32.mxu0 %vm11976_vm3, %v16184_v41  ;;  %11065 = vmatpush3.bf16.msra.mxu0 %v11064_v17  ;;  %v11070_v16 = vpack.c.bf16 %v1250_v1, %v1249_v4 }
 0x33a   :  { %v1553_v46 = vadd.f32 %v13925_v29, %v1552_v57  ;;  %v9726_v34 = vpop.f32.mrb[57].mxu1  ;;  %8051 = vmatmul.mubr.msk.f32.vlgmr.msra.gmra.mrb[162].mxu1 %vm3390_vm12, %v16182_v53  ;;  %11066 = vmatprep.subr.bf16.mxu0 %v16181_v33  ;;  %v14043_v29 = vpop.permute.xlu1 %3370 }
 0x33b   :  { %11314 = vmatpush3.bf16.msra.mxu1 %v13161_v8  ;;  %8052 = vmatprep.mubr.msk.f32.mxu1 %vm3394_vm13, %v16182_v53  ;;  %vm3397_vm0 = vcmp.eq.s32.totalorder %v16183_v62, %v14043_v29  ;;  %v1252_v34 = vld [vmem:[%s16114_s4 + $0x38] sm:$0xff]  ;;  %vm3396_vm1 = vcmp.eq.s32.totalorder %v16180_v24, %v14043_v29 }
 0x33c   :  { %11316 = vmatprep.subr.bf16.mxu1 %v13163_v15  ;;  %9768 = vmatmul.mubr.msk.f32.gmra.mrb[88].mxu0 %vm521_vm5, %v1553_v46  ;;  %v1251_v46 = vld [vmem:[%s16114_s4 + $0x30] sm:$0xff] }
 0x33d   :  { %v1557_v17 = vpop.f32.mrb[58].mxu1  ;;  %9770 = vmatprep.mubr.msk.f32.mxu0 %vm11976_vm3, %v16184_v41  ;;  %11068 = vmatpush3.bf16.msra.mxu0 %v11067_v63  ;;  %v11073_v4 = vpack.c.bf16 %v1252_v34, %v1251_v46 }
 0x33e   :  { %v1558_v2 = vadd.f32 %v13935_v54, %v1557_v17  ;;  %v9729_v57 = vpop.f32.mrb[59].mxu1  ;;  %8053 = vmatmul.mubr.msk.f32.gmra.mrb[164].mxu1 %vm3393_vm15, %v16182_v53  ;;  %11069 = vmatprep.subr.bf16.mxu0 %v16181_v33  ;;  %v14064_v54 = vpop.permute.xlu0 %3373 }
 0x33f   :  { %11318 = vmatpush3.bf16.msra.mxu1 %v13165_v25  ;;  %8054 = vmatprep.mubr.msk.f32.mxu1 %vm3397_vm0, %v16182_v53  ;;  %vm3400_vm4 = vcmp.eq.s32.totalorder %v16183_v62, %v14064_v54  ;;  %vm3399_vm6 = vcmp.eq.s32.totalorder %v16180_v24, %v14064_v54 }
 0x340   :  { %11320 = vmatprep.subr.bf16.mxu1 %v13167_v18  ;;  %9771 = vmatmul.mubr.msk.f32.gmra.mrb[90].mxu0 %vm521_vm5, %v1558_v2 }
 0x341   :  { %v1562_v63 = vpop.f32.mrb[60].mxu1  ;;  %9773 = vmatprep.mubr.msk.f32.mxu0 %vm11976_vm3, %v16184_v41  ;;  %11071 = vmatpush3.bf16.msra.mxu0 %v11070_v16  ;;  %v14079_v16 = vpop.permute.xlu1 %3376 }
 0x342   :  { %v1563_v1 = vadd.f32 %v13945_v58, %v1562_v63  ;;  %v9732_v17 = vpop.f32.mrb[61].mxu1  ;;  %8055 = vmatmul.mubr.msk.f32.gmra.mrb[166].mxu1 %vm3396_vm1, %v16182_v53  ;;  %11072 = vmatprep.subr.bf16.mxu0 %v16181_v33  ;;  %16186 = vst [vmem:[#allocation9_spill] sm:$0xff] %v14079_v16  ;;  %vm3403_vm8 = vcmp.eq.s32.totalorder %v16183_v62, %v14079_v16  ;;  %v14094_v46 = vpop.permute.xlu0 %3379 }
 0x343   :  { %11322 = vmatpush3.bf16.msra.mxu1 %v13169_v22  ;;  %8056 = vmatprep.mubr.msk.f32.mxu1 %vm3400_vm4, %v16182_v53  ;;  %16187 = vst [vmem:[#allocation7_spill] sm:$0xff] %v14094_v46  ;;  %vm3402_vm9 = vcmp.eq.s32.totalorder %v16180_v24, %v14079_v16  ;;  %vm3406_vm10 = vcmp.eq.s32.totalorder %v16183_v62, %v14094_v46 }
 0x344   :  { %11324 = vmatprep.subr.bf16.mxu1 %v13171_v31  ;;  %9774 = vmatmul.mubr.msk.f32.gmra.mrb[92].mxu0 %vm521_vm5, %v1563_v1  ;;  %vm3405_vm11 = vcmp.eq.s32.totalorder %v16180_v24, %v14094_v46 }
 0x345   :  { %v1567_v2 = vpop.f32.mrb[62].mxu1  ;;  %9776 = vmatprep.mubr.msk.f32.mxu0 %vm11976_vm3, %v16184_v41  ;;  %11074 = vmatpush3.bf16.msra.mxu0 %v11073_v4  ;;  %v14108_v4 = vpop.permute.xlu1 %3382 }
 0x346   :  { %v1568_v58 = vadd.f32 %v13955_v28, %v1567_v2  ;;  %v9735_v57 = vpop.f32.mrb[63].mxu1  ;;  %8057 = vmatmul.mubr.msk.f32.gmra.mrb[168].mxu1 %vm3399_vm6, %v16182_v53  ;;  %11122 = vmatprep.subr.bf16.mxu0 %v16181_v33  ;;  %16188 = vst [vmem:[#allocation6_spill] sm:$0xff] %v14108_v4  ;;  %vm3409_vm12 = vcmp.eq.s32.totalorder %v16183_v62, %v14108_v4  ;;  %v14122_v2 = vpop.permute.xlu0 %3385 }
 0x347   :  { %11326 = vmatpush3.bf16.msra.mxu1 %v13173_v38  ;;  %8058 = vmatprep.mubr.msk.f32.mxu1 %vm3403_vm8, %v16182_v53  ;;  %16189 = vst [vmem:[#allocation11_spill] sm:$0xff] %v14122_v2  ;;  %vm3408_vm13 = vcmp.eq.s32.totalorder %v16180_v24, %v14108_v4  ;;  %vm3412_vm15 = vcmp.eq.s32.totalorder %v16183_v62, %v14122_v2 }
 0x348   :  { %11328 = vmatprep.subr.bf16.mxu1 %v13175_v52  ;;  %9777 = vmatmul.mubr.msk.f32.gmra.mrb[94].mxu0 %vm521_vm5, %v1568_v58  ;;  %vm3411_vm0 = vcmp.eq.s32.totalorder %v16180_v24, %v14122_v2 }
 0x349   :  { %v1572_v34 = vpop.f32.mrb[64].mxu1  ;;  %9779 = vmatprep.mubr.msk.f32.mxu0 %vm11976_vm3, %v16184_v41 }
 0x34a   :  { %v1573_v28 = vadd.f32 %v13965_v47, %v1572_v34  ;;  %v9738_v63 = vpop.f32.mrb[65].mxu1  ;;  %8059 = vmatmul.mubr.msk.f32.gmra.mrb[170].mxu1 %vm3402_vm9, %v16182_v53  ;;  %v14136_v34 = vpop.permute.xlu1 %3388 }
 0x34b   :  { %11330 = vmatpush3.bf16.msra.mxu1 %v13178_v37  ;;  %8060 = vmatprep.mubr.msk.f32.mxu1 %vm3406_vm10, %v16182_v53  ;;  %16190 = vst [vmem:[#allocation12_spill] sm:$0xff] %v14136_v34  ;;  %vm3415_vm1 = vcmp.eq.s32.totalorder %v16183_v62, %v14136_v34  ;;  %vm3414_vm4 = vcmp.eq.s32.totalorder %v16180_v24, %v14136_v34 }
 0x34c   :  { %11332 = vmatprep.subr.bf16.mxu1 %v13180_v59  ;;  %9780 = vmatmul.mubr.msk.f32.gmra.mrb[96].mxu0 %vm521_vm5, %v1573_v28 }
 0x34d   :  { %v1577_v1 = vpop.f32.mrb[66].mxu1  ;;  %9782 = vmatprep.mubr.msk.f32.mxu0 %vm11976_vm3, %v16184_v41 }
 0x34e   :  { %v1578_v47 = vadd.f32 %v13975_v55, %v1577_v1  ;;  %v9741_v17 = vpop.f32.mrb[67].mxu1  ;;  %8061 = vmatmul.mubr.msk.f32.gmra.mrb[172].mxu1 %vm3405_vm11, %v16182_v53  ;;  %v7916_v1 = vld [vmem:[%s16114_s4 + $0x80] sm:$0xff] }
 0x34f   :  { %11334 = vmatpush3.bf16.msra.mxu1 %v13182_v3  ;;  %8062 = vmatprep.mubr.msk.f32.mxu1 %vm3409_vm12, %v16182_v53 }
 0x350   :  { %11336 = vmatprep.subr.bf16.mxu1 %v13184_v11  ;;  %9783 = vmatmul.mubr.msk.f32.gmra.mrb[98].mxu0 %vm521_vm5, %v1578_v47  ;;  %v7917_v47 = vld [vmem:[%s16114_s4 + $0x88] sm:$0xff] }
 0x351   :  { %v1582_v58 = vpop.f32.mrb[68].mxu1  ;;  %9785 = vmatprep.mubr.msk.f32.mxu0 %vm11976_vm3, %v16184_v41 }
 0x352   :  { %v1583_v55 = vadd.f32 %v13985_v21, %v1582_v58  ;;  %v9744_v57 = vpop.f32.mrb[69].mxu1  ;;  %8063 = vmatmul.mubr.msk.f32.gmra.mrb[174].mxu1 %vm3408_vm13, %v16182_v53  ;;  %v11123_v58 = vpack.c.bf16 %v7917_v47, %v7916_v1 }
 0x353   :  { %11338 = vmatpush3.bf16.msra.mxu1 %v13187_v19  ;;  %8064 = vmatprep.mubr.msk.f32.mxu1 %vm3412_vm15, %v16182_v53  ;;  %v7918_v57 = vld [vmem:[%s16114_s4 + $0x90] sm:$0xff] }
 0x354   :  { %11340 = vmatprep.subr.bf16.mxu1 %v13189_v27  ;;  %9786 = vmatmul.mubr.msk.f32.gmra.mrb[100].mxu0 %vm521_vm5, %v1583_v55 }
 0x355   :  { %v1587_v28 = vpop.f32.mrb[70].mxu1  ;;  %9788 = vmatprep.mubr.msk.f32.mxu0 %vm11976_vm3, %v16184_v41 }
 0x356   :  { %v1588_v21 = vadd.f32 %v14001_v9, %v1587_v28  ;;  %v9747_v63 = vpop.f32.mrb[71].mxu1  ;;  %8065 = vmatmul.mubr.msk.f32.gmra.mrb[176].mxu1 %vm3411_vm0, %v16182_v53  ;;  %v14156_v9 = vpop.permute.xlu0 %3857  ;;  %v7919_v28 = vld [vmem:[%s16114_s4 + $0x98] sm:$0xff] }
 0x357   :  { %11342 = vmatpush3.bf16.msra.mxu1 %v13191_v35  ;;  %8066 = vmatprep.mubr.msk.f32.mxu1 %vm3415_vm1, %v16182_v53  ;;  %vm3884_vm6 = vcmp.eq.s32.totalorder %v16183_v62, %v14156_v9  ;;  %vm3883_vm8 = vcmp.eq.s32.totalorder %v16180_v24, %v14156_v9  ;;  %v14178_v63 = vpop.permute.xlu1 %3860  ;;  %v11126_v47 = vpack.c.bf16 %v7919_v28, %v7918_v57 }
 0x358   :  { %9789 = vmatmul.mubr.msk.f32.gmra.mrb[102].mxu0 %vm521_vm5, %v1588_v21  ;;  %11343 = vmatprep.subr.bf16.mxu1 %v16181_v33  ;;  %vm3887_vm9 = vcmp.eq.s32.totalorder %v16183_v62, %v14178_v63  ;;  %vm3886_vm10 = vcmp.eq.s32.totalorder %v16180_v24, %v14178_v63 }
 0x359   :  { %v8653_v17 = vpop.f32.mrb[72].mxu1  ;;  %9807 = vmatprep.mubr.msk.f32.mxu0 %vm11976_vm3, %v16184_v41 }
 0x35a   :  { %v8654_v55 = vpop.f32.mrb[73].mxu1  ;;  %8067 = vmatmul.mubr.msk.f32.gmra.mrb[178].mxu1 %vm3414_vm4, %v16182_v53 }
 0x35b   :  { %v14171_v21 = vadd.f32 %v8654_v55, %v8653_v17  ;;  %8104 = vmatprep.mubr.msk.f32.mxu1 %vm3884_vm6, %v16182_v53  ;;  %v7921_v17 = vld [vmem:[%s16114_s4 + $0xa8] sm:$0xff] }
 0x35c   :  { %9808 = vmatmul.mubr.msk.f32.vlgmr.msra.gmra.mrb[86].mxu0 %vm521_vm5, %v13808_v30  ;;  %v7920_v30 = vld [vmem:[%s16114_s4 + $0xa0] sm:$0xff] }
 0x35d   :  { %v8656_v1 = vpop.f32.mrb[74].mxu1  ;;  %9810 = vmatprep.mubr.msk.f32.mxu0 %vm11976_vm3, %v16184_v41  ;;  %11124 = vmatpush3.bf16.msra.mxu0 %v11123_v58  ;;  %v14199_v58 = vpop.permute.xlu0 %3863 }
 0x35e   :  { %v8657_v34 = vpop.f32.mrb[75].mxu1  ;;  %8105 = vmatmul.mubr.msk.f32.vlgmr.msra.gmra.mrb[180].mxu1 %vm3883_vm8, %v16182_v53  ;;  %11125 = vmatprep.subr.bf16.mxu0 %v16181_v33  ;;  %vm3890_vm11 = vcmp.eq.s32.totalorder %v16183_v62, %v14199_v58  ;;  %vm3889_vm12 = vcmp.eq.s32.totalorder %v16180_v24, %v14199_v58 }
 0x35f   :  { %v14192_v55 = vadd.f32 %v8657_v34, %v8656_v1  ;;  %11345 = vmatpush3.bf16.msra.mxu1 %v13193_v43  ;;  %8106 = vmatprep.mubr.msk.f32.mxu1 %vm3887_vm9, %v16182_v53  ;;  %v11129_v34 = vpack.c.bf16 %v7921_v17, %v7920_v30  ;;  %v7923_v1 = vld [vmem:[%s16114_s4 + $0xb8] sm:$0xff] }
 0x360   :  { %9811 = vmatmul.mubr.msk.f32.gmra.mrb[88].mxu0 %vm521_vm5, %v13816_v39  ;;  %11346 = vmatprep.subr.bf16.mxu1 %v16181_v33  ;;  %v7922_v39 = vld [vmem:[%s16114_s4 + $0xb0] sm:$0xff] }
 0x361   :  { %v8659_v57 = vpop.f32.mrb[76].mxu1  ;;  %9813 = vmatprep.mubr.msk.f32.mxu0 %vm11976_vm3, %v16184_v41  ;;  %11127 = vmatpush3.bf16.msra.mxu0 %v11126_v47  ;;  %v14222_v47 = vpop.permute.xlu1 %3866  ;;  %v11132_v17 = vpack.c.bf16 %v7923_v1, %v7922_v39 }
 0x362   :  { %v8660_v28 = vpop.f32.mrb[77].mxu1  ;;  %8107 = vmatmul.mubr.msk.f32.gmra.mrb[182].mxu1 %vm3886_vm10, %v16182_v53  ;;  %11128 = vmatprep.subr.bf16.mxu0 %v16181_v33  ;;  %vm3893_vm13 = vcmp.eq.s32.totalorder %v16183_v62, %v14222_v47  ;;  %vm3892_vm15 = vcmp.eq.s32.totalorder %v16180_v24, %v14222_v47 }
 0x363   :  { %v14215_v2 = vadd.f32 %v8660_v28, %v8659_v57  ;;  %11348 = vmatpush3.bf16.msra.mxu1 %v13196_v12  ;;  %8108 = vmatprep.mubr.msk.f32.mxu1 %vm3890_vm11, %v16182_v53 }
 0x364   :  { %9814 = vmatmul.mubr.msk.f32.gmra.mrb[90].mxu0 %vm521_vm5, %v13829_v20  ;;  %11349 = vmatprep.subr.bf16.mxu1 %v16181_v33 }
 0x365   :  { %v8662_v30 = vpop.f32.mrb[78].mxu1  ;;  %9816 = vmatprep.mubr.msk.f32.mxu0 %vm11976_vm3, %v16184_v41  ;;  %11130 = vmatpush3.bf16.msra.mxu0 %v11129_v34  ;;  %v14239_v34 = vpop.permute.xlu0 %3869 }
 0x366   :  { %v8663_v57 = vpop.f32.mrb[79].mxu1  ;;  %8109 = vmatmul.mubr.msk.f32.gmra.mrb[184].mxu1 %vm3889_vm12, %v16182_v53  ;;  %11131 = vmatprep.subr.bf16.mxu0 %v16181_v33  ;;  %vm3896_vm0 = vcmp.eq.s32.totalorder %v16183_v62, %v14239_v34  ;;  %v14256_v1 = vpop.permute.xlu1 %3872  ;;  %vm3895_vm1 = vcmp.eq.s32.totalorder %v16180_v24, %v14239_v34 }
 0x367   :  { %v14232_v20 = vadd.f32 %v8663_v57, %v8662_v30  ;;  %11351 = vmatpush3.bf16.msra.mxu1 %v13198_v51  ;;  %8110 = vmatprep.mubr.msk.f32.mxu1 %vm3893_vm13, %v16182_v53  ;;  %vm3899_vm4 = vcmp.eq.s32.totalorder %v16183_v62, %v14256_v1  ;;  %vm3898_vm6 = vcmp.eq.s32.totalorder %v16180_v24, %v14256_v1 }
 0x368   :  { %9817 = vmatmul.mubr.msk.f32.gmra.mrb[92].mxu0 %vm521_vm5, %v13842_v13  ;;  %11352 = vmatprep.subr.bf16.mxu1 %v16181_v33 }
 0x369   :  { %v8665_v28 = vpop.f32.mrb[80].mxu1  ;;  %9819 = vmatprep.mubr.msk.f32.mxu0 %vm11976_vm3, %v16184_v41  ;;  %11133 = vmatpush3.bf16.msra.mxu0 %v11132_v17 }
 0x36a   :  { %v8666_v39 = vpop.f32.mrb[81].mxu1  ;;  %8111 = vmatmul.mubr.msk.f32.gmra.mrb[186].mxu1 %vm3892_vm15, %v16182_v53  ;;  %11166 = vmatprep.subr.bf16.mxu0 %v16181_v33  ;;  %vm3885_vm15 = vcmp.eq.s32.totalorder %v13295_v26, %v14156_v9 }
 0x36b   :  { %v14249_v13 = vadd.f32 %v8666_v39, %v8665_v28  ;;  %11354 = vmatpush3.bf16.msra.mxu1 %v13200_v60  ;;  %8112 = vmatprep.mubr.msk.f32.mxu1 %vm3896_vm0, %v16182_v53  ;;  %vm3888_vm0 = vcmp.eq.s32.totalorder %v13295_v26, %v14178_v63 }
 0x36c   :  { %9820 = vmatmul.mubr.msk.f32.gmra.mrb[94].mxu0 %vm521_vm5, %v13855_v36  ;;  %11355 = vmatprep.subr.bf16.mxu1 %v16181_v33  ;;  %v14272_v36 = vpop.permute.xlu0 %3875 }
 0x36d   :  { %v8668_v30 = vpop.f32.mrb[82].mxu1  ;;  %9822 = vmatprep.mubr.msk.f32.mxu0 %vm11976_vm3, %v16184_v41  ;;  %vm3902_vm8 = vcmp.eq.s32.totalorder %v16183_v62, %v14272_v36  ;;  %vm3901_vm9 = vcmp.eq.s32.totalorder %v16180_v24, %v14272_v36 }
 0x36e   :  { %v8669_v17 = vpop.f32.mrb[83].mxu1  ;;  %8113 = vmatmul.mubr.msk.f32.gmra.mrb[188].mxu1 %vm3895_vm1, %v16182_v53  ;;  %vm3891_vm1 = vcmp.eq.s32.totalorder %v13295_v26, %v14199_v58 }
 0x36f   :  { %v14265_v57 = vadd.f32 %v8669_v17, %v8668_v30  ;;  %11357 = vmatpush3.bf16.msra.mxu1 %v13202_v6  ;;  %8114 = vmatprep.mubr.msk.f32.mxu1 %vm3899_vm4, %v16182_v53  ;;  %v3918_v58 = vsel %vm3891_vm1, 1.0, %v16184_v41  ;;  %vm3894_vm4 = vcmp.eq.s32.totalorder %v13295_v26, %v14222_v47 }
 0x370   :  { %9823 = vmatmul.mubr.msk.f32.gmra.mrb[96].mxu0 %vm521_vm5, %v13868_v32  ;;  %10222 = vmatprep.subr.mxu1 %v16184_v41  ;;  %v14289_v32 = vpop.permute.xlu1 %3878  ;;  %v3921_v47 = vsel %vm3894_vm4, 1.0, %v16184_v41  ;;  %vm2412_vm4 = vcmp.eq.s32.totalorder %v13295_v26, %v13716_v56 }
 0x371   :  { %v8671_v28 = vpop.f32.mrb[84].mxu1  ;;  %9825 = vmatprep.mubr.msk.f32.mxu0 %vm11976_vm3, %v16184_v41  ;;  %vm3905_vm10 = vcmp.eq.s32.totalorder %v16183_v62, %v14289_v32  ;;  %vm3904_vm11 = vcmp.eq.s32.totalorder %v16180_v24, %v14289_v32 }
 0x372   :  { %v8672_v39 = vpop.f32.mrb[85].mxu1  ;;  %8115 = vmatmul.mubr.msk.f32.gmra.mrb[190].mxu1 %vm3898_vm6, %v16182_v53  ;;  %vm3897_vm6 = vcmp.eq.s32.totalorder %v13295_v26, %v14239_v34 }
 0x373   :  { %v14281_v30 = vadd.f32 %v8672_v39, %v8671_v28  ;;  %10223 = vmatpush3.msk.msra.mxu1 %vm1021_vm2, %v13271_v0  ;;  %8116 = vmatprep.mubr.msk.f32.mxu1 %vm3902_vm8, %v16182_v53  ;;  %v3924_v34 = vsel %vm3897_vm6, 1.0, %v16184_v41  ;;  %vm3900_vm8 = vcmp.eq.s32.totalorder %v13295_v26, %v14256_v1 }
 0x374   :  { %11371 = vmatprep.subr.bf16.mxu1 %v13159_v61  ;;  %9826 = vmatmul.mubr.msk.f32.gmra.mrb[98].mxu0 %vm521_vm5, %v13881_v48  ;;  %v14303_v48 = vpop.permute.xlu0 %3881 }
 0x375   :  { %v8674_v17 = vpop.f32.mrb[86].mxu1  ;;  %9828 = vmatprep.mubr.msk.f32.mxu0 %vm11976_vm3, %v16184_v41  ;;  %vm3908_vm12 = vcmp.eq.s32.totalorder %v16183_v62, %v14303_v48  ;;  %vm3907_vm13 = vcmp.eq.s32.totalorder %v16180_v24, %v14303_v48 }
 0x376   :  { %v8675_v28 = vpop.f32.mrb[87].mxu1  ;;  %8117 = vmatmul.mubr.msk.f32.gmra.mrb[192].mxu1 %vm3901_vm9, %v16182_v53  ;;  %vm3903_vm9 = vcmp.eq.s32.totalorder %v13295_v26, %v14272_v36 }
 0x377   :  { %v14298_v39 = vadd.f32 %v8675_v28, %v8674_v17  ;;  %8118 = vmatprep.mubr.msk.f32.mxu1 %vm3905_vm10, %v16182_v53  ;;  %vm3906_vm10 = vcmp.eq.s32.totalorder %v13295_v26, %v14289_v32 }
 0x378   :  { %9829 = vmatmul.mubr.msk.f32.gmra.mrb[100].mxu0 %vm521_vm5, %v13895_v40 }
 0x379   :  { %v8677_v4 = vpop.f32.mrb[88].mxu1  ;;  %9831 = vmatprep.mubr.msk.f32.mxu0 %vm11976_vm3, %v16184_v41 }
 0x37a   :  { %v8678_v46 = vpop.f32.mrb[89].mxu1  ;;  %8119 = vmatmul.mubr.msk.f32.gmra.mrb[194].mxu1 %vm3904_vm11, %v16182_v53  ;;  %vm3909_vm11 = vcmp.eq.s32.totalorder %v13295_v26, %v14303_v48 }
 0x37b   :  { %v14312_v17 = vadd.f32 %v8678_v46, %v8677_v4  ;;  %8120 = vmatprep.mubr.msk.f32.mxu1 %vm3908_vm12, %v16182_v53  ;;  %vm2406_vm12 = vcmp.eq.s32.totalorder %v13295_v26, %v13695_v44 }
 0x37c   :  { %9832 = vmatmul.mubr.msk.f32.gmra.mrb[102].mxu0 %vm521_vm5, %v13906_v42  ;;  %v3912_v42 = vsel %vm3885_vm15, 1.0, %v16184_v41  ;;  %v2433_v44 = vsel %vm2406_vm12, 1.0, %v16184_v41  ;;  %vm2409_vm15 = vcmp.eq.s32.totalorder %v13295_v26, %v13704_v14  ;;  %vm2418_vm12 = vcmp.eq.s32.totalorder %v13295_v26, %v13740_v50 }
 0x37d   :  { %v2168_v40 = vpop.f32.mrb[90].mxu1  ;;  %9899 = vmatprep.mubr.msk.f32.mxu0 %vm11976_vm3, %v16184_v41  ;;  %v2436_v14 = vsel %vm2409_vm15, 1.0, %v16184_v41 }
 0x37e   :  { %v2169_v28 = vadd.f32 %v14171_v21, %v2168_v40  ;;  %v9858_v16 = vpop.f32.mrb[91].mxu1  ;;  %8121 = vmatmul.mubr.msk.f32.gmra.mrb[196].mxu1 %vm3907_vm13, %v16182_v53  ;;  %v3915_v21 = vsel %vm3888_vm0, 1.0, %v16184_v41 }
 0x37f   :  { %10224 = vmatprep.mubr.msk.f32.mxu1 %vm11976_vm3, %v16184_v41 }
 0x380   :  { %9900 = vmatmul.mubr.msk.f32.vlgmr.msra.gmra.mrb[86].mxu0 %vm521_vm5, %v2169_v28 }
 0x381   :  { %11168 = vmatpush3.bf16.msra.mxu0 %v13193_v43  ;;  %v2173_v46 = vpop.f32.mrb[92].mxu1  ;;  %9902 = vmatprep.mubr.msk.f32.mxu0 %vm11976_vm3, %v16184_v41 }
 0x382   :  { %v2174_v16 = vadd.f32 %v14192_v55, %v2173_v46  ;;  %v9861_v4 = vpop.f32.mrb[93].mxu1  ;;  %10225 = vmatmul.mubr.msk.f32.vlgmr.msra.gmra.mrb[198].mxu1 %vm993_vm14, %v3912_v42  ;;  %11169 = vmatprep.subr.bf16.mxu0 %v16181_v33 }
 0x383   :  { %11373 = vmatpush3.bf16.msra.mxu1 %v13161_v8  ;;  %10227 = vmatprep.mubr.msk.f32.mxu1 %vm11976_vm3, %v16184_v41 }
 0x384   :  { %11375 = vmatprep.subr.bf16.mxu1 %v13163_v15  ;;  %9903 = vmatmul.mubr.msk.f32.gmra.mrb[88].mxu0 %vm521_vm5, %v2174_v16 }
 0x385   :  { %11171 = vmatpush3.bf16.msra.mxu0 %v13196_v12  ;;  %v2178_v9 = vpop.f32.mrb[94].mxu1  ;;  %9905 = vmatprep.mubr.msk.f32.mxu0 %vm11976_vm3, %v16184_v41 }
 0x386   :  { %v2179_v63 = vadd.f32 %v14215_v2, %v2178_v9  ;;  %v9864_v55 = vpop.f32.mrb[95].mxu1  ;;  %10228 = vmatmul.mubr.msk.f32.gmra.mrb[200].mxu1 %vm993_vm14, %v3915_v21  ;;  %11172 = vmatprep.subr.bf16.mxu0 %v16181_v33 }
 0x387   :  { %11377 = vmatpush3.bf16.msra.mxu1 %v13165_v25  ;;  %10230 = vmatprep.mubr.msk.f32.mxu1 %vm11976_vm3, %v16184_v41  ;;  %v3930_v55 = vsel %vm3903_vm9, 1.0, %v16184_v41  ;;  %vm2415_vm9 = vcmp.eq.s32.totalorder %v13295_v26, %v13728_v45 }
 0x388   :  { %11379 = vmatprep.subr.bf16.mxu1 %v13167_v18  ;;  %9906 = vmatmul.mubr.msk.f32.gmra.mrb[90].mxu0 %vm521_vm5, %v2179_v63 }
 0x389   :  { %11174 = vmatpush3.bf16.msra.mxu0 %v13198_v51  ;;  %v2183_v40 = vpop.f32.mrb[96].mxu1  ;;  %9908 = vmatprep.mubr.msk.f32.mxu0 %vm11976_vm3, %v16184_v41 }
 0x38a   :  { %v2184_v2 = vadd.f32 %v14232_v20, %v2183_v40  ;;  %v9867_v28 = vpop.f32.mrb[97].mxu1  ;;  %10231 = vmatmul.mubr.msk.f32.gmra.mrb[202].mxu1 %vm993_vm14, %v3918_v58  ;;  %11175 = vmatprep.subr.bf16.mxu0 %v16181_v33  ;;  %v3933_v58 = vsel %vm3906_vm10, 1.0, %v16184_v41 }
 0x38b   :  { %11381 = vmatpush3.bf16.msra.mxu1 %v13169_v22  ;;  %10233 = vmatprep.mubr.msk.f32.mxu1 %vm11976_vm3, %v16184_v41 }
 0x38c   :  { %11383 = vmatprep.subr.bf16.mxu1 %v13171_v31  ;;  %9909 = vmatmul.mubr.msk.f32.gmra.mrb[92].mxu0 %vm521_vm5, %v2184_v2  ;;  %v14439_v2 = vpop.permute.xlu1 %4350 }
 0x38d   :  { %11177 = vmatpush3.bf16.msra.mxu0 %v13200_v60  ;;  %v2188_v42 = vpop.f32.mrb[98].mxu1  ;;  %9911 = vmatprep.mubr.msk.f32.mxu0 %vm11976_vm3, %v16184_v41  ;;  %16191 = vst [vmem:[#allocation13_spill] sm:$0xff] %v14439_v2  ;;  %vm4377_vm13 = vcmp.eq.s32.totalorder %v16183_v62, %v14439_v2  ;;  %vm4376_vm0 = vcmp.eq.s32.totalorder %v16180_v24, %v14439_v2 }
 0x38e   :  { %v2189_v20 = vadd.f32 %v14249_v13, %v2188_v42  ;;  %v9870_v46 = vpop.f32.mrb[99].mxu1  ;;  %10234 = vmatmul.mubr.msk.f32.gmra.mrb[204].mxu1 %vm993_vm14, %v3921_v47  ;;  %11178 = vmatprep.subr.bf16.mxu0 %v16181_v33 }
 0x38f   :  { %11385 = vmatpush3.bf16.msra.mxu1 %v13173_v38  ;;  %10236 = vmatprep.mubr.msk.f32.mxu1 %vm11976_vm3, %v16184_v41 }
 0x390   :  { %11387 = vmatprep.subr.bf16.mxu1 %v13175_v52  ;;  %9912 = vmatmul.mubr.msk.f32.gmra.mrb[94].mxu0 %vm521_vm5, %v2189_v20 }
 0x391   :  { %11180 = vmatpush3.bf16.msra.mxu0 %v13202_v6  ;;  %v2193_v16 = vpop.f32.mrb[100].mxu1  ;;  %9914 = vmatprep.mubr.msk.f32.mxu0 %vm11976_vm3, %v16184_v41 }
 0x392   :  { %v2194_v13 = vadd.f32 %v14265_v57, %v2193_v16  ;;  %v9873_v4 = vpop.f32.mrb[101].mxu1  ;;  %10237 = vmatmul.mubr.msk.f32.gmra.mrb[206].mxu1 %vm993_vm14, %v3924_v34  ;;  %9946 = vmatprep.subr.mxu0 %v16184_v41  ;;  %v3927_v57 = vsel %vm3900_vm8, 1.0, %v16184_v41  ;;  %v14472_v16 = vpop.permute.xlu1 %4356 }
 0x393   :  { %11389 = vmatpush3.bf16.msra.mxu1 %v13178_v37  ;;  %10239 = vmatprep.mubr.msk.f32.mxu1 %vm11976_vm3, %v16184_v41  ;;  %16193 = vst [vmem:[#allocation15_spill] sm:$0xff] %v14472_v16  ;;  %vm4383_vm8 = vcmp.eq.s32.totalorder %v16183_v62, %v14472_v16  ;;  %vm4382_vm10 = vcmp.eq.s32.totalorder %v16180_v24, %v14472_v16 }
 0x394   :  { %11391 = vmatprep.subr.bf16.mxu1 %v13180_v59  ;;  %9915 = vmatmul.mubr.msk.f32.gmra.mrb[96].mxu0 %vm521_vm5, %v2194_v13 }
 0x395   :  { %9947 = vmatpush3.msk.msra.mxu0 %vm1021_vm2, %v13271_v0  ;;  %v2198_v1 = vpop.f32.mrb[102].mxu1  ;;  %9917 = vmatprep.mubr.msk.f32.mxu0 %vm11976_vm3, %v16184_v41 }
 0x396   :  { %v2199_v9 = vadd.f32 %v14281_v30, %v2198_v1  ;;  %v9876_v21 = vpop.f32.mrb[103].mxu1  ;;  %10240 = vmatmul.mubr.msk.f32.gmra.mrb[208].mxu1 %vm993_vm14, %v3927_v57  ;;  %11181 = vmatprep.subr.bf16.mxu0 %v16181_v33  ;;  %v14508_v1 = vpop.permute.xlu1 %4362 }
 0x397   :  { %11393 = vmatpush3.bf16.msra.mxu1 %v13182_v3  ;;  %10242 = vmatprep.mubr.msk.f32.mxu1 %vm11976_vm3, %v16184_v41  ;;  %16195 = vst [vmem:[#allocation17_spill] sm:$0xff] %v14508_v1  ;;  %vm4389_vm15 = vcmp.eq.s32.totalorder %v16183_v62, %v14508_v1 }
 0x398   :  { %11395 = vmatprep.subr.bf16.mxu1 %v13184_v11  ;;  %9918 = vmatmul.mubr.msk.f32.gmra.mrb[98].mxu0 %vm521_vm5, %v2199_v9 }
 0x399   :  { %v2203_v63 = vpop.f32.mrb[104].mxu1  ;;  %9920 = vmatprep.mubr.msk.f32.mxu0 %vm11976_vm3, %v16184_v41 }
 0x39a   :  { %v2204_v36 = vadd.f32 %v14298_v39, %v2203_v63  ;;  %v9879_v30 = vpop.f32.mrb[105].mxu1  ;;  %10243 = vmatmul.mubr.msk.f32.gmra.mrb[210].mxu1 %vm993_vm14, %v3930_v55  ;;  %v14544_v63 = vpop.permute.xlu1 %4368 }
 0x39b   :  { %11397 = vmatpush3.bf16.msra.mxu1 %v13187_v19  ;;  %10245 = vmatprep.mubr.msk.f32.mxu1 %vm11976_vm3, %v16184_v41  ;;  %16197 = vst [vmem:[#allocation19_spill] sm:$0xff] %v14544_v63 }
 0x39c   :  { %11399 = vmatprep.subr.bf16.mxu1 %v13189_v27  ;;  %9921 = vmatmul.mubr.msk.f32.gmra.mrb[100].mxu0 %vm521_vm5, %v2204_v36 }
 0x39d   :  { %v2208_v40 = vpop.f32.mrb[106].mxu1  ;;  %9923 = vmatprep.mubr.msk.f32.mxu0 %vm11976_vm3, %v16184_v41 }
 0x39e   :  { %v2209_v32 = vadd.f32 %v14312_v17, %v2208_v40  ;;  %v9882_v39 = vpop.f32.mrb[107].mxu1  ;;  %10246 = vmatmul.mubr.msk.f32.gmra.mrb[212].mxu1 %vm993_vm14, %v3933_v58  ;;  %v3936_v17 = vsel %vm3909_vm11, 1.0, %v16184_v41  ;;  %v16199_v40 = vld [vmem:[#allocation8_spill] sm:$0xff]  ;;  %v14580_v58 = vpop.permute.xlu1 %4374 }
 0x39f   :  { %11401 = vmatpush3.bf16.msra.mxu1 %v13191_v35  ;;  %10248 = vmatprep.mubr.msk.f32.mxu1 %vm11976_vm3, %v16184_v41  ;;  %16200 = vst [vmem:[#allocation8_spill] sm:$0xff] %v14580_v58 }
 0x3a0   :  { %11430 = vmatprep.subr.bf16.mxu1 %v13159_v61  ;;  %9924 = vmatmul.mubr.msk.f32.gmra.mrb[102].mxu0 %vm521_vm5, %v2209_v32  ;;  %v14454_v61 = vpop.permute.xlu0 %4353 }
 0x3a1   :  { %v8749_v48 = vpop.f32.mrb[108].mxu1  ;;  %9948 = vmatprep.mubr.msk.f32.mxu0 %vm11976_vm3, %v16184_v41  ;;  %16192 = vst [vmem:[#allocation14_spill] sm:$0xff] %v14454_v61  ;;  %vm4380_vm1 = vcmp.eq.s32.totalorder %v16183_v62, %v14454_v61  ;;  %vm4379_vm6 = vcmp.eq.s32.totalorder %v16180_v24, %v14454_v61 }
 0x3a2   :  { %v8750_v28 = vpop.f32.mrb[109].mxu1  ;;  %10249 = vmatmul.mubr.msk.f32.gmra.mrb[214].mxu1 %vm993_vm14, %v3936_v17 }
 0x3a3   :  { %v14448_v42 = vadd.f32 %v8750_v28, %v8749_v48  ;;  %8158 = vmatprep.mubr.msk.f32.mxu1 %vm4377_vm13, %v16182_v53 }
 0x3a4   :  { %9949 = vmatmul.mubr.msk.f32.vlgmr.msra.gmra.mrb[104].mxu0 %vm993_vm14, %v2433_v44  ;;  %v14490_v13 = vpop.permute.xlu0 %4359  ;;  %v14610_v44 = vpop.permute.xlu1 %4846 }
 0x3a5   :  { %v8752_v47 = vpop.f32.mrb[110].mxu1  ;;  %9951 = vmatprep.mubr.msk.f32.mxu0 %vm11976_vm3, %v16184_v41  ;;  %16194 = vst [vmem:[#allocation16_spill] sm:$0xff] %v14490_v13  ;;  %vm4386_vm11 = vcmp.eq.s32.totalorder %v16183_v62, %v14490_v13  ;;  %vm4385_vm13 = vcmp.eq.s32.totalorder %v16180_v24, %v14490_v13 }
 0x3a6   :  { %v8753_v20 = vpop.f32.mrb[111].mxu1  ;;  %8159 = vmatmul.mubr.msk.f32.vlgmr.msra.gmra.mrb[216].mxu1 %vm4376_vm0, %v16182_v53  ;;  %vm2421_vm0 = vcmp.eq.s32.totalorder %v13295_v26, %v13752_v49 }
 0x3a7   :  { %v14463_v46 = vadd.f32 %v8753_v20, %v8752_v47  ;;  %11432 = vmatpush3.bf16.msra.mxu1 %v13161_v8  ;;  %8160 = vmatprep.mubr.msk.f32.mxu1 %vm4380_vm1, %v16182_v53  ;;  %vm4388_vm1 = vcmp.eq.s32.totalorder %v16180_v24, %v14508_v1 }
 0x3a8   :  { %11434 = vmatprep.subr.bf16.mxu1 %v13163_v15  ;;  %9952 = vmatmul.mubr.msk.f32.gmra.mrb[106].mxu0 %vm993_vm14, %v2436_v14  ;;  %v2439_v15 = vsel %vm2412_vm4, 1.0, %v16184_v41  ;;  %v14526_v9 = vpop.permute.xlu0 %4365 }
 0x3a9   :  { %v8755_v34 = vpop.f32.mrb[112].mxu1  ;;  %9954 = vmatprep.mubr.msk.f32.mxu0 %vm11976_vm3, %v16184_v41  ;;  %16196 = vst [vmem:[#allocation18_spill] sm:$0xff] %v14526_v9  ;;  %vm4392_vm4 = vcmp.eq.s32.totalorder %v16183_v62, %v14526_v9 }
 0x3aa   :  { %v8756_v8 = vpop.f32.mrb[113].mxu1  ;;  %8161 = vmatmul.mubr.msk.f32.gmra.mrb[218].mxu1 %vm4379_vm6, %v16182_v53  ;;  %vm2424_vm6 = vcmp.eq.s32.totalorder %v13295_v26, %v13764_v10 }
 0x3ab   :  { %v14481_v56 = vadd.f32 %v8756_v8, %v8755_v34  ;;  %11436 = vmatpush3.bf16.msra.mxu1 %v13165_v25  ;;  %8162 = vmatprep.mubr.msk.f32.mxu1 %vm4383_vm8, %v16182_v53  ;;  %vm4391_vm8 = vcmp.eq.s32.totalorder %v16180_v24, %v14526_v9 }
 0x3ac   :  { %11438 = vmatprep.subr.bf16.mxu1 %v13167_v18  ;;  %9955 = vmatmul.mubr.msk.f32.gmra.mrb[108].mxu0 %vm993_vm14, %v2439_v15  ;;  %v2442_v18 = vsel %vm2415_vm9, 1.0, %v16184_v41  ;;  %vm4395_vm9 = vcmp.eq.s32.totalorder %v16183_v62, %v14544_v63  ;;  %v14562_v36 = vpop.permute.xlu0 %4371 }
 0x3ad   :  { %v8758_v4 = vpop.f32.mrb[114].mxu1  ;;  %9957 = vmatprep.mubr.msk.f32.mxu0 %vm11976_vm3, %v16184_v41  ;;  %16198 = vst [vmem:[#allocation20_spill] sm:$0xff] %v14562_v36 }
 0x3ae   :  { %v8759_v25 = vpop.f32.mrb[115].mxu1  ;;  %8163 = vmatmul.mubr.msk.f32.gmra.mrb[220].mxu1 %vm4382_vm10, %v16182_v53  ;;  %vm2427_vm10 = vcmp.eq.s32.totalorder %v13295_v26, %v13776_v7 }
 0x3af   :  { %v14499_v45 = vadd.f32 %v8759_v25, %v8758_v4  ;;  %11440 = vmatpush3.bf16.msra.mxu1 %v13169_v22  ;;  %8164 = vmatprep.mubr.msk.f32.mxu1 %vm4386_vm11, %v16182_v53  ;;  %vm4394_vm11 = vcmp.eq.s32.totalorder %v16180_v24, %v14544_v63  ;;  %v14632_v25 = vpop.permute.xlu1 %4852 }
 0x3b0   :  { %11442 = vmatprep.subr.bf16.mxu1 %v13171_v31  ;;  %9958 = vmatmul.mubr.msk.f32.gmra.mrb[110].mxu0 %vm993_vm14, %v2442_v18  ;;  %v2445_v31 = vsel %vm2418_vm12, 1.0, %v16184_v41  ;;  %vm4398_vm12 = vcmp.eq.s32.totalorder %v16183_v62, %v14562_v36  ;;  %v14596_v48 = vpop.permute.xlu0 %4843 }
 0x3b1   :  { %v8761_v57 = vpop.f32.mrb[116].mxu1  ;;  %9960 = vmatprep.mubr.msk.f32.mxu0 %vm11976_vm3, %v16184_v41 }
 0x3b2   :  { %v8762_v22 = vpop.f32.mrb[117].mxu1  ;;  %8165 = vmatmul.mubr.msk.f32.gmra.mrb[222].mxu1 %vm4385_vm13, %v16182_v53  ;;  %vm2430_vm13 = vcmp.eq.s32.totalorder %v13295_v26, %v16199_v40 }
 0x3b3   :  { %v14517_v50 = vadd.f32 %v8762_v22, %v8761_v57  ;;  %11444 = vmatpush3.bf16.msra.mxu1 %v13173_v38  ;;  %8166 = vmatprep.mubr.msk.f32.mxu1 %vm4389_vm15, %v16182_v53  ;;  %vm4397_vm15 = vcmp.eq.s32.totalorder %v16180_v24, %v14562_v36 }
 0x3b4   :  { %11446 = vmatprep.subr.bf16.mxu1 %v13175_v52  ;;  %9961 = vmatmul.mubr.msk.f32.gmra.mrb[112].mxu0 %vm993_vm14, %v2445_v31  ;;  %v2448_v52 = vsel %vm2421_vm0, 1.0, %v16184_v41  ;;  %vm4401_vm0 = vcmp.eq.s32.totalorder %v16183_v62, %v14580_v58  ;;  %v14620_v34 = vpop.permute.xlu0 %4849 }
 0x3b5   :  { %v8764_v21 = vpop.f32.mrb[118].mxu1  ;;  %9963 = vmatprep.mubr.msk.f32.mxu0 %vm11976_vm3, %v16184_v41 }
 0x3b6   :  { %v8765_v38 = vpop.f32.mrb[119].mxu1  ;;  %8167 = vmatmul.mubr.msk.f32.gmra.mrb[224].mxu1 %vm4388_vm1, %v16182_v53  ;;  %vm4400_vm1 = vcmp.eq.s32.totalorder %v16180_v24, %v14580_v58 }
 0x3b7   :  { %v14535_v49 = vadd.f32 %v8765_v38, %v8764_v21  ;;  %11448 = vmatpush3.bf16.msra.mxu1 %v13178_v37  ;;  %8168 = vmatprep.mubr.msk.f32.mxu1 %vm4392_vm4, %v16182_v53  ;;  %vm4870_vm4 = vcmp.eq.s32.totalorder %v16183_v62, %v14596_v48 }
 0x3b8   :  { %11450 = vmatprep.subr.bf16.mxu1 %v13180_v59  ;;  %9964 = vmatmul.mubr.msk.f32.gmra.mrb[114].mxu0 %vm993_vm14, %v2448_v52  ;;  %v2451_v59 = vsel %vm2424_vm6, 1.0, %v16184_v41  ;;  %vm4869_vm6 = vcmp.eq.s32.totalorder %v16180_v24, %v14596_v48  ;;  %v14644_v31 = vpop.permute.xlu0 %4855 }
 0x3b9   :  { %v8767_v55 = vpop.f32.mrb[120].mxu1  ;;  %9966 = vmatprep.mubr.msk.f32.mxu0 %vm11976_vm3, %v16184_v41 }
 0x3ba   :  { %v8768_v37 = vpop.f32.mrb[121].mxu1  ;;  %8169 = vmatmul.mubr.msk.f32.gmra.mrb[226].mxu1 %vm4391_vm8, %v16182_v53  ;;  %vm4873_vm8 = vcmp.eq.s32.totalorder %v16183_v62, %v14610_v44 }
 0x3bb   :  { %v14553_v10 = vadd.f32 %v8768_v37, %v8767_v55  ;;  %11452 = vmatpush3.bf16.msra.mxu1 %v13182_v3  ;;  %8170 = vmatprep.mubr.msk.f32.mxu1 %vm4395_vm9, %v16182_v53  ;;  %vm4872_vm9 = vcmp.eq.s32.totalorder %v16180_v24, %v14610_v44  ;;  %v14656_v55 = vpop.permute.xlu1 %4858 }
 0x3bc   :  { %11454 = vmatprep.subr.bf16.mxu1 %v13184_v11  ;;  %9967 = vmatmul.mubr.msk.f32.gmra.mrb[116].mxu0 %vm993_vm14, %v2451_v59  ;;  %v2454_v11 = vsel %vm2427_vm10, 1.0, %v16184_v41  ;;  %vm4876_vm10 = vcmp.eq.s32.totalorder %v16183_v62, %v14620_v34 }
 0x3bd   :  { %v8770_v30 = vpop.f32.mrb[122].mxu1  ;;  %9969 = vmatprep.mubr.msk.f32.mxu0 %vm11976_vm3, %v16184_v41 }
 0x3be   :  { %v8771_v3 = vpop.f32.mrb[123].mxu1  ;;  %8171 = vmatmul.mubr.msk.f32.gmra.mrb[228].mxu1 %vm4394_vm11, %v16182_v53  ;;  %vm4875_vm11 = vcmp.eq.s32.totalorder %v16180_v24, %v14620_v34 }
 0x3bf   :  { %v14571_v7 = vadd.f32 %v8771_v3, %v8770_v30  ;;  %11456 = vmatpush3.bf16.msra.mxu1 %v13187_v19  ;;  %8172 = vmatprep.mubr.msk.f32.mxu1 %vm4398_vm12, %v16182_v53  ;;  %vm4879_vm12 = vcmp.eq.s32.totalorder %v16183_v62, %v14632_v25  ;;  %v14668_v3 = vpop.permute.xlu0 %4861 }
 0x3c0   :  { %11458 = vmatprep.subr.bf16.mxu1 %v13189_v27  ;;  %9970 = vmatmul.mubr.msk.f32.gmra.mrb[118].mxu0 %vm993_vm14, %v2454_v11  ;;  %v2457_v27 = vsel %vm2430_vm13, 1.0, %v16184_v41  ;;  %vm4878_vm13 = vcmp.eq.s32.totalorder %v16180_v24, %v14632_v25 }
 0x3c1   :  { %v8773_v32 = vpop.f32.mrb[124].mxu1  ;;  %9972 = vmatprep.mubr.msk.f32.mxu0 %vm11976_vm3, %v16184_v41 }
 0x3c2   :  { %v8774_v19 = vpop.f32.mrb[125].mxu1  ;;  %8173 = vmatmul.mubr.msk.f32.gmra.mrb[230].mxu1 %vm4397_vm15, %v16182_v53  ;;  %vm4882_vm15 = vcmp.eq.s32.totalorder %v16183_v62, %v14644_v31 }
 0x3c3   :  { %v14589_v39 = vadd.f32 %v8774_v19, %v8773_v32  ;;  %11460 = vmatpush3.bf16.msra.mxu1 %v13191_v35  ;;  %8174 = vmatprep.mubr.msk.f32.mxu1 %vm4401_vm0, %v16182_v53  ;;  %vm4881_vm0 = vcmp.eq.s32.totalorder %v16180_v24, %v14644_v31  ;;  %v14681_v19 = vpop.permute.xlu1 %4864 }
 0x3c4   :  { %9973 = vmatmul.mubr.msk.f32.gmra.mrb[120].mxu0 %vm993_vm14, %v2457_v27  ;;  %11461 = vmatprep.subr.bf16.mxu1 %v16181_v33 }
 0x3c5   :  { %v8845_v17 = vpop.f32.mrb[126].mxu1  ;;  %9991 = vmatprep.mubr.msk.f32.mxu0 %vm11976_vm3, %v16184_v41 }
 0x3c6   :  { %v8846_v28 = vpop.f32.mrb[127].mxu1  ;;  %8175 = vmatmul.mubr.msk.f32.gmra.mrb[232].mxu1 %vm4400_vm1, %v16182_v53  ;;  %vm4885_vm1 = vcmp.eq.s32.totalorder %v16183_v62, %v14656_v55 }
 0x3c7   :  { %v14605_v35 = vadd.f32 %v8846_v28, %v8845_v17  ;;  %8212 = vmatprep.mubr.msk.f32.mxu1 %vm4870_vm4, %v16182_v53  ;;  %vm4884_vm4 = vcmp.eq.s32.totalorder %v16180_v24, %v14656_v55 }
 0x3c9   :  { %v8848_v47 = vpop.f32.mrb[128].mxu1 }
 0x3ca   :  { %v8849_v20 = vpop.f32.mrb[129].mxu1  ;;  %8213 = vmatmul.mubr.msk.f32.vlgmr.msra.gmra.mrb[234].mxu1 %vm4869_vm6, %v16182_v53  ;;  %vm4888_vm6 = vcmp.eq.s32.totalorder %v16183_v62, %v14668_v3 }
 0x3cb   :  { %v14615_v14 = vadd.f32 %v8849_v20, %v8848_v47  ;;  %11463 = vmatpush3.bf16.msra.mxu1 %v13193_v43  ;;  %8214 = vmatprep.mubr.msk.f32.mxu1 %vm4873_vm8, %v16182_v53  ;;  %vm4887_vm8 = vcmp.eq.s32.totalorder %v16180_v24, %v14668_v3  ;;  %v14691_v47 = vpop.permute.xlu0 %4867 }
 0x3cc   :  { %11464 = vmatprep.subr.bf16.mxu1 %v16181_v33 }
 0x3cd   :  { %v8851_v8 = vpop.f32.mrb[130].mxu1 }
 0x3ce   :  { %v8852_v15 = vpop.f32.mrb[131].mxu1  ;;  %8215 = vmatmul.mubr.msk.f32.gmra.mrb[236].mxu1 %vm4872_vm9, %v16182_v53  ;;  %vm4891_vm9 = vcmp.eq.s32.totalorder %v16183_v62, %v14681_v19 }
 0x3cf   :  { %v14627_v4 = vadd.f32 %v8852_v15, %v8851_v8  ;;  %11466 = vmatpush3.bf16.msra.mxu1 %v13196_v12  ;;  %8216 = vmatprep.mubr.msk.f32.mxu1 %vm4876_vm10, %v16182_v53  ;;  %vm4890_vm10 = vcmp.eq.s32.totalorder %v16180_v24, %v14681_v19  ;;  %v7970_v15 = vld [vmem:[%s16114_s4 + $0xc0] sm:$0xff] }
 0x3d0   :  { %11467 = vmatprep.subr.bf16.mxu1 %v16181_v33 }
 0x3d1   :  { %v8854_v18 = vpop.f32.mrb[132].mxu1 }
 0x3d2   :  { %v8855_v57 = vpop.f32.mrb[133].mxu1  ;;  %8217 = vmatmul.mubr.msk.f32.gmra.mrb[238].mxu1 %vm4875_vm11, %v16182_v53  ;;  %vm4894_vm11 = vcmp.eq.s32.totalorder %v16183_v62, %v14691_v47 }
 0x3d3   :  { %v14639_v22 = vadd.f32 %v8855_v57, %v8854_v18  ;;  %11469 = vmatpush3.bf16.msra.mxu1 %v13198_v51  ;;  %8218 = vmatprep.mubr.msk.f32.mxu1 %vm4879_vm12, %v16182_v53  ;;  %v7971_v18 = vld [vmem:[%s16114_s4 + $0xc8] sm:$0xff]  ;;  %vm4893_vm12 = vcmp.eq.s32.totalorder %v16180_v24, %v14691_v47 }
 0x3d4   :  { %11470 = vmatprep.subr.bf16.mxu1 %v16181_v33 }
 0x3d5   :  { %v8857_v21 = vpop.f32.mrb[134].mxu1 }
 0x3d6   :  { %v8858_v38 = vpop.f32.mrb[135].mxu1  ;;  %8219 = vmatmul.mubr.msk.f32.gmra.mrb[240].mxu1 %vm4878_vm13, %v16182_v53  ;;  %vm4871_vm13 = vcmp.eq.s32.totalorder %v13295_v26, %v14596_v48 }
 0x3d7   :  { %v14651_v52 = vadd.f32 %v8858_v38, %v8857_v21  ;;  %11472 = vmatpush3.bf16.msra.mxu1 %v13200_v60  ;;  %8220 = vmatprep.mubr.msk.f32.mxu1 %vm4882_vm15, %v16182_v53  ;;  %v11182_v21 = vpack.c.bf16 %v7971_v18, %v7970_v15  ;;  %vm4874_vm15 = vcmp.eq.s32.totalorder %v13295_v26, %v14610_v44  ;;  %v7975_v15 = vld [vmem:[%s16114_s4 + $0xe8] sm:$0xff] }
 0x3d8   :  { %11473 = vmatprep.subr.bf16.mxu1 %v16181_v33  ;;  %v4901_v44 = vsel %vm4874_vm15, 1.0, %v16184_v41  ;;  %vm3401_vm15 = vcmp.eq.s32.totalorder %v13295_v26, %v14064_v54 }
 0x3d9   :  { %v8860_v37 = vpop.f32.mrb[136].mxu1  ;;  %11183 = vmatpush3.bf16.msra.mxu0 %v11182_v21 }
 0x3da   :  { %v8861_v59 = vpop.f32.mrb[137].mxu1  ;;  %8221 = vmatmul.mubr.msk.f32.gmra.mrb[242].mxu1 %vm4881_vm0, %v16182_v53  ;;  %11184 = vmatprep.subr.bf16.mxu0 %v16181_v33  ;;  %vm4877_vm0 = vcmp.eq.s32.totalorder %v13295_v26, %v14620_v34 }
 0x3db   :  { %v14663_v30 = vadd.f32 %v8861_v59, %v8860_v37  ;;  %11475 = vmatpush3.bf16.msra.mxu1 %v13202_v6  ;;  %8222 = vmatprep.mubr.msk.f32.mxu1 %vm4885_vm1, %v16182_v53  ;;  %v4898_v59 = vsel %vm4871_vm13, 1.0, %v16184_v41  ;;  %vm4880_vm1 = vcmp.eq.s32.totalorder %v13295_v26, %v14632_v25  ;;  %vm3398_vm13 = vcmp.eq.s32.totalorder %v13295_v26, %v14043_v29 }
 0x3dc   :  { %10406 = vmatprep.subr.mxu1 %v16184_v41  ;;  %v4907_v25 = vsel %vm4880_vm1, 1.0, %v16184_v41 }
 0x3dd   :  { %v8863_v11 = vpop.f32.mrb[138].mxu1 }
 0x3de   :  { %v8864_v40 = vpop.f32.mrb[139].mxu1  ;;  %8223 = vmatmul.mubr.msk.f32.gmra.mrb[244].mxu1 %vm4884_vm4, %v16182_v53  ;;  %vm4883_vm4 = vcmp.eq.s32.totalorder %v13295_v26, %v14644_v31 }
 0x3df   :  { %v14675_v32 = vadd.f32 %v8864_v40, %v8863_v11  ;;  %10407 = vmatpush3.msk.msra.mxu1 %vm1021_vm2, %v13271_v0  ;;  %8224 = vmatprep.mubr.msk.f32.mxu1 %vm4888_vm6, %v16182_v53  ;;  %vm4886_vm6 = vcmp.eq.s32.totalorder %v13295_v26, %v14656_v55 }
 0x3e0   :  { %11488 = vmatprep.subr.bf16.mxu1 %v16181_v33 }
 0x3e1   :  { %v8866_v27 = vpop.f32.mrb[140].mxu1 }
 0x3e2   :  { %v8867_v17 = vpop.f32.mrb[141].mxu1  ;;  %8225 = vmatmul.mubr.msk.f32.gmra.mrb[246].mxu1 %vm4887_vm8, %v16182_v53  ;;  %vm4889_vm8 = vcmp.eq.s32.totalorder %v13295_v26, %v14668_v3 }
 0x3e3   :  { %v14688_v28 = vadd.f32 %v8867_v17, %v8866_v27  ;;  %8226 = vmatprep.mubr.msk.f32.mxu1 %vm4891_vm9, %v16182_v53  ;;  %v4916_v55 = vsel %vm4889_vm8, 1.0, %v16184_v41  ;;  %vm4892_vm9 = vcmp.eq.s32.totalorder %v13295_v26, %v14681_v19 }
 0x3e4   :  { %v4919_v3 = vsel %vm4892_vm9, 1.0, %v16184_v41 }
 0x3e5   :  { %v8869_v20 = vpop.f32.mrb[142].mxu1 }
 0x3e6   :  { %v8870_v8 = vpop.f32.mrb[143].mxu1  ;;  %8227 = vmatmul.mubr.msk.f32.gmra.mrb[248].mxu1 %vm4890_vm10, %v16182_v53  ;;  %vm4895_vm10 = vcmp.eq.s32.totalorder %v13295_v26, %v14691_v47 }
 0x3e7   :  { %v14704_v57 = vadd.f32 %v8870_v8, %v8869_v20  ;;  %8228 = vmatprep.mubr.msk.f32.mxu1 %vm4894_vm11, %v16182_v53  ;;  %v7974_v8 = vld [vmem:[%s16114_s4 + $0xe0] sm:$0xff]  ;;  %v4922_v19 = vsel %vm4895_vm10, 1.0, %v16184_v41  ;;  %vm3392_vm11 = vcmp.eq.s32.totalorder %v13295_v26, %v14007_v23 }
 0x3e8   :  { %v11188_v34 = vpack.c.bf16 %v7975_v15, %v7974_v8  ;;  %v3419_v23 = vsel %vm3392_vm11, 1.0, %v16184_v41 }
 0x3e9   :  { %v3154_v38 = vpop.f32.mrb[144].mxu1 }
 0x3ea   :  { %v14712_v62 = vadd.f32 %v14605_v35, %v3154_v38  ;;  %v10042_v37 = vpop.f32.mrb[145].mxu1  ;;  %8229 = vmatmul.mubr.msk.f32.gmra.mrb[250].mxu1 %vm4893_vm12, %v16182_v53  ;;  %v7972_v53 = vld [vmem:[%s16114_s4 + $0xd0] sm:$0xff]  ;;  %v7973_v35 = vld [vmem:[%s16114_s4 + $0xd8] sm:$0xff]  ;;  %vm3395_vm12 = vcmp.eq.s32.totalorder %v13295_v26, %v14022_v5  ;;  %v8083_v5 = vld [vmem:[%s16114_s4 + $0x168] sm:$0xff] }
 0x3eb   :  { %10408 = vmatprep.mubr.msk.f32.mxu1 %vm11976_vm3, %v16184_v41  ;;  %v11185_v27 = vpack.c.bf16 %v7973_v35, %v7972_v53  ;;  %v7976_v37 = vld [vmem:[%s16114_s4 + $0xf0] sm:$0xff]  ;;  %v4910_v35 = vsel %vm4883_vm4, 1.0, %v16184_v41 }
 0x3ed   :  { %v3159_v11 = vpop.f32.mrb[146].mxu1  ;;  %11186 = vmatpush3.bf16.msra.mxu0 %v11185_v27 }
 0x3ee   :  { %v14722_v40 = vadd.f32 %v14615_v14, %v3159_v11  ;;  %v10045_v48 = vpop.f32.mrb[147].mxu1  ;;  %10409 = vmatmul.mubr.msk.f32.vlgmr.msra.gmra.mrb[252].mxu1 %vm993_vm14, %v4898_v59  ;;  %11187 = vmatprep.subr.bf16.mxu0 %v16181_v33  ;;  %v7977_v59 = vld [vmem:[%s16114_s4 + $0xf8] sm:$0xff] }
 0x3ef   :  { %10411 = vmatprep.mubr.msk.f32.mxu1 %vm11976_vm3, %v16184_v41  ;;  %v11191_v11 = vpack.c.bf16 %v7977_v59, %v7976_v37 }
 0x3f1   :  { %v3164_v17 = vpop.f32.mrb[148].mxu1  ;;  %11189 = vmatpush3.bf16.msra.mxu0 %v11188_v34 }
 0x3f2   :  { %v14737_v14 = vadd.f32 %v14627_v4, %v3164_v17  ;;  %v10048_v20 = vpop.f32.mrb[149].mxu1  ;;  %10412 = vmatmul.mubr.msk.f32.gmra.mrb[254].mxu1 %vm993_vm14, %v4901_v44  ;;  %v4904_v4 = vsel %vm4877_vm0, 1.0, %v16184_v41  ;;  %11190 = vmatprep.subr.bf16.mxu0 %v16181_v33  ;;  %v4913_v17 = vsel %vm4886_vm6, 1.0, %v16184_v41 }
 0x3f3   :  { %10414 = vmatprep.mubr.msk.f32.mxu1 %vm11976_vm3, %v16184_v41 }
 0x3f5   :  { %v3169_v18 = vpop.f32.mrb[150].mxu1  ;;  %11192 = vmatpush3.bf16.msra.mxu0 %v11191_v11 }
 0x3f6   :  { %v14753_v21 = vadd.f32 %v14639_v22, %v3169_v18  ;;  %v10051_v38 = vpop.f32.mrb[151].mxu1  ;;  %10415 = vmatmul.mubr.msk.f32.gmra.mrb[0].mxu1 %vm993_vm14, %v4904_v4  ;;  %11240 = vmatprep.subr.bf16.mxu0 %v16181_v33 }
 0x3f7   :  { %10417 = vmatprep.mubr.msk.f32.mxu1 %vm11976_vm3, %v16184_v41 }
 0x3f9   :  { %v3174_v22 = vpop.f32.mrb[152].mxu1 }
 0x3fa   :  { %v14769_v48 = vadd.f32 %v14651_v52, %v3174_v22  ;;  %v10054_v53 = vpop.f32.mrb[153].mxu1  ;;  %10418 = vmatmul.mubr.msk.f32.gmra.mrb[2].mxu1 %vm993_vm14, %v4907_v25 }
 0x3fb   :  { %10420 = vmatprep.mubr.msk.f32.mxu1 %vm11976_vm3, %v16184_v41 }
 0x3fd   :  { %v3179_v27 = vpop.f32.mrb[154].mxu1 }
 0x3fe   :  { %v14779_v31 = vadd.f32 %v14663_v30, %v3179_v27  ;;  %v10057_v52 = vpop.f32.mrb[155].mxu1  ;;  %10421 = vmatmul.mubr.msk.f32.gmra.mrb[4].mxu1 %vm993_vm14, %v4910_v35 }
 0x3ff   :  { %10423 = vmatprep.mubr.msk.f32.mxu1 %vm11976_vm3, %v16184_v41 }
 0x401   :  { %v3184_v44 = vpop.f32.mrb[156].mxu1 }
 0x402   :  { %v14788_v20 = vadd.f32 %v14675_v32, %v3184_v44  ;;  %v10060_v8 = vpop.f32.mrb[157].mxu1  ;;  %10424 = vmatmul.mubr.msk.f32.gmra.mrb[6].mxu1 %vm993_vm14, %v4913_v17 }
 0x403   :  { %10426 = vmatprep.mubr.msk.f32.mxu1 %vm11976_vm3, %v16184_v41 }
 0x405   :  { %v3189_v30 = vpop.f32.mrb[158].mxu1 }
 0x406   :  { %v14797_v15 = vadd.f32 %v14688_v28, %v3189_v30  ;;  %v10063_v34 = vpop.f32.mrb[159].mxu1  ;;  %10427 = vmatmul.mubr.msk.f32.gmra.mrb[8].mxu1 %vm993_vm14, %v4916_v55 }
 0x407   :  { %10429 = vmatprep.mubr.msk.f32.mxu1 %vm11976_vm3, %v16184_v41 }
 0x409   :  { %v3194_v32 = vpop.f32.mrb[160].mxu1 }
 0x40a   :  { %v14806_v4 = vadd.f32 %v14704_v57, %v3194_v32  ;;  %v10066_v18 = vpop.f32.mrb[161].mxu1  ;;  %10430 = vmatmul.mubr.msk.f32.gmra.mrb[10].mxu1 %vm993_vm14, %v4919_v3 }
 0x40b   :  { %10432 = vmatprep.mubr.msk.f32.mxu1 %vm11976_vm3, %v16184_v41 }
 0x40d   :  { %v8941_v28 = vpop.f32.mrb[162].mxu1 }
 0x40e   :  { %v8942_v38 = vpop.f32.mrb[163].mxu1  ;;  %10433 = vmatmul.mubr.msk.f32.gmra.mrb[12].mxu1 %vm993_vm14, %v4922_v19 }
 0x40f   :  { %v14813_v37 = vadd.f32 %v8942_v38, %v8941_v28  ;;  %10496 = vmatprep.mubr.msk.f32.mxu1 %vm11976_vm3, %v16184_v41 }
 0x411   :  { %v8944_v47 = vpop.f32.mrb[164].mxu1 }
 0x412   :  { %v8945_v57 = vpop.f32.mrb[165].mxu1 }
 0x413   :  { %v14817_v59 = vadd.f32 %v8945_v57, %v8944_v47 }
 0x415   :  { %v8947_v25 = vpop.f32.mrb[166].mxu1 }
 0x416   :  { %v8948_v22 = vpop.f32.mrb[167].mxu1 }
 0x417   :  { %v14819_v11 = vadd.f32 %v8948_v22, %v8947_v25 }
 0x419   :  { %v8950_v53 = vpop.f32.mrb[168].mxu1 }
 0x41a   :  { %v8951_v35 = vpop.f32.mrb[169].mxu1 }
 0x41b   :  { %v14821_v27 = vadd.f32 %v8951_v35, %v8950_v53 }
 0x41d   :  { %v8953_v52 = vpop.f32.mrb[170].mxu1 }
 0x41e   :  { %v8954_v17 = vpop.f32.mrb[171].mxu1 }
 0x41f   :  { %v14823_v44 = vadd.f32 %v8954_v17, %v8953_v52 }
 0x421   :  { %v8956_v8 = vpop.f32.mrb[172].mxu1 }
 0x422   :  { %v8957_v55 = vpop.f32.mrb[173].mxu1 }
 0x423   :  { %v14825_v30 = vadd.f32 %v8957_v55, %v8956_v8 }
 0x425   :  { %v8959_v34 = vpop.f32.mrb[174].mxu1 }
 0x426   :  { %v8960_v3 = vpop.f32.mrb[175].mxu1 }
 0x427   :  { %v14827_v32 = vadd.f32 %v8960_v3, %v8959_v34 }
 0x429   :  { %v8962_v18 = vpop.f32.mrb[176].mxu1 }
 0x42a   :  { %v8963_v19 = vpop.f32.mrb[177].mxu1 }
 0x42b   :  { %v14829_v28 = vadd.f32 %v8963_v19, %v8962_v18 }
 0x42d   :  { %v8965_v38 = vpop.f32.mrb[178].mxu1 }
 0x42e   :  { %v8966_v47 = vpop.f32.mrb[179].mxu1 }
 0x42f   :  { %v14831_v57 = vadd.f32 %v8966_v47, %v8965_v38 }
 0x431   :  { %16201 = vst [vmem:[#allocation21_spill] sm:$0xff] %v14831_v57  ;;  %v9037_v25 = vpop.f32.mrb[180].mxu1 }
 0x432   :  { %v9038_v22 = vpop.f32.mrb[181].mxu1 }
 0x433   :  { %v9039_v53 = vadd.f32 %v9038_v22, %v9037_v25 }
 0x435   :  { %v9040_v35 = vpop.f32.mrb[182].mxu1 }
 0x436   :  { %v9041_v52 = vpop.f32.mrb[183].mxu1 }
 0x437   :  { %v9042_v17 = vadd.f32 %v9041_v52, %v9040_v35 }
 0x439   :  { %v9043_v8 = vpop.f32.mrb[184].mxu1 }
 0x43a   :  { %v9044_v55 = vpop.f32.mrb[185].mxu1 }
 0x43b   :  { %v9045_v24 = vadd.f32 %v9044_v55, %v9043_v8 }
 0x43d   :  { %v9046_v58 = vpop.f32.mrb[186].mxu1 }
 0x43e   :  { %v9047_v34 = vpop.f32.mrb[187].mxu1 }
 0x43f   :  { %v9048_v3 = vadd.f32 %v9047_v34, %v9046_v58 }
 0x441   :  { %v9049_v36 = vpop.f32.mrb[188].mxu1 }
 0x442   :  { %v9050_v63 = vpop.f32.mrb[189].mxu1 }
 0x443   :  { %v9051_v18 = vadd.f32 %v9050_v63, %v9049_v36 }
 0x445   :  { %v9052_v19 = vpop.f32.mrb[190].mxu1 }
 0x446   :  { %v9053_v9 = vpop.f32.mrb[191].mxu1 }
 0x447   :  { %v9054_v1 = vadd.f32 %v9053_v9, %v9052_v19 }
 0x449   :  { %v9055_v38 = vpop.f32.mrb[192].mxu1 }
 0x44a   :  { %v9056_v47 = vpop.f32.mrb[193].mxu1 }
 0x44b   :  { %v9057_v13 = vadd.f32 %v9056_v47, %v9055_v38 }
 0x44d   :  { %v9058_v16 = vpop.f32.mrb[194].mxu1 }
 0x44e   :  { %v9059_v25 = vpop.f32.mrb[195].mxu1 }
 0x44f   :  { %v9060_v22 = vadd.f32 %v9059_v25, %v9058_v16 }
 0x451   :  { %v9061_v61 = vpop.f32.mrb[196].mxu1 }
 0x452   :  { %v9062_v35 = vpop.f32.mrb[197].mxu1 }
 0x453   :  { %v9063_v52 = vadd.f32 %v9062_v35, %v9061_v61 }
 0x455   :  { %v4140_v2 = vpop.f32.mrb[198].mxu1 }
 0x456   :  { %v14833_v8 = vadd.f32 %v9039_v53, %v4140_v2  ;;  %v10226_v55 = vpop.f32.mrb[199].mxu1 }
 0x459   :  { %v4145_v58 = vpop.f32.mrb[200].mxu1 }
 0x45a   :  { %v14835_v34 = vadd.f32 %v9042_v17, %v4145_v58  ;;  %v10229_v63 = vpop.f32.mrb[201].mxu1 }
 0x45d   :  { %v4150_v36 = vpop.f32.mrb[202].mxu1 }
 0x45e   :  { %v14837_v57 = vadd.f32 %v9045_v24, %v4150_v36  ;;  %v10232_v9 = vpop.f32.mrb[203].mxu1 }
 0x461   :  { %v4155_v19 = vpop.f32.mrb[204].mxu1 }
 0x462   :  { %v14839_v38 = vadd.f32 %v9048_v3, %v4155_v19  ;;  %v10235_v47 = vpop.f32.mrb[205].mxu1  ;;  %v8024_v3 = vld [vmem:[%s16114_s4 + $0x100] sm:$0xff] }
 0x465   :  { %v4160_v16 = vpop.f32.mrb[206].mxu1 }
 0x466   :  { %v14841_v25 = vadd.f32 %v9051_v18, %v4160_v16  ;;  %v10238_v61 = vpop.f32.mrb[207].mxu1  ;;  %v8025_v18 = vld [vmem:[%s16114_s4 + $0x108] sm:$0xff] }
 0x469   :  { %v4165_v35 = vpop.f32.mrb[208].mxu1 }
 0x46a   :  { %v14843_v2 = vadd.f32 %v9054_v1, %v4165_v35  ;;  %v10241_v53 = vpop.f32.mrb[209].mxu1  ;;  %v8027_v35 = vld [vmem:[%s16114_s4 + $0x118] sm:$0xff] }
 0x46d   :  { %v4170_v55 = vpop.f32.mrb[210].mxu1 }
 0x46e   :  { %v14845_v17 = vadd.f32 %v9057_v13, %v4170_v55  ;;  %v10244_v58 = vpop.f32.mrb[211].mxu1  ;;  %v11241_v13 = vpack.c.bf16 %v8025_v18, %v8024_v3  ;;  %v8028_v3 = vld [vmem:[%s16114_s4 + $0x120] sm:$0xff]  ;;  %v8029_v18 = vld [vmem:[%s16114_s4 + $0x128] sm:$0xff] }
 0x471   :  { %v4175_v63 = vpop.f32.mrb[212].mxu1 }
 0x472   :  { %v14847_v24 = vadd.f32 %v9060_v22, %v4175_v63  ;;  %v10247_v36 = vpop.f32.mrb[213].mxu1  ;;  %v8026_v22 = vld [vmem:[%s16114_s4 + $0x110] sm:$0xff] }
 0x475   :  { %v4180_v9 = vpop.f32.mrb[214].mxu1 }
 0x476   :  { %v14855_v1 = vadd.f32 %v9063_v52, %v4180_v9  ;;  %v10250_v19 = vpop.f32.mrb[215].mxu1 }
 0x477   :  { %v2661_v47 = vpop.f32.mrb[104].mxu0 }
 0x478   :  { %v2662_v16 = vadd.f32 %v14448_v42, %v2661_v47  ;;  %v9950_v61 = vpop.f32.mrb[105].mxu0  ;;  %v11244_v42 = vpack.c.bf16 %v8027_v35, %v8026_v22  ;;  %v8030_v22 = vld [vmem:[%s16114_s4 + $0x130] sm:$0xff]  ;;  %v8031_v35 = vld [vmem:[%s16114_s4 + $0x138] sm:$0xff] }
 0x479   :  { %v9133_v53 = vpop.f32.mrb[216].mxu1 }
 0x47a   :  { %9992 = vmatmul.mubr.msk.f32.vlgmr.msra.gmra.mrb[86].mxu0 %vm521_vm5, %v2662_v16  ;;  %v9134_v55 = vpop.f32.mrb[217].mxu1 }
 0x47b   :  { %v14865_v52 = vadd.f32 %v9134_v55, %v9133_v53  ;;  %v2666_v58 = vpop.f32.mrb[106].mxu0  ;;  %9994 = vmatprep.mubr.msk.f32.mxu0 %vm11976_vm3, %v16184_v41  ;;  %11242 = vmatpush3.bf16.msra.mxu0 %v11241_v13 }
 0x47c   :  { %v2667_v63 = vadd.f32 %v14463_v46, %v2666_v58  ;;  %v9953_v36 = vpop.f32.mrb[107].mxu0  ;;  %11243 = vmatprep.subr.bf16.mxu0 %v16181_v33  ;;  %v11247_v46 = vpack.c.bf16 %v8029_v18, %v8028_v3 }
 0x47d   :  { %v9136_v9 = vpop.f32.mrb[218].mxu1 }
 0x47e   :  { %9995 = vmatmul.mubr.msk.f32.gmra.mrb[88].mxu0 %vm521_vm5, %v2667_v63  ;;  %v9137_v19 = vpop.f32.mrb[219].mxu1 }
 0x47f   :  { %v14878_v47 = vadd.f32 %v9137_v19, %v9136_v9  ;;  %v2671_v13 = vpop.f32.mrb[108].mxu0  ;;  %9997 = vmatprep.mubr.msk.f32.mxu0 %vm11976_vm3, %v16184_v41  ;;  %11245 = vmatpush3.bf16.msra.mxu0 %v11244_v42 }
 0x480   :  { %v2672_v16 = vadd.f32 %v14481_v56, %v2671_v13  ;;  %v9956_v61 = vpop.f32.mrb[109].mxu0  ;;  %11246 = vmatprep.subr.bf16.mxu0 %v16181_v33  ;;  %v11250_v56 = vpack.c.bf16 %v8031_v35, %v8030_v22 }
 0x481   :  { %v9139_v53 = vpop.f32.mrb[220].mxu1 }
 0x482   :  { %9998 = vmatmul.mubr.msk.f32.gmra.mrb[90].mxu0 %vm521_vm5, %v2672_v16  ;;  %v9140_v55 = vpop.f32.mrb[221].mxu1 }
 0x483   :  { %v14891_v58 = vadd.f32 %v9140_v55, %v9139_v53  ;;  %v2676_v42 = vpop.f32.mrb[110].mxu0  ;;  %10000 = vmatprep.mubr.msk.f32.mxu0 %vm11976_vm3, %v16184_v41  ;;  %11248 = vmatpush3.bf16.msra.mxu0 %v11247_v46 }
 0x484   :  { %v2677_v63 = vadd.f32 %v14499_v45, %v2676_v42  ;;  %v9959_v36 = vpop.f32.mrb[111].mxu0  ;;  %11249 = vmatprep.subr.bf16.mxu0 %v16181_v33 }
 0x485   :  { %v9142_v3 = vpop.f32.mrb[222].mxu1 }
 0x486   :  { %10001 = vmatmul.mubr.msk.f32.gmra.mrb[92].mxu0 %vm521_vm5, %v2677_v63  ;;  %v9143_v18 = vpop.f32.mrb[223].mxu1 }
 0x487   :  { %v14898_v9 = vadd.f32 %v9143_v18, %v9142_v3  ;;  %v2681_v19 = vpop.f32.mrb[112].mxu0  ;;  %10003 = vmatprep.mubr.msk.f32.mxu0 %vm11976_vm3, %v16184_v41  ;;  %11251 = vmatpush3.bf16.msra.mxu0 %v11250_v56 }
 0x488   :  { %v2682_v13 = vadd.f32 %v14517_v50, %v2681_v19  ;;  %v9962_v46 = vpop.f32.mrb[113].mxu0  ;;  %11284 = vmatprep.subr.bf16.mxu0 %v16181_v33 }
 0x489   :  { %v9145_v45 = vpop.f32.mrb[224].mxu1 }
 0x48a   :  { %10004 = vmatmul.mubr.msk.f32.gmra.mrb[94].mxu0 %vm521_vm5, %v2682_v13  ;;  %v9146_v16 = vpop.f32.mrb[225].mxu1 }
 0x48b   :  { %v14905_v61 = vadd.f32 %v9146_v16, %v9145_v45  ;;  %v2686_v22 = vpop.f32.mrb[114].mxu0  ;;  %10006 = vmatprep.mubr.msk.f32.mxu0 %vm11976_vm3, %v16184_v41 }
 0x48c   :  { %v2687_v35 = vadd.f32 %v14535_v49, %v2686_v22  ;;  %v9965_v53 = vpop.f32.mrb[115].mxu0 }
 0x48d   :  { %v9148_v55 = vpop.f32.mrb[226].mxu1 }
 0x48e   :  { %10007 = vmatmul.mubr.msk.f32.gmra.mrb[96].mxu0 %vm521_vm5, %v2687_v35  ;;  %v9149_v50 = vpop.f32.mrb[227].mxu1 }
 0x48f   :  { %v14911_v42 = vadd.f32 %v9149_v50, %v9148_v55  ;;  %v2691_v56 = vpop.f32.mrb[116].mxu0  ;;  %10009 = vmatprep.mubr.msk.f32.mxu0 %vm11976_vm3, %v16184_v41 }
 0x490   :  { %v2692_v63 = vadd.f32 %v14553_v10, %v2691_v56  ;;  %v9968_v36 = vpop.f32.mrb[117].mxu0 }
 0x491   :  { %v9151_v3 = vpop.f32.mrb[228].mxu1 }
 0x492   :  { %10010 = vmatmul.mubr.msk.f32.gmra.mrb[98].mxu0 %vm521_vm5, %v2692_v63  ;;  %v9152_v18 = vpop.f32.mrb[229].mxu1 }
 0x493   :  { %v14917_v19 = vadd.f32 %v9152_v18, %v9151_v3  ;;  %v2696_v49 = vpop.f32.mrb[118].mxu0  ;;  %10012 = vmatprep.mubr.msk.f32.mxu0 %vm11976_vm3, %v16184_v41 }
 0x494   :  { %v2697_v13 = vadd.f32 %v14571_v7, %v2696_v49  ;;  %v9971_v46 = vpop.f32.mrb[119].mxu0 }
 0x495   :  { %v9154_v45 = vpop.f32.mrb[230].mxu1 }
 0x496   :  { %10013 = vmatmul.mubr.msk.f32.gmra.mrb[100].mxu0 %vm521_vm5, %v2697_v13  ;;  %v9155_v16 = vpop.f32.mrb[231].mxu1 }
 0x497   :  { %v14923_v22 = vadd.f32 %v9155_v16, %v9154_v45  ;;  %v2701_v10 = vpop.f32.mrb[120].mxu0  ;;  %10015 = vmatprep.mubr.msk.f32.mxu0 %vm11976_vm3, %v16184_v41 }
 0x498   :  { %v2702_v35 = vadd.f32 %v14589_v39, %v2701_v10  ;;  %v9974_v53 = vpop.f32.mrb[121].mxu0 }
 0x499   :  { %v9157_v55 = vpop.f32.mrb[232].mxu1 }
 0x49a   :  { %10016 = vmatmul.mubr.msk.f32.gmra.mrb[102].mxu0 %vm521_vm5, %v2702_v35  ;;  %v9158_v50 = vpop.f32.mrb[233].mxu1 }
 0x49b   :  { %v14929_v56 = vadd.f32 %v9158_v50, %v9157_v55  ;;  %10083 = vmatprep.mubr.msk.f32.mxu0 %vm11976_vm3, %v16184_v41 }
 0x49d   :  { %v9229_v7 = vpop.f32.mrb[234].mxu1 }
 0x49e   :  { %10084 = vmatmul.mubr.msk.f32.vlgmr.msra.gmra.mrb[86].mxu0 %vm521_vm5, %v14712_v62  ;;  %v9230_v63 = vpop.f32.mrb[235].mxu1 }
 0x49f   :  { %11286 = vmatpush3.bf16.msra.mxu0 %v13193_v43  ;;  %v9231_v36 = vadd.f32 %v9230_v63, %v9229_v7  ;;  %10086 = vmatprep.mubr.msk.f32.mxu0 %vm11976_vm3, %v16184_v41 }
 0x4a0   :  { %11287 = vmatprep.subr.bf16.mxu0 %v16181_v33 }
 0x4a1   :  { %v9232_v39 = vpop.f32.mrb[236].mxu1 }
 0x4a2   :  { %10087 = vmatmul.mubr.msk.f32.gmra.mrb[88].mxu0 %vm521_vm5, %v14722_v40  ;;  %v9233_v3 = vpop.f32.mrb[237].mxu1 }
 0x4a3   :  { %11289 = vmatpush3.bf16.msra.mxu0 %v13196_v12  ;;  %v14942_v18 = vadd.f32 %v9233_v3, %v9232_v39  ;;  %10089 = vmatprep.mubr.msk.f32.mxu0 %vm11976_vm3, %v16184_v41  ;;  %v8079_v39 = vld [vmem:[%s16114_s4 + $0x148] sm:$0xff] }
 0x4a4   :  { %11290 = vmatprep.subr.bf16.mxu0 %v16181_v33 }
 0x4a5   :  { %v9235_v62 = vpop.f32.mrb[238].mxu1 }
 0x4a6   :  { %10090 = vmatmul.mubr.msk.f32.gmra.mrb[90].mxu0 %vm521_vm5, %v14737_v14  ;;  %v9236_v49 = vpop.f32.mrb[239].mxu1 }
 0x4a7   :  { %11292 = vmatpush3.bf16.msra.mxu0 %v13198_v51  ;;  %v14950_v13 = vadd.f32 %v9236_v49, %v9235_v62  ;;  %10092 = vmatprep.mubr.msk.f32.mxu0 %vm11976_vm3, %v16184_v41 }
 0x4a8   :  { %11293 = vmatprep.subr.bf16.mxu0 %v16181_v33 }
 0x4a9   :  { %v9238_v40 = vpop.f32.mrb[240].mxu1 }
 0x4aa   :  { %10093 = vmatmul.mubr.msk.f32.gmra.mrb[92].mxu0 %vm521_vm5, %v14753_v21  ;;  %v9239_v46 = vpop.f32.mrb[241].mxu1 }
 0x4ab   :  { %11295 = vmatpush3.bf16.msra.mxu0 %v13200_v60  ;;  %v14958_v45 = vadd.f32 %v9239_v46, %v9238_v40  ;;  %10095 = vmatprep.mubr.msk.f32.mxu0 %vm11976_vm3, %v16184_v41  ;;  %v8080_v40 = vld [vmem:[%s16114_s4 + $0x150] sm:$0xff]  ;;  %v8081_v46 = vld [vmem:[%s16114_s4 + $0x158] sm:$0xff] }
 0x4ac   :  { %11296 = vmatprep.subr.bf16.mxu0 %v16181_v33 }
 0x4ad   :  { %v9241_v14 = vpop.f32.mrb[242].mxu1 }
 0x4ae   :  { %10096 = vmatmul.mubr.msk.f32.gmra.mrb[94].mxu0 %vm521_vm5, %v14769_v48  ;;  %v9242_v16 = vpop.f32.mrb[243].mxu1 }
 0x4af   :  { %11298 = vmatpush3.bf16.msra.mxu0 %v13202_v6  ;;  %v14966_v10 = vadd.f32 %v9242_v16, %v9241_v14  ;;  %10098 = vmatprep.mubr.msk.f32.mxu0 %vm11976_vm3, %v16184_v41 }
 0x4b0   :  { %10130 = vmatprep.subr.mxu0 %v16184_v41 }
 0x4b1   :  { %v9244_v21 = vpop.f32.mrb[244].mxu1 }
 0x4b2   :  { %10099 = vmatmul.mubr.msk.f32.gmra.mrb[96].mxu0 %vm521_vm5, %v14779_v31  ;;  %v9245_v35 = vpop.f32.mrb[245].mxu1 }
 0x4b3   :  { %10131 = vmatpush3.msk.msra.mxu0 %vm1021_vm2, %v13271_v0  ;;  %v14975_v53 = vadd.f32 %v9245_v35, %v9244_v21  ;;  %10101 = vmatprep.mubr.msk.f32.mxu0 %vm11976_vm3, %v16184_v41  ;;  %v11303_v21 = vpack.c.bf16 %v8081_v46, %v8080_v40  ;;  %v8082_v35 = vld [vmem:[%s16114_s4 + $0x160] sm:$0xff] }
 0x4b4   :  { %11299 = vmatprep.subr.bf16.mxu0 %v16181_v33 }
 0x4b5   :  { %v9247_v48 = vpop.f32.mrb[246].mxu1 }
 0x4b6   :  { %10102 = vmatmul.mubr.msk.f32.gmra.mrb[98].mxu0 %vm521_vm5, %v14788_v20  ;;  %v9248_v55 = vpop.f32.mrb[247].mxu1  ;;  %v8078_v20 = vld [vmem:[%s16114_s4 + $0x140] sm:$0xff] }
 0x4b7   :  { %v14982_v50 = vadd.f32 %v9248_v55, %v9247_v48  ;;  %10104 = vmatprep.mubr.msk.f32.mxu0 %vm11976_vm3, %v16184_v41  ;;  %v11300_v49 = vpack.c.bf16 %v8079_v39, %v8078_v20  ;;  %v3422_v48 = vsel %vm3395_vm12, 1.0, %v16184_v41  ;;  %v3425_v39 = vsel %vm3398_vm13, 1.0, %v16184_v41 }
 0x4b9   :  { %v9250_v31 = vpop.f32.mrb[248].mxu1 }
 0x4ba   :  { %10105 = vmatmul.mubr.msk.f32.gmra.mrb[100].mxu0 %vm521_vm5, %v14797_v15  ;;  %v9251_v7 = vpop.f32.mrb[249].mxu1 }
 0x4bb   :  { %v14988_v63 = vadd.f32 %v9251_v7, %v9250_v31  ;;  %10107 = vmatprep.mubr.msk.f32.mxu0 %vm11976_vm3, %v16184_v41  ;;  %v11306_v7 = vpack.c.bf16 %v8083_v5, %v8082_v35  ;;  %v16204_v35 = vld [vmem:[#allocation6_spill] sm:$0xff] }
 0x4bc   :  { %vm3410_vm4 = vcmp.eq.s32.totalorder %v13295_v26, %v16204_v35 }
 0x4bd   :  { %v9253_v3 = vpop.f32.mrb[250].mxu1 }
 0x4be   :  { %10108 = vmatmul.mubr.msk.f32.gmra.mrb[102].mxu0 %vm521_vm5, %v14806_v4  ;;  %v9254_v15 = vpop.f32.mrb[251].mxu1 }
 0x4bf   :  { %v15002_v62 = vadd.f32 %v9254_v15, %v9253_v3  ;;  %10132 = vmatprep.mubr.msk.f32.mxu0 %vm11976_vm3, %v16184_v41  ;;  %v3428_v15 = vsel %vm3401_vm15, 1.0, %v16184_v41 }
 0x4c1   :  { %v5126_v14 = vpop.f32.mrb[252].mxu1 }
 0x4c2   :  { %v15015_v4 = vadd.f32 %v9231_v36, %v5126_v14  ;;  %10133 = vmatmul.mubr.msk.f32.vlgmr.msra.gmra.mrb[122].mxu0 %vm993_vm14, %v3419_v23  ;;  %v10410_v16 = vpop.f32.mrb[253].mxu1  ;;  %v16203_v23 = vld [vmem:[#allocation7_spill] sm:$0xff] }
 0x4c3   :  { %10135 = vmatprep.mubr.msk.f32.mxu0 %vm11976_vm3, %v16184_v41  ;;  %11301 = vmatpush3.bf16.msra.mxu0 %v11300_v49  ;;  %v16202_v49 = vld [vmem:[#allocation9_spill] sm:$0xff]  ;;  %vm3407_vm1 = vcmp.eq.s32.totalorder %v13295_v26, %v16203_v23 }
 0x4c4   :  { %11302 = vmatprep.subr.bf16.mxu0 %v16181_v33  ;;  %vm3404_vm0 = vcmp.eq.s32.totalorder %v13295_v26, %v16202_v49 }
 0x4c5   :  { %v5131_v36 = vpop.f32.mrb[254].mxu1  ;;  %v3431_v46 = vsel %vm3404_vm0, 1.0, %v16184_v41 }
 0x4c6   :  { %v15031_v55 = vadd.f32 %v14942_v18, %v5131_v36  ;;  %10136 = vmatmul.mubr.msk.f32.gmra.mrb[124].mxu0 %vm993_vm14, %v3422_v48  ;;  %v10413_v31 = vpop.f32.mrb[255].mxu1  ;;  %v3437_v48 = vsel %vm3410_vm4, 1.0, %v16184_v41 }
 0x4c7   :  { %10138 = vmatprep.mubr.msk.f32.mxu0 %vm11976_vm3, %v16184_v41  ;;  %11304 = vmatpush3.bf16.msra.mxu0 %v11303_v21  ;;  %v3434_v21 = vsel %vm3407_vm1, 1.0, %v16184_v41  ;;  %v16205_v31 = vld [vmem:[#allocation11_spill] sm:$0xff] }
 0x4c8   :  { %11305 = vmatprep.subr.bf16.mxu0 %v16181_v33  ;;  %vm3413_vm6 = vcmp.eq.s32.totalorder %v13295_v26, %v16205_v31 }
 0x4c9   :  { %v5136_v20 = vpop.f32.mrb[0].mxu1 }
 0x4ca   :  { %v15041_v29 = vadd.f32 %v14950_v13, %v5136_v20  ;;  %10139 = vmatmul.mubr.msk.f32.gmra.mrb[126].mxu0 %vm993_vm14, %v3425_v39  ;;  %v10416_v18 = vpop.f32.mrb[1].mxu1  ;;  %v3440_v39 = vsel %vm3413_vm6, 1.0, %v16184_v41  ;;  %vm5437_vm6 = vcmask 588800  }
 0x4cb   :  { %10141 = vmatprep.mubr.msk.f32.mxu0 %vm11976_vm3, %v16184_v41  ;;  %11307 = vmatpush3.bf16.msra.mxu0 %v11306_v7  ;;  %v16206_v18 = vld [vmem:[#allocation12_spill] sm:$0xff] }
 0x4cc   :  { %11308 = vmatprep.subr.bf16.mxu0 %v16181_v33  ;;  %vm3416_vm8 = vcmp.eq.s32.totalorder %v13295_v26, %v16206_v18  ;;  %v8137_v18 = vld [vmem:[%s16114_s4 + $0x1a8] sm:$0xff] }
 0x4cd   :  { %v5141_v3 = vpop.f32.mrb[2].mxu1  ;;  %v3443_v49 = vsel %vm3416_vm8, 1.0, %v16184_v41 }
 0x4ce   :  { %v15051_v54 = vadd.f32 %v14958_v45, %v5141_v3  ;;  %10142 = vmatmul.mubr.msk.f32.gmra.mrb[128].mxu0 %vm993_vm14, %v3428_v15  ;;  %v10419_v13 = vpop.f32.mrb[3].mxu1 }
 0x4cf   :  { %10144 = vmatprep.mubr.msk.f32.mxu0 %vm11976_vm3, %v16184_v41 }
 0x4d1   :  { %v5146_v40 = vpop.f32.mrb[4].mxu1 }
 0x4d2   :  { %v15060_v14 = vadd.f32 %v14966_v10, %v5146_v40  ;;  %10145 = vmatmul.mubr.msk.f32.gmra.mrb[130].mxu0 %vm993_vm14, %v3431_v46  ;;  %v10422_v16 = vpop.f32.mrb[5].mxu1  ;;  %v8085_v46 = vld [vmem:[%s16114_s4 + $0x178] sm:$0xff] }
 0x4d3   :  { %10147 = vmatprep.mubr.msk.f32.mxu0 %vm11976_vm3, %v16184_v41  ;;  %v8133_v16 = vld [vmem:[%s16114_s4 + $0x188] sm:$0xff] }
 0x4d5   :  { %v5151_v45 = vpop.f32.mrb[6].mxu1 }
 0x4d6   :  { %v15069_v5 = vadd.f32 %v14975_v53, %v5151_v45  ;;  %10148 = vmatmul.mubr.msk.f32.gmra.mrb[132].mxu0 %vm993_vm14, %v3434_v21  ;;  %v10425_v36 = vpop.f32.mrb[7].mxu1 }
 0x4d7   :  { %10150 = vmatprep.mubr.msk.f32.mxu0 %vm11976_vm3, %v16184_v41 }
 0x4d9   :  { %v5156_v10 = vpop.f32.mrb[8].mxu1 }
 0x4da   :  { %v15078_v7 = vadd.f32 %v14982_v50, %v5156_v10  ;;  %10151 = vmatmul.mubr.msk.f32.gmra.mrb[134].mxu0 %vm993_vm14, %v3437_v48  ;;  %v10428_v20 = vpop.f32.mrb[9].mxu1  ;;  %v8134_v10 = vld [vmem:[%s16114_s4 + $0x190] sm:$0xff]  ;;  %v8135_v48 = vld [vmem:[%s16114_s4 + $0x198] sm:$0xff] }
 0x4db   :  { %10153 = vmatprep.mubr.msk.f32.mxu0 %vm11976_vm3, %v16184_v41  ;;  %v11362_v20 = vpack.c.bf16 %v8135_v48, %v8134_v10 }
 0x4dd   :  { %v5161_v53 = vpop.f32.mrb[10].mxu1 }
 0x4de   :  { %v15087_v3 = vadd.f32 %v14988_v63, %v5161_v53  ;;  %10154 = vmatmul.mubr.msk.f32.gmra.mrb[136].mxu0 %vm993_vm14, %v3440_v39  ;;  %v10431_v15 = vpop.f32.mrb[11].mxu1  ;;  %v8084_v63 = vld [vmem:[%s16114_s4 + $0x170] sm:$0xff]  ;;  %v8136_v39 = vld [vmem:[%s16114_s4 + $0x1a0] sm:$0xff] }
 0x4df   :  { %10156 = vmatprep.mubr.msk.f32.mxu0 %vm11976_vm3, %v16184_v41  ;;  %v11309_v23 = vpack.c.bf16 %v8085_v46, %v8084_v63  ;;  %v8139_v63 = vld [vmem:[%s16114_s4 + $0x1b8] sm:$0xff] }
 0x4e1   :  { %v5166_v50 = vpop.f32.mrb[12].mxu1  ;;  %11310 = vmatpush3.bf16.msra.mxu0 %v11309_v23 }
 0x4e2   :  { %v15094_v13 = vadd.f32 %v15002_v62, %v5166_v50  ;;  %10157 = vmatmul.mubr.msk.f32.gmra.mrb[138].mxu0 %vm993_vm14, %v3443_v49  ;;  %v10434_v40 = vpop.f32.mrb[13].mxu1  ;;  %11358 = vmatprep.subr.bf16.mxu0 %v16181_v33  ;;  %v8132_v62 = vld [vmem:[%s16114_s4 + $0x180] sm:$0xff]  ;;  %v11365_v50 = vpack.c.bf16 %v8137_v18, %v8136_v39 }
 0x4e3   :  { %10175 = vmatprep.mubr.msk.f32.mxu0 %vm11976_vm3, %v16184_v41  ;;  %v11359_v21 = vpack.c.bf16 %v8133_v16, %v8132_v62  ;;  %v8138_v40 = vld [vmem:[%s16114_s4 + $0x1b0] sm:$0xff] }
 0x4e4   :  { %v11368_v23 = vpack.c.bf16 %v8139_v63, %v8138_v40  ;;  %v16214_v40 = vld [vmem:[#allocation19_spill] sm:$0xff] }
 0x4e5   :  { %vm4396_vm15 = vcmp.eq.s32.totalorder %v13295_v26, %v16214_v40 }
 0x4e6   :  { %v4423_v63 = vsel %vm4396_vm15, 1.0, %v16184_v41 }
 0x595   :  { %v3647_v45 = vpop.f32.mrb[122].mxu0 }
 0x596   :  { %v3648_v35 = vadd.f32 %v14813_v37, %v3647_v45  ;;  %v10134_v36 = vpop.f32.mrb[123].mxu0 }
 0x598   :  { %10176 = vmatmul.mubr.msk.f32.vlgmr.msra.gmra.mrb[86].mxu0 %vm521_vm5, %v3648_v35 }
 0x599   :  { %v3652_v31 = vpop.f32.mrb[124].mxu0  ;;  %10178 = vmatprep.mubr.msk.f32.mxu0 %vm11976_vm3, %v16184_v41  ;;  %11360 = vmatpush3.bf16.msra.mxu0 %v11359_v21 }
 0x59a   :  { %v3653_v53 = vadd.f32 %v14817_v59, %v3652_v31  ;;  %v10137_v37 = vpop.f32.mrb[125].mxu0  ;;  %11361 = vmatprep.subr.bf16.mxu0 %v16181_v33 }
 0x59b   :  { %v16207_v37 = vld [vmem:[#allocation21_spill] sm:$0xff] }
 0x59c   :  { %10179 = vmatmul.mubr.msk.f32.gmra.mrb[88].mxu0 %vm521_vm5, %v3653_v53 }
 0x59d   :  { %v3657_v15 = vpop.f32.mrb[126].mxu0  ;;  %10181 = vmatprep.mubr.msk.f32.mxu0 %vm11976_vm3, %v16184_v41  ;;  %11363 = vmatpush3.bf16.msra.mxu0 %v11362_v20 }
 0x59e   :  { %v3658_v59 = vadd.f32 %v14819_v11, %v3657_v15  ;;  %v10140_v49 = vpop.f32.mrb[127].mxu0  ;;  %11364 = vmatprep.subr.bf16.mxu0 %v16181_v33  ;;  %v16212_v15 = vld [vmem:[#allocation17_spill] sm:$0xff] }
 0x59f   :  { %vm4390_vm12 = vcmp.eq.s32.totalorder %v13295_v26, %v16212_v15 }
 0x5a0   :  { %10182 = vmatmul.mubr.msk.f32.gmra.mrb[90].mxu0 %vm521_vm5, %v3658_v59  ;;  %v16213_v59 = vld [vmem:[#allocation18_spill] sm:$0xff] }
 0x5a1   :  { %v3662_v46 = vpop.f32.mrb[128].mxu0  ;;  %10184 = vmatprep.mubr.msk.f32.mxu0 %vm11976_vm3, %v16184_v41  ;;  %11366 = vmatpush3.bf16.msra.mxu0 %v11365_v50  ;;  %v4417_v50 = vsel %vm4390_vm12, 1.0, %v16184_v41  ;;  %vm4393_vm13 = vcmp.eq.s32.totalorder %v13295_v26, %v16213_v59 }
 0x5a2   :  { %v3663_v11 = vadd.f32 %v14821_v27, %v3662_v46  ;;  %v10143_v62 = vpop.f32.mrb[129].mxu0  ;;  %11367 = vmatprep.subr.bf16.mxu0 %v16181_v33  ;;  %v4420_v49 = vsel %vm4393_vm13, 1.0, %v16184_v41  ;;  %v16215_v46 = vld [vmem:[#allocation20_spill] sm:$0xff] }
 0x5a3   :  { %vm4399_vm0 = vcmp.eq.s32.totalorder %v13295_v26, %v16215_v46 }
 0x5a4   :  { %10185 = vmatmul.mubr.msk.f32.gmra.mrb[92].mxu0 %vm521_vm5, %v3663_v11  ;;  %v16216_v11 = vld [vmem:[#allocation8_spill] sm:$0xff] }
 0x5a5   :  { %v3667_v16 = vpop.f32.mrb[130].mxu0  ;;  %10187 = vmatprep.mubr.msk.f32.mxu0 %vm11976_vm3, %v16184_v41  ;;  %11369 = vmatpush3.bf16.msra.mxu0 %v11368_v23  ;;  %v4426_v23 = vsel %vm4399_vm0, 1.0, %v16184_v41  ;;  %vm4402_vm1 = vcmp.eq.s32.totalorder %v13295_v26, %v16216_v11  ;;  %vm6943_vm0 = vcmask 64512  }
 0x5a6   :  { %v3668_v45 = vadd.f32 %v14823_v44, %v3667_v16  ;;  %v10146_v21 = vpop.f32.mrb[131].mxu0  ;;  %11402 = vmatprep.subr.bf16.mxu0 %v16181_v33  ;;  %v4429_v62 = vsel %vm4402_vm1, 1.0, %v16184_v41  ;;  %v8192_v16 = vld [vmem:[%s16114_s4 + $0x1f0] sm:$0xff] }
 0x5a7   :  { %v8240_v21 = vld [vmem:[%s16114_s4 + $0x200] sm:$0xff] }
 0x5a8   :  { %10188 = vmatmul.mubr.msk.f32.gmra.mrb[94].mxu0 %vm521_vm5, %v3668_v45 }
 0x5a9   :  { %v3672_v35 = vpop.f32.mrb[132].mxu0  ;;  %10190 = vmatprep.mubr.msk.f32.mxu0 %vm11976_vm3, %v16184_v41 }
 0x5aa   :  { %v3673_v27 = vadd.f32 %v14825_v30, %v3672_v35  ;;  %v10149_v36 = vpop.f32.mrb[133].mxu0  ;;  %v8241_v35 = vld [vmem:[%s16114_s4 + $0x208] sm:$0xff] }
 0x5ab   :  { %v11477_v36 = vpack.c.bf16 %v8241_v35, %v8240_v21 }
 0x5ac   :  { %10191 = vmatmul.mubr.msk.f32.gmra.mrb[96].mxu0 %vm521_vm5, %v3673_v27 }
 0x5ad   :  { %v3677_v10 = vpop.f32.mrb[134].mxu0  ;;  %10193 = vmatprep.mubr.msk.f32.mxu0 %vm11976_vm3, %v16184_v41 }
 0x5ae   :  { %v3678_v44 = vadd.f32 %v14827_v32, %v3677_v10  ;;  %v10152_v48 = vpop.f32.mrb[135].mxu0 }
 0x5af   :  { %v8242_v48 = vld [vmem:[%s16114_s4 + $0x210] sm:$0xff] }
 0x5b0   :  { %10194 = vmatmul.mubr.msk.f32.gmra.mrb[98].mxu0 %vm521_vm5, %v3678_v44 }
 0x5b1   :  { %v3682_v31 = vpop.f32.mrb[136].mxu0  ;;  %10196 = vmatprep.mubr.msk.f32.mxu0 %vm11976_vm3, %v16184_v41 }
 0x5b2   :  { %v3683_v20 = vadd.f32 %v14829_v28, %v3682_v31  ;;  %v10155_v53 = vpop.f32.mrb[137].mxu0  ;;  %v16209_v28 = vld [vmem:[#allocation14_spill] sm:$0xff]  ;;  %v8243_v31 = vld [vmem:[%s16114_s4 + $0x218] sm:$0xff] }
 0x5b3   :  { %vm4381_vm9 = vcmp.eq.s32.totalorder %v13295_v26, %v16209_v28  ;;  %v11480_v53 = vpack.c.bf16 %v8243_v31, %v8242_v48 }
 0x5b4   :  { %10197 = vmatmul.mubr.msk.f32.gmra.mrb[100].mxu0 %vm521_vm5, %v3683_v20 }
 0x5b5   :  { %v3687_v30 = vpop.f32.mrb[138].mxu0  ;;  %10199 = vmatprep.mubr.msk.f32.mxu0 %vm11976_vm3, %v16184_v41 }
 0x5b6   :  { %v3688_v39 = vadd.f32 %v16207_v37, %v3687_v30  ;;  %v10158_v18 = vpop.f32.mrb[139].mxu0  ;;  %v8244_v37 = vld [vmem:[%s16114_s4 + $0x220] sm:$0xff] }
 0x5b8   :  { %10200 = vmatmul.mubr.msk.f32.gmra.mrb[102].mxu0 %vm521_vm5, %v3688_v39  ;;  %v8245_v39 = vld [vmem:[%s16114_s4 + $0x228] sm:$0xff] }
 0x5b9   :  { %10267 = vmatprep.mubr.msk.f32.mxu0 %vm11976_vm3, %v16184_v41 }
 0x5bc   :  { %10268 = vmatmul.mubr.msk.f32.vlgmr.msra.gmra.mrb[86].mxu0 %vm521_vm5, %v14833_v8  ;;  %v8190_v8 = vld [vmem:[%s16114_s4 + $0x1e0] sm:$0xff] }
 0x5bd   :  { %11404 = vmatpush3.bf16.msra.mxu0 %v13193_v43  ;;  %10270 = vmatprep.mubr.msk.f32.mxu0 %vm11976_vm3, %v16184_v41  ;;  %v8186_v43 = vld [vmem:[%s16114_s4 + $0x1c0] sm:$0xff] }
 0x5be   :  { %11405 = vmatprep.subr.bf16.mxu0 %v16181_v33 }
 0x5c0   :  { %10271 = vmatmul.mubr.msk.f32.gmra.mrb[88].mxu0 %vm521_vm5, %v14835_v34  ;;  %v8191_v34 = vld [vmem:[%s16114_s4 + $0x1e8] sm:$0xff] }
 0x5c1   :  { %11407 = vmatpush3.bf16.msra.mxu0 %v13196_v12  ;;  %10273 = vmatprep.mubr.msk.f32.mxu0 %vm11976_vm3, %v16184_v41  ;;  %v8187_v12 = vld [vmem:[%s16114_s4 + $0x1c8] sm:$0xff] }
 0x5c2   :  { %11408 = vmatprep.subr.bf16.mxu0 %v16181_v33 }
 0x5c4   :  { %10274 = vmatmul.mubr.msk.f32.gmra.mrb[90].mxu0 %vm521_vm5, %v14837_v57 }
 0x5c5   :  { %11410 = vmatpush3.bf16.msra.mxu0 %v13198_v51  ;;  %10276 = vmatprep.mubr.msk.f32.mxu0 %vm11976_vm3, %v16184_v41  ;;  %v16208_v51 = vld [vmem:[#allocation13_spill] sm:$0xff] }
 0x5c6   :  { %11411 = vmatprep.subr.bf16.mxu0 %v16181_v33 }
 0x5c8   :  { %10277 = vmatmul.mubr.msk.f32.gmra.mrb[92].mxu0 %vm521_vm5, %v14839_v38  ;;  %v4408_v38 = vsel %vm4381_vm9, 1.0, %v16184_v41 }
 0x5c9   :  { %11413 = vmatpush3.bf16.msra.mxu0 %v13200_v60  ;;  %10279 = vmatprep.mubr.msk.f32.mxu0 %vm11976_vm3, %v16184_v41  ;;  %v11418_v60 = vpack.c.bf16 %v8187_v12, %v8186_v43  ;;  %v11483_v43 = vpack.c.bf16 %v8245_v39, %v8244_v37 }
 0x5ca   :  { %11414 = vmatprep.subr.bf16.mxu0 %v16181_v33 }
 0x5cc   :  { %10280 = vmatmul.mubr.msk.f32.gmra.mrb[94].mxu0 %vm521_vm5, %v14841_v25  ;;  %v16210_v25 = vld [vmem:[#allocation15_spill] sm:$0xff] }
 0x5cd   :  { %11416 = vmatpush3.bf16.msra.mxu0 %v13202_v6  ;;  %10282 = vmatprep.mubr.msk.f32.mxu0 %vm11976_vm3, %v16184_v41  ;;  %v8188_v6 = vld [vmem:[%s16114_s4 + $0x1d0] sm:$0xff]  ;;  %vm4384_vm10 = vcmp.eq.s32.totalorder %v13295_v26, %v16210_v25 }
 0x5ce   :  { %10314 = vmatprep.subr.mxu0 %v16184_v41 }
 0x5d0   :  { %10283 = vmatmul.mubr.msk.f32.gmra.mrb[96].mxu0 %vm521_vm5, %v14843_v2  ;;  %v11424_v2 = vpack.c.bf16 %v8191_v34, %v8190_v8 }
 0x5d1   :  { %10315 = vmatpush3.msk.msra.mxu0 %vm1021_vm2, %v13271_v0  ;;  %10285 = vmatprep.mubr.msk.f32.mxu0 %vm11976_vm3, %v16184_v41  ;;  %vm4378_vm2 = vcmp.eq.s32.totalorder %v13295_v26, %v16208_v51  ;;  %v8189_v0 = vld [vmem:[%s16114_s4 + $0x1d8] sm:$0xff]  ;;  %v8246_v51 = vld [vmem:[%s16114_s4 + $0x230] sm:$0xff] }
 0x5d2   :  { %11417 = vmatprep.subr.bf16.mxu0 %v16181_v33  ;;  %v4405_v32 = vsel %vm4378_vm2, 1.0, %v16184_v41  ;;  %v11421_v57 = vpack.c.bf16 %v8189_v0, %v8188_v6 }
 0x5d4   :  { %10286 = vmatmul.mubr.msk.f32.gmra.mrb[98].mxu0 %vm521_vm5, %v14845_v17  ;;  %v4411_v17 = vsel %vm4384_vm10, 1.0, %v16184_v41 }
 0x5d5   :  { %10288 = vmatprep.mubr.msk.f32.mxu0 %vm11976_vm3, %v16184_v41 }
 0x5d8   :  { %10289 = vmatmul.mubr.msk.f32.gmra.mrb[100].mxu0 %vm521_vm5, %v14847_v24  ;;  %v16211_v24 = vld [vmem:[#allocation16_spill] sm:$0xff] }
 0x5d9   :  { %10291 = vmatprep.mubr.msk.f32.mxu0 %vm11976_vm3, %v16184_v41  ;;  %vm4387_vm11 = vcmp.eq.s32.totalorder %v13295_v26, %v16211_v24  ;;  %v8193_v26 = vld [vmem:[%s16114_s4 + $0x1f8] sm:$0xff] }
 0x5da   :  { %v11427_v45 = vpack.c.bf16 %v8193_v26, %v8192_v16 }
 0x5dc   :  { %10292 = vmatmul.mubr.msk.f32.gmra.mrb[102].mxu0 %vm521_vm5, %v14855_v1  ;;  %v4414_v1 = vsel %vm4387_vm11, 1.0, %v16184_v41 }
 0x5dd   :  { %10316 = vmatprep.mubr.msk.f32.mxu0 %vm11976_vm3, %v16184_v41 }
 0x5e0   :  { %10317 = vmatmul.mubr.msk.f32.vlgmr.msra.gmra.mrb[140].mxu0 %vm993_vm14, %v4405_v32 }
 0x5e1   :  { %10319 = vmatprep.mubr.msk.f32.mxu0 %vm11976_vm3, %v16184_v41  ;;  %11419 = vmatpush3.bf16.msra.mxu0 %v11418_v60  ;;  %v8247_v60 = vld [vmem:[%s16114_s4 + $0x238] sm:$0xff] }
 0x5e2   :  { %11420 = vmatprep.subr.bf16.mxu0 %v16181_v33  ;;  %v11486_v0 = vpack.c.bf16 %v8247_v60, %v8246_v51 }
 0x5e4   :  { %10320 = vmatmul.mubr.msk.f32.gmra.mrb[142].mxu0 %vm993_vm14, %v4408_v38 }
 0x5e5   :  { %10322 = vmatprep.mubr.msk.f32.mxu0 %vm11976_vm3, %v16184_v41  ;;  %11422 = vmatpush3.bf16.msra.mxu0 %v11421_v57 }
 0x5e6   :  { %11423 = vmatprep.subr.bf16.mxu0 %v16181_v33 }
 0x5e8   :  { %10323 = vmatmul.mubr.msk.f32.gmra.mrb[144].mxu0 %vm993_vm14, %v4411_v17 }
 0x5e9   :  { %10325 = vmatprep.mubr.msk.f32.mxu0 %vm11976_vm3, %v16184_v41  ;;  %11425 = vmatpush3.bf16.msra.mxu0 %v11424_v2 }
 0x5ea   :  { %11426 = vmatprep.subr.bf16.mxu0 %v16181_v33 }
 0x5ec   :  { %10326 = vmatmul.mubr.msk.f32.gmra.mrb[146].mxu0 %vm993_vm14, %v4414_v1 }
 0x5ed   :  { %10328 = vmatprep.mubr.msk.f32.mxu0 %vm11976_vm3, %v16184_v41  ;;  %11428 = vmatpush3.bf16.msra.mxu0 %v11427_v45 }
 0x5ee   :  { %11476 = vmatprep.subr.bf16.mxu0 %v16181_v33 }
 0x5f0   :  { %10329 = vmatmul.mubr.msk.f32.gmra.mrb[148].mxu0 %vm993_vm14, %v4417_v50 }
 0x5f1   :  { %10331 = vmatprep.mubr.msk.f32.mxu0 %vm11976_vm3, %v16184_v41 }
 0x5f4   :  { %10332 = vmatmul.mubr.msk.f32.gmra.mrb[150].mxu0 %vm993_vm14, %v4420_v49 }
 0x5f5   :  { %10334 = vmatprep.mubr.msk.f32.mxu0 %vm11976_vm3, %v16184_v41 }
 0x5f8   :  { %10335 = vmatmul.mubr.msk.f32.gmra.mrb[152].mxu0 %vm993_vm14, %v4423_v63 }
 0x5f9   :  { %10337 = vmatprep.mubr.msk.f32.mxu0 %vm11976_vm3, %v16184_v41 }
 0x5fc   :  { %10338 = vmatmul.mubr.msk.f32.gmra.mrb[154].mxu0 %vm993_vm14, %v4426_v23 }
 0x5fd   :  { %10340 = vmatprep.mubr.msk.f32.mxu0 %vm11976_vm3, %v16184_v41 }
 0x600   :  { %10341 = vmatmul.mubr.msk.f32.gmra.mrb[156].mxu0 %vm993_vm14, %v4429_v62 }
 0x601   :  { %10359 = vmatprep.mubr.msk.f32.mxu0 %vm11976_vm3, %v16184_v41 }
 0x6b3   :  { %v4633_v27 = vpop.f32.mrb[140].mxu0 }
 0x6b4   :  { %v4634_v10 = vadd.f32 %v14865_v52, %v4633_v27  ;;  %v10318_v44 = vpop.f32.mrb[141].mxu0 }
 0x6b6   :  { %10360 = vmatmul.mubr.msk.f32.vlgmr.msra.gmra.mrb[86].mxu0 %vm521_vm5, %v4634_v10 }
 0x6b7   :  { %v4638_v20 = vpop.f32.mrb[142].mxu0  ;;  %10362 = vmatprep.mubr.msk.f32.mxu0 %vm11976_vm3, %v16184_v41  ;;  %11478 = vmatpush3.bf16.msra.mxu0 %v11477_v36 }
 0x6b8   :  { %v4639_v30 = vadd.f32 %v14878_v47, %v4638_v20  ;;  %v10321_v52 = vpop.f32.mrb[143].mxu0  ;;  %11479 = vmatprep.subr.bf16.mxu0 %v16181_v33 }
 0x6ba   :  { %10363 = vmatmul.mubr.msk.f32.gmra.mrb[88].mxu0 %vm521_vm5, %v4639_v30 }
 0x6bb   :  { %v4643_v18 = vpop.f32.mrb[144].mxu0  ;;  %10365 = vmatprep.mubr.msk.f32.mxu0 %vm11976_vm3, %v16184_v41  ;;  %11481 = vmatpush3.bf16.msra.mxu0 %v11480_v53 }
 0x6bc   :  { %v4644_v47 = vadd.f32 %v14891_v58, %v4643_v18  ;;  %v10324_v12 = vpop.f32.mrb[145].mxu0  ;;  %11482 = vmatprep.subr.bf16.mxu0 %v16181_v33 }
 0x6be   :  { %10366 = vmatmul.mubr.msk.f32.gmra.mrb[90].mxu0 %vm521_vm5, %v4644_v47 }
 0x6bf   :  { %v4648_v6 = vpop.f32.mrb[146].mxu0  ;;  %10368 = vmatprep.mubr.msk.f32.mxu0 %vm11976_vm3, %v16184_v41  ;;  %11484 = vmatpush3.bf16.msra.mxu0 %v11483_v43 }
 0x6c0   :  { %v4649_v58 = vadd.f32 %v14898_v9, %v4648_v6  ;;  %v10327_v32 = vpop.f32.mrb[147].mxu0  ;;  %11485 = vmatprep.subr.bf16.mxu0 %v16181_v33 }
 0x6c2   :  { %10369 = vmatmul.mubr.msk.f32.gmra.mrb[92].mxu0 %vm521_vm5, %v4649_v58 }
 0x6c3   :  { %v4653_v28 = vpop.f32.mrb[148].mxu0  ;;  %10371 = vmatprep.mubr.msk.f32.mxu0 %vm11976_vm3, %v16184_v41  ;;  %11487 = vmatpush3.bf16.msra.mxu0 %v11486_v0 }
 0x6c4   :  { %v4654_v57 = vadd.f32 %v14905_v61, %v4653_v28  ;;  %v10330_v8 = vpop.f32.mrb[149].mxu0  ;;  %11536 = vmatprep.subr.bf16.mxu0 %v16181_v33 }
 0x6c6   :  { %10372 = vmatmul.mubr.msk.f32.gmra.mrb[94].mxu0 %vm521_vm5, %v4654_v57 }
 0x6c7   :  { %v4658_v34 = vpop.f32.mrb[150].mxu0  ;;  %10374 = vmatprep.mubr.msk.f32.mxu0 %vm11976_vm3, %v16184_v41 }
 0x6c8   :  { %v4659_v9 = vadd.f32 %v14911_v42, %v4658_v34  ;;  %v10333_v38 = vpop.f32.mrb[151].mxu0 }
 0x6ca   :  { %10375 = vmatmul.mubr.msk.f32.gmra.mrb[96].mxu0 %vm521_vm5, %v4659_v9 }
 0x6cb   :  { %v4663_v25 = vpop.f32.mrb[152].mxu0  ;;  %10377 = vmatprep.mubr.msk.f32.mxu0 %vm11976_vm3, %v16184_v41 }
 0x6cc   :  { %v4664_v61 = vadd.f32 %v14917_v19, %v4663_v25  ;;  %v10336_v2 = vpop.f32.mrb[153].mxu0 }
 0x6ce   :  { %10378 = vmatmul.mubr.msk.f32.gmra.mrb[98].mxu0 %vm521_vm5, %v4664_v61 }
 0x6cf   :  { %v4668_v17 = vpop.f32.mrb[154].mxu0  ;;  %10380 = vmatprep.mubr.msk.f32.mxu0 %vm11976_vm3, %v16184_v41 }
 0x6d0   :  { %v4669_v24 = vadd.f32 %v14923_v22, %v4668_v17  ;;  %v10339_v1 = vpop.f32.mrb[155].mxu0 }
 0x6d2   :  { %10381 = vmatmul.mubr.msk.f32.gmra.mrb[100].mxu0 %vm521_vm5, %v4669_v24 }
 0x6d3   :  { %v4673_v42 = vpop.f32.mrb[156].mxu0  ;;  %10383 = vmatprep.mubr.msk.f32.mxu0 %vm11976_vm3, %v16184_v41 }
 0x6d4   :  { %v4674_v15 = vadd.f32 %v14929_v56, %v4673_v42  ;;  %v10342_v50 = vpop.f32.mrb[157].mxu0 }
 0x6d6   :  { %10384 = vmatmul.mubr.msk.f32.gmra.mrb[102].mxu0 %vm521_vm5, %v4674_v15 }
 0x6d7   :  { %10451 = vmatprep.mubr.msk.f32.mxu0 %vm11976_vm3, %v16184_v41 }
 0x6da   :  { %10452 = vmatmul.mubr.msk.f32.vlgmr.msra.gmra.mrb[86].mxu0 %vm521_vm5, %v15015_v4 }
 0x6db   :  { %10454 = vmatprep.mubr.msk.f32.mxu0 %vm11976_vm3, %v16184_v41 }
 0x6de   :  { %10455 = vmatmul.mubr.msk.f32.gmra.mrb[88].mxu0 %vm521_vm5, %v15031_v55 }
 0x6df   :  { %10457 = vmatprep.mubr.msk.f32.mxu0 %vm11976_vm3, %v16184_v41 }
 0x6e2   :  { %10458 = vmatmul.mubr.msk.f32.gmra.mrb[90].mxu0 %vm521_vm5, %v15041_v29 }
 0x6e3   :  { %10460 = vmatprep.mubr.msk.f32.mxu0 %vm11976_vm3, %v16184_v41 }
 0x6e6   :  { %10461 = vmatmul.mubr.msk.f32.gmra.mrb[92].mxu0 %vm521_vm5, %v15051_v54 }
 0x6e7   :  { %10463 = vmatprep.mubr.msk.f32.mxu0 %vm11976_vm3, %v16184_v41 }
 0x6ea   :  { %10464 = vmatmul.mubr.msk.f32.gmra.mrb[94].mxu0 %vm521_vm5, %v15060_v14 }
 0x6eb   :  { %10466 = vmatprep.mubr.msk.f32.mxu0 %vm11976_vm3, %v16184_v41 }
 0x6ee   :  { %10467 = vmatmul.mubr.msk.f32.gmra.mrb[96].mxu0 %vm521_vm5, %v15069_v5 }
 0x6ef   :  { %10469 = vmatprep.mubr.msk.f32.mxu0 %vm11976_vm3, %v16184_v41 }
 0x6f2   :  { %10470 = vmatmul.mubr.msk.f32.gmra.mrb[98].mxu0 %vm521_vm5, %v15078_v7 }
 0x6f3   :  { %10472 = vmatprep.mubr.msk.f32.mxu0 %vm11976_vm3, %v16184_v41 }
 0x6f6   :  { %10473 = vmatmul.mubr.msk.f32.gmra.mrb[100].mxu0 %vm521_vm5, %v15087_v3 }
 0x6f7   :  { %10475 = vmatprep.mubr.msk.f32.mxu0 %vm11976_vm3, %v16184_v41 }
 0x6fa   :  { %10476 = vmatmul.mubr.msk.f32.gmra.mrb[102].mxu0 %vm521_vm5, %v15094_v13 }
 0x6fb   :  { %10576 = vmatprep.mubr.msk.f32.mxu0 %vm11976_vm3, %v16184_v41 }
 0x7ad   :  { %v15401_v19 = vpop.f32.mrb[86].mxu0 }
 0x7ae   :  { %v10453_v22 = vpop.f32.mrb[87].mxu0  ;;  %v5350_v56 = vmul.f32 %v15401_v19, %v15401_v19  ;;  %v5327_v55 = vsel %vm521_vm5, %v15401_v19, 0.0 }
 0x7b0   :  { %v5359_v7 = vsel %vm521_vm5, %v5350_v56, 0.0 }
 0x7b1   :  { %v15405_v4 = vpop.f32.mrb[88].mxu0 }
 0x7b2   :  { %v5328_v29 = vsel %vm521_vm5, %v15405_v4, 0.0  ;;  %v5351_v54 = vmul.f32 %v15405_v4, %v15405_v4  ;;  %v10456_v14 = vpop.f32.mrb[89].mxu0 }
 0x7b3   :  { %v5329_v5 = vadd.f32 %v5328_v29, %v5327_v55 }
 0x7b4   :  { %v5360_v3 = vsel %vm521_vm5, %v5351_v54, 0.0 }
 0x7b5   :  { %v5361_v13 = vadd.f32 %v5360_v3, %v5359_v7  ;;  %v15415_v59 = vpop.f32.mrb[90].mxu0 }
 0x7b6   :  { %v5330_v49 = vsel %vm521_vm5, %v15415_v59, 0.0  ;;  %v5352_v40 = vmul.f32 %v15415_v59, %v15415_v59  ;;  %v10459_v63 = vpop.f32.mrb[91].mxu0 }
 0x7b7   :  { %v5331_v46 = vadd.f32 %v5330_v49, %v5329_v5 }
 0x7b8   :  { %v5362_v23 = vsel %vm521_vm5, %v5352_v40, 0.0 }
 0x7b9   :  { %v5363_v11 = vadd.f32 %v5362_v23, %v5361_v13  ;;  %v15422_v62 = vpop.f32.mrb[92].mxu0 }
 0x7ba   :  { %v5332_v16 = vsel %vm521_vm5, %v15422_v62, 0.0  ;;  %v5353_v26 = vmul.f32 %v15422_v62, %v15422_v62  ;;  %v10462_v45 = vpop.f32.mrb[93].mxu0 }
 0x7bb   :  { %v5333_v21 = vadd.f32 %v5332_v16, %v5331_v46 }
 0x7bc   :  { %v5364_v35 = vsel %vm521_vm5, %v5353_v26, 0.0  ;;  %v5325_v26 = vld [vmem:[%s16116_s6] sm:$0x1] }
 0x7bd   :  { %v5365_v27 = vadd.f32 %v5364_v35, %v5363_v11  ;;  %v15429_v36 = vpop.f32.mrb[94].mxu0  ;;  %v5326_v35 = vld [vmem:[%s16117_s7] sm:$0x1] }
 0x7be   :  { %v5334_v10 = vsel %vm521_vm5, %v15429_v36, 0.0  ;;  %v5354_v44 = vmul.f32 %v15429_v36, %v15429_v36  ;;  %v10465_v48 = vpop.f32.mrb[95].mxu0 }
 0x7bf   :  { %v5335_v31 = vadd.f32 %v5334_v10, %v5333_v21  ;;  %v16217_v10 = vld [vmem:[#allocation10_spill] sm:$0xff] }
 0x7c0   :  { %v5366_v20 = vsel %vm521_vm5, %v5354_v44, 0.0 }
 0x7c1   :  { %v5367_v53 = vadd.f32 %v5366_v20, %v5365_v27  ;;  %v5297_v30 = vpop.f32.mrb[96].mxu0 }
 0x7c2   :  { %v5336_v52 = vsel %vm521_vm5, %v5297_v30, 0.0  ;;  %v5355_v37 = vmul.f32 %v5297_v30, %v5297_v30  ;;  %v10468_v39 = vpop.f32.mrb[97].mxu0 }
 0x7c3   :  { %v5337_v18 = vadd.f32 %v5336_v52, %v5335_v31 }
 0x7c4   :  { %v5368_v43 = vsel %vm521_vm5, %v5355_v37, 0.0 }
 0x7c5   :  { %v5369_v47 = vadd.f32 %v5368_v43, %v5367_v53  ;;  %v5302_v12 = vpop.f32.mrb[98].mxu0 }
 0x7c6   :  { %v5338_v51 = vsel %vm521_vm5, %v5302_v12, 0.0  ;;  %v5356_v60 = vmul.f32 %v5302_v12, %v5302_v12  ;;  %v10471_v6 = vpop.f32.mrb[99].mxu0 }
 0x7c7   :  { %v5339_v0 = vadd.f32 %v5338_v51, %v5337_v18 }
 0x7c8   :  { %v5370_v58 = vsel %vm521_vm5, %v5356_v60, 0.0 }
 0x7c9   :  { %v5371_v32 = vadd.f32 %v5370_v58, %v5369_v47  ;;  %v5307_v28 = vpop.f32.mrb[100].mxu0 }
 0x7ca   :  { %v5340_v57 = vsel %vm521_vm5, %v5307_v28, 0.0  ;;  %v5357_v8 = vmul.f32 %v5307_v28, %v5307_v28  ;;  %v10474_v34 = vpop.f32.mrb[101].mxu0 }
 0x7cb   :  { %v5341_v9 = vadd.f32 %v5340_v57, %v5339_v0 }
 0x7cc   :  { %v5372_v38 = vsel %vm521_vm5, %v5357_v8, 0.0 }
 0x7cd   :  { %v5373_v25 = vadd.f32 %v5372_v38, %v5371_v32  ;;  %v5312_v61 = vpop.f32.mrb[102].mxu0 }
 0x7ce   :  { %v5342_v2 = vsel %vm521_vm5, %v5312_v61, 0.0  ;;  %v5358_v17 = vmul.f32 %v5312_v61, %v5312_v61  ;;  %v10477_v24 = vpop.f32.mrb[103].mxu0 }
 0x7cf   :  { %v5343_v1 = vadd.f32 %v5342_v2, %v5341_v9  ;;  %v16218_v24 = vld [vmem:[#allocation5_spill] sm:$0xff] }
 0x7d0   :  { %v5374_v42 = vsel %vm521_vm5, %v5358_v17, 0.0  ;;  %v5434_v17 = vpop.permute.xlu1 %5433 }
 0x7d1   :  { %v5344_v15 = vrot.slane %v5343_v1, 4  ;;  %v5375_v50 = vadd.f32 %v5374_v42, %v5373_v25  ;;  %vm5435_vm14 = vcmp.eq.s32.totalorder %v16218_v24, %v5434_v17 }
 0x7d3   :  { %v5345_v22 = vadd.f32 %v5344_v15, %v5343_v1  ;;  %v5376_v56 = vrot.slane %v5375_v50, 4  ;;  %v5436_v15 = vsel %vm5435_vm14, 1.0, %v16184_v41 }
 0x7d4   :  { %v5758_v1 = vpop.permute.xlu1 %5757 }
 0x7d5   :  { %v5346_v55 = vrot.slane %v5345_v22, 2  ;;  %v5377_v29 = vadd.f32 %v5376_v56, %v5375_v50  ;;  %vm5759_vm4 = vcmp.eq.s32.totalorder %v16218_v24, %v5758_v1 }
 0x7d6   :  { %v5760_v50 = vsel %vm5759_vm4, 1.0, %v16184_v41 }
 0x7d7   :  { %v5347_v54 = vadd.f32 %v5346_v55, %v5345_v22  ;;  %v5378_v14 = vrot.slane %v5377_v29, 2  ;;  %v5523_v22 = vpop.permute.xlu0 %5522 }
 0x7d8   :  { %vm5524_vm8 = vcmp.eq.s32.totalorder %v16218_v24, %v5523_v22  ;;  %v8283_v22 = vld [vmem:[%s16118_s8 + $0xc0] sm:$0xff] }
 0x7d9   :  { %v5348_v5 = vrot.slane %v5347_v54, 1  ;;  %v5379_v7 = vadd.f32 %v5378_v14, %v5377_v29  ;;  %v5525_v55 = vsel %vm5524_vm8, 1.0, %v16184_v41 }
 0x7db   :  { %v5349_v3 = vadd.f32 %v5348_v5, %v5347_v54  ;;  %v5380_v13 = vrot.slane %v5379_v7, 1  ;;  %v5921_v56 = vpop.permute.xlu0 %5920  ;;  %v6084_v54 = vpop.permute.xlu1 %6083 }
 0x7dc   :  { %vm5922_vm2 = vcmp.eq.s32.totalorder %v16218_v24, %v5921_v56  ;;  %vm6085_vm9 = vcmp.eq.s32.totalorder %v16218_v24, %v6084_v54  ;;  %v8284_v56 = vld [vmem:[%s16118_s8 + $0xc8] sm:$0xff]  ;;  %v8286_v54 = vld [vmem:[%s16118_s8 + $0xd8] sm:$0xff] }
 0x7dd   :  { %v5381_v49 = vadd.f32 %v5380_v13, %v5379_v7  ;;  %v5382_v40 = vmul.f32 0.013888889, %v5349_v3  ;;  %v5923_v29 = vsel %vm5922_vm2, 1.0, %v16184_v41  ;;  %v6086_v14 = vsel %vm6085_vm9, 1.0, %v16184_v41 }
 0x7df   :  { %v5383_v63 = vmul.f32 0.013888889, %v5381_v49  ;;  %v5384_v46 = vmul.f32 %v5382_v40, %v5382_v40  ;;  %v6247_v5 = vpop.permute.xlu0 %6246  ;;  %v6410_v3 = vpop.permute.xlu1 %6409  ;;  %v8260_v49 = vld [vmem:[%s16118_s8 + $0x40] sm:$0xff] }
 0x7e0   :  { %vm6248_vm10 = vcmp.eq.s32.totalorder %v16218_v24, %v6247_v5  ;;  %vm6411_vm11 = vcmp.eq.s32.totalorder %v16218_v24, %v6410_v3  ;;  %v8287_v5 = vld [vmem:[%s16118_s8 + $0xe0] sm:$0xff] }
 0x7e1   :  { %v5385_v23 = vsub.f32 %v5383_v63, %v5384_v46  ;;  %v6249_v7 = vsel %vm6248_vm10, 1.0, %v16184_v41  ;;  %v6412_v13 = vsel %vm6411_vm11, 1.0, %v16184_v41 }
 0x7e3   :  { %v5386_v11 = vmax.f32 %v5385_v23, 0.0  ;;  %v6573_v46 = vpop.permute.xlu0 %6572  ;;  %v8262_v23 = vld [vmem:[%s16118_s8 + $0x50] sm:$0xff] }
 0x7e4   :  { %vm6574_vm12 = vcmp.eq.s32.totalorder %v16218_v24, %v6573_v46 }
 0x7e5   :  { %v5387_v16 = vadd.f32 1e-05, %v5386_v11  ;;  %v8263_v11 = vld [vmem:[%s16118_s8 + $0x58] sm:$0xff] }
 0x7e7   :  { %11940 = vrsqrt.f32 %v5387_v16  ;;  %v11516_v16 = vpack.c.bf16 %v8263_v11, %v8262_v23  ;;  %v8294_v23 = vld [vmem:[%s16118_s8 + $0x100] sm:$0xff]  ;;  %v8295_v11 = vld [vmem:[%s16118_s8 + $0x108] sm:$0xff] }
 0x7f1   :  { %v11941_v45 = vpop.eup %11940 }
 0x7f2   :  { %v5389_v21 = vmul.f32 %v11941_v45, %v5325_v26  ;;  %v6575_v26 = vsel %vm6574_vm12, 1.0, %v16184_v41  ;;  %v8264_v45 = vld [vmem:[%s16118_s8 + $0x60] sm:$0xff] }
 0x7f4   :  { %v5390_v27 = vmul.f32 %v5389_v21, %v5382_v40  ;;  %v5396_v44 = vrot.slane %v5389_v21, %v16217_v10  ;;  %v8261_v40 = vld [vmem:[%s16118_s8 + $0x48] sm:$0xff] }
 0x7f5   :  { %v11513_v63 = vpack.c.bf16 %v8261_v40, %v8260_v49  ;;  %v8265_v21 = vld [vmem:[%s16118_s8 + $0x68] sm:$0xff]  ;;  %v8289_v40 = vld [vmem:[%s16118_s8 + $0xf0] sm:$0xff] }
 0x7f6   :  { %v5391_v48 = vsub.f32 %v5326_v35, %v5390_v27  ;;  %v5406_v31 = vmul.f32 %v5396_v44, %v5312_v61  ;;  %v5398_v20 = vmul.f32 %v5396_v44, %v15401_v19  ;;  %v5399_v53 = vmul.f32 %v5396_v44, %v15405_v4  ;;  %v8266_v27 = vld [vmem:[%s16118_s8 + $0x70] sm:$0xff] }
 0x7f7   :  { %v5400_v52 = vmul.f32 %v5396_v44, %v15415_v59  ;;  %v5401_v37 = vmul.f32 %v5396_v44, %v15422_v62  ;;  %v5402_v39 = vmul.f32 %v5396_v44, %v15429_v36  ;;  %v5403_v18 = vmul.f32 %v5396_v44, %v5297_v30 }
 0x7f8   :  { %v5411_v43 = vrot.slane %v5391_v48, %v16217_v10  ;;  %v5404_v47 = vmul.f32 %v5396_v44, %v5302_v12  ;;  %v5405_v51 = vmul.f32 %v5396_v44, %v5307_v28  ;;  %v11519_v35 = vpack.c.bf16 %v8265_v21, %v8264_v45  ;;  %v8267_v44 = vld [vmem:[%s16118_s8 + $0x78] sm:$0xff] }
 0x7f9   :  { %v11522_v48 = vpack.c.bf16 %v8267_v44, %v8266_v27  ;;  %v8297_v45 = vld [vmem:[%s16118_s8 + $0x118] sm:$0xff]  ;;  %v8299_v27 = vld [vmem:[%s16118_s8 + $0x128] sm:$0xff] }
 0x7fa   :  { %v5421_v60 = vadd.f32 %v5411_v43, %v5406_v31  ;;  %v5413_v6 = vadd.f32 %v5411_v43, %v5398_v20  ;;  %v5414_v0 = vadd.f32 %v5411_v43, %v5399_v53  ;;  %v5415_v58 = vadd.f32 %v5411_v43, %v5400_v52  ;;  %v6736_v31 = vpop.permute.xlu1 %6735 }
 0x7fb   :  { %v5416_v32 = vadd.f32 %v5411_v43, %v5401_v37  ;;  %v5417_v57 = vadd.f32 %v5411_v43, %v5402_v39  ;;  %v5418_v19 = vadd.f32 %v5411_v43, %v5403_v18  ;;  %v5419_v8 = vadd.f32 %v5411_v43, %v5404_v47  ;;  %v5511_v18 = vld [vmem:[%s16118_s8] sm:$0xff] }
 0x7fc   :  { %v5422_v4 = vmax.f32 %v5413_v6, 0.0  ;;  %v5423_v34 = vmax.f32 %v5414_v0, 0.0  ;;  %v5424_v59 = vmax.f32 %v5415_v58, 0.0  ;;  %v5420_v36 = vadd.f32 %v5411_v43, %v5405_v51  ;;  %v5512_v43 = vld [vmem:[%s16118_s8 + $0x8] sm:$0xff]  ;;  %v5513_v51 = vld [vmem:[%s16118_s8 + $0x10] sm:$0xff] }
 0x7fd   :  { %v5425_v9 = vmax.f32 %v5416_v32, 0.0  ;;  %v5426_v62 = vmax.f32 %v5417_v57, 0.0  ;;  %v5427_v38 = vmax.f32 %v5418_v19, 0.0  ;;  %v5428_v25 = vmax.f32 %v5419_v8, 0.0  ;;  %v5515_v19 = vld [vmem:[%s16118_s8 + $0x20] sm:$0xff]  ;;  %v5516_v8 = vld [vmem:[%s16118_s8 + $0x28] sm:$0xff] }
 0x7fe   :  { %v15457_v30 = vpack.c.bf16 %v5423_v34, %v5422_v4  ;;  %v5429_v61 = vmax.f32 %v5420_v36, 0.0  ;;  %v15483_v42 = vmax.f32 %v5421_v60, 0.0  ;;  %vm6737_vm13 = vcmp.eq.s32.totalorder %v16218_v24, %v6736_v31  ;;  %v5514_v60 = vld [vmem:[%s16118_s8 + $0x18] sm:$0xff]  ;;  %v5517_v34 = vld [vmem:[%s16118_s8 + $0x30] sm:$0xff] }
 0x7ff   :  { %v15459_v12 = vpack.c.bf16 %v5425_v9, %v5424_v59  ;;  %v15461_v28 = vpack.c.bf16 %v5427_v38, %v5426_v62  ;;  %v6738_v20 = vsel %vm6737_vm13, 1.0, %v16184_v41  ;;  %v11525_v47 = vpack.c.bf16 %v5512_v43, %v5511_v18  ;;  %v5518_v59 = vld [vmem:[%s16118_s8 + $0x38] sm:$0xff]  ;;  %v8272_v62 = vld [vmem:[%s16118_s8 + $0x80] sm:$0xff]  ;;  %v8273_v38 = vld [vmem:[%s16118_s8 + $0x88] sm:$0xff] }
 0x800   :  { %11490 = vmatpush3.bf16.msra.mxu1 %v15457_v30  ;;  %11538 = vmatpush3.bf16.msra.mxu0 %v15457_v30  ;;  %v15467_v2 = vpack.c.bf16 %v5429_v61, %v5428_v25  ;;  %v11528_v57 = vpack.c.bf16 %v5514_v60, %v5513_v51  ;;  %v11531_v4 = vpack.c.bf16 %v5516_v8, %v5515_v19  ;;  %v8275_v25 = vld [vmem:[%s16118_s8 + $0x98] sm:$0xff]  ;;  %v8276_v61 = vld [vmem:[%s16118_s8 + $0xa0] sm:$0xff]  ;;  %v8300_v31 = vld [vmem:[%s16118_s8 + $0x130] sm:$0xff] }
 0x801   :  { %11491 = vmatprep.subr.bf16.mxu1 %v16181_v33  ;;  %11539 = vmatprep.subr.bf16.mxu0 %v16181_v33  ;;  %v11534_v9 = vpack.c.bf16 %v5518_v59, %v5517_v34  ;;  %v11549_v36 = vpack.c.bf16 %v8273_v38, %v8272_v62  ;;  %v8307_v43 = vld [vmem:[%s16118_s8 + $0x150] sm:$0xff]  ;;  %v8309_v60 = vld [vmem:[%s16118_s8 + $0x160] sm:$0xff]  ;;  %v8317_v34 = vld [vmem:[%s16118_s8 + $0x188] sm:$0xff] }
 0x802   :  { %v8319_v62 = vld [vmem:[%s16118_s8 + $0x198] sm:$0xff] }
 0x804   :  { %11493 = vmatpush3.bf16.msra.mxu1 %v15459_v12  ;;  %11541 = vmatpush3.bf16.msra.mxu0 %v15459_v12 }
 0x805   :  { %11494 = vmatprep.subr.bf16.mxu1 %v16181_v33  ;;  %11542 = vmatprep.subr.bf16.mxu0 %v16181_v33 }
 0x808   :  { %11496 = vmatpush3.bf16.msra.mxu1 %v15461_v28  ;;  %11544 = vmatpush3.bf16.msra.mxu0 %v15461_v28 }
 0x809   :  { %11497 = vmatprep.subr.bf16.mxu1 %v16181_v33  ;;  %11545 = vmatprep.subr.bf16.mxu0 %v16181_v33 }
 0x80c   :  { %11499 = vmatpush3.bf16.msra.mxu1 %v15467_v2  ;;  %11547 = vmatpush3.bf16.msra.mxu0 %v15467_v2 }
 0x80d   :  { %10494 = vmatprep.subr.mxu1 %v16184_v41  ;;  %10574 = vmatprep.subr.mxu0 %v16184_v41 }
 0x810   :  { %10495 = vmatpush3.msra.mxu1 %v15483_v42  ;;  %10575 = vmatpush3.msra.mxu0 %v15483_v42 }
 0x811   :  { %10497 = vmatmul.mubr.msk.f32.vlgmr.msra.gmra.mrb[14].mxu1 %vm5437_vm6, %v5436_v15  ;;  %11500 = vmatprep.subr.bf16.mxu1 %v16181_v33  ;;  %v8279_v15 = vld [vmem:[%s16118_s8 + $0xb8] sm:$0xff] }
 0x812   :  { %10577 = vmatmul.mubr.msk.f32.vlgmr.msra.gmra.mrb[158].mxu0 %vm5437_vm6, %v5760_v50  ;;  %11560 = vmatprep.subr.bf16.mxu0 %v16181_v33 }
 0x813   :  { %11502 = vmatpush3.bf16.msra.mxu1 %v15457_v30  ;;  %11562 = vmatpush3.bf16.msra.mxu0 %v15457_v30 }
 0x814   :  { %11503 = vmatprep.subr.bf16.mxu1 %v16181_v33  ;;  %11563 = vmatprep.subr.bf16.mxu0 %v16181_v33 }
 0x815   :  { %10517 = vmatprep.mubr.msk.f32.mxu1 %vm11976_vm3, %v16184_v41  ;;  %10616 = vmatprep.mubr.msk.f32.mxu0 %vm11976_vm3, %v16184_v41 }
 0x817   :  { %11505 = vmatpush3.bf16.msra.mxu1 %v15459_v12  ;;  %11565 = vmatpush3.bf16.msra.mxu0 %v15459_v12 }
 0x818   :  { %11506 = vmatprep.subr.bf16.mxu1 %v16181_v33  ;;  %11566 = vmatprep.subr.bf16.mxu0 %v16181_v33 }
 0x81b   :  { %11508 = vmatpush3.bf16.msra.mxu1 %v15461_v28  ;;  %11568 = vmatpush3.bf16.msra.mxu0 %v15461_v28 }
 0x81c   :  { %11509 = vmatprep.subr.bf16.mxu1 %v16181_v33  ;;  %11569 = vmatprep.subr.bf16.mxu0 %v16181_v33 }
 0x81f   :  { %11511 = vmatpush3.bf16.msra.mxu1 %v15467_v2  ;;  %11571 = vmatpush3.bf16.msra.mxu0 %v15467_v2 }
 0x820   :  { %10515 = vmatprep.subr.mxu1 %v16184_v41  ;;  %10614 = vmatprep.subr.mxu0 %v16184_v41 }
 0x823   :  { %10516 = vmatpush3.msra.mxu1 %v15483_v42  ;;  %10615 = vmatpush3.msra.mxu0 %v15483_v42 }
 0x824   :  { %10518 = vmatmul.mubr.msk.f32.vlgmr.msra.gmra.mrb[16].mxu1 %vm5437_vm6, %v5525_v55  ;;  %10617 = vmatmul.mubr.msk.f32.vlgmr.msra.gmra.mrb[160].mxu0 %vm5437_vm6, %v5923_v29  ;;  %v11573_v55 = vpack.c.bf16 %v8284_v56, %v8283_v22  ;;  %v8285_v29 = vld [vmem:[%s16118_s8 + $0xd0] sm:$0xff]  ;;  %v8330_v22 = vld [vmem:[%s16118_s8 + $0x1d8] sm:$0xff] }
 0x825   :  { %11584 = vmatprep.subr.bf16.mxu0 %v16181_v33  ;;  %10656 = vmatprep.mubr.msk.f32.mxu0 %vm11976_vm3, %v16184_v41 }
 0x826   :  { %11586 = vmatpush3.bf16.msra.mxu0 %v15457_v30  ;;  %11512 = vmatprep.subr.bf16.mxu1 %v16181_v33 }
 0x827   :  { %11587 = vmatprep.subr.bf16.mxu0 %v16181_v33  ;;  %10536 = vmatprep.mubr.msk.f32.mxu1 %vm11976_vm3, %v16184_v41 }
 0x828   :  { %11514 = vmatpush3.bf16.msra.mxu1 %v11513_v63  ;;  %v8290_v63 = vld [vmem:[%s16118_s8 + $0xf8] sm:$0xff] }
 0x829   :  { %11515 = vmatprep.subr.bf16.mxu1 %v16181_v33  ;;  %v11582_v46 = vpack.c.bf16 %v8290_v63, %v8289_v40  ;;  %v8340_v40 = vld [vmem:[%s16118_s8 + $0x210] sm:$0xff]  ;;  %v8341_v63 = vld [vmem:[%s16118_s8 + $0x218] sm:$0xff] }
 0x82a   :  { %11589 = vmatpush3.bf16.msra.mxu0 %v15459_v12 }
 0x82b   :  { %11590 = vmatprep.subr.bf16.mxu0 %v16181_v33 }
 0x82c   :  { %11517 = vmatpush3.bf16.msra.mxu1 %v11516_v16  ;;  %v11597_v16 = vpack.c.bf16 %v8295_v11, %v8294_v23  ;;  %v8342_v23 = vld [vmem:[%s16118_s8 + $0x220] sm:$0xff]  ;;  %v8343_v11 = vld [vmem:[%s16118_s8 + $0x228] sm:$0xff] }
 0x82d   :  { %11518 = vmatprep.subr.bf16.mxu1 %v16181_v33 }
 0x82e   :  { %11592 = vmatpush3.bf16.msra.mxu0 %v15461_v28 }
 0x82f   :  { %11593 = vmatprep.subr.bf16.mxu0 %v16181_v33 }
 0x830   :  { %11520 = vmatpush3.bf16.msra.mxu1 %v11519_v35  ;;  %v8298_v35 = vld [vmem:[%s16118_s8 + $0x120] sm:$0xff] }
 0x831   :  { %11521 = vmatprep.subr.bf16.mxu1 %v16181_v33  ;;  %v11603_v44 = vpack.c.bf16 %v8299_v27, %v8298_v35  ;;  %v8350_v35 = vld [vmem:[%s16122_s12 + $0x40] sm:$0xff]  ;;  %v8351_v27 = vld [vmem:[%s16122_s12 + $0x48] sm:$0xff] }
 0x832   :  { %11595 = vmatpush3.bf16.msra.mxu0 %v15467_v2 }
 0x833   :  { %10654 = vmatprep.subr.mxu0 %v16184_v41 }
 0x834   :  { %11523 = vmatpush3.bf16.msra.mxu1 %v11522_v48 }
 0x835   :  { %11524 = vmatprep.subr.bf16.mxu1 %v16181_v33 }
 0x836   :  { %10655 = vmatpush3.msra.mxu0 %v15483_v42 }
 0x837   :  { %10657 = vmatmul.mubr.msk.f32.vlgmr.msra.gmra.mrb[162].mxu0 %vm5437_vm6, %v6086_v14  ;;  %11608 = vmatprep.subr.bf16.mxu0 %v16181_v33  ;;  %v11576_v14 = vpack.c.bf16 %v8286_v54, %v8285_v29  ;;  %v8332_v29 = vld [vmem:[%s16118_s8 + $0x1e8] sm:$0xff] }
 0x838   :  { %11610 = vmatpush3.bf16.msra.mxu0 %v15457_v30  ;;  %10696 = vmatprep.mubr.msk.f32.mxu0 %vm11976_vm3, %v16184_v41 }
 0x839   :  { %11611 = vmatprep.subr.bf16.mxu0 %v16181_v33 }
 0x83c   :  { %11613 = vmatpush3.bf16.msra.mxu0 %v15459_v12 }
 0x83d   :  { %11614 = vmatprep.subr.bf16.mxu0 %v16181_v33 }
 0x840   :  { %11616 = vmatpush3.bf16.msra.mxu0 %v15461_v28 }
 0x841   :  { %11617 = vmatprep.subr.bf16.mxu0 %v16181_v33 }
 0x844   :  { %11619 = vmatpush3.bf16.msra.mxu0 %v15467_v2 }
 0x845   :  { %10694 = vmatprep.subr.mxu0 %v16184_v41 }
 0x848   :  { %10695 = vmatpush3.msra.mxu0 %v15483_v42 }
 0x849   :  { %10697 = vmatmul.mubr.msk.f32.vlgmr.msra.gmra.mrb[164].mxu0 %vm5437_vm6, %v6249_v7  ;;  %11632 = vmatprep.subr.bf16.mxu0 %v16181_v33  ;;  %v8288_v7 = vld [vmem:[%s16118_s8 + $0xe8] sm:$0xff] }
 0x84a   :  { %11634 = vmatpush3.bf16.msra.mxu0 %v15457_v30  ;;  %10736 = vmatprep.mubr.msk.f32.mxu0 %vm11976_vm3, %v16184_v41  ;;  %v11579_v49 = vpack.c.bf16 %v8288_v7, %v8287_v5  ;;  %v8334_v5 = vld [vmem:[%s16118_s8 + $0x1f8] sm:$0xff] }
 0x84b   :  { %11635 = vmatprep.subr.bf16.mxu0 %v16181_v33 }
 0x84e   :  { %11637 = vmatpush3.bf16.msra.mxu0 %v15459_v12 }
 0x84f   :  { %11638 = vmatprep.subr.bf16.mxu0 %v16181_v33 }
 0x852   :  { %11640 = vmatpush3.bf16.msra.mxu0 %v15461_v28 }
 0x853   :  { %11641 = vmatprep.subr.bf16.mxu0 %v16181_v33 }
 0x856   :  { %11643 = vmatpush3.bf16.msra.mxu0 %v15467_v2 }
 0x857   :  { %10734 = vmatprep.subr.mxu0 %v16184_v41 }
 0x85a   :  { %10735 = vmatpush3.msra.mxu0 %v15483_v42 }
 0x85b   :  { %10737 = vmatmul.mubr.msk.f32.vlgmr.msra.gmra.mrb[166].mxu0 %vm5437_vm6, %v6412_v13  ;;  %11656 = vmatprep.subr.bf16.mxu0 %v16181_v33 }
 0x85c   :  { %11658 = vmatpush3.bf16.msra.mxu0 %v15457_v30  ;;  %10776 = vmatprep.mubr.msk.f32.mxu0 %vm11976_vm3, %v16184_v41 }
 0x85d   :  { %11659 = vmatprep.subr.bf16.mxu0 %v16181_v33 }
 0x860   :  { %11661 = vmatpush3.bf16.msra.mxu0 %v15459_v12 }
 0x861   :  { %11662 = vmatprep.subr.bf16.mxu0 %v16181_v33 }
 0x864   :  { %11664 = vmatpush3.bf16.msra.mxu0 %v15461_v28 }
 0x865   :  { %11665 = vmatprep.subr.bf16.mxu0 %v16181_v33 }
 0x868   :  { %11667 = vmatpush3.bf16.msra.mxu0 %v15467_v2 }
 0x869   :  { %10774 = vmatprep.subr.mxu0 %v16184_v41 }
 0x86c   :  { %10775 = vmatpush3.msra.mxu0 %v15483_v42 }
 0x86d   :  { %10777 = vmatmul.mubr.msk.f32.vlgmr.msra.gmra.mrb[168].mxu0 %vm5437_vm6, %v6575_v26  ;;  %11680 = vmatprep.subr.bf16.mxu0 %v16181_v33  ;;  %v8296_v26 = vld [vmem:[%s16118_s8 + $0x110] sm:$0xff] }
 0x86e   :  { %11682 = vmatpush3.bf16.msra.mxu0 %v15457_v30  ;;  %10816 = vmatprep.mubr.msk.f32.mxu0 %vm11976_vm3, %v16184_v41  ;;  %v8274_v30 = vld [vmem:[%s16118_s8 + $0x90] sm:$0xff]  ;;  %v11600_v21 = vpack.c.bf16 %v8297_v45, %v8296_v26  ;;  %v8345_v45 = vld [vmem:[%s16118_s8 + $0x238] sm:$0xff] }
 0x86f   :  { %11683 = vmatprep.subr.bf16.mxu0 %v16181_v33  ;;  %v8344_v26 = vld [vmem:[%s16118_s8 + $0x230] sm:$0xff] }
 0x872   :  { %11685 = vmatpush3.bf16.msra.mxu0 %v15459_v12  ;;  %v11552_v12 = vpack.c.bf16 %v8275_v25, %v8274_v30  ;;  %v8321_v30 = vld [vmem:[%s16118_s8 + $0x1a8] sm:$0xff] }
 0x873   :  { %11686 = vmatprep.subr.bf16.mxu0 %v16181_v33 }
 0x876   :  { %11688 = vmatpush3.bf16.msra.mxu0 %v15461_v28 }
 0x877   :  { %11689 = vmatprep.subr.bf16.mxu0 %v16181_v33 }
 0x87a   :  { %11691 = vmatpush3.bf16.msra.mxu0 %v15467_v2  ;;  %v8277_v2 = vld [vmem:[%s16118_s8 + $0xa8] sm:$0xff] }
 0x87b   :  { %10814 = vmatprep.subr.mxu0 %v16184_v41  ;;  %v11555_v1 = vpack.c.bf16 %v8277_v2, %v8276_v61 }
 0x87e   :  { %10815 = vmatpush3.msra.mxu0 %v15483_v42  ;;  %v8278_v42 = vld [vmem:[%s16118_s8 + $0xb0] sm:$0xff] }
 0x87f   :  { %10817 = vmatmul.mubr.msk.f32.vlgmr.msra.gmra.mrb[170].mxu0 %vm5437_vm6, %v6738_v20  ;;  %10838 = vmatprep.subr.mxu0 %v16184_v41  ;;  %v11558_v50 = vpack.c.bf16 %v8279_v15, %v8278_v42  ;;  %v8301_v20 = vld [vmem:[%s16118_s8 + $0x138] sm:$0xff] }
 0x880   :  { %10840 = vmatprep.mubr.msk.f32.mxu0 %vm11976_vm3, %v16184_v41 }
 0x8e4   :  { %v5507_v53 = vpop.f32.mrb[14].mxu1 }
 0x8e5   :  { %v5830_v52 = vpop.f32.mrb[158].mxu0  ;;  %v10498_v37 = vpop.f32.mrb[15].mxu1 }
 0x8e6   :  { %v10578_v39 = vpop.f32.mrb[159].mxu0  ;;  %v8305_v37 = vld [vmem:[%s16118_s8 + $0x140] sm:$0xff] }
 0x8e7   :  { %v8306_v39 = vld [vmem:[%s16118_s8 + $0x148] sm:$0xff] }
 0x8e8   :  { %v11621_v18 = vpack.c.bf16 %v8306_v39, %v8305_v37 }
 0x8f7   :  { %v5595_v6 = vpop.f32.mrb[16].mxu1  ;;  %v15642_v0 = vpop.f32.mrb[160].mxu0 }
 0x8f8   :  { %v10519_v58 = vpop.f32.mrb[17].mxu1  ;;  %10537 = vmatmul.mubr.msk.f32.vlgmr.msra.gmra.mrb[18].mxu1 %vm521_vm5, %v5595_v6  ;;  %v10618_v32 = vpop.f32.mrb[161].mxu0  ;;  %v8310_v6 = vld [vmem:[%s16118_s8 + $0x168] sm:$0xff] }
 0x8f9   :  { %11526 = vmatpush3.bf16.msra.mxu1 %v11525_v47  ;;  %10555 = vmatprep.mubr.msk.f32.mxu1 %vm11976_vm3, %v16184_v41  ;;  %v8308_v47 = vld [vmem:[%s16118_s8 + $0x158] sm:$0xff]  ;;  %v8311_v58 = vld [vmem:[%s16118_s8 + $0x170] sm:$0xff] }
 0x8fa   :  { %11527 = vmatprep.subr.bf16.mxu1 %v16181_v33  ;;  %v11624_v51 = vpack.c.bf16 %v8308_v47, %v8307_v43  ;;  %v8312_v32 = vld [vmem:[%s16118_s8 + $0x178] sm:$0xff] }
 0x8fb   :  { %v11630_v8 = vpack.c.bf16 %v8312_v32, %v8311_v58 }
 0x8fd   :  { %11529 = vmatpush3.bf16.msra.mxu1 %v11528_v57 }
 0x8fe   :  { %11530 = vmatprep.subr.bf16.mxu1 %v16181_v33 }
 0x901   :  { %11532 = vmatpush3.bf16.msra.mxu1 %v11531_v4  ;;  %v8316_v4 = vld [vmem:[%s16118_s8 + $0x180] sm:$0xff] }
 0x902   :  { %11533 = vmatprep.subr.bf16.mxu1 %v16181_v33  ;;  %v11645_v59 = vpack.c.bf16 %v8317_v34, %v8316_v4 }
 0x905   :  { %11535 = vmatpush3.bf16.msra.mxu1 %v11534_v9  ;;  %v8318_v9 = vld [vmem:[%s16118_s8 + $0x190] sm:$0xff] }
 0x906   :  { %11548 = vmatprep.subr.bf16.mxu1 %v16181_v33  ;;  %v11648_v38 = vpack.c.bf16 %v8319_v62, %v8318_v9 }
 0x908   :  { %10556 = vmatmul.mubr.msk.f32.vlgmr.msra.gmra.mrb[18].mxu1 %vm521_vm5, %v5507_v53 }
 0x909   :  { %11550 = vmatpush3.bf16.msra.mxu1 %v11549_v36  ;;  %10595 = vmatprep.mubr.msk.f32.mxu1 %vm11976_vm3, %v16184_v41  ;;  %v8320_v36 = vld [vmem:[%s16118_s8 + $0x1a0] sm:$0xff] }
 0x90a   :  { %v15678_v28 = vpop.f32.mrb[162].mxu0  ;;  %11551 = vmatprep.subr.bf16.mxu1 %v16181_v33  ;;  %v11651_v25 = vpack.c.bf16 %v8321_v30, %v8320_v36 }
 0x90b   :  { %v10658_v17 = vpop.f32.mrb[163].mxu0 }
 0x90c   :  { %v8327_v17 = vld [vmem:[%s16118_s8 + $0x1c0] sm:$0xff] }
 0x90d   :  { %11553 = vmatpush3.bf16.msra.mxu1 %v11552_v12  ;;  %v8322_v12 = vld [vmem:[%s16118_s8 + $0x1b0] sm:$0xff] }
 0x90e   :  { %11554 = vmatprep.subr.bf16.mxu1 %v16181_v33 }
 0x911   :  { %11556 = vmatpush3.bf16.msra.mxu1 %v11555_v1  ;;  %v8328_v1 = vld [vmem:[%s16118_s8 + $0x1c8] sm:$0xff] }
 0x912   :  { %11557 = vmatprep.subr.bf16.mxu1 %v16181_v33  ;;  %v11669_v15 = vpack.c.bf16 %v8328_v1, %v8327_v17  ;;  %v6896_v17 = vld [vmem:[%s16121_s11] sm:$0x1] }
 0x915   :  { %11559 = vmatpush3.bf16.msra.mxu1 %v11558_v50  ;;  %v8329_v50 = vld [vmem:[%s16118_s8 + $0x1d0] sm:$0xff] }
 0x916   :  { %11572 = vmatprep.subr.bf16.mxu1 %v16181_v33  ;;  %v11672_v56 = vpack.c.bf16 %v8330_v22, %v8329_v50 }
 0x918   :  { %10596 = vmatmul.mubr.msk.f32.vlgmr.msra.gmra.mrb[18].mxu1 %vm521_vm5, %v5830_v52  ;;  %v11606_v52 = vpack.c.bf16 %v8301_v20, %v8300_v31  ;;  %v8353_v31 = vld [vmem:[%s16122_s12 + $0x58] sm:$0xff] }
 0x919   :  { %11574 = vmatpush3.bf16.msra.mxu1 %v11573_v55  ;;  %10635 = vmatprep.mubr.msk.f32.mxu1 %vm11976_vm3, %v16184_v41  ;;  %v8331_v55 = vld [vmem:[%s16118_s8 + $0x1e0] sm:$0xff] }
 0x91a   :  { %11575 = vmatprep.subr.bf16.mxu1 %v16181_v33  ;;  %v11675_v54 = vpack.c.bf16 %v8332_v29, %v8331_v55 }
 0x91c   :  { %v15718_v3 = vpop.f32.mrb[164].mxu0 }
 0x91d   :  { %11577 = vmatpush3.bf16.msra.mxu1 %v11576_v14  ;;  %v10698_v13 = vpop.f32.mrb[165].mxu0  ;;  %v8333_v14 = vld [vmem:[%s16118_s8 + $0x1f0] sm:$0xff] }
 0x91e   :  { %11578 = vmatprep.subr.bf16.mxu1 %v16181_v33  ;;  %v11678_v7 = vpack.c.bf16 %v8334_v5, %v8333_v14  ;;  %v8339_v13 = vld [vmem:[%s16118_s8 + $0x208] sm:$0xff] }
 0x91f   :  { %v7018_v14 = vld [vmem:[%s16122_s12 + $0x8] sm:$0xff] }
 0x921   :  { %11580 = vmatpush3.bf16.msra.mxu1 %v11579_v49 }
 0x922   :  { %11581 = vmatprep.subr.bf16.mxu1 %v16181_v33 }
 0x925   :  { %11583 = vmatpush3.bf16.msra.mxu1 %v11582_v46  ;;  %v11696_v46 = vpack.c.bf16 %v8341_v63, %v8340_v40 }
 0x926   :  { %11596 = vmatprep.subr.bf16.mxu1 %v16181_v33 }
 0x928   :  { %10636 = vmatmul.mubr.msk.f32.vlgmr.msra.gmra.mrb[18].mxu1 %vm521_vm5, %v15642_v0  ;;  %v11627_v0 = vpack.c.bf16 %v8310_v6, %v8309_v60 }
 0x929   :  { %11598 = vmatpush3.bf16.msra.mxu1 %v11597_v16  ;;  %10675 = vmatprep.mubr.msk.f32.mxu1 %vm11976_vm3, %v16184_v41  ;;  %v11699_v16 = vpack.c.bf16 %v8343_v11, %v8342_v23  ;;  %v7022_v23 = vld [vmem:[%s16122_s12 + $0x28] sm:$0xff] }
 0x92a   :  { %11599 = vmatprep.subr.bf16.mxu1 %v16181_v33 }
 0x92d   :  { %11601 = vmatpush3.bf16.msra.mxu1 %v11600_v21  ;;  %v11702_v21 = vpack.c.bf16 %v8345_v45, %v8344_v26  ;;  %v7024_v26 = vld [vmem:[%s16122_s12 + $0x38] sm:$0xff] }
 0x92e   :  { %v15752_v48 = vpop.f32.mrb[166].mxu0  ;;  %11602 = vmatprep.subr.bf16.mxu1 %v16181_v33 }
 0x92f   :  { %v10738_v53 = vpop.f32.mrb[167].mxu0 }
 0x930   :  { %v8354_v53 = vld [vmem:[%s16122_s12 + $0x60] sm:$0xff] }
 0x931   :  { %11604 = vmatpush3.bf16.msra.mxu1 %v11603_v44  ;;  %v11705_v44 = vpack.c.bf16 %v8351_v27, %v8350_v35  ;;  %v8357_v35 = vld [vmem:[%s16122_s12 + $0x78] sm:$0xff] }
 0x932   :  { %11605 = vmatprep.subr.bf16.mxu1 %v16181_v33 }
 0x935   :  { %11607 = vmatpush3.bf16.msra.mxu1 %v11606_v52  ;;  %v8355_v52 = vld [vmem:[%s16122_s12 + $0x68] sm:$0xff] }
 0x936   :  { %11620 = vmatprep.subr.bf16.mxu1 %v16181_v33  ;;  %v11711_v37 = vpack.c.bf16 %v8355_v52, %v8354_v53  ;;  %v8364_v53 = vld [vmem:[%s16122_s12 + $0x90] sm:$0xff]  ;;  %v8365_v52 = vld [vmem:[%s16122_s12 + $0x98] sm:$0xff] }
 0x938   :  { %10676 = vmatmul.mubr.msk.f32.vlgmr.msra.gmra.mrb[18].mxu1 %vm521_vm5, %v15678_v28  ;;  %v8323_v28 = vld [vmem:[%s16118_s8 + $0x1b8] sm:$0xff] }
 0x939   :  { %11622 = vmatpush3.bf16.msra.mxu1 %v11621_v18  ;;  %10715 = vmatprep.mubr.msk.f32.mxu1 %vm11976_vm3, %v16184_v41  ;;  %v11654_v61 = vpack.c.bf16 %v8323_v28, %v8322_v12  ;;  %v6895_v28 = vld [vmem:[%s16120_s10] sm:$0x1] }
 0x93a   :  { %11623 = vmatprep.subr.bf16.mxu1 %v16181_v33 }
 0x93d   :  { %11625 = vmatpush3.bf16.msra.mxu1 %v11624_v51 }
 0x93e   :  { %11626 = vmatprep.subr.bf16.mxu1 %v16181_v33 }
 0x940   :  { %v6645_v57 = vpop.f32.mrb[168].mxu0 }
 0x941   :  { %11628 = vmatpush3.bf16.msra.mxu1 %v11627_v0  ;;  %v10778_v19 = vpop.f32.mrb[169].mxu0 }
 0x942   :  { %11629 = vmatprep.subr.bf16.mxu1 %v16181_v33 }
 0x945   :  { %11631 = vmatpush3.bf16.msra.mxu1 %v11630_v8 }
 0x946   :  { %11644 = vmatprep.subr.bf16.mxu1 %v16181_v33 }
 0x948   :  { %10716 = vmatmul.mubr.msk.f32.vlgmr.msra.gmra.mrb[18].mxu1 %vm521_vm5, %v15718_v3  ;;  %v8338_v3 = vld [vmem:[%s16118_s8 + $0x200] sm:$0xff] }
 0x949   :  { %11646 = vmatpush3.bf16.msra.mxu1 %v11645_v59  ;;  %10755 = vmatprep.mubr.msk.f32.mxu1 %vm11976_vm3, %v16184_v41  ;;  %v11693_v49 = vpack.c.bf16 %v8339_v13, %v8338_v3  ;;  %v7019_v13 = vld [vmem:[%s16122_s12 + $0x10] sm:$0xff] }
 0x94a   :  { %11647 = vmatprep.subr.bf16.mxu1 %v16181_v33 }
 0x94d   :  { %11649 = vmatpush3.bf16.msra.mxu1 %v11648_v38 }
 0x94e   :  { %11650 = vmatprep.subr.bf16.mxu1 %v16181_v33 }
 0x951   :  { %11652 = vmatpush3.bf16.msra.mxu1 %v11651_v25 }
 0x952   :  { %v6808_v2 = vpop.f32.mrb[170].mxu0  ;;  %11653 = vmatprep.subr.bf16.mxu1 %v16181_v33 }
 0x953   :  { %v10818_v42 = vpop.f32.mrb[171].mxu0 }
 0x955   :  { %11655 = vmatpush3.bf16.msra.mxu1 %v11654_v61 }
 0x956   :  { %11668 = vmatprep.subr.bf16.mxu1 %v16181_v33 }
 0x958   :  { %10756 = vmatmul.mubr.msk.f32.vlgmr.msra.gmra.mrb[18].mxu1 %vm521_vm5, %v15752_v48  ;;  %v8352_v48 = vld [vmem:[%s16122_s12 + $0x50] sm:$0xff] }
 0x959   :  { %11670 = vmatpush3.bf16.msra.mxu1 %v11669_v15  ;;  %10795 = vmatprep.mubr.msk.f32.mxu1 %vm11976_vm3, %v16184_v41  ;;  %v11708_v20 = vpack.c.bf16 %v8353_v31, %v8352_v48  ;;  %v8363_v48 = vld [vmem:[%s16122_s12 + $0x88] sm:$0xff] }
 0x95a   :  { %11671 = vmatprep.subr.bf16.mxu1 %v16181_v33 }
 0x95d   :  { %11673 = vmatpush3.bf16.msra.mxu1 %v11672_v56  ;;  %v6940_v56 = vpop.permute.xlu0 %6939 }
 0x95e   :  { %11674 = vmatprep.subr.bf16.mxu1 %v16181_v33  ;;  %vm6941_vm15 = vcmp.eq.s32.totalorder %v16218_v24, %v6940_v56  ;;  %v7630_v56 = vld [vmem:[%s16126_s16 + $0x10] sm:$0xff] }
 0x95f   :  { %v6942_v5 = vsel %vm6941_vm15, 1.0, %v16184_v41 }
 0x961   :  { %11676 = vmatpush3.bf16.msra.mxu1 %v11675_v54  ;;  %v7017_v54 = vld [vmem:[%s16122_s12] sm:$0xff] }
 0x962   :  { %11677 = vmatprep.subr.bf16.mxu1 %v16181_v33  ;;  %v11717_v3 = vpack.c.bf16 %v7018_v14, %v7017_v54  ;;  %v7632_v54 = vld [vmem:[%s16126_s16 + $0x20] sm:$0xff]  ;;  %v7633_v14 = vld [vmem:[%s16126_s16 + $0x28] sm:$0xff] }
 0x965   :  { %11679 = vmatpush3.bf16.msra.mxu1 %v11678_v7  ;;  %v7029_v7 = vpop.permute.xlu1 %7028 }
 0x966   :  { %11692 = vmatprep.subr.bf16.mxu1 %v16181_v33  ;;  %vm7030_vm1 = vcmp.eq.s32.totalorder %v16218_v24, %v7029_v7  ;;  %v7634_v7 = vld [vmem:[%s16126_s16 + $0x30] sm:$0xff] }
 0x967   :  { %v7031_v40 = vsel %vm7030_vm1, 1.0, %v16184_v41 }
 0x968   :  { %10796 = vmatmul.mubr.msk.f32.vlgmr.msra.gmra.mrb[18].mxu1 %vm521_vm5, %v6645_v57 }
 0x969   :  { %11694 = vmatpush3.bf16.msra.mxu1 %v11693_v49  ;;  %10835 = vmatprep.mubr.msk.f32.mxu1 %vm11976_vm3, %v16184_v41  ;;  %v7020_v49 = vld [vmem:[%s16122_s12 + $0x18] sm:$0xff] }
 0x96a   :  { %11695 = vmatprep.subr.bf16.mxu1 %v16181_v33  ;;  %v11720_v63 = vpack.c.bf16 %v7020_v49, %v7019_v13 }
 0x96d   :  { %11697 = vmatpush3.bf16.msra.mxu1 %v11696_v46  ;;  %v7021_v46 = vld [vmem:[%s16122_s12 + $0x20] sm:$0xff] }
 0x96e   :  { %11698 = vmatprep.subr.bf16.mxu1 %v16181_v33  ;;  %v11723_v11 = vpack.c.bf16 %v7022_v23, %v7021_v46 }
 0x971   :  { %11700 = vmatpush3.bf16.msra.mxu1 %v11699_v16  ;;  %v7023_v16 = vld [vmem:[%s16122_s12 + $0x30] sm:$0xff] }
 0x972   :  { %11701 = vmatprep.subr.bf16.mxu1 %v16181_v33  ;;  %v11726_v45 = vpack.c.bf16 %v7024_v26, %v7023_v16 }
 0x975   :  { %11703 = vmatpush3.bf16.msra.mxu1 %v11702_v21  ;;  %v8356_v21 = vld [vmem:[%s16122_s12 + $0x70] sm:$0xff] }
 0x976   :  { %11704 = vmatprep.subr.bf16.mxu1 %v16181_v33  ;;  %v11714_v27 = vpack.c.bf16 %v8357_v35, %v8356_v21 }
 0x978   :  { %10836 = vmatmul.mubr.msk.f32.vlgmr.msra.gmra.mrb[18].mxu1 %vm521_vm5, %v6808_v2 }
 0x979   :  { %10864 = vmatprep.mubr.msk.f32.mxu1 %vm11976_vm3, %v16184_v41  ;;  %11706 = vmatpush3.bf16.msra.mxu1 %v11705_v44  ;;  %v8362_v44 = vld [vmem:[%s16122_s12 + $0x80] sm:$0xff] }
 0x97a   :  { %11707 = vmatprep.subr.bf16.mxu1 %v16181_v33  ;;  %v11729_v31 = vpack.c.bf16 %v8363_v48, %v8362_v44 }
 0x97d   :  { %11709 = vmatpush3.bf16.msra.mxu1 %v11708_v20 }
 0x97e   :  { %11710 = vmatprep.subr.bf16.mxu1 %v16181_v33 }
 0x981   :  { %11712 = vmatpush3.bf16.msra.mxu1 %v11711_v37 }
 0x982   :  { %11713 = vmatprep.subr.bf16.mxu1 %v16181_v33 }
 0x985   :  { %11715 = vmatpush3.bf16.msra.mxu1 %v11714_v27 }
 0x986   :  { %10886 = vmatprep.subr.mxu1 %v16184_v41 }
 0xa4b   :  { %v6890_v39 = vpop.f32.mrb[18].mxu1 }
 0xa4c   :  { %v6897_v18 = vsel %vm521_vm5, %v6890_v39, 0.0  ;;  %v6904_v43 = vmul.f32 %v6890_v39, %v6890_v39  ;;  %v10837_v47 = vpop.f32.mrb[19].mxu1 }
 0xa4d   :  { %v6898_v51 = vrot.slane %v6897_v18, 4  ;;  %v8366_v47 = vld [vmem:[%s16122_s12 + $0xa0] sm:$0xff] }
 0xa4e   :  { %v6905_v60 = vsel %vm521_vm5, %v6904_v43, 0.0 }
 0xa4f   :  { %v6899_v6 = vadd.f32 %v6898_v51, %v6897_v18  ;;  %v6906_v0 = vrot.slane %v6905_v60, 4  ;;  %v11732_v18 = vpack.c.bf16 %v8365_v52, %v8364_v53  ;;  %v8367_v51 = vld [vmem:[%s16122_s12 + $0xa8] sm:$0xff] }
 0xa51   :  { %v6900_v58 = vrot.slane %v6899_v6, 2  ;;  %v6907_v32 = vadd.f32 %v6906_v0, %v6905_v60  ;;  %v11735_v0 = vpack.c.bf16 %v8367_v51, %v8366_v47  ;;  %v7586_v51 = vld [vmem:[%s16124_s14] sm:$0x1]  ;;  %s11980_s14 = smov [#allocation2]  }
 0xa53   :  { %v6901_v57 = vadd.f32 %v6900_v58, %v6899_v6  ;;  %v6908_v19 = vrot.slane %v6907_v32, 2  ;;  %v7427_v6 = vpop.permute.xlu1 %7426 }
 0xa54   :  { %vm7428_vm4 = vcmp.eq.s32.totalorder %v16218_v24, %v7427_v6 }
 0xa55   :  { %v6902_v8 = vrot.slane %v6901_v57, 1  ;;  %v6909_v4 = vadd.f32 %v6908_v19, %v6907_v32  ;;  %v7429_v32 = vsel %vm7428_vm4, 1.0, %v16184_v41 }
 0xa57   :  { %v6903_v34 = vadd.f32 %v6902_v8, %v6901_v57  ;;  %v6910_v59 = vrot.slane %v6909_v4, 1  ;;  %v8369_v57 = vld [vmem:[%s16122_s12 + $0xb8] sm:$0xff]  ;;  %v8373_v8 = vld [vmem:[%s16122_s12 + $0xc0] sm:$0xff] }
 0xa59   :  { %v6911_v9 = vadd.f32 %v6910_v59, %v6909_v4  ;;  %v6912_v62 = vmul.f32 0.125, %v6903_v34  ;;  %v8374_v4 = vld [vmem:[%s16122_s12 + $0xc8] sm:$0xff] }
 0xa5b   :  { %v6913_v38 = vmul.f32 0.125, %v6911_v9  ;;  %v6914_v36 = vmul.f32 %v6912_v62, %v6912_v62  ;;  %v11741_v9 = vpack.c.bf16 %v8374_v4, %v8373_v8 }
 0xa5d   :  { %v6915_v30 = vsub.f32 %v6913_v38, %v6914_v36  ;;  %v8376_v38 = vld [vmem:[%s16122_s12 + $0xd8] sm:$0xff] }
 0xa5f   :  { %v6916_v25 = vmax.f32 %v6915_v30, 0.0 }
 0xa61   :  { %v6917_v12 = vadd.f32 1e-05, %v6916_v25 }
 0xa63   :  { %11942 = vrsqrt.f32 %v6917_v12  ;;  %v8377_v12 = vld [vmem:[%s16122_s12 + $0xe0] sm:$0xff] }
 0xa6d   :  { %v11943_v61 = vpop.eup %11942 }
 0xa6e   :  { %v6919_v2 = vmul.f32 %v11943_v61, %v6895_v28  ;;  %v8378_v28 = vld [vmem:[%s16122_s12 + $0xe8] sm:$0xff] }
 0xa70   :  { %v6920_v1 = vmul.f32 %v6919_v2, %v6912_v62  ;;  %v6926_v42 = vrot.slane %v6919_v2, %v16217_v10  ;;  %v8375_v62 = vld [vmem:[%s16122_s12 + $0xd0] sm:$0xff] }
 0xa71   :  { %v11744_v25 = vpack.c.bf16 %v8376_v38, %v8375_v62 }
 0xa72   :  { %v6921_v15 = vsub.f32 %v6896_v17, %v6920_v1  ;;  %v6928_v50 = vmul.f32 %v6926_v42, %v6890_v39  ;;  %v7264_v39 = vpop.permute.xlu0 %7263  ;;  %v11747_v17 = vpack.c.bf16 %v8378_v28, %v8377_v12  ;;  %v8380_v1 = vld [vmem:[%s16122_s12 + $0xf8] sm:$0xff] }
 0xa73   :  { %vm7265_vm14 = vcmp.eq.s32.totalorder %v16218_v24, %v7264_v39  ;;  %v8368_v24 = vld [vmem:[%s16122_s12 + $0xb0] sm:$0xff] }
 0xa74   :  { %v6933_v22 = vrot.slane %v6921_v15, %v16217_v10  ;;  %v7266_v58 = vsel %vm7265_vm14, 1.0, %v16184_v41  ;;  %v11738_v19 = vpack.c.bf16 %v8369_v57, %v8368_v24  ;;  %v7628_v15 = vld [vmem:[%s16126_s16] sm:$0xff] }
 0xa76   :  { %v6935_v55 = vadd.f32 %v6933_v22, %v6928_v50  ;;  %v7629_v50 = vld [vmem:[%s16126_s16 + $0x8] sm:$0xff] }
 0xa77   :  { %v11753_v22 = vpack.c.bf16 %v7629_v50, %v7628_v15 }
 0xa78   :  { %v15925_v29 = vmax.f32 %v6935_v55, 0.0  ;;  %v7631_v55 = vld [vmem:[%s16126_s16 + $0x18] sm:$0xff] }
 0xa7a   :  { %10839 = vmatpush3.msra.mxu0 %v15925_v29 }
 0xa7b   :  { %10841 = vmatmul.mubr.msk.f32.vlgmr.msra.gmra.mrb[172].mxu0 %vm6943_vm0, %v6942_v5  ;;  %10843 = vmatprep.subr.mxu0 %v16184_v41  ;;  %v11759_v5 = vpack.c.bf16 %v7633_v14, %v7632_v54 }
 0xa7c   :  { %10844 = vmatpush3.msra.mxu0 %v15925_v29  ;;  %10845 = vmatprep.mubr.msk.f32.mxu0 %vm11976_vm3, %v16184_v41 }
 0xa7d   :  { %11716 = vmatprep.subr.bf16.mxu0 %v16181_v33 }
 0xa7f   :  { %10846 = vmatmul.mubr.msk.f32.vlgmr.msra.gmra.mrb[174].mxu0 %vm6943_vm0, %v7031_v40 }
 0xa80   :  { %11718 = vmatpush3.bf16.msra.mxu0 %v11717_v3  ;;  %10883 = vmatprep.mubr.msk.f32.mxu0 %vm11976_vm3, %v16184_v41  ;;  %v7635_v3 = vld [vmem:[%s16126_s16 + $0x38] sm:$0xff] }
 0xa81   :  { %11719 = vmatprep.subr.bf16.mxu0 %v16181_v33  ;;  %v11762_v13 = vpack.c.bf16 %v7635_v3, %v7634_v7 }
 0xa84   :  { %11721 = vmatpush3.bf16.msra.mxu0 %v11720_v63 }
 0xa85   :  { %11722 = vmatprep.subr.bf16.mxu0 %v16181_v33 }
 0xa88   :  { %11724 = vmatpush3.bf16.msra.mxu0 %v11723_v11 }
 0xa89   :  { %11725 = vmatprep.subr.bf16.mxu0 %v16181_v33 }
 0xa8c   :  { %11727 = vmatpush3.bf16.msra.mxu0 %v11726_v45 }
 0xa8d   :  { %11728 = vmatprep.subr.bf16.mxu0 %v16181_v33 }
 0xb4e   :  { %v7013_v20 = vpop.f32.mrb[172].mxu0 }
 0xb4f   :  { %v10842_v37 = vpop.f32.mrb[173].mxu0  ;;  %10884 = vmatmul.mubr.msk.f32.vlgmr.msra.gmra.mrb[176].mxu0 %vm521_vm5, %v7013_v20 }
 0xb50   :  { %11730 = vmatpush3.bf16.msra.mxu0 %v11729_v31  ;;  %10907 = vmatprep.mubr.msk.f32.mxu0 %vm11976_vm3, %v16184_v41 }
 0xb51   :  { %11731 = vmatprep.subr.bf16.mxu0 %v16181_v33 }
 0xb52   :  { %v7101_v43 = vpop.f32.mrb[174].mxu0 }
 0xb53   :  { %v10847_v60 = vpop.f32.mrb[175].mxu0  ;;  %10865 = vmatmul.mubr.msk.f32.vlgmr.msra.gmra.mrb[20].mxu1 %vm521_vm5, %v7101_v43 }
 0xb54   :  { %10887 = vmatpush3.msra.mxu1 %v15925_v29  ;;  %10888 = vmatprep.mubr.msk.f32.mxu1 %vm11976_vm3, %v16184_v41 }
 0xb55   :  { %10910 = vmatprep.subr.mxu1 %v16184_v41  ;;  %11733 = vmatpush3.bf16.msra.mxu0 %v11732_v18 }
 0xb56   :  { %11734 = vmatprep.subr.bf16.mxu0 %v16181_v33 }
 0xb57   :  { %10889 = vmatmul.mubr.msk.f32.vlgmr.msra.gmra.mrb[22].mxu1 %vm6943_vm0, %v7266_v58 }
 0xb58   :  { %10911 = vmatpush3.msra.mxu1 %v15925_v29  ;;  %10912 = vmatprep.mubr.msk.f32.mxu1 %vm11976_vm3, %v16184_v41  ;;  %v11756_v29 = vpack.c.bf16 %v7631_v55, %v7630_v56 }
 0xb59   :  { %11736 = vmatpush3.bf16.msra.mxu0 %v11735_v0  ;;  %11752 = vmatprep.subr.bf16.mxu1 %v16181_v33  ;;  %v7587_v0 = vld [vmem:[%s16125_s15] sm:$0x1]  ;;  %s7736_s15 = sshll.u32 %s11980_s14, 4  ;;  %s7737_s15 = int_to_ptr.vmem [resolvable:$true] %s7736_s15 }
 0xb5a   :  { %11737 = vmatprep.subr.bf16.mxu0 %v16181_v33  ;;  %p11955_p1 = scmp.lt.s32.totalorder %s7737_s15, %s7737_s15 }
 0xb5b   :  { %10913 = vmatmul.mubr.msk.f32.vlgmr.msra.gmra.mrb[24].mxu1 %vm6943_vm0, %v7429_v32 }
 0xb5c   :  { %10950 = vmatprep.mubr.msk.f32.mxu1 %vm11976_vm3, %v16184_v41  ;;  %11754 = vmatpush3.bf16.msra.mxu1 %v11753_v22 }
 0xb5d   :  { %11739 = vmatpush3.bf16.msra.mxu0 %v11738_v19  ;;  %11755 = vmatprep.subr.bf16.mxu1 %v16181_v33 }
 0xb5e   :  { %11740 = vmatprep.subr.bf16.mxu0 %v16181_v33 }
 0xb60   :  { %11757 = vmatpush3.bf16.msra.mxu1 %v11756_v29 }
 0xb61   :  { %11758 = vmatprep.subr.bf16.mxu1 %v16181_v33 }
 0xb64   :  { %11760 = vmatpush3.bf16.msra.mxu1 %v11759_v5 }
 0xb65   :  { %11761 = vmatprep.subr.bf16.mxu1 %v16181_v33 }
 0xb68   :  { %11763 = vmatpush3.bf16.msra.mxu1 %v11762_v13 }
 0xc26   :  { %v7183_v34 = vpop.f32.mrb[20].mxu1 }
 0xc27   :  { %v10866_v59 = vpop.f32.mrb[21].mxu1 }
 0xc2a   :  { %v7336_v36 = vpop.f32.mrb[22].mxu1 }
 0xc2b   :  { %v10890_v30 = vpop.f32.mrb[23].mxu1  ;;  %10908 = vmatmul.mubr.msk.f32.vlgmr.msra.gmra.mrb[176].mxu0 %vm521_vm5, %v7336_v36 }
 0xc2c   :  { %11742 = vmatpush3.bf16.msra.mxu0 %v11741_v9  ;;  %10931 = vmatprep.mubr.msk.f32.mxu0 %vm11976_vm3, %v16184_v41  ;;  %v8379_v41 = vld [vmem:[%s16122_s12 + $0xf0] sm:$0xff]  ;;  %vm7716_vm3 = vcmask 33792  }
 0xc2d   :  { %11743 = vmatprep.subr.bf16.mxu0 %v16181_v33  ;;  %v11750_v42 = vpack.c.bf16 %v8380_v1, %v8379_v41 }
 0xc2e   :  { %v7499_v61 = vpop.f32.mrb[24].mxu1 }
 0xc2f   :  { %v10914_v2 = vpop.f32.mrb[25].mxu1 }
 0xc30   :  { %11745 = vmatpush3.bf16.msra.mxu0 %v11744_v25 }
 0xc31   :  { %11746 = vmatprep.subr.bf16.mxu0 %v16181_v33 }
 0xc34   :  { %11748 = vmatpush3.bf16.msra.mxu0 %v11747_v17 }
 0xc35   :  { %11749 = vmatprep.subr.bf16.mxu0 %v16181_v33 }
 0xc38   :  { %11751 = vmatpush3.bf16.msra.mxu0 %v11750_v42 }
 0xc3b   :  { %10932 = vmatmul.mubr.msk.f32.vlgmr.msra.gmra.mrb[176].mxu0 %vm521_vm5, %v7499_v61 }
 0xd0e   :  { %v7581_v49 = vpop.f32.mrb[176].mxu0 }
 0xd0f   :  { %v11764_v40 = vadd.f32 %v7581_v49, %v7183_v34  ;;  %v10933_v63 = vpop.f32.mrb[177].mxu0  ;;  %v8382_v34 = vld [vmem:[%s16127_s17] ss:$0 sm:$0xff]  ;;  %s11950_s17 = scalar_lea.vmem %s7737_s15, 32 }
 0xd10   :  { %p11951_p0 = scmp.ne.s32.totalorder %s7737_s15, %s11950_s17  ;;  %p11956_p2 = scmp.lt.s32.totalorder %s11950_s17, %s11950_s17 }
 0xd11   :  { %v7588_v46 = vsel %vm605_vm7, %v11764_v40, 0.0  ;;  %v7595_v23 = vmul.f32 %v11764_v40, %v11764_v40 }
 0xd12   :  { %v7589_v11 = vrot.slane %v7588_v46, 4  ;;  %p11957_p3 = por %p11956_p2, %p11955_p1 }
 0xd13   :  { %v7596_v16 = vsel %vm605_vm7, %v7595_v23, 0.0 }
 0xd14   :  { %v7590_v33 = vadd.f32 %v7589_v11, %v7588_v46  ;;  %v7597_v26 = vrot.slane %v7596_v16, 4  ;;  %p11958_p4 = pnand %p11957_p3, %p11951_p0 }
 0xd16   :  { %v7591_v45 = vrot.slane %v7590_v33, 2  ;;  %v7598_v21 = vadd.f32 %v7597_v26, %v7596_v16 }
 0xd18   :  { %v7592_v35 = vadd.f32 %v7591_v45, %v7590_v33  ;;  %v7599_v27 = vrot.slane %v7598_v21, 2 }
 0xd1a   :  { %v7593_v44 = vrot.slane %v7592_v35, 1  ;;  %v7600_v48 = vadd.f32 %v7599_v27, %v7598_v21 }
 0xd1c   :  { %v7594_v31 = vadd.f32 %v7593_v44, %v7592_v35  ;;  %v7601_v20 = vrot.slane %v7600_v48, 1 }
 0xd1e   :  { %v7602_v53 = vadd.f32 %v7601_v20, %v7600_v48  ;;  %v7603_v52 = vmul.f32 0.5, %v7594_v31 }
 0xd20   :  { %v7604_v37 = vmul.f32 0.5, %v7602_v53  ;;  %v7605_v39 = vmul.f32 %v7603_v52, %v7603_v52 }
 0xd22   :  { %v7606_v18 = vsub.f32 %v7604_v37, %v7605_v39 }
 0xd24   :  { %v7607_v43 = vmax.f32 %v7606_v18, 0.0 }
 0xd26   :  { %v7608_v47 = vadd.f32 1e-05, %v7607_v43 }
 0xd28   :  { %11944 = vrsqrt.f32 %v7608_v47 }
 0xd32   :  { %v11945_v60 = vpop.eup %11944 }
 0xd33   :  { %v7610_v6 = vmul.f32 %v11945_v60, %v7586_v51 }
 0xd35   :  { %v7611_v58 = vmul.f32 %v7610_v6, %v7603_v52  ;;  %v7617_v32 = vrot.slane %v7610_v6, %v16217_v10 }
 0xd37   :  { %v7612_v24 = vsub.f32 %v7587_v0, %v7611_v58  ;;  %v7619_v57 = vmul.f32 %v11764_v40, %v7617_v32 }
 0xd39   :  { %v7624_v19 = vrot.slane %v7612_v24, %v16217_v10 }
 0xd3b   :  { %v7626_v8 = vadd.f32 %v7624_v19, %v7619_v57 }
 0xd3d   :  { %v7627_v4 = vmax.f32 %v7626_v8, 0.0 }
 0xd3f   :  { %10951 = vmatmul.mubr.msk.f32.vlgmr.msra.gmra.mrb[26].mxu1 %vm521_vm5, %v7627_v4 }
 0xe12   :  { %v7712_v59 = vpop.f32.mrb[26].mxu1 }
 0xe13   :  { %v7713_v9 = vadd.f32 %v8382_v34, %v7712_v59  ;;  %v10952_v62 = vpop.f32.mrb[27].mxu1 }
 0xe15   :  { %v7717_v38 = vsel %vm7716_vm3, %v7713_v9, -inf }
 0xe16   :  { %7718 = vmax.xlane.f32.xlu0 %v7717_v38 }
 0xea3   :  { %v7719_v36 = vpop.xlane.xlu0 %7718 }
 0xea4   :  { %v7720_v30 = vsub.f32 %v7713_v9, %v7719_v36 }
 0xea6   :  { %v7721_v25 = vmul.f32 1.442695, %v7720_v30 }
 0xea8   :  { %11946 = vpow2.f32 %v7721_v25 }
 0xeb2   :  { %v11947_v10 = vpop.eup %11946 }
 0xeb3   :  { %v7723_v12 = vsel %vm7716_vm3, %v11947_v10, 0.0 }
 0xeb4   :  { %7724 = vadd.xlane.f32.xlu1 %v7723_v12 }
 0xf41   :  { %v7725_v28 = vpop.xlane.xlu1 %7724 }
 0xf42   :  { %11948 = vlog2.f32 %v7725_v28 }
 0xf4c   :  { %v11949_v61 = vpop.eup %11948 }
 0xf4d   :  { %v7727_v2 = vmul.f32 0.6931472, %v11949_v61 }
 0xf4f   :  { %v7728_v17 = vsub.f32 %v7720_v30, %v7727_v2 }
 0xf51   :  { %7729 = vst.msk [vmem:[#allocation2] sm:$0x3] %vm7716_vm3, %v7728_v17 }
 0xf52   :  { %11961 = shalt.err (!%p11958_p4)
}
 0xf53   :  { %s11962_s22 = scalar_lea.hbm %s16128_s18, 32 }
 0xf54   :  { %p11963_p5 = scmp.ne.s32.totalorder %s16128_s18, %s11962_s22  ;;  %p11966_p6 = scmp.lt.u32.totalorder %s11962_s22, %s16128_s18 }
 0xf56   :  { %p11968_p7 = pnand %p11966_p6, %p11963_p5 }
 0xf58   :  { %11971 = shalt.err (!%p11968_p7)
}
 0xf59   :  { %7739 = dma.vmem_to_hbm [thread:$0]  %s7737_s15, 32, %s16128_s18, [#allocation3]  }
 0xf5a   :  { %11972 = dma.done.wait [#allocation3], 32  }
 0xf5b   :  { %11973 = vsyncadd [#allocation3], 4294967264 }
 0xf5c   :  { %7743 = vsyncpa [#allocation3], 1 }

</bundles_post_ra>
